<compile_context>
chip_gen: v7x
topology: tpu7x:2x2x1
jax: 0.10.0
libtpu: 0.0.40
codegen_flags: <defaults>
</compile_context>

<pallas_src>
import functools
import math

import jax
import jax.numpy as jnp
from jax import lax
from jax.experimental import pallas as pl
from jax.experimental.pallas import tpu as pltpu

# ---------------------------------------------------------------------------
# Config (small shapes consistent with the module)
# ---------------------------------------------------------------------------
INPUT_DIM = 29
INPUT_PAD = 32            # padded feature dim; lane INPUT_DIM carries the mask bit
HIDDEN = 128
NUM_MODES = 6
FUTURE = 16               # future_steps (small for the demo)
NUM_HEADS = 8
HEAD_DIM = HIDDEN // NUM_HEADS

VMEM_SPEC = pl.BlockSpec(memory_space=pltpu.MemorySpace.VMEM)


def _round_up(x, m):
    return ((x + m - 1) // m) * m


def _choose_block_m(m_total, t):
    """Pick the B*N block size for the fused encoder+LSTM kernel.

    Accounts for lane padding (Fp=32 lanes pad to 128), the bf16 x0 scratch,
    both encoder intermediates and the f32 x0 value, and the double-buffered
    input/output blocks.  Capped at 128 (loop-carry register pressure) and at
    ~half the sequence count so v7x's two TensorCores both get work.
    """
    H = HIDDEN
    per_seq = (
        t * 4 * H * 2            # bf16 x0 scratch (T, mb, 4H)
        + 2 * t * 128 * 2        # double-buffered bf16 input block (32 lanes pad to 128)
        + t * (H * 4 + H * 4)    # encoder intermediates h / feats (f32)
        + t * 4 * H * 4          # f32 x0 value before the bf16 store
        + 16 * H * 4             # loop carries + gate temporaries
    )
    budget = 20 * 1024 * 1024    # fits v7x (64 MiB physical) with headroom
    mb = int(budget // per_seq)
    mb = max(16, min(128, (mb // 16) * 16))
    if m_total > 16:             # >=2 grid blocks when possible (v7x dual TC)
        half = _round_up((m_total + 1) // 2, 16)
        mb = min(mb, max(16, half))
    if _round_up(m_total, 8) <= mb:
        mb = _round_up(m_total, 8)   # single block covering the (padded) full dim
    return mb


# ---------------------------------------------------------------------------
# Kernel 1: fused feature-encoder + 2-layer LSTM + last-valid-state extraction
#   input  x: (T, MB, Fp) bf16, time-major; lane INPUT_DIM holds the validity bit
#   output:   (MB, H) bf16, top-layer hidden state at the last valid timestep
# ---------------------------------------------------------------------------
def _enc_lstm_kernel(x_ref, ew1_ref, eb1_ref, ew2_ref, eb2_ref,
                     wih0_ref, whh0_ref, b0_ref, wih1_ref, whh1_ref, b1_ref,
                     out_ref, x0_ref, *, unroll):
    T, MB, Fp = x_ref.shape
    H = whh0_ref.shape[0]

    x = x_ref[...]                                                   # (T, MB, Fp) bf16
    # validity bit lives in lane INPUT_DIM (enc_w1 rows >= INPUT_DIM are zero)
    mask = x[:, :, INPUT_DIM:INPUT_DIM + 1].astype(jnp.float32)      # (T, MB, 1)
    seq_len = jnp.sum(mask, axis=0)                                  # (MB, 1)
    last_idx = (seq_len + 0.5).astype(jnp.int32) - 1                 # -1 => fully padded

    # ---- feature encoder over the whole (T*MB, Fp) slab: two bf16 MXU matmuls
    xf = x.reshape(T * MB, Fp)
    h = jnp.dot(xf, ew1_ref[...], preferred_element_type=jnp.float32) + eb1_ref[...]
    h = jnp.maximum(h, 0.0)
    feats = (jnp.dot(h.astype(jnp.bfloat16), ew2_ref[...],
                     preferred_element_type=jnp.float32) + eb2_ref[...])

    # ---- hoisted LSTM layer-0 input projection (mask commutes row-wise), bf16 scratch
    x0 = (jnp.dot(feats.astype(jnp.bfloat16), wih0_ref[...],
                  preferred_element_type=jnp.float32)
          * mask.reshape(T * MB, 1) + b0_ref[...])
    x0_ref[...] = x0.reshape(T, MB, 4 * H).astype(jnp.bfloat16)

    whh0 = whh0_ref[...]
    wih1 = wih1_ref[...]
    whh1 = whh1_ref[...]
    b1 = b1_ref[...]

    def gates(g, c):            # PyTorch gate order: i, f, g, o
        i = jax.nn.sigmoid(g[:, 0 * H:1 * H])
        f = jax.nn.sigmoid(g[:, 1 * H:2 * H])
        gc = jnp.tanh(g[:, 2 * H:3 * H])
        o = jax.nn.sigmoid(g[:, 3 * H:4 * H])
        c_new = f * c + i * gc
        return o * jnp.tanh(c_new), c_new

    def step(t, carry):
        h0, c0, h1, c1, out = carry
        # layer 0: precomputed (bf16) input projection + recurrent matmul only
        g0 = x0_ref[t].astype(jnp.float32) + jnp.dot(
            h0.astype(jnp.bfloat16), whh0, preferred_element_type=jnp.float32)
        h0, c0 = gates(g0, c0)
        # layer 1: two K=128 dots (no per-step concat); fused K=256 is an
        # alternative on v6e/v7x's 256-deep MXU.
        g1 = (jnp.dot(h0.astype(jnp.bfloat16), wih1, preferred_element_type=jnp.float32)
              + jnp.dot(h1.astype(jnp.bfloat16), whh1, preferred_element_type=jnp.float32)
              + b1)
        h1, c1 = gates(g1, c1)
        # capture the top-layer state at the last valid timestep of each sequence
        out = jnp.where(last_idx == t, h1, out)
        return h0, c0, h1, c1, out

    z = jnp.zeros((MB, H), jnp.float32)
    _, _, _, _, out = lax.fori_loop(0, T, step, (z, z, z, z, z), unroll=unroll)
    out_ref[...] = out.astype(out_ref.dtype)


def enc_lstm(x_tmf, p, *, block_m):
    T, Mp, Fp = x_tmf.shape
    H = HIDDEN
    unroll = True if T <= 16 else 4
    kernel = functools.partial(_enc_lstm_kernel, unroll=unroll)
    return pl.pallas_call(
        kernel,
        out_shape=jax.ShapeDtypeStruct((Mp, H), jnp.bfloat16),
        grid=(Mp // block_m,),
        in_specs=[
            pl.BlockSpec((T, block_m, Fp), lambda m: (0, m, 0)),
            pl.BlockSpec((Fp, H), lambda m: (0, 0)),
            pl.BlockSpec((1, H), lambda m: (0, 0)),
            pl.BlockSpec((H, H), lambda m: (0, 0)),
            pl.BlockSpec((1, H), lambda m: (0, 0)),
            pl.BlockSpec((H, 4 * H), lambda m: (0, 0)),
            pl.BlockSpec((H, 4 * H), lambda m: (0, 0)),
            pl.BlockSpec((1, 4 * H), lambda m: (0, 0)),
            pl.BlockSpec((H, 4 * H), lambda m: (0, 0)),
            pl.BlockSpec((H, 4 * H), lambda m: (0, 0)),
            pl.BlockSpec((1, 4 * H), lambda m: (0, 0)),
        ],
        out_specs=pl.BlockSpec((block_m, H), lambda m: (m, 0)),
        scratch_shapes=[pltpu.VMEM((T, block_m, 4 * H), jnp.bfloat16)],
        compiler_params=pltpu.CompilerParams(
            dimension_semantics=("parallel",),
            vmem_limit_bytes=32 * 1024 * 1024,
        ),
    )(x_tmf, p['enc_w1'], p['enc_b1'], p['enc_w2'], p['enc_b2'],
      p['wih0'], p['whh0'], p['b0'], p['wih1'], p['whh1'], p['b1'])


# ---------------------------------------------------------------------------
# Kernel 2: fused MHA (center-row queries only) + center select + mode predictor
#           + all per-mode trajectory decoders — one gridless launch.
#   x:       (B*N, H) bf16 last hidden states
#   onehot:  (B, B*N)  bf16 one-hot rows selecting each batch's center object
#   mask:    (B, B*N)  f32  1.0 where the key is a valid object of the same batch
#   outputs: scores (B, NUM_MODES) f32, traj (NUM_MODES, B, FUTURE*4) f32
# ---------------------------------------------------------------------------
def _attn_head_kernel(x_ref, onehot_ref, mask_ref,
                      wq_ref, bq_ref, wkv_ref, bkv_ref, wo_ref, bo_ref,
                      mw1_ref, mb1_ref, mw2_ref, mb2_ref,
                      dw1_ref, db1_ref, dw2_ref, db2_ref, dw3_ref, db3_ref,
                      scores_ref, traj_ref, *, num_heads, head_dim):
    x = x_ref[...]                                                   # (BN, H) bf16
    BN, H = x.shape
    B = onehot_ref.shape[0]
    num_modes = dw1_ref.shape[0]

    # keys/values for every object (single lane-dense matmul); queries only for
    # the center rows — the only attention output rows the module ever uses.
    kv = jnp.dot(x, wkv_ref[...], preferred_element_type=jnp.float32) + bkv_ref[...]
    k = kv[:, :H]
    v = kv[:, H:2 * H]
    xc = jnp.dot(onehot_ref[...], x, preferred_element_type=jnp.float32)      # (B, H)
    q = (jnp.dot(xc.astype(jnp.bfloat16), wq_ref[...],
                 preferred_element_type=jnp.float32) + bq_ref[...])           # (B, H)

    wo = wo_ref[...]
    mask = mask_ref[...] > 0.0                                        # (B, BN)
    scale = 1.0 / math.sqrt(head_dim)

    attn = jnp.zeros((B, H), jnp.float32)
    for hh in range(num_heads):
        sl = slice(hh * head_dim, (hh + 1) * head_dim)
        qh = q[:, sl].astype(jnp.bfloat16)                            # (B, hd)
        kh = k[:, sl].astype(jnp.bfloat16)                            # (BN, hd)
        vh = v[:, sl].astype(jnp.bfloat16)                            # (BN, hd)
        s = lax.dot_general(qh, kh, (((1,), (1,)), ((), ())),
                            preferred_element_type=jnp.float32) * scale       # (B, BN)
        s = jnp.where(mask, s, -1e30)                                 # key_padding_mask
        s = s - jnp.max(s, axis=-1, keepdims=True)
        pr = jnp.exp(s)
        pr = pr * pl.reciprocal(jnp.sum(pr, axis=-1, keepdims=True), approx=True)
        ctx = jnp.dot(pr.astype(jnp.bfloat16), vh,
                      preferred_element_type=jnp.float32)             # (B, hd)
        attn = attn + jnp.dot(ctx.astype(jnp.bfloat16), wo[sl, :],
                              preferred_element_type=jnp.float32)     # (B, H)
    center = attn + bo_ref[...]                                       # (B, H)

    # mode predictor + exact softmax
    cb = center.astype(jnp.bfloat16)
    mh = jnp.maximum(jnp.dot(cb, mw1_ref[...], preferred_element_type=jnp.float32)
                     + mb1_ref[...], 0.0)
    logits = (jnp.dot(mh.astype(jnp.bfloat16), mw2_ref[...],
                      preferred_element_type=jnp.float32) + mb2_ref[...])
    logits = logits - jnp.max(logits, axis=-1, keepdims=True)
    e = jnp.exp(logits)
    scores_ref[...] = e / jnp.sum(e, axis=-1, keepdims=True)

    # trajectory decoders: mode-batched dot_generals, one dense output store
    bdims = (((2,), (1,)), ((0,), (0,)))
    cbm = jnp.broadcast_to(cb, (num_modes, B, H))
    d1 = jnp.maximum(lax.dot_general(cbm, dw1_ref[...], bdims,
                                     preferred_element_type=jnp.float32)
                     + db1_ref[...], 0.0)
    d2 = jnp.maximum(lax.dot_general(d1.astype(jnp.bfloat16), dw2_ref[...], bdims,
                                     preferred_element_type=jnp.float32)
                     + db2_ref[...], 0.0)
    traj_ref[...] = (lax.dot_general(d2.astype(jnp.bfloat16), dw3_ref[...], bdims,
                                     preferred_element_type=jnp.float32)
                     + db3_ref[...])


def attn_head(x, onehot, attn_mask, p):
    B = onehot.shape[0]
    F4 = FUTURE * 4
    kernel = functools.partial(_attn_head_kernel,
                               num_heads=NUM_HEADS, head_dim=HEAD_DIM)
    return pl.pallas_call(
        kernel,
        out_shape=(jax.ShapeDtypeStruct((B, NUM_MODES), jnp.float32),
                   jax.ShapeDtypeStruct((NUM_MODES, B, F4), jnp.float32)),
        in_specs=[VMEM_SPEC] * 19,
        out_specs=(VMEM_SPEC, VMEM_SPEC),
    )(x, onehot, attn_mask,
      p['attn_wq'], p['attn_bq'], p['attn_wkv'], p['attn_bkv'],
      p['attn_wo'], p['attn_bo'],
      p['mode_w1'], p['mode_b1'], p['mode_w2'], p['mode_b2'],
      p['dec_w1'], p['dec_b1'], p['dec_w2'], p['dec_b2'], p['dec_w3'], p['dec_b3'])


# ---------------------------------------------------------------------------
# Parameter initialization (deterministic; weights stored [in, out] in bf16 for
# MXU feeding, biases f32 zeros like the module init)
# ---------------------------------------------------------------------------
def init_params(key):
    H, F, Fp = HIDDEN, INPUT_DIM, INPUT_PAD
    M, F4 = NUM_MODES, FUTURE * 4
    keys = iter(jax.random.split(key, 64))

    def xav(out_dim, in_dim):
        limit = math.sqrt(6.0 / (in_dim + out_dim))
        w = jax.random.uniform(next(keys), (in_dim, out_dim), jnp.float32, -limit, limit)
        return w.astype(jnp.bfloat16)

    def zeros(*s):
        return jnp.zeros(s, jnp.float32)

    p = {}
    # feature_encoder: Linear(F,H) ReLU Linear(H,H); weight rows >= F are zero so
    # the mask lane (and the padding lanes) never reach the encoder output.
    p['enc_w1'] = jnp.zeros((Fp, H), jnp.bfloat16).at[:F].set(xav(H, F))
    p['enc_b1'] = zeros(1, H)
    p['enc_w2'] = xav(H, H)
    p['enc_b2'] = zeros(1, H)
    # LSTM (b = bias_ih + bias_hh = 0)
    p['wih0'], p['whh0'], p['b0'] = xav(4 * H, H), xav(4 * H, H), zeros(1, 4 * H)
    p['wih1'], p['whh1'], p['b1'] = xav(4 * H, H), xav(4 * H, H), zeros(1, 4 * H)
    # MultiheadAttention: dense Q weight and fused [K;V] weight
    p['attn_wq'] = xav(H, H)
    p['attn_wkv'] = jnp.concatenate([xav(H, H), xav(H, H)], axis=1)       # (H, 2H)
    p['attn_bq'], p['attn_bkv'] = zeros(1, H), zeros(1, 2 * H)
    p['attn_wo'], p['attn_bo'] = xav(H, H), zeros(1, H)
    # mode_predictor: Linear(H,H) ReLU Linear(H,M)
    p['mode_w1'], p['mode_b1'] = xav(H, H), zeros(1, H)
    p['mode_w2'], p['mode_b2'] = xav(M, H), zeros(1, M)
    # traj_decoders: stacked per mode for batched dot_generals
    p['dec_w1'] = jnp.stack([xav(H, H) for _ in range(M)])                # (M, H, H)
    p['dec_b1'] = zeros(M, 1, H)
    p['dec_w2'] = jnp.stack([xav(H, H) for _ in range(M)])                # (M, H, H)
    p['dec_b2'] = zeros(M, 1, H)
    p['dec_w3'] = jnp.stack([xav(F4, H) for _ in range(M)])               # (M, H, F4)
    p['dec_b3'] = zeros(M, 1, F4)
    return p


# ---------------------------------------------------------------------------
# Forward pass (eval mode of TrajectoryLSTM.forward)
# ---------------------------------------------------------------------------
def trajectory_lstm_forward(params, obj_trajs, obj_trajs_mask, track_indices):
    B, N, T, F = obj_trajs.shape
    M = B * N
    Fp = INPUT_PAD

    # layout prep on the small raw input: pad 29->32 features, pack the mask bit
    # into lane 29, go time-major, cast to bf16 (halves the streaming DMA).
    feat = obj_trajs.astype(jnp.float32)
    maskf = obj_trajs_mask.astype(jnp.float32)
    tail = jnp.zeros((B, N, T, Fp - F - 1), jnp.float32)
    xp = jnp.concatenate([feat, maskf[..., None], tail], axis=-1)         # (B,N,T,Fp)
    x_tmf = jnp.transpose(xp.reshape(M, T, Fp), (1, 0, 2)).astype(jnp.bfloat16)

    block_m = _choose_block_m(M, T)
    Mp = _round_up(M, block_m)
    if Mp > M:
        x_tmf = jnp.pad(x_tmf, ((0, 0), (0, Mp - M), (0, 0)))

    # 1+2. fused feature encoder + 2-layer LSTM + last-valid-state extraction
    last = enc_lstm(x_tmf, params, block_m=block_m)[:M]                   # (M, H) bf16

    # attention mask: key must be a valid object of the SAME batch element
    valid = (maskf.sum(axis=-1) > 0.0).astype(jnp.float32)                # (B, N)
    attn_mask = (jnp.eye(B, dtype=jnp.float32)[:, :, None]
                 * valid[None, :, :]).reshape(B, M)                       # (B, B*N)
    onehot = jax.nn.one_hot(jnp.arange(B) * N + track_indices.astype(jnp.int32),
                            M, dtype=jnp.bfloat16)                        # (B, B*N)

    # 3+4+5+6. fused MHA + center select + mode predictor + trajectory decoders
    pred_scores, traj = attn_head(last, onehot, attn_mask, params)
    pred_trajs = jnp.transpose(traj, (1, 0, 2)).reshape(B, NUM_MODES, FUTURE, 4)

    # eval-mode output layout: [x, y, 0, 0, 0, vx, vy]
    pred_trajs7 = jnp.concatenate(
        [pred_trajs[..., :2], jnp.zeros_like(pred_trajs[..., :3]), pred_trajs[..., 2:4]],
        axis=-1)
    return pred_scores, pred_trajs7


# ---------------------------------------------------------------------------
if __name__ == "__main__":
    B, N, T = 2, 4, 8

    params = init_params(jax.random.PRNGKey(0))

    k_traj, _ = jax.random.split(jax.random.PRNGKey(0))
    obj_trajs = jax.random.normal(k_traj, (B, N, T, INPUT_DIM), jnp.float32)

    obj_trajs_mask = jnp.ones((B, N, T), jnp.float32)
    obj_trajs_mask = obj_trajs_mask.at[0, 1, 5:].set(0.0)   # shorter history
    obj_trajs_mask = obj_trajs_mask.at[1, 3, :].set(0.0)    # fully padded object

    track_indices = jnp.array([0, 2], jnp.int32)

    fwd = jax.jit(trajectory_lstm_forward)
    pred_scores, pred_trajs = fwd(params, obj_trajs, obj_trajs_mask, track_indices)
    jax.block_until_ready((pred_scores, pred_trajs))

    assert pred_scores.shape == (B, NUM_MODES)
    assert pred_trajs.shape == (B, NUM_MODES, FUTURE, 7)
    assert bool(jnp.all(jnp.isfinite(pred_scores))) and bool(jnp.all(jnp.isfinite(pred_trajs)))
    print("KERNEL_OK")
</pallas_src>

<mosaic_0001>
module attributes {stable_mosaic.version = 11 : i64} {
  func.func @_enc_lstm_kernel(%arg0: i32, %arg1: memref<8x8x32xbf16, #tpu.memory_space<vmem>>, %arg2: memref<32x128xbf16, #tpu.memory_space<vmem>>, %arg3: memref<1x128xf32, #tpu.memory_space<vmem>>, %arg4: memref<128x128xbf16, #tpu.memory_space<vmem>>, %arg5: memref<1x128xf32, #tpu.memory_space<vmem>>, %arg6: memref<128x512xbf16, #tpu.memory_space<vmem>>, %arg7: memref<128x512xbf16, #tpu.memory_space<vmem>>, %arg8: memref<1x512xf32, #tpu.memory_space<vmem>>, %arg9: memref<128x512xbf16, #tpu.memory_space<vmem>>, %arg10: memref<128x512xbf16, #tpu.memory_space<vmem>>, %arg11: memref<1x512xf32, #tpu.memory_space<vmem>>, %arg12: memref<8x128xbf16, #tpu.memory_space<vmem>>, %arg13: memref<8x8x512xbf16, #tpu.memory_space<vmem>>) attributes {dimension_semantics = [#tpu.dimension_semantics<parallel>], iteration_bounds = array<i64: 1>, scalar_prefetch = 0 : i64, scratch_operands = 1 : i64, tpu.core_type = #tpu.core_type<tc>, window_params = [{transform_indices = @transform_0, window_bounds = array<i64: 8, 8, 32>}, {pipeline_mode = #tpu.pipeline_mode<synchronous>, transform_indices = @transform_1, window_bounds = array<i64: 32, 128>}, {pipeline_mode = #tpu.pipeline_mode<synchronous>, transform_indices = @transform_2, window_bounds = array<i64: 1, 128>}, {pipeline_mode = #tpu.pipeline_mode<synchronous>, transform_indices = @transform_3, window_bounds = array<i64: 128, 128>}, {pipeline_mode = #tpu.pipeline_mode<synchronous>, transform_indices = @transform_4, window_bounds = array<i64: 1, 128>}, {pipeline_mode = #tpu.pipeline_mode<synchronous>, transform_indices = @transform_5, window_bounds = array<i64: 128, 512>}, {pipeline_mode = #tpu.pipeline_mode<synchronous>, transform_indices = @transform_6, window_bounds = array<i64: 128, 512>}, {pipeline_mode = #tpu.pipeline_mode<synchronous>, transform_indices = @transform_7, window_bounds = array<i64: 1, 512>}, {pipeline_mode = #tpu.pipeline_mode<synchronous>, transform_indices = @transform_8, window_bounds = array<i64: 128, 512>}, {pipeline_mode = #tpu.pipeline_mode<synchronous>, transform_indices = @transform_9, window_bounds = array<i64: 128, 512>}, {pipeline_mode = #tpu.pipeline_mode<synchronous>, transform_indices = @transform_10, window_bounds = array<i64: 1, 512>}, {transform_indices = @transform_11, window_bounds = array<i64: 8, 128>}]} {
    %c0 = arith.constant 0 : index
    %c0_0 = arith.constant 0 : index
    %c0_1 = arith.constant 0 : index
    %0 = vector.load %arg1[%c0, %c0_0, %c0_1] : memref<8x8x32xbf16, #tpu.memory_space<vmem>>, vector<8x8x32xbf16>
    %1 = vector.extract_strided_slice %0 {offsets = [0, 0, 29], sizes = [8, 8, 1], strides = [1, 1, 1]} : vector<8x8x32xbf16> to vector<8x8x1xbf16>
    %2 = arith.extf %1 : vector<8x8x1xbf16> to vector<8x8x1xf32>
    %cst = arith.constant dense<0.000000e+00> : vector<8x1xf32>
    %3 = vector.multi_reduction <add>, %2, %cst [0] : vector<8x8x1xf32> to vector<8x1xf32>
    %cst_2 = arith.constant 5.000000e-01 : f32
    %4 = vector.broadcast %cst_2 : f32 to vector<8x1xf32>
    %5 = arith.addf %3, %4 : vector<8x1xf32>
    %6 = arith.fptosi %5 : vector<8x1xf32> to vector<8x1xi32>
    %c1_i32 = arith.constant 1 : i32
    %7 = vector.broadcast %c1_i32 : i32 to vector<8x1xi32>
    %8 = arith.subi %6, %7 : vector<8x1xi32>
    %9 = vector.shape_cast %0 : vector<8x8x32xbf16> to vector<64x32xbf16>
    %c0_3 = arith.constant 0 : index
    %c0_4 = arith.constant 0 : index
    %10 = vector.load %arg2[%c0_3, %c0_4] : memref<32x128xbf16, #tpu.memory_space<vmem>>, vector<32x128xbf16>
    %cst_5 = arith.constant dense<0.000000e+00> : vector<64x128xf32>
    %11 = tpu.matmul %9, %10, %cst_5 {dimension_numbers = #tpu.dot_dimension_numbers<[1], [0], [0], [1], [0, 0, 1, 1], [], []>} : vector<64x32xbf16>, vector<32x128xbf16>, vector<64x128xf32> -> vector<64x128xf32>
    %c0_6 = arith.constant 0 : index
    %c0_7 = arith.constant 0 : index
    %12 = vector.load %arg3[%c0_6, %c0_7] : memref<1x128xf32, #tpu.memory_space<vmem>>, vector<1x128xf32>
    %13 = vector.broadcast %12 : vector<1x128xf32> to vector<64x128xf32>
    %14 = arith.addf %11, %13 : vector<64x128xf32>
    %cst_8 = arith.constant 0.000000e+00 : f32
    %15 = vector.broadcast %cst_8 : f32 to vector<64x128xf32>
    %16 = arith.maximumf %14, %15 : vector<64x128xf32>
    %17 = arith.truncf %16 : vector<64x128xf32> to vector<64x128xbf16>
    %c0_9 = arith.constant 0 : index
    %c0_10 = arith.constant 0 : index
    %18 = vector.load %arg4[%c0_9, %c0_10] : memref<128x128xbf16, #tpu.memory_space<vmem>>, vector<128x128xbf16>
    %cst_11 = arith.constant dense<0.000000e+00> : vector<64x128xf32>
    %19 = tpu.matmul %17, %18, %cst_11 {dimension_numbers = #tpu.dot_dimension_numbers<[1], [0], [0], [1], [0, 0, 1, 1], [], []>} : vector<64x128xbf16>, vector<128x128xbf16>, vector<64x128xf32> -> vector<64x128xf32>
    %c0_12 = arith.constant 0 : index
    %c0_13 = arith.constant 0 : index
    %20 = vector.load %arg5[%c0_12, %c0_13] : memref<1x128xf32, #tpu.memory_space<vmem>>, vector<1x128xf32>
    %21 = vector.broadcast %20 : vector<1x128xf32> to vector<64x128xf32>
    %22 = arith.addf %19, %21 : vector<64x128xf32>
    %23 = arith.truncf %22 : vector<64x128xf32> to vector<64x128xbf16>
    %c0_14 = arith.constant 0 : index
    %c0_15 = arith.constant 0 : index
    %24 = vector.load %arg6[%c0_14, %c0_15] : memref<128x512xbf16, #tpu.memory_space<vmem>>, vector<128x512xbf16>
    %cst_16 = arith.constant dense<0.000000e+00> : vector<64x512xf32>
    %25 = tpu.matmul %23, %24, %cst_16 {dimension_numbers = #tpu.dot_dimension_numbers<[1], [0], [0], [1], [0, 0, 1, 1], [], []>} : vector<64x128xbf16>, vector<128x512xbf16>, vector<64x512xf32> -> vector<64x512xf32>
    %26 = vector.shape_cast %2 : vector<8x8x1xf32> to vector<64x1xf32>
    %27 = vector.broadcast %26 : vector<64x1xf32> to vector<64x512xf32>
    %28 = arith.mulf %25, %27 : vector<64x512xf32>
    %c0_17 = arith.constant 0 : index
    %c0_18 = arith.constant 0 : index
    %29 = vector.load %arg8[%c0_17, %c0_18] : memref<1x512xf32, #tpu.memory_space<vmem>>, vector<1x512xf32>
    %30 = vector.broadcast %29 : vector<1x512xf32> to vector<64x512xf32>
    %31 = arith.addf %28, %30 : vector<64x512xf32>
    %32 = vector.shape_cast %31 : vector<64x512xf32> to vector<8x8x512xf32>
    %33 = arith.truncf %32 : vector<8x8x512xf32> to vector<8x8x512xbf16>
    %c0_19 = arith.constant 0 : index
    %c0_20 = arith.constant 0 : index
    %c0_21 = arith.constant 0 : index
    %34 = vector.load %arg13[%c0_19, %c0_20, %c0_21] : memref<8x8x512xbf16, #tpu.memory_space<vmem>>, vector<8x8x512xbf16>
    tpu.vector_store %arg13[%c0_19, %c0_20, %c0_21], %33 {strides = array<i32>} : memref<8x8x512xbf16, #tpu.memory_space<vmem>>, vector<8x8x512xbf16>,
    %c0_22 = arith.constant 0 : index
    %c0_23 = arith.constant 0 : index
    %35 = vector.load %arg7[%c0_22, %c0_23] : memref<128x512xbf16, #tpu.memory_space<vmem>>, vector<128x512xbf16>
    %c0_24 = arith.constant 0 : index
    %c0_25 = arith.constant 0 : index
    %36 = vector.load %arg9[%c0_24, %c0_25] : memref<128x512xbf16, #tpu.memory_space<vmem>>, vector<128x512xbf16>
    %c0_26 = arith.constant 0 : index
    %c0_27 = arith.constant 0 : index
    %37 = vector.load %arg10[%c0_26, %c0_27] : memref<128x512xbf16, #tpu.memory_space<vmem>>, vector<128x512xbf16>
    %c0_28 = arith.constant 0 : index
    %c0_29 = arith.constant 0 : index
    %38 = vector.load %arg11[%c0_28, %c0_29] : memref<1x512xf32, #tpu.memory_space<vmem>>, vector<1x512xf32>
    %cst_30 = arith.constant 0.000000e+00 : f32
    %39 = vector.broadcast %cst_30 : f32 to vector<8x128xf32>
    %c0_i32 = arith.constant 0 : i32
    %40 = arith.index_cast %c0_i32 : i32 to index
    %c0_31 = arith.constant 0 : index
    %c0_32 = arith.constant 0 : index
    %41 = vector.load %arg13[%40, %c0_31, %c0_32] : memref<8x8x512xbf16, #tpu.memory_space<vmem>>, vector<1x8x512xbf16>
    %42 = vector.shape_cast %41 : vector<1x8x512xbf16> to vector<8x512xbf16>
    %43 = arith.extf %42 : vector<8x512xbf16> to vector<8x512xf32>
    %44 = arith.truncf %39 : vector<8x128xf32> to vector<8x128xbf16>
    %cst_33 = arith.constant dense<0.000000e+00> : vector<8x512xf32>
    %45 = tpu.matmul %44, %35, %cst_33 {dimension_numbers = #tpu.dot_dimension_numbers<[1], [0], [0], [1], [0, 0, 1, 1], [], []>} : vector<8x128xbf16>, vector<128x512xbf16>, vector<8x512xf32> -> vector<8x512xf32>
    %46 = arith.addf %43, %45 : vector<8x512xf32>
    %47 = vector.extract_strided_slice %46 {offsets = [0, 0], sizes = [8, 128], strides = [1, 1]} : vector<8x512xf32> to vector<8x128xf32>
    %48 = arith.negf %47 : vector<8x128xf32>
    %49 = math.exp %48 : vector<8x128xf32>
    %cst_34 = arith.constant 1.000000e+00 : f32
    %50 = vector.broadcast %cst_34 : f32 to vector<8x128xf32>
    %51 = arith.addf %50, %49 : vector<8x128xf32>
    %52 = arith.divf %50, %51 : vector<8x128xf32>
    %53 = vector.extract_strided_slice %46 {offsets = [0, 128], sizes = [8, 128], strides = [1, 1]} : vector<8x512xf32> to vector<8x128xf32>
    %54 = arith.negf %53 : vector<8x128xf32>
    %55 = math.exp %54 : vector<8x128xf32>
    %cst_35 = arith.constant 1.000000e+00 : f32
    %56 = vector.broadcast %cst_35 : f32 to vector<8x128xf32>
    %57 = arith.addf %56, %55 : vector<8x128xf32>
    %58 = arith.divf %56, %57 : vector<8x128xf32>
    %59 = vector.extract_strided_slice %46 {offsets = [0, 256], sizes = [8, 128], strides = [1, 1]} : vector<8x512xf32> to vector<8x128xf32>
    %60 = math.tanh %59 : vector<8x128xf32>
    %61 = vector.extract_strided_slice %46 {offsets = [0, 384], sizes = [8, 128], strides = [1, 1]} : vector<8x512xf32> to vector<8x128xf32>
    %62 = arith.negf %61 : vector<8x128xf32>
    %63 = math.exp %62 : vector<8x128xf32>
    %cst_36 = arith.constant 1.000000e+00 : f32
    %64 = vector.broadcast %cst_36 : f32 to vector<8x128xf32>
    %65 = arith.addf %64, %63 : vector<8x128xf32>
    %66 = arith.divf %64, %65 : vector<8x128xf32>
    %67 = arith.mulf %58, %39 : vector<8x128xf32>
    %68 = arith.mulf %52, %60 : vector<8x128xf32>
    %69 = arith.addf %67, %68 : vector<8x128xf32>
    %70 = math.tanh %69 : vector<8x128xf32>
    %71 = arith.mulf %66, %70 : vector<8x128xf32>
    %72 = arith.truncf %71 : vector<8x128xf32> to vector<8x128xbf16>
    %cst_37 = arith.constant dense<0.000000e+00> : vector<8x512xf32>
    %73 = tpu.matmul %72, %36, %cst_37 {dimension_numbers = #tpu.dot_dimension_numbers<[1], [0], [0], [1], [0, 0, 1, 1], [], []>} : vector<8x128xbf16>, vector<128x512xbf16>, vector<8x512xf32> -> vector<8x512xf32>
    %74 = arith.truncf %39 : vector<8x128xf32> to vector<8x128xbf16>
    %cst_38 = arith.constant dense<0.000000e+00> : vector<8x512xf32>
    %75 = tpu.matmul %74, %37, %cst_38 {dimension_numbers = #tpu.dot_dimension_numbers<[1], [0], [0], [1], [0, 0, 1, 1], [], []>} : vector<8x128xbf16>, vector<128x512xbf16>, vector<8x512xf32> -> vector<8x512xf32>
    %76 = arith.addf %73, %75 : vector<8x512xf32>
    %77 = vector.broadcast %38 : vector<1x512xf32> to vector<8x512xf32>
    %78 = arith.addf %76, %77 : vector<8x512xf32>
    %79 = vector.extract_strided_slice %78 {offsets = [0, 0], sizes = [8, 128], strides = [1, 1]} : vector<8x512xf32> to vector<8x128xf32>
    %80 = arith.negf %79 : vector<8x128xf32>
    %81 = math.exp %80 : vector<8x128xf32>
    %cst_39 = arith.constant 1.000000e+00 : f32
    %82 = vector.broadcast %cst_39 : f32 to vector<8x128xf32>
    %83 = arith.addf %82, %81 : vector<8x128xf32>
    %84 = arith.divf %82, %83 : vector<8x128xf32>
    %85 = vector.extract_strided_slice %78 {offsets = [0, 128], sizes = [8, 128], strides = [1, 1]} : vector<8x512xf32> to vector<8x128xf32>
    %86 = arith.negf %85 : vector<8x128xf32>
    %87 = math.exp %86 : vector<8x128xf32>
    %cst_40 = arith.constant 1.000000e+00 : f32
    %88 = vector.broadcast %cst_40 : f32 to vector<8x128xf32>
    %89 = arith.addf %88, %87 : vector<8x128xf32>
    %90 = arith.divf %88, %89 : vector<8x128xf32>
    %91 = vector.extract_strided_slice %78 {offsets = [0, 256], sizes = [8, 128], strides = [1, 1]} : vector<8x512xf32> to vector<8x128xf32>
    %92 = math.tanh %91 : vector<8x128xf32>
    %93 = vector.extract_strided_slice %78 {offsets = [0, 384], sizes = [8, 128], strides = [1, 1]} : vector<8x512xf32> to vector<8x128xf32>
    %94 = arith.negf %93 : vector<8x128xf32>
    %95 = math.exp %94 : vector<8x128xf32>
    %cst_41 = arith.constant 1.000000e+00 : f32
    %96 = vector.broadcast %cst_41 : f32 to vector<8x128xf32>
    %97 = arith.addf %96, %95 : vector<8x128xf32>
    %98 = arith.divf %96, %97 : vector<8x128xf32>
    %99 = arith.mulf %90, %39 : vector<8x128xf32>
    %100 = arith.mulf %84, %92 : vector<8x128xf32>
    %101 = arith.addf %99, %100 : vector<8x128xf32>
    %102 = math.tanh %101 : vector<8x128xf32>
    %103 = arith.mulf %98, %102 : vector<8x128xf32>
    %104 = vector.broadcast %c0_i32 : i32 to vector<8x1xi32>
    %105 = arith.cmpi eq, %8, %104 : vector<8x1xi32>
    %106 = vector.shape_cast %105 : vector<8x1xi1> to vector<8x1xi1>
    %107 = vector.broadcast %106 : vector<8x1xi1> to vector<8x128xi1>
    %108 = arith.select %107, %103, %39 : vector<8x128xi1>, vector<8x128xf32>
    %c1_i32_42 = arith.constant 1 : i32
    %109 = arith.index_cast %c1_i32_42 : i32 to index
    %c0_43 = arith.constant 0 : index
    %c0_44 = arith.constant 0 : index
    %110 = vector.load %arg13[%109, %c0_43, %c0_44] : memref<8x8x512xbf16, #tpu.memory_space<vmem>>, vector<1x8x512xbf16>
    %111 = vector.shape_cast %110 : vector<1x8x512xbf16> to vector<8x512xbf16>
    %112 = arith.extf %111 : vector<8x512xbf16> to vector<8x512xf32>
    %113 = arith.truncf %71 : vector<8x128xf32> to vector<8x128xbf16>
    %cst_45 = arith.constant dense<0.000000e+00> : vector<8x512xf32>
    %114 = tpu.matmul %113, %35, %cst_45 {dimension_numbers = #tpu.dot_dimension_numbers<[1], [0], [0], [1], [0, 0, 1, 1], [], []>} : vector<8x128xbf16>, vector<128x512xbf16>, vector<8x512xf32> -> vector<8x512xf32>
    %115 = arith.addf %112, %114 : vector<8x512xf32>
    %116 = vector.extract_strided_slice %115 {offsets = [0, 0], sizes = [8, 128], strides = [1, 1]} : vector<8x512xf32> to vector<8x128xf32>
    %117 = arith.negf %116 : vector<8x128xf32>
    %118 = math.exp %117 : vector<8x128xf32>
    %cst_46 = arith.constant 1.000000e+00 : f32
    %119 = vector.broadcast %cst_46 : f32 to vector<8x128xf32>
    %120 = arith.addf %119, %118 : vector<8x128xf32>
    %121 = arith.divf %119, %120 : vector<8x128xf32>
    %122 = vector.extract_strided_slice %115 {offsets = [0, 128], sizes = [8, 128], strides = [1, 1]} : vector<8x512xf32> to vector<8x128xf32>
    %123 = arith.negf %122 : vector<8x128xf32>
    %124 = math.exp %123 : vector<8x128xf32>
    %cst_47 = arith.constant 1.000000e+00 : f32
    %125 = vector.broadcast %cst_47 : f32 to vector<8x128xf32>
    %126 = arith.addf %125, %124 : vector<8x128xf32>
    %127 = arith.divf %125, %126 : vector<8x128xf32>
    %128 = vector.extract_strided_slice %115 {offsets = [0, 256], sizes = [8, 128], strides = [1, 1]} : vector<8x512xf32> to vector<8x128xf32>
    %129 = math.tanh %128 : vector<8x128xf32>
    %130 = vector.extract_strided_slice %115 {offsets = [0, 384], sizes = [8, 128], strides = [1, 1]} : vector<8x512xf32> to vector<8x128xf32>
    %131 = arith.negf %130 : vector<8x128xf32>
    %132 = math.exp %131 : vector<8x128xf32>
    %cst_48 = arith.constant 1.000000e+00 : f32
    %133 = vector.broadcast %cst_48 : f32 to vector<8x128xf32>
    %134 = arith.addf %133, %132 : vector<8x128xf32>
    %135 = arith.divf %133, %134 : vector<8x128xf32>
    %136 = arith.mulf %127, %69 : vector<8x128xf32>
    %137 = arith.mulf %121, %129 : vector<8x128xf32>
    %138 = arith.addf %136, %137 : vector<8x128xf32>
    %139 = math.tanh %138 : vector<8x128xf32>
    %140 = arith.mulf %135, %139 : vector<8x128xf32>
    %141 = arith.truncf %140 : vector<8x128xf32> to vector<8x128xbf16>
    %cst_49 = arith.constant dense<0.000000e+00> : vector<8x512xf32>
    %142 = tpu.matmul %141, %36, %cst_49 {dimension_numbers = #tpu.dot_dimension_numbers<[1], [0], [0], [1], [0, 0, 1, 1], [], []>} : vector<8x128xbf16>, vector<128x512xbf16>, vector<8x512xf32> -> vector<8x512xf32>
    %143 = arith.truncf %103 : vector<8x128xf32> to vector<8x128xbf16>
    %cst_50 = arith.constant dense<0.000000e+00> : vector<8x512xf32>
    %144 = tpu.matmul %143, %37, %cst_50 {dimension_numbers = #tpu.dot_dimension_numbers<[1], [0], [0], [1], [0, 0, 1, 1], [], []>} : vector<8x128xbf16>, vector<128x512xbf16>, vector<8x512xf32> -> vector<8x512xf32>
    %145 = arith.addf %142, %144 : vector<8x512xf32>
    %146 = vector.broadcast %38 : vector<1x512xf32> to vector<8x512xf32>
    %147 = arith.addf %145, %146 : vector<8x512xf32>
    %148 = vector.extract_strided_slice %147 {offsets = [0, 0], sizes = [8, 128], strides = [1, 1]} : vector<8x512xf32> to vector<8x128xf32>
    %149 = arith.negf %148 : vector<8x128xf32>
    %150 = math.exp %149 : vector<8x128xf32>
    %cst_51 = arith.constant 1.000000e+00 : f32
    %151 = vector.broadcast %cst_51 : f32 to vector<8x128xf32>
    %152 = arith.addf %151, %150 : vector<8x128xf32>
    %153 = arith.divf %151, %152 : vector<8x128xf32>
    %154 = vector.extract_strided_slice %147 {offsets = [0, 128], sizes = [8, 128], strides = [1, 1]} : vector<8x512xf32> to vector<8x128xf32>
    %155 = arith.negf %154 : vector<8x128xf32>
    %156 = math.exp %155 : vector<8x128xf32>
    %cst_52 = arith.constant 1.000000e+00 : f32
    %157 = vector.broadcast %cst_52 : f32 to vector<8x128xf32>
    %158 = arith.addf %157, %156 : vector<8x128xf32>
    %159 = arith.divf %157, %158 : vector<8x128xf32>
    %160 = vector.extract_strided_slice %147 {offsets = [0, 256], sizes = [8, 128], strides = [1, 1]} : vector<8x512xf32> to vector<8x128xf32>
    %161 = math.tanh %160 : vector<8x128xf32>
    %162 = vector.extract_strided_slice %147 {offsets = [0, 384], sizes = [8, 128], strides = [1, 1]} : vector<8x512xf32> to vector<8x128xf32>
    %163 = arith.negf %162 : vector<8x128xf32>
    %164 = math.exp %163 : vector<8x128xf32>
    %cst_53 = arith.constant 1.000000e+00 : f32
    %165 = vector.broadcast %cst_53 : f32 to vector<8x128xf32>
    %166 = arith.addf %165, %164 : vector<8x128xf32>
    %167 = arith.divf %165, %166 : vector<8x128xf32>
    %168 = arith.mulf %159, %101 : vector<8x128xf32>
    %169 = arith.mulf %153, %161 : vector<8x128xf32>
    %170 = arith.addf %168, %169 : vector<8x128xf32>
    %171 = math.tanh %170 : vector<8x128xf32>
    %172 = arith.mulf %167, %171 : vector<8x128xf32>
    %173 = vector.broadcast %c1_i32_42 : i32 to vector<8x1xi32>
    %174 = arith.cmpi eq, %8, %173 : vector<8x1xi32>
    %175 = vector.shape_cast %174 : vector<8x1xi1> to vector<8x1xi1>
    %176 = vector.broadcast %175 : vector<8x1xi1> to vector<8x128xi1>
    %177 = arith.select %176, %172, %108 : vector<8x128xi1>, vector<8x128xf32>
    %c2_i32 = arith.constant 2 : i32
    %178 = arith.index_cast %c2_i32 : i32 to index
    %c0_54 = arith.constant 0 : index
    %c0_55 = arith.constant 0 : index
    %179 = vector.load %arg13[%178, %c0_54, %c0_55] : memref<8x8x512xbf16, #tpu.memory_space<vmem>>, vector<1x8x512xbf16>
    %180 = vector.shape_cast %179 : vector<1x8x512xbf16> to vector<8x512xbf16>
    %181 = arith.extf %180 : vector<8x512xbf16> to vector<8x512xf32>
    %182 = arith.truncf %140 : vector<8x128xf32> to vector<8x128xbf16>
    %cst_56 = arith.constant dense<0.000000e+00> : vector<8x512xf32>
    %183 = tpu.matmul %182, %35, %cst_56 {dimension_numbers = #tpu.dot_dimension_numbers<[1], [0], [0], [1], [0, 0, 1, 1], [], []>} : vector<8x128xbf16>, vector<128x512xbf16>, vector<8x512xf32> -> vector<8x512xf32>
    %184 = arith.addf %181, %183 : vector<8x512xf32>
    %185 = vector.extract_strided_slice %184 {offsets = [0, 0], sizes = [8, 128], strides = [1, 1]} : vector<8x512xf32> to vector<8x128xf32>
    %186 = arith.negf %185 : vector<8x128xf32>
    %187 = math.exp %186 : vector<8x128xf32>
    %cst_57 = arith.constant 1.000000e+00 : f32
    %188 = vector.broadcast %cst_57 : f32 to vector<8x128xf32>
    %189 = arith.addf %188, %187 : vector<8x128xf32>
    %190 = arith.divf %188, %189 : vector<8x128xf32>
    %191 = vector.extract_strided_slice %184 {offsets = [0, 128], sizes = [8, 128], strides = [1, 1]} : vector<8x512xf32> to vector<8x128xf32>
    %192 = arith.negf %191 : vector<8x128xf32>
    %193 = math.exp %192 : vector<8x128xf32>
    %cst_58 = arith.constant 1.000000e+00 : f32
    %194 = vector.broadcast %cst_58 : f32 to vector<8x128xf32>
    %195 = arith.addf %194, %193 : vector<8x128xf32>
    %196 = arith.divf %194, %195 : vector<8x128xf32>
    %197 = vector.extract_strided_slice %184 {offsets = [0, 256], sizes = [8, 128], strides = [1, 1]} : vector<8x512xf32> to vector<8x128xf32>
    %198 = math.tanh %197 : vector<8x128xf32>
    %199 = vector.extract_strided_slice %184 {offsets = [0, 384], sizes = [8, 128], strides = [1, 1]} : vector<8x512xf32> to vector<8x128xf32>
    %200 = arith.negf %199 : vector<8x128xf32>
    %201 = math.exp %200 : vector<8x128xf32>
    %cst_59 = arith.constant 1.000000e+00 : f32
    %202 = vector.broadcast %cst_59 : f32 to vector<8x128xf32>
    %203 = arith.addf %202, %201 : vector<8x128xf32>
    %204 = arith.divf %202, %203 : vector<8x128xf32>
    %205 = arith.mulf %196, %138 : vector<8x128xf32>
    %206 = arith.mulf %190, %198 : vector<8x128xf32>
    %207 = arith.addf %205, %206 : vector<8x128xf32>
    %208 = math.tanh %207 : vector<8x128xf32>
    %209 = arith.mulf %204, %208 : vector<8x128xf32>
    %210 = arith.truncf %209 : vector<8x128xf32> to vector<8x128xbf16>
    %cst_60 = arith.constant dense<0.000000e+00> : vector<8x512xf32>
    %211 = tpu.matmul %210, %36, %cst_60 {dimension_numbers = #tpu.dot_dimension_numbers<[1], [0], [0], [1], [0, 0, 1, 1], [], []>} : vector<8x128xbf16>, vector<128x512xbf16>, vector<8x512xf32> -> vector<8x512xf32>
    %212 = arith.truncf %172 : vector<8x128xf32> to vector<8x128xbf16>
    %cst_61 = arith.constant dense<0.000000e+00> : vector<8x512xf32>
    %213 = tpu.matmul %212, %37, %cst_61 {dimension_numbers = #tpu.dot_dimension_numbers<[1], [0], [0], [1], [0, 0, 1, 1], [], []>} : vector<8x128xbf16>, vector<128x512xbf16>, vector<8x512xf32> -> vector<8x512xf32>
    %214 = arith.addf %211, %213 : vector<8x512xf32>
    %215 = vector.broadcast %38 : vector<1x512xf32> to vector<8x512xf32>
    %216 = arith.addf %214, %215 : vector<8x512xf32>
    %217 = vector.extract_strided_slice %216 {offsets = [0, 0], sizes = [8, 128], strides = [1, 1]} : vector<8x512xf32> to vector<8x128xf32>
    %218 = arith.negf %217 : vector<8x128xf32>
    %219 = math.exp %218 : vector<8x128xf32>
    %cst_62 = arith.constant 1.000000e+00 : f32
    %220 = vector.broadcast %cst_62 : f32 to vector<8x128xf32>
    %221 = arith.addf %220, %219 : vector<8x128xf32>
    %222 = arith.divf %220, %221 : vector<8x128xf32>
    %223 = vector.extract_strided_slice %216 {offsets = [0, 128], sizes = [8, 128], strides = [1, 1]} : vector<8x512xf32> to vector<8x128xf32>
    %224 = arith.negf %223 : vector<8x128xf32>
    %225 = math.exp %224 : vector<8x128xf32>
    %cst_63 = arith.constant 1.000000e+00 : f32
    %226 = vector.broadcast %cst_63 : f32 to vector<8x128xf32>
    %227 = arith.addf %226, %225 : vector<8x128xf32>
    %228 = arith.divf %226, %227 : vector<8x128xf32>
    %229 = vector.extract_strided_slice %216 {offsets = [0, 256], sizes = [8, 128], strides = [1, 1]} : vector<8x512xf32> to vector<8x128xf32>
    %230 = math.tanh %229 : vector<8x128xf32>
    %231 = vector.extract_strided_slice %216 {offsets = [0, 384], sizes = [8, 128], strides = [1, 1]} : vector<8x512xf32> to vector<8x128xf32>
    %232 = arith.negf %231 : vector<8x128xf32>
    %233 = math.exp %232 : vector<8x128xf32>
    %cst_64 = arith.constant 1.000000e+00 : f32
    %234 = vector.broadcast %cst_64 : f32 to vector<8x128xf32>
    %235 = arith.addf %234, %233 : vector<8x128xf32>
    %236 = arith.divf %234, %235 : vector<8x128xf32>
    %237 = arith.mulf %228, %170 : vector<8x128xf32>
    %238 = arith.mulf %222, %230 : vector<8x128xf32>
    %239 = arith.addf %237, %238 : vector<8x128xf32>
    %240 = math.tanh %239 : vector<8x128xf32>
    %241 = arith.mulf %236, %240 : vector<8x128xf32>
    %242 = vector.broadcast %c2_i32 : i32 to vector<8x1xi32>
    %243 = arith.cmpi eq, %8, %242 : vector<8x1xi32>
    %244 = vector.shape_cast %243 : vector<8x1xi1> to vector<8x1xi1>
    %245 = vector.broadcast %244 : vector<8x1xi1> to vector<8x128xi1>
    %246 = arith.select %245, %241, %177 : vector<8x128xi1>, vector<8x128xf32>
    %c3_i32 = arith.constant 3 : i32
    %247 = arith.index_cast %c3_i32 : i32 to index
    %c0_65 = arith.constant 0 : index
    %c0_66 = arith.constant 0 : index
    %248 = vector.load %arg13[%247, %c0_65, %c0_66] : memref<8x8x512xbf16, #tpu.memory_space<vmem>>, vector<1x8x512xbf16>
    %249 = vector.shape_cast %248 : vector<1x8x512xbf16> to vector<8x512xbf16>
    %250 = arith.extf %249 : vector<8x512xbf16> to vector<8x512xf32>
    %251 = arith.truncf %209 : vector<8x128xf32> to vector<8x128xbf16>
    %cst_67 = arith.constant dense<0.000000e+00> : vector<8x512xf32>
    %252 = tpu.matmul %251, %35, %cst_67 {dimension_numbers = #tpu.dot_dimension_numbers<[1], [0], [0], [1], [0, 0, 1, 1], [], []>} : vector<8x128xbf16>, vector<128x512xbf16>, vector<8x512xf32> -> vector<8x512xf32>
    %253 = arith.addf %250, %252 : vector<8x512xf32>
    %254 = vector.extract_strided_slice %253 {offsets = [0, 0], sizes = [8, 128], strides = [1, 1]} : vector<8x512xf32> to vector<8x128xf32>
    %255 = arith.negf %254 : vector<8x128xf32>
    %256 = math.exp %255 : vector<8x128xf32>
    %cst_68 = arith.constant 1.000000e+00 : f32
    %257 = vector.broadcast %cst_68 : f32 to vector<8x128xf32>
    %258 = arith.addf %257, %256 : vector<8x128xf32>
    %259 = arith.divf %257, %258 : vector<8x128xf32>
    %260 = vector.extract_strided_slice %253 {offsets = [0, 128], sizes = [8, 128], strides = [1, 1]} : vector<8x512xf32> to vector<8x128xf32>
    %261 = arith.negf %260 : vector<8x128xf32>
    %262 = math.exp %261 : vector<8x128xf32>
    %cst_69 = arith.constant 1.000000e+00 : f32
    %263 = vector.broadcast %cst_69 : f32 to vector<8x128xf32>
    %264 = arith.addf %263, %262 : vector<8x128xf32>
    %265 = arith.divf %263, %264 : vector<8x128xf32>
    %266 = vector.extract_strided_slice %253 {offsets = [0, 256], sizes = [8, 128], strides = [1, 1]} : vector<8x512xf32> to vector<8x128xf32>
    %267 = math.tanh %266 : vector<8x128xf32>
    %268 = vector.extract_strided_slice %253 {offsets = [0, 384], sizes = [8, 128], strides = [1, 1]} : vector<8x512xf32> to vector<8x128xf32>
    %269 = arith.negf %268 : vector<8x128xf32>
    %270 = math.exp %269 : vector<8x128xf32>
    %cst_70 = arith.constant 1.000000e+00 : f32
    %271 = vector.broadcast %cst_70 : f32 to vector<8x128xf32>
    %272 = arith.addf %271, %270 : vector<8x128xf32>
    %273 = arith.divf %271, %272 : vector<8x128xf32>
    %274 = arith.mulf %265, %207 : vector<8x128xf32>
    %275 = arith.mulf %259, %267 : vector<8x128xf32>
    %276 = arith.addf %274, %275 : vector<8x128xf32>
    %277 = math.tanh %276 : vector<8x128xf32>
    %278 = arith.mulf %273, %277 : vector<8x128xf32>
    %279 = arith.truncf %278 : vector<8x128xf32> to vector<8x128xbf16>
    %cst_71 = arith.constant dense<0.000000e+00> : vector<8x512xf32>
    %280 = tpu.matmul %279, %36, %cst_71 {dimension_numbers = #tpu.dot_dimension_numbers<[1], [0], [0], [1], [0, 0, 1, 1], [], []>} : vector<8x128xbf16>, vector<128x512xbf16>, vector<8x512xf32> -> vector<8x512xf32>
    %281 = arith.truncf %241 : vector<8x128xf32> to vector<8x128xbf16>
    %cst_72 = arith.constant dense<0.000000e+00> : vector<8x512xf32>
    %282 = tpu.matmul %281, %37, %cst_72 {dimension_numbers = #tpu.dot_dimension_numbers<[1], [0], [0], [1], [0, 0, 1, 1], [], []>} : vector<8x128xbf16>, vector<128x512xbf16>, vector<8x512xf32> -> vector<8x512xf32>
    %283 = arith.addf %280, %282 : vector<8x512xf32>
    %284 = vector.broadcast %38 : vector<1x512xf32> to vector<8x512xf32>
    %285 = arith.addf %283, %284 : vector<8x512xf32>
    %286 = vector.extract_strided_slice %285 {offsets = [0, 0], sizes = [8, 128], strides = [1, 1]} : vector<8x512xf32> to vector<8x128xf32>
    %287 = arith.negf %286 : vector<8x128xf32>
    %288 = math.exp %287 : vector<8x128xf32>
    %cst_73 = arith.constant 1.000000e+00 : f32
    %289 = vector.broadcast %cst_73 : f32 to vector<8x128xf32>
    %290 = arith.addf %289, %288 : vector<8x128xf32>
    %291 = arith.divf %289, %290 : vector<8x128xf32>
    %292 = vector.extract_strided_slice %285 {offsets = [0, 128], sizes = [8, 128], strides = [1, 1]} : vector<8x512xf32> to vector<8x128xf32>
    %293 = arith.negf %292 : vector<8x128xf32>
    %294 = math.exp %293 : vector<8x128xf32>
    %cst_74 = arith.constant 1.000000e+00 : f32
    %295 = vector.broadcast %cst_74 : f32 to vector<8x128xf32>
    %296 = arith.addf %295, %294 : vector<8x128xf32>
    %297 = arith.divf %295, %296 : vector<8x128xf32>
    %298 = vector.extract_strided_slice %285 {offsets = [0, 256], sizes = [8, 128], strides = [1, 1]} : vector<8x512xf32> to vector<8x128xf32>
    %299 = math.tanh %298 : vector<8x128xf32>
    %300 = vector.extract_strided_slice %285 {offsets = [0, 384], sizes = [8, 128], strides = [1, 1]} : vector<8x512xf32> to vector<8x128xf32>
    %301 = arith.negf %300 : vector<8x128xf32>
    %302 = math.exp %301 : vector<8x128xf32>
    %cst_75 = arith.constant 1.000000e+00 : f32
    %303 = vector.broadcast %cst_75 : f32 to vector<8x128xf32>
    %304 = arith.addf %303, %302 : vector<8x128xf32>
    %305 = arith.divf %303, %304 : vector<8x128xf32>
    %306 = arith.mulf %297, %239 : vector<8x128xf32>
    %307 = arith.mulf %291, %299 : vector<8x128xf32>
    %308 = arith.addf %306, %307 : vector<8x128xf32>
    %309 = math.tanh %308 : vector<8x128xf32>
    %310 = arith.mulf %305, %309 : vector<8x128xf32>
    %311 = vector.broadcast %c3_i32 : i32 to vector<8x1xi32>
    %312 = arith.cmpi eq, %8, %311 : vector<8x1xi32>
    %313 = vector.shape_cast %312 : vector<8x1xi1> to vector<8x1xi1>
    %314 = vector.broadcast %313 : vector<8x1xi1> to vector<8x128xi1>
    %315 = arith.select %314, %310, %246 : vector<8x128xi1>, vector<8x128xf32>
    %c4_i32 = arith.constant 4 : i32
    %316 = arith.index_cast %c4_i32 : i32 to index
    %c0_76 = arith.constant 0 : index
    %c0_77 = arith.constant 0 : index
    %317 = vector.load %arg13[%316, %c0_76, %c0_77] : memref<8x8x512xbf16, #tpu.memory_space<vmem>>, vector<1x8x512xbf16>
    %318 = vector.shape_cast %317 : vector<1x8x512xbf16> to vector<8x512xbf16>
    %319 = arith.extf %318 : vector<8x512xbf16> to vector<8x512xf32>
    %320 = arith.truncf %278 : vector<8x128xf32> to vector<8x128xbf16>
    %cst_78 = arith.constant dense<0.000000e+00> : vector<8x512xf32>
    %321 = tpu.matmul %320, %35, %cst_78 {dimension_numbers = #tpu.dot_dimension_numbers<[1], [0], [0], [1], [0, 0, 1, 1], [], []>} : vector<8x128xbf16>, vector<128x512xbf16>, vector<8x512xf32> -> vector<8x512xf32>
    %322 = arith.addf %319, %321 : vector<8x512xf32>
    %323 = vector.extract_strided_slice %322 {offsets = [0, 0], sizes = [8, 128], strides = [1, 1]} : vector<8x512xf32> to vector<8x128xf32>
    %324 = arith.negf %323 : vector<8x128xf32>
    %325 = math.exp %324 : vector<8x128xf32>
    %cst_79 = arith.constant 1.000000e+00 : f32
    %326 = vector.broadcast %cst_79 : f32 to vector<8x128xf32>
    %327 = arith.addf %326, %325 : vector<8x128xf32>
    %328 = arith.divf %326, %327 : vector<8x128xf32>
    %329 = vector.extract_strided_slice %322 {offsets = [0, 128], sizes = [8, 128], strides = [1, 1]} : vector<8x512xf32> to vector<8x128xf32>
    %330 = arith.negf %329 : vector<8x128xf32>
    %331 = math.exp %330 : vector<8x128xf32>
    %cst_80 = arith.constant 1.000000e+00 : f32
    %332 = vector.broadcast %cst_80 : f32 to vector<8x128xf32>
    %333 = arith.addf %332, %331 : vector<8x128xf32>
    %334 = arith.divf %332, %333 : vector<8x128xf32>
    %335 = vector.extract_strided_slice %322 {offsets = [0, 256], sizes = [8, 128], strides = [1, 1]} : vector<8x512xf32> to vector<8x128xf32>
    %336 = math.tanh %335 : vector<8x128xf32>
    %337 = vector.extract_strided_slice %322 {offsets = [0, 384], sizes = [8, 128], strides = [1, 1]} : vector<8x512xf32> to vector<8x128xf32>
    %338 = arith.negf %337 : vector<8x128xf32>
    %339 = math.exp %338 : vector<8x128xf32>
    %cst_81 = arith.constant 1.000000e+00 : f32
    %340 = vector.broadcast %cst_81 : f32 to vector<8x128xf32>
    %341 = arith.addf %340, %339 : vector<8x128xf32>
    %342 = arith.divf %340, %341 : vector<8x128xf32>
    %343 = arith.mulf %334, %276 : vector<8x128xf32>
    %344 = arith.mulf %328, %336 : vector<8x128xf32>
    %345 = arith.addf %343, %344 : vector<8x128xf32>
    %346 = math.tanh %345 : vector<8x128xf32>
    %347 = arith.mulf %342, %346 : vector<8x128xf32>
    %348 = arith.truncf %347 : vector<8x128xf32> to vector<8x128xbf16>
    %cst_82 = arith.constant dense<0.000000e+00> : vector<8x512xf32>
    %349 = tpu.matmul %348, %36, %cst_82 {dimension_numbers = #tpu.dot_dimension_numbers<[1], [0], [0], [1], [0, 0, 1, 1], [], []>} : vector<8x128xbf16>, vector<128x512xbf16>, vector<8x512xf32> -> vector<8x512xf32>
    %350 = arith.truncf %310 : vector<8x128xf32> to vector<8x128xbf16>
    %cst_83 = arith.constant dense<0.000000e+00> : vector<8x512xf32>
    %351 = tpu.matmul %350, %37, %cst_83 {dimension_numbers = #tpu.dot_dimension_numbers<[1], [0], [0], [1], [0, 0, 1, 1], [], []>} : vector<8x128xbf16>, vector<128x512xbf16>, vector<8x512xf32> -> vector<8x512xf32>
    %352 = arith.addf %349, %351 : vector<8x512xf32>
    %353 = vector.broadcast %38 : vector<1x512xf32> to vector<8x512xf32>
    %354 = arith.addf %352, %353 : vector<8x512xf32>
    %355 = vector.extract_strided_slice %354 {offsets = [0, 0], sizes = [8, 128], strides = [1, 1]} : vector<8x512xf32> to vector<8x128xf32>
    %356 = arith.negf %355 : vector<8x128xf32>
    %357 = math.exp %356 : vector<8x128xf32>
    %cst_84 = arith.constant 1.000000e+00 : f32
    %358 = vector.broadcast %cst_84 : f32 to vector<8x128xf32>
    %359 = arith.addf %358, %357 : vector<8x128xf32>
    %360 = arith.divf %358, %359 : vector<8x128xf32>
    %361 = vector.extract_strided_slice %354 {offsets = [0, 128], sizes = [8, 128], strides = [1, 1]} : vector<8x512xf32> to vector<8x128xf32>
    %362 = arith.negf %361 : vector<8x128xf32>
    %363 = math.exp %362 : vector<8x128xf32>
    %cst_85 = arith.constant 1.000000e+00 : f32
    %364 = vector.broadcast %cst_85 : f32 to vector<8x128xf32>
    %365 = arith.addf %364, %363 : vector<8x128xf32>
    %366 = arith.divf %364, %365 : vector<8x128xf32>
    %367 = vector.extract_strided_slice %354 {offsets = [0, 256], sizes = [8, 128], strides = [1, 1]} : vector<8x512xf32> to vector<8x128xf32>
    %368 = math.tanh %367 : vector<8x128xf32>
    %369 = vector.extract_strided_slice %354 {offsets = [0, 384], sizes = [8, 128], strides = [1, 1]} : vector<8x512xf32> to vector<8x128xf32>
    %370 = arith.negf %369 : vector<8x128xf32>
    %371 = math.exp %370 : vector<8x128xf32>
    %cst_86 = arith.constant 1.000000e+00 : f32
    %372 = vector.broadcast %cst_86 : f32 to vector<8x128xf32>
    %373 = arith.addf %372, %371 : vector<8x128xf32>
    %374 = arith.divf %372, %373 : vector<8x128xf32>
    %375 = arith.mulf %366, %308 : vector<8x128xf32>
    %376 = arith.mulf %360, %368 : vector<8x128xf32>
    %377 = arith.addf %375, %376 : vector<8x128xf32>
    %378 = math.tanh %377 : vector<8x128xf32>
    %379 = arith.mulf %374, %378 : vector<8x128xf32>
    %380 = vector.broadcast %c4_i32 : i32 to vector<8x1xi32>
    %381 = arith.cmpi eq, %8, %380 : vector<8x1xi32>
    %382 = vector.shape_cast %381 : vector<8x1xi1> to vector<8x1xi1>
    %383 = vector.broadcast %382 : vector<8x1xi1> to vector<8x128xi1>
    %384 = arith.select %383, %379, %315 : vector<8x128xi1>, vector<8x128xf32>
    %c5_i32 = arith.constant 5 : i32
    %385 = arith.index_cast %c5_i32 : i32 to index
    %c0_87 = arith.constant 0 : index
    %c0_88 = arith.constant 0 : index
    %386 = vector.load %arg13[%385, %c0_87, %c0_88] : memref<8x8x512xbf16, #tpu.memory_space<vmem>>, vector<1x8x512xbf16>
    %387 = vector.shape_cast %386 : vector<1x8x512xbf16> to vector<8x512xbf16>
    %388 = arith.extf %387 : vector<8x512xbf16> to vector<8x512xf32>
    %389 = arith.truncf %347 : vector<8x128xf32> to vector<8x128xbf16>
    %cst_89 = arith.constant dense<0.000000e+00> : vector<8x512xf32>
    %390 = tpu.matmul %389, %35, %cst_89 {dimension_numbers = #tpu.dot_dimension_numbers<[1], [0], [0], [1], [0, 0, 1, 1], [], []>} : vector<8x128xbf16>, vector<128x512xbf16>, vector<8x512xf32> -> vector<8x512xf32>
    %391 = arith.addf %388, %390 : vector<8x512xf32>
    %392 = vector.extract_strided_slice %391 {offsets = [0, 0], sizes = [8, 128], strides = [1, 1]} : vector<8x512xf32> to vector<8x128xf32>
    %393 = arith.negf %392 : vector<8x128xf32>
    %394 = math.exp %393 : vector<8x128xf32>
    %cst_90 = arith.constant 1.000000e+00 : f32
    %395 = vector.broadcast %cst_90 : f32 to vector<8x128xf32>
    %396 = arith.addf %395, %394 : vector<8x128xf32>
    %397 = arith.divf %395, %396 : vector<8x128xf32>
    %398 = vector.extract_strided_slice %391 {offsets = [0, 128], sizes = [8, 128], strides = [1, 1]} : vector<8x512xf32> to vector<8x128xf32>
    %399 = arith.negf %398 : vector<8x128xf32>
    %400 = math.exp %399 : vector<8x128xf32>
    %cst_91 = arith.constant 1.000000e+00 : f32
    %401 = vector.broadcast %cst_91 : f32 to vector<8x128xf32>
    %402 = arith.addf %401, %400 : vector<8x128xf32>
    %403 = arith.divf %401, %402 : vector<8x128xf32>
    %404 = vector.extract_strided_slice %391 {offsets = [0, 256], sizes = [8, 128], strides = [1, 1]} : vector<8x512xf32> to vector<8x128xf32>
    %405 = math.tanh %404 : vector<8x128xf32>
    %406 = vector.extract_strided_slice %391 {offsets = [0, 384], sizes = [8, 128], strides = [1, 1]} : vector<8x512xf32> to vector<8x128xf32>
    %407 = arith.negf %406 : vector<8x128xf32>
    %408 = math.exp %407 : vector<8x128xf32>
    %cst_92 = arith.constant 1.000000e+00 : f32
    %409 = vector.broadcast %cst_92 : f32 to vector<8x128xf32>
    %410 = arith.addf %409, %408 : vector<8x128xf32>
    %411 = arith.divf %409, %410 : vector<8x128xf32>
    %412 = arith.mulf %403, %345 : vector<8x128xf32>
    %413 = arith.mulf %397, %405 : vector<8x128xf32>
    %414 = arith.addf %412, %413 : vector<8x128xf32>
    %415 = math.tanh %414 : vector<8x128xf32>
    %416 = arith.mulf %411, %415 : vector<8x128xf32>
    %417 = arith.truncf %416 : vector<8x128xf32> to vector<8x128xbf16>
    %cst_93 = arith.constant dense<0.000000e+00> : vector<8x512xf32>
    %418 = tpu.matmul %417, %36, %cst_93 {dimension_numbers = #tpu.dot_dimension_numbers<[1], [0], [0], [1], [0, 0, 1, 1], [], []>} : vector<8x128xbf16>, vector<128x512xbf16>, vector<8x512xf32> -> vector<8x512xf32>
    %419 = arith.truncf %379 : vector<8x128xf32> to vector<8x128xbf16>
    %cst_94 = arith.constant dense<0.000000e+00> : vector<8x512xf32>
    %420 = tpu.matmul %419, %37, %cst_94 {dimension_numbers = #tpu.dot_dimension_numbers<[1], [0], [0], [1], [0, 0, 1, 1], [], []>} : vector<8x128xbf16>, vector<128x512xbf16>, vector<8x512xf32> -> vector<8x512xf32>
    %421 = arith.addf %418, %420 : vector<8x512xf32>
    %422 = vector.broadcast %38 : vector<1x512xf32> to vector<8x512xf32>
    %423 = arith.addf %421, %422 : vector<8x512xf32>
    %424 = vector.extract_strided_slice %423 {offsets = [0, 0], sizes = [8, 128], strides = [1, 1]} : vector<8x512xf32> to vector<8x128xf32>
    %425 = arith.negf %424 : vector<8x128xf32>
    %426 = math.exp %425 : vector<8x128xf32>
    %cst_95 = arith.constant 1.000000e+00 : f32
    %427 = vector.broadcast %cst_95 : f32 to vector<8x128xf32>
    %428 = arith.addf %427, %426 : vector<8x128xf32>
    %429 = arith.divf %427, %428 : vector<8x128xf32>
    %430 = vector.extract_strided_slice %423 {offsets = [0, 128], sizes = [8, 128], strides = [1, 1]} : vector<8x512xf32> to vector<8x128xf32>
    %431 = arith.negf %430 : vector<8x128xf32>
    %432 = math.exp %431 : vector<8x128xf32>
    %cst_96 = arith.constant 1.000000e+00 : f32
    %433 = vector.broadcast %cst_96 : f32 to vector<8x128xf32>
    %434 = arith.addf %433, %432 : vector<8x128xf32>
    %435 = arith.divf %433, %434 : vector<8x128xf32>
    %436 = vector.extract_strided_slice %423 {offsets = [0, 256], sizes = [8, 128], strides = [1, 1]} : vector<8x512xf32> to vector<8x128xf32>
    %437 = math.tanh %436 : vector<8x128xf32>
    %438 = vector.extract_strided_slice %423 {offsets = [0, 384], sizes = [8, 128], strides = [1, 1]} : vector<8x512xf32> to vector<8x128xf32>
    %439 = arith.negf %438 : vector<8x128xf32>
    %440 = math.exp %439 : vector<8x128xf32>
    %cst_97 = arith.constant 1.000000e+00 : f32
    %441 = vector.broadcast %cst_97 : f32 to vector<8x128xf32>
    %442 = arith.addf %441, %440 : vector<8x128xf32>
    %443 = arith.divf %441, %442 : vector<8x128xf32>
    %444 = arith.mulf %435, %377 : vector<8x128xf32>
    %445 = arith.mulf %429, %437 : vector<8x128xf32>
    %446 = arith.addf %444, %445 : vector<8x128xf32>
    %447 = math.tanh %446 : vector<8x128xf32>
    %448 = arith.mulf %443, %447 : vector<8x128xf32>
    %449 = vector.broadcast %c5_i32 : i32 to vector<8x1xi32>
    %450 = arith.cmpi eq, %8, %449 : vector<8x1xi32>
    %451 = vector.shape_cast %450 : vector<8x1xi1> to vector<8x1xi1>
    %452 = vector.broadcast %451 : vector<8x1xi1> to vector<8x128xi1>
    %453 = arith.select %452, %448, %384 : vector<8x128xi1>, vector<8x128xf32>
    %c6_i32 = arith.constant 6 : i32
    %454 = arith.index_cast %c6_i32 : i32 to index
    %c0_98 = arith.constant 0 : index
    %c0_99 = arith.constant 0 : index
    %455 = vector.load %arg13[%454, %c0_98, %c0_99] : memref<8x8x512xbf16, #tpu.memory_space<vmem>>, vector<1x8x512xbf16>
    %456 = vector.shape_cast %455 : vector<1x8x512xbf16> to vector<8x512xbf16>
    %457 = arith.extf %456 : vector<8x512xbf16> to vector<8x512xf32>
    %458 = arith.truncf %416 : vector<8x128xf32> to vector<8x128xbf16>
    %cst_100 = arith.constant dense<0.000000e+00> : vector<8x512xf32>
    %459 = tpu.matmul %458, %35, %cst_100 {dimension_numbers = #tpu.dot_dimension_numbers<[1], [0], [0], [1], [0, 0, 1, 1], [], []>} : vector<8x128xbf16>, vector<128x512xbf16>, vector<8x512xf32> -> vector<8x512xf32>
    %460 = arith.addf %457, %459 : vector<8x512xf32>
    %461 = vector.extract_strided_slice %460 {offsets = [0, 0], sizes = [8, 128], strides = [1, 1]} : vector<8x512xf32> to vector<8x128xf32>
    %462 = arith.negf %461 : vector<8x128xf32>
    %463 = math.exp %462 : vector<8x128xf32>
    %cst_101 = arith.constant 1.000000e+00 : f32
    %464 = vector.broadcast %cst_101 : f32 to vector<8x128xf32>
    %465 = arith.addf %464, %463 : vector<8x128xf32>
    %466 = arith.divf %464, %465 : vector<8x128xf32>
    %467 = vector.extract_strided_slice %460 {offsets = [0, 128], sizes = [8, 128], strides = [1, 1]} : vector<8x512xf32> to vector<8x128xf32>
    %468 = arith.negf %467 : vector<8x128xf32>
    %469 = math.exp %468 : vector<8x128xf32>
    %cst_102 = arith.constant 1.000000e+00 : f32
    %470 = vector.broadcast %cst_102 : f32 to vector<8x128xf32>
    %471 = arith.addf %470, %469 : vector<8x128xf32>
    %472 = arith.divf %470, %471 : vector<8x128xf32>
    %473 = vector.extract_strided_slice %460 {offsets = [0, 256], sizes = [8, 128], strides = [1, 1]} : vector<8x512xf32> to vector<8x128xf32>
    %474 = math.tanh %473 : vector<8x128xf32>
    %475 = vector.extract_strided_slice %460 {offsets = [0, 384], sizes = [8, 128], strides = [1, 1]} : vector<8x512xf32> to vector<8x128xf32>
    %476 = arith.negf %475 : vector<8x128xf32>
    %477 = math.exp %476 : vector<8x128xf32>
    %cst_103 = arith.constant 1.000000e+00 : f32
    %478 = vector.broadcast %cst_103 : f32 to vector<8x128xf32>
    %479 = arith.addf %478, %477 : vector<8x128xf32>
    %480 = arith.divf %478, %479 : vector<8x128xf32>
    %481 = arith.mulf %472, %414 : vector<8x128xf32>
    %482 = arith.mulf %466, %474 : vector<8x128xf32>
    %483 = arith.addf %481, %482 : vector<8x128xf32>
    %484 = math.tanh %483 : vector<8x128xf32>
    %485 = arith.mulf %480, %484 : vector<8x128xf32>
    %486 = arith.truncf %485 : vector<8x128xf32> to vector<8x128xbf16>
    %cst_104 = arith.constant dense<0.000000e+00> : vector<8x512xf32>
    %487 = tpu.matmul %486, %36, %cst_104 {dimension_numbers = #tpu.dot_dimension_numbers<[1], [0], [0], [1], [0, 0, 1, 1], [], []>} : vector<8x128xbf16>, vector<128x512xbf16>, vector<8x512xf32> -> vector<8x512xf32>
    %488 = arith.truncf %448 : vector<8x128xf32> to vector<8x128xbf16>
    %cst_105 = arith.constant dense<0.000000e+00> : vector<8x512xf32>
    %489 = tpu.matmul %488, %37, %cst_105 {dimension_numbers = #tpu.dot_dimension_numbers<[1], [0], [0], [1], [0, 0, 1, 1], [], []>} : vector<8x128xbf16>, vector<128x512xbf16>, vector<8x512xf32> -> vector<8x512xf32>
    %490 = arith.addf %487, %489 : vector<8x512xf32>
    %491 = vector.broadcast %38 : vector<1x512xf32> to vector<8x512xf32>
    %492 = arith.addf %490, %491 : vector<8x512xf32>
    %493 = vector.extract_strided_slice %492 {offsets = [0, 0], sizes = [8, 128], strides = [1, 1]} : vector<8x512xf32> to vector<8x128xf32>
    %494 = arith.negf %493 : vector<8x128xf32>
    %495 = math.exp %494 : vector<8x128xf32>
    %cst_106 = arith.constant 1.000000e+00 : f32
    %496 = vector.broadcast %cst_106 : f32 to vector<8x128xf32>
    %497 = arith.addf %496, %495 : vector<8x128xf32>
    %498 = arith.divf %496, %497 : vector<8x128xf32>
    %499 = vector.extract_strided_slice %492 {offsets = [0, 128], sizes = [8, 128], strides = [1, 1]} : vector<8x512xf32> to vector<8x128xf32>
    %500 = arith.negf %499 : vector<8x128xf32>
    %501 = math.exp %500 : vector<8x128xf32>
    %cst_107 = arith.constant 1.000000e+00 : f32
    %502 = vector.broadcast %cst_107 : f32 to vector<8x128xf32>
    %503 = arith.addf %502, %501 : vector<8x128xf32>
    %504 = arith.divf %502, %503 : vector<8x128xf32>
    %505 = vector.extract_strided_slice %492 {offsets = [0, 256], sizes = [8, 128], strides = [1, 1]} : vector<8x512xf32> to vector<8x128xf32>
    %506 = math.tanh %505 : vector<8x128xf32>
    %507 = vector.extract_strided_slice %492 {offsets = [0, 384], sizes = [8, 128], strides = [1, 1]} : vector<8x512xf32> to vector<8x128xf32>
    %508 = arith.negf %507 : vector<8x128xf32>
    %509 = math.exp %508 : vector<8x128xf32>
    %cst_108 = arith.constant 1.000000e+00 : f32
    %510 = vector.broadcast %cst_108 : f32 to vector<8x128xf32>
    %511 = arith.addf %510, %509 : vector<8x128xf32>
    %512 = arith.divf %510, %511 : vector<8x128xf32>
    %513 = arith.mulf %504, %446 : vector<8x128xf32>
    %514 = arith.mulf %498, %506 : vector<8x128xf32>
    %515 = arith.addf %513, %514 : vector<8x128xf32>
    %516 = math.tanh %515 : vector<8x128xf32>
    %517 = arith.mulf %512, %516 : vector<8x128xf32>
    %518 = vector.broadcast %c6_i32 : i32 to vector<8x1xi32>
    %519 = arith.cmpi eq, %8, %518 : vector<8x1xi32>
    %520 = vector.shape_cast %519 : vector<8x1xi1> to vector<8x1xi1>
    %521 = vector.broadcast %520 : vector<8x1xi1> to vector<8x128xi1>
    %522 = arith.select %521, %517, %453 : vector<8x128xi1>, vector<8x128xf32>
    %c7_i32 = arith.constant 7 : i32
    %523 = arith.index_cast %c7_i32 : i32 to index
    %c0_109 = arith.constant 0 : index
    %c0_110 = arith.constant 0 : index
    %524 = vector.load %arg13[%523, %c0_109, %c0_110] : memref<8x8x512xbf16, #tpu.memory_space<vmem>>, vector<1x8x512xbf16>
    %525 = vector.shape_cast %524 : vector<1x8x512xbf16> to vector<8x512xbf16>
    %526 = arith.extf %525 : vector<8x512xbf16> to vector<8x512xf32>
    %527 = arith.truncf %485 : vector<8x128xf32> to vector<8x128xbf16>
    %cst_111 = arith.constant dense<0.000000e+00> : vector<8x512xf32>
    %528 = tpu.matmul %527, %35, %cst_111 {dimension_numbers = #tpu.dot_dimension_numbers<[1], [0], [0], [1], [0, 0, 1, 1], [], []>} : vector<8x128xbf16>, vector<128x512xbf16>, vector<8x512xf32> -> vector<8x512xf32>
    %529 = arith.addf %526, %528 : vector<8x512xf32>
    %530 = vector.extract_strided_slice %529 {offsets = [0, 0], sizes = [8, 128], strides = [1, 1]} : vector<8x512xf32> to vector<8x128xf32>
    %531 = arith.negf %530 : vector<8x128xf32>
    %532 = math.exp %531 : vector<8x128xf32>
    %cst_112 = arith.constant 1.000000e+00 : f32
    %533 = vector.broadcast %cst_112 : f32 to vector<8x128xf32>
    %534 = arith.addf %533, %532 : vector<8x128xf32>
    %535 = arith.divf %533, %534 : vector<8x128xf32>
    %536 = vector.extract_strided_slice %529 {offsets = [0, 128], sizes = [8, 128], strides = [1, 1]} : vector<8x512xf32> to vector<8x128xf32>
    %537 = arith.negf %536 : vector<8x128xf32>
    %538 = math.exp %537 : vector<8x128xf32>
    %cst_113 = arith.constant 1.000000e+00 : f32
    %539 = vector.broadcast %cst_113 : f32 to vector<8x128xf32>
    %540 = arith.addf %539, %538 : vector<8x128xf32>
    %541 = arith.divf %539, %540 : vector<8x128xf32>
    %542 = vector.extract_strided_slice %529 {offsets = [0, 256], sizes = [8, 128], strides = [1, 1]} : vector<8x512xf32> to vector<8x128xf32>
    %543 = math.tanh %542 : vector<8x128xf32>
    %544 = vector.extract_strided_slice %529 {offsets = [0, 384], sizes = [8, 128], strides = [1, 1]} : vector<8x512xf32> to vector<8x128xf32>
    %545 = arith.negf %544 : vector<8x128xf32>
    %546 = math.exp %545 : vector<8x128xf32>
    %cst_114 = arith.constant 1.000000e+00 : f32
    %547 = vector.broadcast %cst_114 : f32 to vector<8x128xf32>
    %548 = arith.addf %547, %546 : vector<8x128xf32>
    %549 = arith.divf %547, %548 : vector<8x128xf32>
    %550 = arith.mulf %541, %483 : vector<8x128xf32>
    %551 = arith.mulf %535, %543 : vector<8x128xf32>
    %552 = arith.addf %550, %551 : vector<8x128xf32>
    %553 = math.tanh %552 : vector<8x128xf32>
    %554 = arith.mulf %549, %553 : vector<8x128xf32>
    %555 = arith.truncf %554 : vector<8x128xf32> to vector<8x128xbf16>
    %cst_115 = arith.constant dense<0.000000e+00> : vector<8x512xf32>
    %556 = tpu.matmul %555, %36, %cst_115 {dimension_numbers = #tpu.dot_dimension_numbers<[1], [0], [0], [1], [0, 0, 1, 1], [], []>} : vector<8x128xbf16>, vector<128x512xbf16>, vector<8x512xf32> -> vector<8x512xf32>
    %557 = arith.truncf %517 : vector<8x128xf32> to vector<8x128xbf16>
    %cst_116 = arith.constant dense<0.000000e+00> : vector<8x512xf32>
    %558 = tpu.matmul %557, %37, %cst_116 {dimension_numbers = #tpu.dot_dimension_numbers<[1], [0], [0], [1], [0, 0, 1, 1], [], []>} : vector<8x128xbf16>, vector<128x512xbf16>, vector<8x512xf32> -> vector<8x512xf32>
    %559 = arith.addf %556, %558 : vector<8x512xf32>
    %560 = vector.broadcast %38 : vector<1x512xf32> to vector<8x512xf32>
    %561 = arith.addf %559, %560 : vector<8x512xf32>
    %562 = vector.extract_strided_slice %561 {offsets = [0, 0], sizes = [8, 128], strides = [1, 1]} : vector<8x512xf32> to vector<8x128xf32>
    %563 = arith.negf %562 : vector<8x128xf32>
    %564 = math.exp %563 : vector<8x128xf32>
    %cst_117 = arith.constant 1.000000e+00 : f32
    %565 = vector.broadcast %cst_117 : f32 to vector<8x128xf32>
    %566 = arith.addf %565, %564 : vector<8x128xf32>
    %567 = arith.divf %565, %566 : vector<8x128xf32>
    %568 = vector.extract_strided_slice %561 {offsets = [0, 128], sizes = [8, 128], strides = [1, 1]} : vector<8x512xf32> to vector<8x128xf32>
    %569 = arith.negf %568 : vector<8x128xf32>
    %570 = math.exp %569 : vector<8x128xf32>
    %cst_118 = arith.constant 1.000000e+00 : f32
    %571 = vector.broadcast %cst_118 : f32 to vector<8x128xf32>
    %572 = arith.addf %571, %570 : vector<8x128xf32>
    %573 = arith.divf %571, %572 : vector<8x128xf32>
    %574 = vector.extract_strided_slice %561 {offsets = [0, 256], sizes = [8, 128], strides = [1, 1]} : vector<8x512xf32> to vector<8x128xf32>
    %575 = math.tanh %574 : vector<8x128xf32>
    %576 = vector.extract_strided_slice %561 {offsets = [0, 384], sizes = [8, 128], strides = [1, 1]} : vector<8x512xf32> to vector<8x128xf32>
    %577 = arith.negf %576 : vector<8x128xf32>
    %578 = math.exp %577 : vector<8x128xf32>
    %cst_119 = arith.constant 1.000000e+00 : f32
    %579 = vector.broadcast %cst_119 : f32 to vector<8x128xf32>
    %580 = arith.addf %579, %578 : vector<8x128xf32>
    %581 = arith.divf %579, %580 : vector<8x128xf32>
    %582 = arith.mulf %573, %515 : vector<8x128xf32>
    %583 = arith.mulf %567, %575 : vector<8x128xf32>
    %584 = arith.addf %582, %583 : vector<8x128xf32>
    %585 = math.tanh %584 : vector<8x128xf32>
    %586 = arith.mulf %581, %585 : vector<8x128xf32>
    %587 = vector.broadcast %c7_i32 : i32 to vector<8x1xi32>
    %588 = arith.cmpi eq, %8, %587 : vector<8x1xi32>
    %589 = vector.shape_cast %588 : vector<8x1xi1> to vector<8x1xi1>
    %590 = vector.broadcast %589 : vector<8x1xi1> to vector<8x128xi1>
    %591 = arith.select %590, %586, %522 : vector<8x128xi1>, vector<8x128xf32>
    %c8_i32 = arith.constant 8 : i32
    %592 = arith.truncf %591 : vector<8x128xf32> to vector<8x128xbf16>
    %c0_120 = arith.constant 0 : index
    %c0_121 = arith.constant 0 : index
    %593 = vector.load %arg12[%c0_120, %c0_121] : memref<8x128xbf16, #tpu.memory_space<vmem>>, vector<8x128xbf16>
    tpu.vector_store %arg12[%c0_120, %c0_121], %592 {strides = array<i32>} : memref<8x128xbf16, #tpu.memory_space<vmem>>, vector<8x128xbf16>,
    return
  }
  func.func @transform_0(%arg0: i32) -> (i32, i32, i32) {
    %c0_i32 = arith.constant 0 : i32
    %c0_i32_0 = arith.constant 0 : i32
    %c0_i32_1 = arith.constant 0 : i32
    return %c0_i32, %arg0, %c0_i32_0 : i32, i32, i32
  }
  func.func @transform_1(%arg0: i32) -> (i32, i32) {
    %c0_i32 = arith.constant 0 : i32
    %c0_i32_0 = arith.constant 0 : i32
    %c0_i32_1 = arith.constant 0 : i32
    return %c0_i32, %c0_i32_0 : i32, i32
  }
  func.func @transform_2(%arg0: i32) -> (i32, i32) {
    %c0_i32 = arith.constant 0 : i32
    %c0_i32_0 = arith.constant 0 : i32
    %c0_i32_1 = arith.constant 0 : i32
    return %c0_i32, %c0_i32_0 : i32, i32
  }
  func.func @transform_3(%arg0: i32) -> (i32, i32) {
    %c0_i32 = arith.constant 0 : i32
    %c0_i32_0 = arith.constant 0 : i32
    %c0_i32_1 = arith.constant 0 : i32
    return %c0_i32, %c0_i32_0 : i32, i32
  }
  func.func @transform_4(%arg0: i32) -> (i32, i32) {
    %c0_i32 = arith.constant 0 : i32
    %c0_i32_0 = arith.constant 0 : i32
    %c0_i32_1 = arith.constant 0 : i32
    return %c0_i32, %c0_i32_0 : i32, i32
  }
  func.func @transform_5(%arg0: i32) -> (i32, i32) {
    %c0_i32 = arith.constant 0 : i32
    %c0_i32_0 = arith.constant 0 : i32
    %c0_i32_1 = arith.constant 0 : i32
    return %c0_i32, %c0_i32_0 : i32, i32
  }
  func.func @transform_6(%arg0: i32) -> (i32, i32) {
    %c0_i32 = arith.constant 0 : i32
    %c0_i32_0 = arith.constant 0 : i32
    %c0_i32_1 = arith.constant 0 : i32
    return %c0_i32, %c0_i32_0 : i32, i32
  }
  func.func @transform_7(%arg0: i32) -> (i32, i32) {
    %c0_i32 = arith.constant 0 : i32
    %c0_i32_0 = arith.constant 0 : i32
    %c0_i32_1 = arith.constant 0 : i32
    return %c0_i32, %c0_i32_0 : i32, i32
  }
  func.func @transform_8(%arg0: i32) -> (i32, i32) {
    %c0_i32 = arith.constant 0 : i32
    %c0_i32_0 = arith.constant 0 : i32
    %c0_i32_1 = arith.constant 0 : i32
    return %c0_i32, %c0_i32_0 : i32, i32
  }
  func.func @transform_9(%arg0: i32) -> (i32, i32) {
    %c0_i32 = arith.constant 0 : i32
    %c0_i32_0 = arith.constant 0 : i32
    %c0_i32_1 = arith.constant 0 : i32
    return %c0_i32, %c0_i32_0 : i32, i32
  }
  func.func @transform_10(%arg0: i32) -> (i32, i32) {
    %c0_i32 = arith.constant 0 : i32
    %c0_i32_0 = arith.constant 0 : i32
    %c0_i32_1 = arith.constant 0 : i32
    return %c0_i32, %c0_i32_0 : i32, i32
  }
  func.func @transform_11(%arg0: i32) -> (i32, i32) {
    %c0_i32 = arith.constant 0 : i32
    %c0_i32_0 = arith.constant 0 : i32
    return %arg0, %c0_i32 : i32, i32
  }
}

module attributes {stable_mosaic.version = 11 : i64} {
  func.func @_attn_head_kernel(%arg0: memref<8x128xbf16, #tpu.memory_space<vmem>>, %arg1: memref<2x8xbf16, #tpu.memory_space<vmem>>, %arg2: memref<2x8xf32, #tpu.memory_space<vmem>>, %arg3: memref<128x128xbf16, #tpu.memory_space<vmem>>, %arg4: memref<1x128xf32, #tpu.memory_space<vmem>>, %arg5: memref<128x256xbf16, #tpu.memory_space<vmem>>, %arg6: memref<1x256xf32, #tpu.memory_space<vmem>>, %arg7: memref<128x128xbf16, #tpu.memory_space<vmem>>, %arg8: memref<1x128xf32, #tpu.memory_space<vmem>>, %arg9: memref<128x128xbf16, #tpu.memory_space<vmem>>, %arg10: memref<1x128xf32, #tpu.memory_space<vmem>>, %arg11: memref<128x6xbf16, #tpu.memory_space<vmem>>, %arg12: memref<1x6xf32, #tpu.memory_space<vmem>>, %arg13: memref<6x128x128xbf16, #tpu.memory_space<vmem>>, %arg14: memref<6x1x128xf32, #tpu.memory_space<vmem>>, %arg15: memref<6x128x128xbf16, #tpu.memory_space<vmem>>, %arg16: memref<6x1x128xf32, #tpu.memory_space<vmem>>, %arg17: memref<6x128x64xbf16, #tpu.memory_space<vmem>>, %arg18: memref<6x1x64xf32, #tpu.memory_space<vmem>>, %arg19: memref<2x6xf32, #tpu.memory_space<vmem>>, %arg20: memref<6x2x64xf32, #tpu.memory_space<vmem>>) attributes {dimension_semantics = [], scalar_prefetch = 0 : i64, scratch_operands = 0 : i64, tpu.core_type = #tpu.core_type<tc>} {
    %c0 = arith.constant 0 : index
    %c0_0 = arith.constant 0 : index
    %0 = vector.load %arg0[%c0, %c0_0] : memref<8x128xbf16, #tpu.memory_space<vmem>>, vector<8x128xbf16>
    %c0_1 = arith.constant 0 : index
    %c0_2 = arith.constant 0 : index
    %1 = vector.load %arg5[%c0_1, %c0_2] : memref<128x256xbf16, #tpu.memory_space<vmem>>, vector<128x256xbf16>
    %cst = arith.constant dense<0.000000e+00> : vector<8x256xf32>
    %2 = tpu.matmul %0, %1, %cst {dimension_numbers = #tpu.dot_dimension_numbers<[1], [0], [0], [1], [0, 0, 1, 1], [], []>} : vector<8x128xbf16>, vector<128x256xbf16>, vector<8x256xf32> -> vector<8x256xf32>
    %c0_3 = arith.constant 0 : index
    %c0_4 = arith.constant 0 : index
    %3 = vector.load %arg6[%c0_3, %c0_4] : memref<1x256xf32, #tpu.memory_space<vmem>>, vector<1x256xf32>
    %4 = vector.broadcast %3 : vector<1x256xf32> to vector<8x256xf32>
    %5 = arith.addf %2, %4 : vector<8x256xf32>
    %6 = vector.extract_strided_slice %5 {offsets = [0, 0], sizes = [8, 128], strides = [1, 1]} : vector<8x256xf32> to vector<8x128xf32>
    %7 = vector.extract_strided_slice %5 {offsets = [0, 128], sizes = [8, 128], strides = [1, 1]} : vector<8x256xf32> to vector<8x128xf32>
    %c0_5 = arith.constant 0 : index
    %c0_6 = arith.constant 0 : index
    %8 = vector.load %arg1[%c0_5, %c0_6] : memref<2x8xbf16, #tpu.memory_space<vmem>>, vector<2x8xbf16>
    %cst_7 = arith.constant dense<0.000000e+00> : vector<2x128xf32>
    %9 = tpu.matmul %8, %0, %cst_7 {dimension_numbers = #tpu.dot_dimension_numbers<[1], [0], [0], [1], [0, 0, 1, 1], [], []>} : vector<2x8xbf16>, vector<8x128xbf16>, vector<2x128xf32> -> vector<2x128xf32>
    %10 = arith.truncf %9 : vector<2x128xf32> to vector<2x128xbf16>
    %c0_8 = arith.constant 0 : index
    %c0_9 = arith.constant 0 : index
    %11 = vector.load %arg3[%c0_8, %c0_9] : memref<128x128xbf16, #tpu.memory_space<vmem>>, vector<128x128xbf16>
    %cst_10 = arith.constant dense<0.000000e+00> : vector<2x128xf32>
    %12 = tpu.matmul %10, %11, %cst_10 {dimension_numbers = #tpu.dot_dimension_numbers<[1], [0], [0], [1], [0, 0, 1, 1], [], []>} : vector<2x128xbf16>, vector<128x128xbf16>, vector<2x128xf32> -> vector<2x128xf32>
    %c0_11 = arith.constant 0 : index
    %c0_12 = arith.constant 0 : index
    %13 = vector.load %arg4[%c0_11, %c0_12] : memref<1x128xf32, #tpu.memory_space<vmem>>, vector<1x128xf32>
    %14 = vector.broadcast %13 : vector<1x128xf32> to vector<2x128xf32>
    %15 = arith.addf %12, %14 : vector<2x128xf32>
    %c0_13 = arith.constant 0 : index
    %c0_14 = arith.constant 0 : index
    %16 = vector.load %arg7[%c0_13, %c0_14] : memref<128x128xbf16, #tpu.memory_space<vmem>>, vector<128x128xbf16>
    %c0_15 = arith.constant 0 : index
    %c0_16 = arith.constant 0 : index
    %17 = vector.load %arg2[%c0_15, %c0_16] : memref<2x8xf32, #tpu.memory_space<vmem>>, vector<2x8xf32>
    %cst_17 = arith.constant 0.000000e+00 : f32
    %18 = vector.broadcast %cst_17 : f32 to vector<2x8xf32>
    %19 = arith.cmpf ogt, %17, %18 : vector<2x8xf32>
    %cst_18 = arith.constant 0.000000e+00 : f32
    %20 = vector.broadcast %cst_18 : f32 to vector<2x128xf32>
    %21 = vector.extract_strided_slice %15 {offsets = [0, 0], sizes = [2, 16], strides = [1, 1]} : vector<2x128xf32> to vector<2x16xf32>
    %22 = arith.truncf %21 : vector<2x16xf32> to vector<2x16xbf16>
    %23 = vector.extract_strided_slice %6 {offsets = [0, 0], sizes = [8, 16], strides = [1, 1]} : vector<8x128xf32> to vector<8x16xf32>
    %24 = arith.truncf %23 : vector<8x16xf32> to vector<8x16xbf16>
    %25 = vector.extract_strided_slice %7 {offsets = [0, 0], sizes = [8, 16], strides = [1, 1]} : vector<8x128xf32> to vector<8x16xf32>
    %26 = arith.truncf %25 : vector<8x16xf32> to vector<8x16xbf16>
    %cst_19 = arith.constant dense<0.000000e+00> : vector<2x8xf32>
    %27 = tpu.matmul %22, %24, %cst_19 {dimension_numbers = #tpu.dot_dimension_numbers<[1], [1], [0], [0], [0, 0, 1, 0], [], []>} : vector<2x16xbf16>, vector<8x16xbf16>, vector<2x8xf32> -> vector<2x8xf32>
    %cst_20 = arith.constant 2.500000e-01 : f32
    %28 = vector.broadcast %cst_20 : f32 to vector<2x8xf32>
    %29 = arith.mulf %27, %28 : vector<2x8xf32>
    %cst_21 = arith.constant -1.000000e+30 : f32
    %30 = vector.broadcast %cst_21 : f32 to vector<2x8xf32>
    %31 = arith.select %19, %29, %30 : vector<2x8xi1>, vector<2x8xf32>
    %cst_22 = arith.constant dense<0xFF800000> : vector<2xf32>
    %32 = vector.multi_reduction <maximumf>, %31, %cst_22 [1] : vector<2x8xf32> to vector<2xf32>
    %33 = vector.shape_cast %32 : vector<2xf32> to vector<2x1xf32>
    %34 = vector.broadcast %33 : vector<2x1xf32> to vector<2x8xf32>
    %35 = arith.subf %31, %34 : vector<2x8xf32>
    %36 = math.exp %35 : vector<2x8xf32>
    %cst_23 = arith.constant dense<0.000000e+00> : vector<2xf32>
    %37 = vector.multi_reduction <add>, %36, %cst_23 [1] : vector<2x8xf32> to vector<2xf32>
    %38 = vector.shape_cast %37 : vector<2xf32> to vector<2x1xf32>
    %39 = tpu.reciprocal %38 {approx = true} : vector<2x1xf32> -> vector<2x1xf32>
    %40 = vector.broadcast %39 : vector<2x1xf32> to vector<2x8xf32>
    %41 = arith.mulf %36, %40 : vector<2x8xf32>
    %42 = arith.truncf %41 : vector<2x8xf32> to vector<2x8xbf16>
    %cst_24 = arith.constant dense<0.000000e+00> : vector<2x16xf32>
    %43 = tpu.matmul %42, %26, %cst_24 {dimension_numbers = #tpu.dot_dimension_numbers<[1], [0], [0], [1], [0, 0, 1, 1], [], []>} : vector<2x8xbf16>, vector<8x16xbf16>, vector<2x16xf32> -> vector<2x16xf32>
    %44 = arith.truncf %43 : vector<2x16xf32> to vector<2x16xbf16>
    %45 = vector.extract_strided_slice %16 {offsets = [0, 0], sizes = [16, 128], strides = [1, 1]} : vector<128x128xbf16> to vector<16x128xbf16>
    %cst_25 = arith.constant dense<0.000000e+00> : vector<2x128xf32>
    %46 = tpu.matmul %44, %45, %cst_25 {dimension_numbers = #tpu.dot_dimension_numbers<[1], [0], [0], [1], [0, 0, 1, 1], [], []>} : vector<2x16xbf16>, vector<16x128xbf16>, vector<2x128xf32> -> vector<2x128xf32>
    %47 = arith.addf %20, %46 : vector<2x128xf32>
    %48 = vector.extract_strided_slice %15 {offsets = [0, 16], sizes = [2, 16], strides = [1, 1]} : vector<2x128xf32> to vector<2x16xf32>
    %49 = arith.truncf %48 : vector<2x16xf32> to vector<2x16xbf16>
    %50 = vector.extract_strided_slice %6 {offsets = [0, 16], sizes = [8, 16], strides = [1, 1]} : vector<8x128xf32> to vector<8x16xf32>
    %51 = arith.truncf %50 : vector<8x16xf32> to vector<8x16xbf16>
    %52 = vector.extract_strided_slice %7 {offsets = [0, 16], sizes = [8, 16], strides = [1, 1]} : vector<8x128xf32> to vector<8x16xf32>
    %53 = arith.truncf %52 : vector<8x16xf32> to vector<8x16xbf16>
    %cst_26 = arith.constant dense<0.000000e+00> : vector<2x8xf32>
    %54 = tpu.matmul %49, %51, %cst_26 {dimension_numbers = #tpu.dot_dimension_numbers<[1], [1], [0], [0], [0, 0, 1, 0], [], []>} : vector<2x16xbf16>, vector<8x16xbf16>, vector<2x8xf32> -> vector<2x8xf32>
    %cst_27 = arith.constant 2.500000e-01 : f32
    %55 = vector.broadcast %cst_27 : f32 to vector<2x8xf32>
    %56 = arith.mulf %54, %55 : vector<2x8xf32>
    %cst_28 = arith.constant -1.000000e+30 : f32
    %57 = vector.broadcast %cst_28 : f32 to vector<2x8xf32>
    %58 = arith.select %19, %56, %57 : vector<2x8xi1>, vector<2x8xf32>
    %cst_29 = arith.constant dense<0xFF800000> : vector<2xf32>
    %59 = vector.multi_reduction <maximumf>, %58, %cst_29 [1] : vector<2x8xf32> to vector<2xf32>
    %60 = vector.shape_cast %59 : vector<2xf32> to vector<2x1xf32>
    %61 = vector.broadcast %60 : vector<2x1xf32> to vector<2x8xf32>
    %62 = arith.subf %58, %61 : vector<2x8xf32>
    %63 = math.exp %62 : vector<2x8xf32>
    %cst_30 = arith.constant dense<0.000000e+00> : vector<2xf32>
    %64 = vector.multi_reduction <add>, %63, %cst_30 [1] : vector<2x8xf32> to vector<2xf32>
    %65 = vector.shape_cast %64 : vector<2xf32> to vector<2x1xf32>
    %66 = tpu.reciprocal %65 {approx = true} : vector<2x1xf32> -> vector<2x1xf32>
    %67 = vector.broadcast %66 : vector<2x1xf32> to vector<2x8xf32>
    %68 = arith.mulf %63, %67 : vector<2x8xf32>
    %69 = arith.truncf %68 : vector<2x8xf32> to vector<2x8xbf16>
    %cst_31 = arith.constant dense<0.000000e+00> : vector<2x16xf32>
    %70 = tpu.matmul %69, %53, %cst_31 {dimension_numbers = #tpu.dot_dimension_numbers<[1], [0], [0], [1], [0, 0, 1, 1], [], []>} : vector<2x8xbf16>, vector<8x16xbf16>, vector<2x16xf32> -> vector<2x16xf32>
    %71 = arith.truncf %70 : vector<2x16xf32> to vector<2x16xbf16>
    %72 = vector.extract_strided_slice %16 {offsets = [16, 0], sizes = [16, 128], strides = [1, 1]} : vector<128x128xbf16> to vector<16x128xbf16>
    %cst_32 = arith.constant dense<0.000000e+00> : vector<2x128xf32>
    %73 = tpu.matmul %71, %72, %cst_32 {dimension_numbers = #tpu.dot_dimension_numbers<[1], [0], [0], [1], [0, 0, 1, 1], [], []>} : vector<2x16xbf16>, vector<16x128xbf16>, vector<2x128xf32> -> vector<2x128xf32>
    %74 = arith.addf %47, %73 : vector<2x128xf32>
    %75 = vector.extract_strided_slice %15 {offsets = [0, 32], sizes = [2, 16], strides = [1, 1]} : vector<2x128xf32> to vector<2x16xf32>
    %76 = arith.truncf %75 : vector<2x16xf32> to vector<2x16xbf16>
    %77 = vector.extract_strided_slice %6 {offsets = [0, 32], sizes = [8, 16], strides = [1, 1]} : vector<8x128xf32> to vector<8x16xf32>
    %78 = arith.truncf %77 : vector<8x16xf32> to vector<8x16xbf16>
    %79 = vector.extract_strided_slice %7 {offsets = [0, 32], sizes = [8, 16], strides = [1, 1]} : vector<8x128xf32> to vector<8x16xf32>
    %80 = arith.truncf %79 : vector<8x16xf32> to vector<8x16xbf16>
    %cst_33 = arith.constant dense<0.000000e+00> : vector<2x8xf32>
    %81 = tpu.matmul %76, %78, %cst_33 {dimension_numbers = #tpu.dot_dimension_numbers<[1], [1], [0], [0], [0, 0, 1, 0], [], []>} : vector<2x16xbf16>, vector<8x16xbf16>, vector<2x8xf32> -> vector<2x8xf32>
    %cst_34 = arith.constant 2.500000e-01 : f32
    %82 = vector.broadcast %cst_34 : f32 to vector<2x8xf32>
    %83 = arith.mulf %81, %82 : vector<2x8xf32>
    %cst_35 = arith.constant -1.000000e+30 : f32
    %84 = vector.broadcast %cst_35 : f32 to vector<2x8xf32>
    %85 = arith.select %19, %83, %84 : vector<2x8xi1>, vector<2x8xf32>
    %cst_36 = arith.constant dense<0xFF800000> : vector<2xf32>
    %86 = vector.multi_reduction <maximumf>, %85, %cst_36 [1] : vector<2x8xf32> to vector<2xf32>
    %87 = vector.shape_cast %86 : vector<2xf32> to vector<2x1xf32>
    %88 = vector.broadcast %87 : vector<2x1xf32> to vector<2x8xf32>
    %89 = arith.subf %85, %88 : vector<2x8xf32>
    %90 = math.exp %89 : vector<2x8xf32>
    %cst_37 = arith.constant dense<0.000000e+00> : vector<2xf32>
    %91 = vector.multi_reduction <add>, %90, %cst_37 [1] : vector<2x8xf32> to vector<2xf32>
    %92 = vector.shape_cast %91 : vector<2xf32> to vector<2x1xf32>
    %93 = tpu.reciprocal %92 {approx = true} : vector<2x1xf32> -> vector<2x1xf32>
    %94 = vector.broadcast %93 : vector<2x1xf32> to vector<2x8xf32>
    %95 = arith.mulf %90, %94 : vector<2x8xf32>
    %96 = arith.truncf %95 : vector<2x8xf32> to vector<2x8xbf16>
    %cst_38 = arith.constant dense<0.000000e+00> : vector<2x16xf32>
    %97 = tpu.matmul %96, %80, %cst_38 {dimension_numbers = #tpu.dot_dimension_numbers<[1], [0], [0], [1], [0, 0, 1, 1], [], []>} : vector<2x8xbf16>, vector<8x16xbf16>, vector<2x16xf32> -> vector<2x16xf32>
    %98 = arith.truncf %97 : vector<2x16xf32> to vector<2x16xbf16>
    %99 = vector.extract_strided_slice %16 {offsets = [32, 0], sizes = [16, 128], strides = [1, 1]} : vector<128x128xbf16> to vector<16x128xbf16>
    %cst_39 = arith.constant dense<0.000000e+00> : vector<2x128xf32>
    %100 = tpu.matmul %98, %99, %cst_39 {dimension_numbers = #tpu.dot_dimension_numbers<[1], [0], [0], [1], [0, 0, 1, 1], [], []>} : vector<2x16xbf16>, vector<16x128xbf16>, vector<2x128xf32> -> vector<2x128xf32>
    %101 = arith.addf %74, %100 : vector<2x128xf32>
    %102 = vector.extract_strided_slice %15 {offsets = [0, 48], sizes = [2, 16], strides = [1, 1]} : vector<2x128xf32> to vector<2x16xf32>
    %103 = arith.truncf %102 : vector<2x16xf32> to vector<2x16xbf16>
    %104 = vector.extract_strided_slice %6 {offsets = [0, 48], sizes = [8, 16], strides = [1, 1]} : vector<8x128xf32> to vector<8x16xf32>
    %105 = arith.truncf %104 : vector<8x16xf32> to vector<8x16xbf16>
    %106 = vector.extract_strided_slice %7 {offsets = [0, 48], sizes = [8, 16], strides = [1, 1]} : vector<8x128xf32> to vector<8x16xf32>
    %107 = arith.truncf %106 : vector<8x16xf32> to vector<8x16xbf16>
    %cst_40 = arith.constant dense<0.000000e+00> : vector<2x8xf32>
    %108 = tpu.matmul %103, %105, %cst_40 {dimension_numbers = #tpu.dot_dimension_numbers<[1], [1], [0], [0], [0, 0, 1, 0], [], []>} : vector<2x16xbf16>, vector<8x16xbf16>, vector<2x8xf32> -> vector<2x8xf32>
    %cst_41 = arith.constant 2.500000e-01 : f32
    %109 = vector.broadcast %cst_41 : f32 to vector<2x8xf32>
    %110 = arith.mulf %108, %109 : vector<2x8xf32>
    %cst_42 = arith.constant -1.000000e+30 : f32
    %111 = vector.broadcast %cst_42 : f32 to vector<2x8xf32>
    %112 = arith.select %19, %110, %111 : vector<2x8xi1>, vector<2x8xf32>
    %cst_43 = arith.constant dense<0xFF800000> : vector<2xf32>
    %113 = vector.multi_reduction <maximumf>, %112, %cst_43 [1] : vector<2x8xf32> to vector<2xf32>
    %114 = vector.shape_cast %113 : vector<2xf32> to vector<2x1xf32>
    %115 = vector.broadcast %114 : vector<2x1xf32> to vector<2x8xf32>
    %116 = arith.subf %112, %115 : vector<2x8xf32>
    %117 = math.exp %116 : vector<2x8xf32>
    %cst_44 = arith.constant dense<0.000000e+00> : vector<2xf32>
    %118 = vector.multi_reduction <add>, %117, %cst_44 [1] : vector<2x8xf32> to vector<2xf32>
    %119 = vector.shape_cast %118 : vector<2xf32> to vector<2x1xf32>
    %120 = tpu.reciprocal %119 {approx = true} : vector<2x1xf32> -> vector<2x1xf32>
    %121 = vector.broadcast %120 : vector<2x1xf32> to vector<2x8xf32>
    %122 = arith.mulf %117, %121 : vector<2x8xf32>
    %123 = arith.truncf %122 : vector<2x8xf32> to vector<2x8xbf16>
    %cst_45 = arith.constant dense<0.000000e+00> : vector<2x16xf32>
    %124 = tpu.matmul %123, %107, %cst_45 {dimension_numbers = #tpu.dot_dimension_numbers<[1], [0], [0], [1], [0, 0, 1, 1], [], []>} : vector<2x8xbf16>, vector<8x16xbf16>, vector<2x16xf32> -> vector<2x16xf32>
    %125 = arith.truncf %124 : vector<2x16xf32> to vector<2x16xbf16>
    %126 = vector.extract_strided_slice %16 {offsets = [48, 0], sizes = [16, 128], strides = [1, 1]} : vector<128x128xbf16> to vector<16x128xbf16>
    %cst_46 = arith.constant dense<0.000000e+00> : vector<2x128xf32>
    %127 = tpu.matmul %125, %126, %cst_46 {dimension_numbers = #tpu.dot_dimension_numbers<[1], [0], [0], [1], [0, 0, 1, 1], [], []>} : vector<2x16xbf16>, vector<16x128xbf16>, vector<2x128xf32> -> vector<2x128xf32>
    %128 = arith.addf %101, %127 : vector<2x128xf32>
    %129 = vector.extract_strided_slice %15 {offsets = [0, 64], sizes = [2, 16], strides = [1, 1]} : vector<2x128xf32> to vector<2x16xf32>
    %130 = arith.truncf %129 : vector<2x16xf32> to vector<2x16xbf16>
    %131 = vector.extract_strided_slice %6 {offsets = [0, 64], sizes = [8, 16], strides = [1, 1]} : vector<8x128xf32> to vector<8x16xf32>
    %132 = arith.truncf %131 : vector<8x16xf32> to vector<8x16xbf16>
    %133 = vector.extract_strided_slice %7 {offsets = [0, 64], sizes = [8, 16], strides = [1, 1]} : vector<8x128xf32> to vector<8x16xf32>
    %134 = arith.truncf %133 : vector<8x16xf32> to vector<8x16xbf16>
    %cst_47 = arith.constant dense<0.000000e+00> : vector<2x8xf32>
    %135 = tpu.matmul %130, %132, %cst_47 {dimension_numbers = #tpu.dot_dimension_numbers<[1], [1], [0], [0], [0, 0, 1, 0], [], []>} : vector<2x16xbf16>, vector<8x16xbf16>, vector<2x8xf32> -> vector<2x8xf32>
    %cst_48 = arith.constant 2.500000e-01 : f32
    %136 = vector.broadcast %cst_48 : f32 to vector<2x8xf32>
    %137 = arith.mulf %135, %136 : vector<2x8xf32>
    %cst_49 = arith.constant -1.000000e+30 : f32
    %138 = vector.broadcast %cst_49 : f32 to vector<2x8xf32>
    %139 = arith.select %19, %137, %138 : vector<2x8xi1>, vector<2x8xf32>
    %cst_50 = arith.constant dense<0xFF800000> : vector<2xf32>
    %140 = vector.multi_reduction <maximumf>, %139, %cst_50 [1] : vector<2x8xf32> to vector<2xf32>
    %141 = vector.shape_cast %140 : vector<2xf32> to vector<2x1xf32>
    %142 = vector.broadcast %141 : vector<2x1xf32> to vector<2x8xf32>
    %143 = arith.subf %139, %142 : vector<2x8xf32>
    %144 = math.exp %143 : vector<2x8xf32>
    %cst_51 = arith.constant dense<0.000000e+00> : vector<2xf32>
    %145 = vector.multi_reduction <add>, %144, %cst_51 [1] : vector<2x8xf32> to vector<2xf32>
    %146 = vector.shape_cast %145 : vector<2xf32> to vector<2x1xf32>
    %147 = tpu.reciprocal %146 {approx = true} : vector<2x1xf32> -> vector<2x1xf32>
    %148 = vector.broadcast %147 : vector<2x1xf32> to vector<2x8xf32>
    %149 = arith.mulf %144, %148 : vector<2x8xf32>
    %150 = arith.truncf %149 : vector<2x8xf32> to vector<2x8xbf16>
    %cst_52 = arith.constant dense<0.000000e+00> : vector<2x16xf32>
    %151 = tpu.matmul %150, %134, %cst_52 {dimension_numbers = #tpu.dot_dimension_numbers<[1], [0], [0], [1], [0, 0, 1, 1], [], []>} : vector<2x8xbf16>, vector<8x16xbf16>, vector<2x16xf32> -> vector<2x16xf32>
    %152 = arith.truncf %151 : vector<2x16xf32> to vector<2x16xbf16>
    %153 = vector.extract_strided_slice %16 {offsets = [64, 0], sizes = [16, 128], strides = [1, 1]} : vector<128x128xbf16> to vector<16x128xbf16>
    %cst_53 = arith.constant dense<0.000000e+00> : vector<2x128xf32>
    %154 = tpu.matmul %152, %153, %cst_53 {dimension_numbers = #tpu.dot_dimension_numbers<[1], [0], [0], [1], [0, 0, 1, 1], [], []>} : vector<2x16xbf16>, vector<16x128xbf16>, vector<2x128xf32> -> vector<2x128xf32>
    %155 = arith.addf %128, %154 : vector<2x128xf32>
    %156 = vector.extract_strided_slice %15 {offsets = [0, 80], sizes = [2, 16], strides = [1, 1]} : vector<2x128xf32> to vector<2x16xf32>
    %157 = arith.truncf %156 : vector<2x16xf32> to vector<2x16xbf16>
    %158 = vector.extract_strided_slice %6 {offsets = [0, 80], sizes = [8, 16], strides = [1, 1]} : vector<8x128xf32> to vector<8x16xf32>
    %159 = arith.truncf %158 : vector<8x16xf32> to vector<8x16xbf16>
    %160 = vector.extract_strided_slice %7 {offsets = [0, 80], sizes = [8, 16], strides = [1, 1]} : vector<8x128xf32> to vector<8x16xf32>
    %161 = arith.truncf %160 : vector<8x16xf32> to vector<8x16xbf16>
    %cst_54 = arith.constant dense<0.000000e+00> : vector<2x8xf32>
    %162 = tpu.matmul %157, %159, %cst_54 {dimension_numbers = #tpu.dot_dimension_numbers<[1], [1], [0], [0], [0, 0, 1, 0], [], []>} : vector<2x16xbf16>, vector<8x16xbf16>, vector<2x8xf32> -> vector<2x8xf32>
    %cst_55 = arith.constant 2.500000e-01 : f32
    %163 = vector.broadcast %cst_55 : f32 to vector<2x8xf32>
    %164 = arith.mulf %162, %163 : vector<2x8xf32>
    %cst_56 = arith.constant -1.000000e+30 : f32
    %165 = vector.broadcast %cst_56 : f32 to vector<2x8xf32>
    %166 = arith.select %19, %164, %165 : vector<2x8xi1>, vector<2x8xf32>
    %cst_57 = arith.constant dense<0xFF800000> : vector<2xf32>
    %167 = vector.multi_reduction <maximumf>, %166, %cst_57 [1] : vector<2x8xf32> to vector<2xf32>
    %168 = vector.shape_cast %167 : vector<2xf32> to vector<2x1xf32>
    %169 = vector.broadcast %168 : vector<2x1xf32> to vector<2x8xf32>
    %170 = arith.subf %166, %169 : vector<2x8xf32>
    %171 = math.exp %170 : vector<2x8xf32>
    %cst_58 = arith.constant dense<0.000000e+00> : vector<2xf32>
    %172 = vector.multi_reduction <add>, %171, %cst_58 [1] : vector<2x8xf32> to vector<2xf32>
    %173 = vector.shape_cast %172 : vector<2xf32> to vector<2x1xf32>
    %174 = tpu.reciprocal %173 {approx = true} : vector<2x1xf32> -> vector<2x1xf32>
    %175 = vector.broadcast %174 : vector<2x1xf32> to vector<2x8xf32>
    %176 = arith.mulf %171, %175 : vector<2x8xf32>
    %177 = arith.truncf %176 : vector<2x8xf32> to vector<2x8xbf16>
    %cst_59 = arith.constant dense<0.000000e+00> : vector<2x16xf32>
    %178 = tpu.matmul %177, %161, %cst_59 {dimension_numbers = #tpu.dot_dimension_numbers<[1], [0], [0], [1], [0, 0, 1, 1], [], []>} : vector<2x8xbf16>, vector<8x16xbf16>, vector<2x16xf32> -> vector<2x16xf32>
    %179 = arith.truncf %178 : vector<2x16xf32> to vector<2x16xbf16>
    %180 = vector.extract_strided_slice %16 {offsets = [80, 0], sizes = [16, 128], strides = [1, 1]} : vector<128x128xbf16> to vector<16x128xbf16>
    %cst_60 = arith.constant dense<0.000000e+00> : vector<2x128xf32>
    %181 = tpu.matmul %179, %180, %cst_60 {dimension_numbers = #tpu.dot_dimension_numbers<[1], [0], [0], [1], [0, 0, 1, 1], [], []>} : vector<2x16xbf16>, vector<16x128xbf16>, vector<2x128xf32> -> vector<2x128xf32>
    %182 = arith.addf %155, %181 : vector<2x128xf32>
    %183 = vector.extract_strided_slice %15 {offsets = [0, 96], sizes = [2, 16], strides = [1, 1]} : vector<2x128xf32> to vector<2x16xf32>
    %184 = arith.truncf %183 : vector<2x16xf32> to vector<2x16xbf16>
    %185 = vector.extract_strided_slice %6 {offsets = [0, 96], sizes = [8, 16], strides = [1, 1]} : vector<8x128xf32> to vector<8x16xf32>
    %186 = arith.truncf %185 : vector<8x16xf32> to vector<8x16xbf16>
    %187 = vector.extract_strided_slice %7 {offsets = [0, 96], sizes = [8, 16], strides = [1, 1]} : vector<8x128xf32> to vector<8x16xf32>
    %188 = arith.truncf %187 : vector<8x16xf32> to vector<8x16xbf16>
    %cst_61 = arith.constant dense<0.000000e+00> : vector<2x8xf32>
    %189 = tpu.matmul %184, %186, %cst_61 {dimension_numbers = #tpu.dot_dimension_numbers<[1], [1], [0], [0], [0, 0, 1, 0], [], []>} : vector<2x16xbf16>, vector<8x16xbf16>, vector<2x8xf32> -> vector<2x8xf32>
    %cst_62 = arith.constant 2.500000e-01 : f32
    %190 = vector.broadcast %cst_62 : f32 to vector<2x8xf32>
    %191 = arith.mulf %189, %190 : vector<2x8xf32>
    %cst_63 = arith.constant -1.000000e+30 : f32
    %192 = vector.broadcast %cst_63 : f32 to vector<2x8xf32>
    %193 = arith.select %19, %191, %192 : vector<2x8xi1>, vector<2x8xf32>
    %cst_64 = arith.constant dense<0xFF800000> : vector<2xf32>
    %194 = vector.multi_reduction <maximumf>, %193, %cst_64 [1] : vector<2x8xf32> to vector<2xf32>
    %195 = vector.shape_cast %194 : vector<2xf32> to vector<2x1xf32>
    %196 = vector.broadcast %195 : vector<2x1xf32> to vector<2x8xf32>
    %197 = arith.subf %193, %196 : vector<2x8xf32>
    %198 = math.exp %197 : vector<2x8xf32>
    %cst_65 = arith.constant dense<0.000000e+00> : vector<2xf32>
    %199 = vector.multi_reduction <add>, %198, %cst_65 [1] : vector<2x8xf32> to vector<2xf32>
    %200 = vector.shape_cast %199 : vector<2xf32> to vector<2x1xf32>
    %201 = tpu.reciprocal %200 {approx = true} : vector<2x1xf32> -> vector<2x1xf32>
    %202 = vector.broadcast %201 : vector<2x1xf32> to vector<2x8xf32>
    %203 = arith.mulf %198, %202 : vector<2x8xf32>
    %204 = arith.truncf %203 : vector<2x8xf32> to vector<2x8xbf16>
    %cst_66 = arith.constant dense<0.000000e+00> : vector<2x16xf32>
    %205 = tpu.matmul %204, %188, %cst_66 {dimension_numbers = #tpu.dot_dimension_numbers<[1], [0], [0], [1], [0, 0, 1, 1], [], []>} : vector<2x8xbf16>, vector<8x16xbf16>, vector<2x16xf32> -> vector<2x16xf32>
    %206 = arith.truncf %205 : vector<2x16xf32> to vector<2x16xbf16>
    %207 = vector.extract_strided_slice %16 {offsets = [96, 0], sizes = [16, 128], strides = [1, 1]} : vector<128x128xbf16> to vector<16x128xbf16>
    %cst_67 = arith.constant dense<0.000000e+00> : vector<2x128xf32>
    %208 = tpu.matmul %206, %207, %cst_67 {dimension_numbers = #tpu.dot_dimension_numbers<[1], [0], [0], [1], [0, 0, 1, 1], [], []>} : vector<2x16xbf16>, vector<16x128xbf16>, vector<2x128xf32> -> vector<2x128xf32>
    %209 = arith.addf %182, %208 : vector<2x128xf32>
    %210 = vector.extract_strided_slice %15 {offsets = [0, 112], sizes = [2, 16], strides = [1, 1]} : vector<2x128xf32> to vector<2x16xf32>
    %211 = arith.truncf %210 : vector<2x16xf32> to vector<2x16xbf16>
    %212 = vector.extract_strided_slice %6 {offsets = [0, 112], sizes = [8, 16], strides = [1, 1]} : vector<8x128xf32> to vector<8x16xf32>
    %213 = arith.truncf %212 : vector<8x16xf32> to vector<8x16xbf16>
    %214 = vector.extract_strided_slice %7 {offsets = [0, 112], sizes = [8, 16], strides = [1, 1]} : vector<8x128xf32> to vector<8x16xf32>
    %215 = arith.truncf %214 : vector<8x16xf32> to vector<8x16xbf16>
    %cst_68 = arith.constant dense<0.000000e+00> : vector<2x8xf32>
    %216 = tpu.matmul %211, %213, %cst_68 {dimension_numbers = #tpu.dot_dimension_numbers<[1], [1], [0], [0], [0, 0, 1, 0], [], []>} : vector<2x16xbf16>, vector<8x16xbf16>, vector<2x8xf32> -> vector<2x8xf32>
    %cst_69 = arith.constant 2.500000e-01 : f32
    %217 = vector.broadcast %cst_69 : f32 to vector<2x8xf32>
    %218 = arith.mulf %216, %217 : vector<2x8xf32>
    %cst_70 = arith.constant -1.000000e+30 : f32
    %219 = vector.broadcast %cst_70 : f32 to vector<2x8xf32>
    %220 = arith.select %19, %218, %219 : vector<2x8xi1>, vector<2x8xf32>
    %cst_71 = arith.constant dense<0xFF800000> : vector<2xf32>
    %221 = vector.multi_reduction <maximumf>, %220, %cst_71 [1] : vector<2x8xf32> to vector<2xf32>
    %222 = vector.shape_cast %221 : vector<2xf32> to vector<2x1xf32>
    %223 = vector.broadcast %222 : vector<2x1xf32> to vector<2x8xf32>
    %224 = arith.subf %220, %223 : vector<2x8xf32>
    %225 = math.exp %224 : vector<2x8xf32>
    %cst_72 = arith.constant dense<0.000000e+00> : vector<2xf32>
    %226 = vector.multi_reduction <add>, %225, %cst_72 [1] : vector<2x8xf32> to vector<2xf32>
    %227 = vector.shape_cast %226 : vector<2xf32> to vector<2x1xf32>
    %228 = tpu.reciprocal %227 {approx = true} : vector<2x1xf32> -> vector<2x1xf32>
    %229 = vector.broadcast %228 : vector<2x1xf32> to vector<2x8xf32>
    %230 = arith.mulf %225, %229 : vector<2x8xf32>
    %231 = arith.truncf %230 : vector<2x8xf32> to vector<2x8xbf16>
    %cst_73 = arith.constant dense<0.000000e+00> : vector<2x16xf32>
    %232 = tpu.matmul %231, %215, %cst_73 {dimension_numbers = #tpu.dot_dimension_numbers<[1], [0], [0], [1], [0, 0, 1, 1], [], []>} : vector<2x8xbf16>, vector<8x16xbf16>, vector<2x16xf32> -> vector<2x16xf32>
    %233 = arith.truncf %232 : vector<2x16xf32> to vector<2x16xbf16>
    %234 = vector.extract_strided_slice %16 {offsets = [112, 0], sizes = [16, 128], strides = [1, 1]} : vector<128x128xbf16> to vector<16x128xbf16>
    %cst_74 = arith.constant dense<0.000000e+00> : vector<2x128xf32>
    %235 = tpu.matmul %233, %234, %cst_74 {dimension_numbers = #tpu.dot_dimension_numbers<[1], [0], [0], [1], [0, 0, 1, 1], [], []>} : vector<2x16xbf16>, vector<16x128xbf16>, vector<2x128xf32> -> vector<2x128xf32>
    %236 = arith.addf %209, %235 : vector<2x128xf32>
    %c0_75 = arith.constant 0 : index
    %c0_76 = arith.constant 0 : index
    %237 = vector.load %arg8[%c0_75, %c0_76] : memref<1x128xf32, #tpu.memory_space<vmem>>, vector<1x128xf32>
    %238 = vector.broadcast %237 : vector<1x128xf32> to vector<2x128xf32>
    %239 = arith.addf %236, %238 : vector<2x128xf32>
    %240 = arith.truncf %239 : vector<2x128xf32> to vector<2x128xbf16>
    %c0_77 = arith.constant 0 : index
    %c0_78 = arith.constant 0 : index
    %241 = vector.load %arg9[%c0_77, %c0_78] : memref<128x128xbf16, #tpu.memory_space<vmem>>, vector<128x128xbf16>
    %cst_79 = arith.constant dense<0.000000e+00> : vector<2x128xf32>
    %242 = tpu.matmul %240, %241, %cst_79 {dimension_numbers = #tpu.dot_dimension_numbers<[1], [0], [0], [1], [0, 0, 1, 1], [], []>} : vector<2x128xbf16>, vector<128x128xbf16>, vector<2x128xf32> -> vector<2x128xf32>
    %c0_80 = arith.constant 0 : index
    %c0_81 = arith.constant 0 : index
    %243 = vector.load %arg10[%c0_80, %c0_81] : memref<1x128xf32, #tpu.memory_space<vmem>>, vector<1x128xf32>
    %244 = vector.broadcast %243 : vector<1x128xf32> to vector<2x128xf32>
    %245 = arith.addf %242, %244 : vector<2x128xf32>
    %cst_82 = arith.constant 0.000000e+00 : f32
    %246 = vector.broadcast %cst_82 : f32 to vector<2x128xf32>
    %247 = arith.maximumf %245, %246 : vector<2x128xf32>
    %248 = arith.truncf %247 : vector<2x128xf32> to vector<2x128xbf16>
    %c0_83 = arith.constant 0 : index
    %c0_84 = arith.constant 0 : index
    %249 = vector.load %arg11[%c0_83, %c0_84] : memref<128x6xbf16, #tpu.memory_space<vmem>>, vector<128x6xbf16>
    %cst_85 = arith.constant dense<0.000000e+00> : vector<2x6xf32>
    %250 = tpu.matmul %248, %249, %cst_85 {dimension_numbers = #tpu.dot_dimension_numbers<[1], [0], [0], [1], [0, 0, 1, 1], [], []>} : vector<2x128xbf16>, vector<128x6xbf16>, vector<2x6xf32> -> vector<2x6xf32>
    %c0_86 = arith.constant 0 : index
    %c0_87 = arith.constant 0 : index
    %251 = vector.load %arg12[%c0_86, %c0_87] : memref<1x6xf32, #tpu.memory_space<vmem>>, vector<1x6xf32>
    %252 = vector.broadcast %251 : vector<1x6xf32> to vector<2x6xf32>
    %253 = arith.addf %250, %252 : vector<2x6xf32>
    %cst_88 = arith.constant dense<0xFF800000> : vector<2xf32>
    %254 = vector.multi_reduction <maximumf>, %253, %cst_88 [1] : vector<2x6xf32> to vector<2xf32>
    %255 = vector.shape_cast %254 : vector<2xf32> to vector<2x1xf32>
    %256 = vector.broadcast %255 : vector<2x1xf32> to vector<2x6xf32>
    %257 = arith.subf %253, %256 : vector<2x6xf32>
    %258 = math.exp %257 : vector<2x6xf32>
    %cst_89 = arith.constant dense<0.000000e+00> : vector<2xf32>
    %259 = vector.multi_reduction <add>, %258, %cst_89 [1] : vector<2x6xf32> to vector<2xf32>
    %260 = vector.shape_cast %259 : vector<2xf32> to vector<2x1xf32>
    %261 = vector.broadcast %260 : vector<2x1xf32> to vector<2x6xf32>
    %262 = arith.divf %258, %261 : vector<2x6xf32>
    %c0_90 = arith.constant 0 : index
    %c0_91 = arith.constant 0 : index
    %263 = vector.load %arg19[%c0_90, %c0_91] : memref<2x6xf32, #tpu.memory_space<vmem>>, vector<2x6xf32>
    tpu.vector_store %arg19[%c0_90, %c0_91], %262 {strides = array<i32>} : memref<2x6xf32, #tpu.memory_space<vmem>>, vector<2x6xf32>,
    %264 = vector.shape_cast %240 : vector<2x128xbf16> to vector<1x2x128xbf16>
    %265 = vector.broadcast %264 : vector<1x2x128xbf16> to vector<6x2x128xbf16>
    %c0_92 = arith.constant 0 : index
    %c0_93 = arith.constant 0 : index
    %c0_94 = arith.constant 0 : index
    %266 = vector.load %arg13[%c0_92, %c0_93, %c0_94] : memref<6x128x128xbf16, #tpu.memory_space<vmem>>, vector<6x128x128xbf16>
    %cst_95 = arith.constant dense<0.000000e+00> : vector<6x2x128xf32>
    %267 = tpu.matmul %265, %266, %cst_95 {dimension_numbers = #tpu.dot_dimension_numbers<[2], [1], [1], [2], [0, 0, 0, 1, 1, 2], [0], [0]>} : vector<6x2x128xbf16>, vector<6x128x128xbf16>, vector<6x2x128xf32> -> vector<6x2x128xf32>
    %c0_96 = arith.constant 0 : index
    %c0_97 = arith.constant 0 : index
    %c0_98 = arith.constant 0 : index
    %268 = vector.load %arg14[%c0_96, %c0_97, %c0_98] : memref<6x1x128xf32, #tpu.memory_space<vmem>>, vector<6x1x128xf32>
    %269 = vector.broadcast %268 : vector<6x1x128xf32> to vector<6x2x128xf32>
    %270 = arith.addf %267, %269 : vector<6x2x128xf32>
    %cst_99 = arith.constant 0.000000e+00 : f32
    %271 = vector.broadcast %cst_99 : f32 to vector<6x2x128xf32>
    %272 = arith.maximumf %270, %271 : vector<6x2x128xf32>
    %273 = arith.truncf %272 : vector<6x2x128xf32> to vector<6x2x128xbf16>
    %c0_100 = arith.constant 0 : index
    %c0_101 = arith.constant 0 : index
    %c0_102 = arith.constant 0 : index
    %274 = vector.load %arg15[%c0_100, %c0_101, %c0_102] : memref<6x128x128xbf16, #tpu.memory_space<vmem>>, vector<6x128x128xbf16>
    %cst_103 = arith.constant dense<0.000000e+00> : vector<6x2x128xf32>
    %275 = tpu.matmul %273, %274, %cst_103 {dimension_numbers = #tpu.dot_dimension_numbers<[2], [1], [1], [2], [0, 0, 0, 1, 1, 2], [0], [0]>} : vector<6x2x128xbf16>, vector<6x128x128xbf16>, vector<6x2x128xf32> -> vector<6x2x128xf32>
    %c0_104 = arith.constant 0 : index
    %c0_105 = arith.constant 0 : index
    %c0_106 = arith.constant 0 : index
    %276 = vector.load %arg16[%c0_104, %c0_105, %c0_106] : memref<6x1x128xf32, #tpu.memory_space<vmem>>, vector<6x1x128xf32>
    %277 = vector.broadcast %276 : vector<6x1x128xf32> to vector<6x2x128xf32>
    %278 = arith.addf %275, %277 : vector<6x2x128xf32>
    %cst_107 = arith.constant 0.000000e+00 : f32
    %279 = vector.broadcast %cst_107 : f32 to vector<6x2x128xf32>
    %280 = arith.maximumf %278, %279 : vector<6x2x128xf32>
    %281 = arith.truncf %280 : vector<6x2x128xf32> to vector<6x2x128xbf16>
    %c0_108 = arith.constant 0 : index
    %c0_109 = arith.constant 0 : index
    %c0_110 = arith.constant 0 : index
    %282 = vector.load %arg17[%c0_108, %c0_109, %c0_110] : memref<6x128x64xbf16, #tpu.memory_space<vmem>>, vector<6x128x64xbf16>
    %cst_111 = arith.constant dense<0.000000e+00> : vector<6x2x64xf32>
    %283 = tpu.matmul %281, %282, %cst_111 {dimension_numbers = #tpu.dot_dimension_numbers<[2], [1], [1], [2], [0, 0, 0, 1, 1, 2], [0], [0]>} : vector<6x2x128xbf16>, vector<6x128x64xbf16>, vector<6x2x64xf32> -> vector<6x2x64xf32>
    %c0_112 = arith.constant 0 : index
    %c0_113 = arith.constant 0 : index
    %c0_114 = arith.constant 0 : index
    %284 = vector.load %arg18[%c0_112, %c0_113, %c0_114] : memref<6x1x64xf32, #tpu.memory_space<vmem>>, vector<6x1x64xf32>
    %285 = vector.broadcast %284 : vector<6x1x64xf32> to vector<6x2x64xf32>
    %286 = arith.addf %283, %285 : vector<6x2x64xf32>
    %c0_115 = arith.constant 0 : index
    %c0_116 = arith.constant 0 : index
    %c0_117 = arith.constant 0 : index
    %287 = vector.load %arg20[%c0_115, %c0_116, %c0_117] : memref<6x2x64xf32, #tpu.memory_space<vmem>>, vector<6x2x64xf32>
    tpu.vector_store %arg20[%c0_115, %c0_116, %c0_117], %286 {strides = array<i32>} : memref<6x2x64xf32, #tpu.memory_space<vmem>>, vector<6x2x64xf32>,
    return
  }
}

</mosaic_0001>

<bundles_post_ra>
// kernel: trajectory_lstm_forward.2
= control target key start
LH: loop header
LB: loop body
LE: loop exit
PB: predicated region body
PF: predicated region fallthrough
CT: control target
= control target key end

     0   :  { %16 = vsyncpa [#allocation4], 0  ;;  %s7234_s0 = inlined_call_operand.vmem [shape: bf16[8,8,32], index: 0, kind: input, shape index: {}]   ;;  %s7235_s1 = inlined_call_operand.vmem [shape: bf16[32,128], index: 1, kind: input, shape index: {}]   ;;  %s7236_s2 = inlined_call_operand.vmem [shape: f32[1,128], index: 2, kind: input, shape index: {}]   ;;  %s7237_s3 = inlined_call_operand.vmem [shape: bf16[128,128], index: 3, kind: input, shape index: {}]   ;;  %s7238_s4 = inlined_call_operand.hbm [shape: f32[1,128], index: 4, kind: input, shape index: {}]   ;;  %s7239_s5 = inlined_call_operand.vmem [shape: bf16[128,512], index: 5, kind: input, shape index: {}]   ;;  %s7240_s6 = inlined_call_operand.hbm [shape: bf16[128,512], index: 6, kind: input, shape index: {}]   ;;  %s7241_s7 = inlined_call_operand.vmem [shape: f32[1,512], index: 7, kind: input, shape index: {}]   ;;  %s7242_s8 = inlined_call_operand.hbm [shape: bf16[128,512], index: 8, kind: input, shape index: {}]   ;;  %s7243_s9 = inlined_call_operand.hbm [shape: bf16[128,512], index: 9, kind: input, shape index: {}]   ;;  %s7244_s10 = inlined_call_operand.hbm [shape: f32[1,512], index: 10, kind: input, shape index: {}]   ;;  %s7245_s11 = inlined_call_operand.vmem [shape: bf16[8,128], index: 11, kind: output, shape index: {}]  }
   0x1   :  { %17 = vsyncpa [#allocation6], 0 }
   0x2   :  { %18 = vsyncpa [#allocation9], 0  ;;  %s5238_s17 = smov [#allocation5]   ;;  %s5122_s21 = scalar_lea.hbm %s7240_s6, 4096 }
   0x3   :  { %s44_s18 = sshll.u32 %s5238_s17, 4  ;;  %p5123_p0 = scmp.ne.s32.totalorder %s7240_s6, %s5122_s21  ;;  %s45_s18 = int_to_ptr.vmem [resolvable:$true] %s44_s18 }
   0x4   :  { %p5126_p1 = scmp.lt.u32.totalorder %s5122_s21, %s7240_s6 }
   0x6   :  { %p5128_p2 = pnand %p5126_p1, %p5123_p0 }
   0x8   :  { %5131 = shalt.err (!%p5128_p2)
}
   0x9   :  { %s5132_s26 = scalar_lea.vmem %s45_s18, 4096  ;;  %p5137_p4 = scmp.lt.s32.totalorder %s45_s18, %s45_s18 }
   0xa   :  { %p5133_p3 = scmp.ne.s32.totalorder %s45_s18, %s5132_s26  ;;  %p5138_p5 = scmp.lt.s32.totalorder %s5132_s26, %s5132_s26 }
   0xc   :  { %p5139_p6 = por %p5138_p5, %p5137_p4 }
   0xe   :  { %p5140_p7 = pnand %p5139_p6, %p5133_p3 }
  0x10   :  { %5143 = shalt.err (!%p5140_p7)
}
  0x11   :  { %s5239_s27 = smov 256   ;;  %s5240_s28 = smov 16  }
  0x12   :  { %50 = dma.hbm_to_vmem [thread:$0]  %s7240_s6, 4096, %s45_s18, [#allocation6], %s5239_s27, %s5239_s27, %s5240_s28  }
  0x13   :  { %s5241_s12 = smov [#allocation8]   ;;  %s5242_s14 = smov [#allocation3]  }
  0x14   :  { %s70_s13 = sshll.u32 %s5241_s12, 4  ;;  %s33_s15 = sshll.u32 %s5242_s14, 4  ;;  %s71_s13 = int_to_ptr.vmem [resolvable:$true] %s70_s13  ;;  %s34_s15 = int_to_ptr.vmem [resolvable:$true] %s33_s15 }
  0x15   :  { %s5144_s19 = scalar_lea.hbm %s7243_s9, 4096 }
  0x16   :  { %p5145_p8 = scmp.ne.s32.totalorder %s7243_s9, %s5144_s19  ;;  %p5148_p9 = scmp.lt.u32.totalorder %s5144_s19, %s7243_s9 }
  0x18   :  { %p5150_p10 = pnand %p5148_p9, %p5145_p8 }
  0x1a   :  { %5153 = shalt.err (!%p5150_p10)
}
  0x1b   :  { %s5154_s6 = scalar_lea.vmem %s71_s13, 4096  ;;  %p5159_p12 = scmp.lt.s32.totalorder %s71_s13, %s71_s13 }
  0x1c   :  { %p5155_p11 = scmp.ne.s32.totalorder %s71_s13, %s5154_s6  ;;  %p5160_p13 = scmp.lt.s32.totalorder %s5154_s6, %s5154_s6 }
  0x1e   :  { %p5161_p0 = por %p5160_p13, %p5159_p12 }
  0x20   :  { %p5162_p1 = pnand %p5161_p0, %p5155_p11 }
  0x22   :  { %5165 = shalt.err (!%p5162_p1)
}
  0x23   :  { %76 = dma.hbm_to_vmem [thread:$0]  %s7243_s9, 4096, %s71_s13, [#allocation9], %s5239_s27, %s5239_s27, %s5240_s28  }
  0x24   :  { %s5166_s29 = scalar_lea.hbm %s7238_s4, 16 }
  0x25   :  { %p5167_p2 = scmp.ne.s32.totalorder %s7238_s4, %s5166_s29  ;;  %p5170_p3 = scmp.lt.u32.totalorder %s5166_s29, %s7238_s4 }
  0x27   :  { %p5172_p4 = pnand %p5170_p3, %p5167_p2 }
  0x29   :  { %5175 = shalt.err (!%p5172_p4)
}
  0x2a   :  { %s5176_s17 = scalar_lea.vmem %s34_s15, 16  ;;  %s5180_s19 = scalar_lea.vmem %s34_s15, 32 }
  0x2b   :  { %p5177_p5 = scmp.ne.s32.totalorder %s34_s15, %s5176_s17  ;;  %p5181_p6 = scmp.lt.s32.totalorder %s34_s15, %s34_s15 }
  0x2c   :  { %p5182_p7 = scmp.lt.s32.totalorder %s5180_s19, %s5176_s17 }
  0x2e   :  { %p5183_p8 = por %p5182_p7, %p5181_p6 }
  0x30   :  { %p5184_p9 = pnand %p5183_p8, %p5177_p5 }
  0x32   :  { %5187 = shalt.err (!%p5184_p9)
}
  0x33   :  { %36 = dma.hbm_to_vmem [thread:$0]  %s7238_s4, 16, %s34_s15, [#allocation4]  }
  0x34   :  { %s5243_s20 = smov [#allocation7]   ;;  %s5244_s22 = smov [#allocation10]  }
  0x35   :  { %s58_s21 = sshll.u32 %s5243_s20, 4  ;;  %s83_s23 = sshll.u32 %s5244_s22, 4  ;;  %s59_s21 = int_to_ptr.vmem [resolvable:$true] %s58_s21  ;;  %s84_s23 = int_to_ptr.vmem [resolvable:$true] %s83_s23 }
  0x36   :  { %s5188_s24 = scalar_lea.hbm %s7242_s8, 4096 }
  0x37   :  { %p5189_p10 = scmp.ne.s32.totalorder %s7242_s8, %s5188_s24  ;;  %p5192_p11 = scmp.lt.u32.totalorder %s5188_s24, %s7242_s8 }
  0x39   :  { %p5194_p12 = pnand %p5192_p11, %p5189_p10 }
  0x3b   :  { %5197 = shalt.err (!%p5194_p12)
}
  0x3c   :  { %s5198_s4 = scalar_lea.vmem %s59_s21, 4096  ;;  %p5203_p0 = scmp.lt.s32.totalorder %s59_s21, %s59_s21 }
  0x3d   :  { %p5199_p13 = scmp.ne.s32.totalorder %s59_s21, %s5198_s4  ;;  %p5204_p1 = scmp.lt.s32.totalorder %s5198_s4, %s5198_s4 }
  0x3f   :  { %p5205_p2 = por %p5204_p1, %p5203_p0 }
  0x41   :  { %p5206_p3 = pnand %p5205_p2, %p5199_p13 }
  0x43   :  { %5209 = shalt.err (!%p5206_p3)
}
  0x44   :  { %64 = dma.hbm_to_vmem [thread:$0]  %s7242_s8, 4096, %s59_s21, [#allocation6], %s5239_s27, %s5239_s27, %s5240_s28  }
  0x45   :  { %s5210_s17 = scalar_lea.hbm %s7244_s10, 64 }
  0x46   :  { %p5211_p4 = scmp.ne.s32.totalorder %s7244_s10, %s5210_s17  ;;  %p5214_p5 = scmp.lt.u32.totalorder %s5210_s17, %s7244_s10 }
  0x48   :  { %p5216_p6 = pnand %p5214_p5, %p5211_p4 }
  0x4a   :  { %5219 = shalt.err (!%p5216_p6)
}
  0x4b   :  { %s5220_s22 = scalar_lea.vmem %s84_s23, 64  ;;  %p5225_p8 = scmp.lt.s32.totalorder %s84_s23, %s84_s23 }
  0x4c   :  { %p5221_p7 = scmp.ne.s32.totalorder %s84_s23, %s5220_s22  ;;  %p5226_p9 = scmp.lt.s32.totalorder %s5220_s22, %s5220_s22 }
  0x4e   :  { %p5227_p10 = por %p5226_p9, %p5225_p8 }
  0x50   :  { %p5228_p11 = pnand %p5227_p10, %p5221_p7 }
  0x52   :  { %5231 = shalt.err (!%p5228_p11)
}
  0x53   :  { %86 = dma.hbm_to_vmem [thread:$0]  %s7244_s10, 64, %s84_s23, [#allocation9]  }
  0x54   :  { %5232 = dma.done.wait [#allocation4], 16  }
  0x55   :  { %5233 = vsyncadd [#allocation4], 4294967280 }
  0x56   :  { %5234 = dma.done.wait [#allocation6], 8192  }
  0x57   :  { %5235 = vsyncadd [#allocation6], 4294959104 }
  0x58   :  { %5236 = dma.done.wait [#allocation9], 4160  }
  0x59   :  { %5237 = vsyncadd [#allocation9], 4294963136  ;;  %v4464_v0 = vld [vmem:[%s7235_s1] sm:$0xff]   ;;  %v4465_v1 = vld [vmem:[%s7235_s1 + $0x8] sm:$0xff]   ;;  %vm181_vm0 = vcmask 261120   ;;  %vm119_vm1 = vcmask 244968  }
  0x5a   :  { %4415 = vmatprep.subr.bf16.mxu0 %v4464_v0  ;;  %v5385_v2 = vld [vmem:[%s7234_s0] sm:$0xff]   ;;  %v5390_v3 = vld [vmem:[%s7234_s0 + $0x8] sm:$0xff]   ;;  %v5395_v4 = vld [vmem:[%s7234_s0 + $0x10] sm:$0xff]  }
  0x5b   :  { %4416 = vmatpush3.bf16.msra.mxu0 %v4464_v0  ;;  %v4470_v5 = vld [vmem:[%s7237_s3] sm:$0xff]   ;;  %4419 = vmatprep.mubr.msk.bf16.mxu0 %vm181_vm0, %v5385_v2  ;;  %v4471_v6 = vld [vmem:[%s7237_s3 + $0x8] sm:$0xff]   ;;  %v4472_v7 = vld [vmem:[%s7237_s3 + $0x10] sm:$0xff]  }
  0x5c   :  { %4417 = vmatprep.subr.bf16.mxu0 %v4465_v1  ;;  %4427 = vmatprep.subr.bf16.mxu1 %v4470_v5  ;;  %v5411_v8 = vld [vmem:[%s7234_s0 + $0x18] sm:$0xff]   ;;  %v4474_v10 = vld [vmem:[%s7237_s3 + $0x20] sm:$0xff]   ;;  %v4475_v11 = vld [vmem:[%s7237_s3 + $0x28] sm:$0xff]  }
  0x5d   :  { %4428 = vmatpush3.bf16.msra.mxu1 %v4470_v5  ;;  %v4473_v9 = vld [vmem:[%s7237_s3 + $0x18] sm:$0xff]   ;;  %v4476_v12 = vld [vmem:[%s7237_s3 + $0x30] sm:$0xff]   ;;  %v4169_v29 = vld [vmem:[%s7236_s2] ss:$0 sm:$0xff] }
  0x5e   :  { %4429 = vmatprep.subr.bf16.mxu1 %v4471_v6  ;;  %v4477_v13 = vld [vmem:[%s7237_s3 + $0x38] sm:$0xff]   ;;  %v4478_v14 = vld [vmem:[%s7239_s5] ss:$16 sps:$4 sm:$0xff]   ;;  %v4480_v15 = vld [vmem:[%s7239_s5 + $0x4] ss:$16 sps:$4 sm:$0xff]  }
  0x5f   :  { %4418 = vmatpush3.bf16.msra.mxu0 %v4465_v1  ;;  %v4483_v16 = vld [vmem:[%s7239_s5 + $0xc] ss:$16 sps:$4 sm:$0xff]   ;;  %v4486_v17 = vld [vmem:[%s7239_s5 + $0x24] ss:$16 sps:$4 sm:$0xff]   ;;  %v4484_v18 = vld [vmem:[%s7239_s5 + $0x20] ss:$16 sps:$4 sm:$0xff]  }
  0x60   :  { %603 = vmatprep.subr.bf16.mxu0 %v4480_v15  ;;  %v4492_v19 = vld [vmem:[%s7239_s5 + $0x44] ss:$16 sps:$4 sm:$0xff]   ;;  %v4490_v20 = vld [vmem:[%s7239_s5 + $0x40] ss:$16 sps:$4 sm:$0xff]   ;;  %v4481_v45 = vld [vmem:[%s7239_s5 + $0x8] ss:$16 sps:$4 sm:$0xff]  }
  0x61   :  { %4430 = vmatpush3.bf16.msra.mxu1 %v4471_v6  ;;  %v4498_v21 = vld [vmem:[%s7239_s5 + $0x64] ss:$16 sps:$4 sm:$0xff]   ;;  %v4496_v22 = vld [vmem:[%s7239_s5 + $0x60] ss:$16 sps:$4 sm:$0xff]   ;;  %v4489_v48 = vld [vmem:[%s7239_s5 + $0x2c] ss:$16 sps:$4 sm:$0xff]  }
  0x62   :  { %4420 = vmatmul.mubr.msk.bf16.vlgmr.msra.gmra.mrb[0].mxu0 %vm181_vm0, %v5390_v3  ;;  %4431 = vmatprep.subr.bf16.mxu1 %v4472_v7  ;;  %v4504_v23 = vld [vmem:[%s7239_s5 + $0x84] ss:$16 sps:$4 sm:$0xff]   ;;  %v4502_v24 = vld [vmem:[%s7239_s5 + $0x80] ss:$16 sps:$4 sm:$0xff]   ;;  %v4487_v56 = vld [vmem:[%s7239_s5 + $0x28] ss:$16 sps:$4 sm:$0xff]  }
  0x63   :  { %4423 = vmatprep.mubr.msk.bf16.mxu0 %vm181_vm0, %v5395_v4  ;;  %604 = vmatpush1.bf16.msra.mxu0 %v4478_v14  ;;  %v4510_v25 = vld [vmem:[%s7239_s5 + $0xa4] ss:$16 sps:$4 sm:$0xff]   ;;  %v4508_v26 = vld [vmem:[%s7239_s5 + $0xa0] ss:$16 sps:$4 sm:$0xff]   ;;  %v4495_v58 = vld [vmem:[%s7239_s5 + $0x4c] ss:$16 sps:$4 sm:$0xff]  }
  0x64   :  { %605 = vmatprep.subr.bf16.mxu0 %v4486_v17  ;;  %v4516_v27 = vld [vmem:[%s7239_s5 + $0xc4] ss:$16 sps:$4 sm:$0xff]   ;;  %v4514_v28 = vld [vmem:[%s7239_s5 + $0xc0] ss:$16 sps:$4 sm:$0xff]   ;;  %v4493_v62 = vld [vmem:[%s7239_s5 + $0x48] ss:$16 sps:$4 sm:$0xff]  }
  0x65   :  { %4432 = vmatpush3.bf16.msra.mxu1 %v4472_v7  ;;  %v4501_v63 = vld [vmem:[%s7239_s5 + $0x6c] ss:$16 sps:$4 sm:$0xff]   ;;  %v4499_v0 = vld [vmem:[%s7239_s5 + $0x68] ss:$16 sps:$4 sm:$0xff]   ;;  %v7246_v17 = vmov 0  }
  0x66   :  { %4433 = vmatprep.subr.bf16.mxu1 %v4473_v9  ;;  %v4507_v1 = vld [vmem:[%s7239_s5 + $0x8c] ss:$16 sps:$4 sm:$0xff]   ;;  %v4505_v5 = vld [vmem:[%s7239_s5 + $0x88] ss:$16 sps:$4 sm:$0xff]  }
  0x67   :  { %606 = vmatpush1.bf16.msra.mxu0 %v4484_v18  ;;  %v4513_v6 = vld [vmem:[%s7239_s5 + $0xac] ss:$16 sps:$4 sm:$0xff]   ;;  %v4511_v7 = vld [vmem:[%s7239_s5 + $0xa8] ss:$16 sps:$4 sm:$0xff]   ;;  %v112_v18 = vunpack.c.h.bf16 %v5385_v2 }
  0x68   :  { %607 = vmatprep.subr.bf16.mxu0 %v4492_v19  ;;  %v4523_v14 = vld [vmem:[%s7239_s5 + $0xe8] ss:$16 sps:$4 sm:$0xff]   ;;  %v111_v19 = vunpack.c.l.bf16 %v5385_v2  ;;  %v116_v2 = vunpack.c.h.bf16 %v5395_v4 }
  0x69   :  { %4434 = vmatpush3.bf16.msra.mxu1 %v4473_v9  ;;  %v4519_v9 = vld [vmem:[%s7239_s5 + $0xcc] ss:$16 sps:$4 sm:$0xff]   ;;  %v5533_v15 = vld [vmem:[#allocation5 + $0x4] ss:$16 sps:$4 sm:$0xff]  }
  0x6a   :  { %4424 = vmatmul.mubr.msk.bf16.gmra.mrb[4].mxu0 %vm181_vm0, %v5411_v8  ;;  %4435 = vmatprep.subr.bf16.mxu1 %v4474_v10 }
  0x6b   :  { %608 = vmatpush1.bf16.msra.mxu0 %v4490_v20  ;;  %635 = vmatprep.mubr.bf16.mxu0 %v7246_v17  ;;  %v121_v20 = vsel %vm119_vm1, %v112_v18, 0.0 }
  0x6c   :  { %609 = vmatprep.subr.bf16.mxu0 %v4498_v21  ;;  %v5246_v21 = vmov 29  }
  0x6d   :  { %4436 = vmatpush3.bf16.msra.mxu1 %v4474_v10  ;;  %v4517_v10 = vld [vmem:[%s7239_s5 + $0xc8] ss:$16 sps:$4 sm:$0xff]   ;;  %4462 = vset.pattern.permute.xlu0 %v5246_v21 }
  0x6e   :  { %4437 = vmatprep.subr.bf16.mxu1 %v4475_v11  ;;  %4463 = vset.pattern.permute.xlu1 %v5246_v21  ;;  %v5599_v21 = vld [vmem:[#allocation5 + $0x6c] ss:$16 sps:$4 sm:$0xff]  }
  0x6f   :  { %610 = vmatpush1.bf16.msra.mxu0 %v4496_v22  ;;  %v113_v22 = vunpack.c.l.bf16 %v5390_v3  ;;  %751 = vperm.xlu0 %4462, %v111_v19  }
  0x70   :  { %611 = vmatprep.subr.bf16.mxu0 %v4504_v23  ;;  %v114_v23 = vunpack.c.h.bf16 %v5390_v3 }
  0x71   :  { %4438 = vmatpush3.bf16.msra.mxu1 %v4475_v11  ;;  %v4522_v11 = vld [vmem:[%s7239_s5 + $0xe4] ss:$16 sps:$4 sm:$0xff]   ;;  %761 = vperm.xlu1 %4463, %v113_v22  }
  0x72   :  { %4439 = vmatprep.subr.bf16.mxu1 %v4476_v12 }
  0x73   :  { %612 = vmatpush1.bf16.msra.mxu0 %v4502_v24  ;;  %v120_v24 = vsel %vm119_vm1, %v111_v19, 0.0  ;;  %756 = vperm.xlu0 %4462, %v112_v18   ;;  %v5593_v18 = vld [vmem:[#allocation5 + $0x48] ss:$16 sps:$4 sm:$0xff]  }
  0x74   :  { %613 = vmatprep.subr.bf16.mxu0 %v4510_v25  ;;  %v115_v25 = vunpack.c.l.bf16 %v5395_v4 }
  0x75   :  { %4440 = vmatpush3.bf16.msra.mxu1 %v4476_v12  ;;  %v4525_v12 = vld [vmem:[%s7239_s5 + $0xec] ss:$16 sps:$4 sm:$0xff]   ;;  %766 = vperm.xlu1 %4463, %v114_v23  }
  0x76   :  { %4441 = vmatprep.subr.bf16.mxu1 %v4477_v13 }
  0x77   :  { %614 = vmatpush1.bf16.msra.mxu0 %v4508_v26  ;;  %v122_v26 = vadd.f32 %v121_v20, %v120_v24  ;;  %771 = vperm.xlu0 %4462, %v115_v25   ;;  %v5597_v20 = vld [vmem:[#allocation5 + $0x64] ss:$16 sps:$4 sm:$0xff]  }
  0x78   :  { %615 = vmatprep.subr.bf16.mxu0 %v4516_v27  ;;  %v123_v27 = vsel %vm119_vm1, %v113_v22, 0.0  ;;  %v5603_v22 = vld [vmem:[#allocation5 + $0x60] ss:$16 sps:$4 sm:$0xff]   ;;  %v5609_v24 = vld [vmem:[#allocation5 + $0x84] ss:$16 sps:$4 sm:$0xff]  }
  0x79   :  { %4442 = vmatpush3.bf16.msra.mxu1 %v4477_v13  ;;  %v4520_v13 = vld [vmem:[%s7239_s5 + $0xe0] ss:$16 sps:$4 sm:$0xff]   ;;  %776 = vperm.xlu1 %4463, %v116_v2  }
  0x7a   :  { %676 = vmatprep.subr.bf16.mxu1 %v4483_v16  ;;  %v5535_v16 = vld [vmem:[#allocation5 + $0xc] ss:$16 sps:$4 sm:$0xff]  }
  0x7b   :  { %616 = vmatpush1.bf16.msra.mxu0 %v4514_v28  ;;  %v125_v28 = vsel %vm119_vm1, %v114_v23, 0.0  ;;  %v5605_v23 = vld [vmem:[#allocation5 + $0x68] ss:$16 sps:$4 sm:$0xff]  }
  0x7c   :  { %617 = vmatprep.subr.bf16.mxu0 %v4522_v11 }
  0x7f   :  { %618 = vmatpush1.bf16.msra.mxu0 %v4520_v13 }
  0x80   :  { %1282 = vmatprep.subr.bf16.mxu0 %v5533_v15 }
 0x135   :  { %v4421_v30 = vpop.f32.mrb[0].mxu0 }
 0x136   :  { %v237_v31 = vadd.f32 %v4421_v30, %v4169_v29  ;;  %v228_v32 = vpop.f32.mrb[1].mxu0  ;;  %v127_v30 = vsel %vm119_vm1, %v115_v25, 0.0  ;;  %v5611_v25 = vld [vmem:[#allocation5 + $0x8c] ss:$16 sps:$4 sm:$0xff]  }
 0x137   :  { %v229_v33 = vadd.f32 %v4169_v29, %v228_v32  ;;  %v4422_v34 = vpop.f32.mrb[2].mxu0  ;;  %v129_v32 = vsel %vm119_vm1, %v116_v2, 0.0  ;;  %v5623_v2 = vld [vmem:[#allocation5 + $0xa4] ss:$16 sps:$4 sm:$0xff]  }
 0x138   :  { %v240_v35 = vadd.f32 %v4422_v34, %v4169_v29  ;;  %v231_v36 = vpop.f32.mrb[3].mxu0  ;;  %v261_v38 = vmax.f32 %v237_v31, 0.0  ;;  %v117_v31 = vunpack.c.l.bf16 %v5411_v8 }
 0x139   :  { %v232_v37 = vadd.f32 %v4169_v29, %v231_v36  ;;  %v259_v40 = vmax.f32 %v229_v33, 0.0  ;;  %v118_v33 = vunpack.c.h.bf16 %v5411_v8 }
 0x13a   :  { %v262_v39 = vmax.f32 %v240_v35, 0.0  ;;  %v131_v35 = vsel %vm119_vm1, %v117_v31, 0.0  ;;  %781 = vperm.xlu0 %4462, %v117_v31   ;;  %v5635_v31 = vld [vmem:[#allocation5 + $0xc4] ss:$16 sps:$4 sm:$0xff]  }
 0x13b   :  { %v260_v41 = vmax.f32 %v232_v37, 0.0  ;;  %v133_v4 = vsel %vm119_vm1, %v118_v33, 0.0  ;;  %786 = vperm.xlu1 %4463, %v118_v33   ;;  %v5645_v33 = vld [vmem:[#allocation5 + $0xc8] ss:$16 sps:$4 sm:$0xff]  }
 0x13c   :  { %v268_v42 = vpack.c.bf16 %v262_v39, %v261_v38 }
 0x13d   :  { %v4425_v43 = vpop.f32.mrb[4].mxu0  ;;  %v267_v44 = vpack.c.bf16 %v260_v41, %v259_v40 }
 0x13e   :  { %v253_v46 = vadd.f32 %v4425_v43, %v4169_v29  ;;  %v244_v47 = vpop.f32.mrb[5].mxu0 }
 0x13f   :  { %v245_v49 = vadd.f32 %v4169_v29, %v244_v47  ;;  %4443 = vmatprep.mubr.bf16.mxu1 %v267_v44  ;;  %v4426_v50 = vpop.f32.mrb[6].mxu0  ;;  %v4180_v47 = vld [vmem:[#allocation3] ss:$0 sm:$0xff] }
 0x140   :  { %v265_v51 = vmax.f32 %v253_v46, 0.0  ;;  %v256_v52 = vadd.f32 %v4426_v50, %v4169_v29  ;;  %4444 = vmatmul.mubr.bf16.vlgmr.msra.gmra.mrb[0].mxu1 %v268_v42  ;;  %v247_v53 = vpop.f32.mrb[7].mxu0 }
 0x141   :  { %v263_v54 = vmax.f32 %v245_v49, 0.0  ;;  %v248_v55 = vadd.f32 %v4169_v29, %v247_v53  ;;  %677 = vmatpush1.bf16.msra.mxu1 %v4481_v45  ;;  %v124_v29 = vadd.f32 %v123_v27, %v122_v26  ;;  %v5617_v26 = vld [vmem:[#allocation5 + $0x80] ss:$16 sps:$4 sm:$0xff]   ;;  %v5619_v27 = vld [vmem:[#allocation5 + $0x88] ss:$16 sps:$4 sm:$0xff]  }
 0x142   :  { %v266_v57 = vmax.f32 %v256_v52, 0.0  ;;  %678 = vmatprep.subr.bf16.mxu1 %v4489_v48 }
 0x143   :  { %v264_v59 = vmax.f32 %v248_v55, 0.0  ;;  %v126_v3 = vadd.f32 %v125_v28, %v124_v29  ;;  %v5625_v28 = vld [vmem:[#allocation5 + $0xac] ss:$16 sps:$4 sm:$0xff]   ;;  %v5629_v29 = vld [vmem:[#allocation5 + $0xa0] ss:$16 sps:$4 sm:$0xff]  }
 0x144   :  { %v270_v60 = vpack.c.bf16 %v266_v57, %v265_v51  ;;  %v5569_v57 = vld [vmem:[#allocation5 + $0x8] ss:$16 sps:$4 sm:$0xff]  }
 0x145   :  { %v269_v61 = vpack.c.bf16 %v264_v59, %v263_v54  ;;  %679 = vmatpush1.bf16.msra.mxu1 %v4487_v56  ;;  %v128_v34 = vadd.f32 %v127_v30, %v126_v3  ;;  %v5567_v56 = vld [vmem:[#allocation5] ss:$16 sps:$4 sm:$0xff]   ;;  %v5571_v59 = vld [vmem:[#allocation5 + $0x24] ss:$16 sps:$4 sm:$0xff]   ;;  %v5631_v30 = vld [vmem:[#allocation5 + $0xa8] ss:$16 sps:$4 sm:$0xff]  }
 0x146   :  { %680 = vmatprep.subr.bf16.mxu1 %v4495_v58  ;;  %v5637_v3 = vld [vmem:[#allocation5 + $0xcc] ss:$16 sps:$4 sm:$0xff]  }
 0x147   :  { %4447 = vmatprep.mubr.bf16.mxu1 %v269_v61  ;;  %v130_v36 = vadd.f32 %v129_v32, %v128_v34  ;;  %v5643_v32 = vld [vmem:[#allocation5 + $0xc0] ss:$16 sps:$4 sm:$0xff]   ;;  %v5649_v34 = vld [vmem:[#allocation5 + $0xe4] ss:$16 sps:$4 sm:$0xff]  }
 0x148   :  { %4448 = vmatmul.mubr.bf16.gmra.mrb[4].mxu1 %v270_v60  ;;  %v5573_v60 = vld [vmem:[#allocation5 + $0x2c] ss:$16 sps:$4 sm:$0xff]  }
 0x149   :  { %681 = vmatpush1.bf16.msra.mxu1 %v4493_v62  ;;  %708 = vmatprep.mubr.bf16.mxu1 %v7246_v17  ;;  %v132_v37 = vadd.f32 %v131_v35, %v130_v36  ;;  %v5651_v35 = vld [vmem:[#allocation5 + $0xec] ss:$16 sps:$4 sm:$0xff]   ;;  %v5655_v36 = vld [vmem:[#allocation5 + $0xe0] ss:$16 sps:$4 sm:$0xff]  }
 0x14a   :  { %682 = vmatprep.subr.bf16.mxu1 %v4501_v63 }
 0x14b   :  { %v134_v38 = vadd.f32 %v133_v4, %v132_v37  ;;  %v5657_v4 = vld [vmem:[#allocation5 + $0xe8] ss:$16 sps:$4 sm:$0xff]   ;;  %v5669_v37 = vld [vmem:[#allocation8 + $0x4] ss:$16 sps:$4 sm:$0xff]  }
 0x14d   :  { %683 = vmatpush1.bf16.msra.mxu1 %v4499_v0  ;;  %v135_v39 = vadd.f32 0.5, %v134_v38  ;;  %v5577_v0 = vld [vmem:[#allocation5 + $0x20] ss:$16 sps:$4 sm:$0xff]  }
 0x14e   :  { %684 = vmatprep.subr.bf16.mxu1 %v4507_v1  ;;  %v5579_v1 = vld [vmem:[#allocation5 + $0x28] ss:$16 sps:$4 sm:$0xff]   ;;  %v5671_v38 = vld [vmem:[#allocation8] ss:$16 sps:$4 sm:$0xff]  }
 0x14f   :  { %v4451_v40 = vtrunc.f32 %v135_v39  ;;  %7547 = vst [vmem:[#allocation15_spill] sm:$0xff] %v5671_v38  ;;  %v5673_v39 = vld [vmem:[#allocation8 + $0xc] ss:$16 sps:$4 sm:$0xff]  }
 0x151   :  { %685 = vmatpush1.bf16.msra.mxu1 %v4505_v5  ;;  %v4452_v41 = vcvt.f32.s32 %v4451_v40  ;;  %v5676_v40 = vld [vmem:[#allocation8 + $0x8] ss:$16 sps:$4 sm:$0xff]  }
 0x152   :  { %686 = vmatprep.subr.bf16.mxu1 %v4513_v6  ;;  %7548 = vst [vmem:[#allocation16_spill] sm:$0xff] %v5676_v40 }
 0x153   :  { %v5557_v42 = vadd.s32 4294967295, %v4452_v41  ;;  %v5681_v41 = vld [vmem:[#allocation8 + $0x24] ss:$16 sps:$4 sm:$0xff]  }
 0x154   :  { %7549 = vst [vmem:[#allocation17_spill] sm:$0xff] %v5681_v41 }
 0x155   :  { %687 = vmatpush1.bf16.msra.mxu1 %v4511_v7  ;;  %7546 = vst [vmem:[#allocation14_spill] sm:$0xff] %v5557_v42  ;;  %vm1926_vm2 = vcmp.eq.s32.totalorder %v5557_v42, 0  ;;  %vm2562_vm3 = vcmp.eq.s32.totalorder %v5557_v42, 2  ;;  %vm3198_vm4 = vcmp.eq.s32.totalorder %v5557_v42, 4  ;;  %vm3834_vm5 = vcmp.eq.s32.totalorder %v5557_v42, 6 }
 0x156   :  { %688 = vmatprep.subr.bf16.mxu1 %v4519_v9  ;;  %v1927_v8 = vsel %vm1926_vm2, 1, %v7246_v17  ;;  %v2563_v43 = vsel %vm2562_vm3, 1, %v7246_v17  ;;  %v3199_v44 = vsel %vm3198_vm4, 1, %v7246_v17  ;;  %v3835_v45 = vsel %vm3834_vm5, 1, %v7246_v17  ;;  %v5583_v7 = vld [vmem:[#allocation5 + $0x44] ss:$16 sps:$4 sm:$0xff]  }
 0x157   :  { %1929 = vperm.xlu0 %4462, %v1927_v8   ;;  %v5585_v9 = vld [vmem:[#allocation5 + $0x4c] ss:$16 sps:$4 sm:$0xff]   ;;  %v5683_v8 = vld [vmem:[#allocation8 + $0x20] ss:$16 sps:$4 sm:$0xff]   ;;  %v5760_v42 = vld [vmem:[#allocation8 + $0xe8] ss:$16 sps:$4 sm:$0xff]  }
 0x158   :  { %7550 = vst [vmem:[#allocation18_spill] sm:$0xff] %v5683_v8  ;;  %7576 = vst [vmem:[#allocation44_spill] sm:$0xff] %v5760_v42 }
 0x159   :  { %689 = vmatpush1.bf16.msra.mxu1 %v4517_v10 }
 0x15a   :  { %690 = vmatprep.subr.bf16.mxu1 %v4525_v12 }
 0x15b   :  { %2565 = vperm.xlu0 %4462, %v2563_v43   ;;  %v5685_v43 = vld [vmem:[#allocation8 + $0x2c] ss:$16 sps:$4 sm:$0xff]  }
 0x15c   :  { %7551 = vst [vmem:[#allocation19_spill] sm:$0xff] %v5685_v43 }
 0x15d   :  { %691 = vmatpush1.bf16.msra.mxu1 %v4523_v14  ;;  %v5591_v14 = vld [vmem:[#allocation5 + $0x40] ss:$16 sps:$4 sm:$0xff]  }
 0x15e   :  { %1323 = vmatprep.subr.bf16.mxu1 %v5535_v16 }
 0x15f   :  { %3201 = vperm.xlu0 %4462, %v3199_v44   ;;  %v5688_v44 = vld [vmem:[#allocation8 + $0x28] ss:$16 sps:$4 sm:$0xff]  }
 0x160   :  { %7552 = vst [vmem:[#allocation20_spill] sm:$0xff] %v5688_v44 }
 0x163   :  { %3837 = vperm.xlu0 %4462, %v3835_v45   ;;  %v5693_v45 = vld [vmem:[#allocation8 + $0x44] ss:$16 sps:$4 sm:$0xff]  }
 0x164   :  { %7553 = vst [vmem:[#allocation21_spill] sm:$0xff] %v5693_v45 }
 0x213   :  { %v4445_v46 = vpop.f32.mrb[0].mxu1 }
 0x214   :  { %v376_v48 = vpop.f32.mrb[1].mxu1  ;;  %v385_v50 = vadd.f32 %v4445_v46, %v4180_v47  ;;  %v5695_v46 = vld [vmem:[#allocation8 + $0x40] ss:$16 sps:$4 sm:$0xff]  }
 0x215   :  { %v4446_v49 = vpop.f32.mrb[2].mxu1  ;;  %v377_v53 = vadd.f32 %v4180_v47, %v376_v48  ;;  %7554 = vst [vmem:[#allocation22_spill] sm:$0xff] %v5695_v46  ;;  %v5700_v48 = vld [vmem:[#allocation8 + $0x48] ss:$16 sps:$4 sm:$0xff]  }
 0x216   :  { %v388_v51 = vadd.f32 %v4446_v49, %v4180_v47  ;;  %v379_v52 = vpop.f32.mrb[3].mxu1  ;;  %7556 = vst [vmem:[#allocation24_spill] sm:$0xff] %v5700_v48  ;;  %v5705_v49 = vld [vmem:[#allocation8 + $0x64] ss:$16 sps:$4 sm:$0xff]  }
 0x217   :  { %v380_v54 = vadd.f32 %v4180_v47, %v379_v52  ;;  %7557 = vst [vmem:[#allocation25_spill] sm:$0xff] %v5705_v49  ;;  %v5712_v52 = vld [vmem:[#allocation8 + $0x68] ss:$16 sps:$4 sm:$0xff]  }
 0x218   :  { %v408_v55 = vpack.c.bf16 %v388_v51, %v385_v50  ;;  %v5707_v50 = vld [vmem:[#allocation8 + $0x60] ss:$16 sps:$4 sm:$0xff]   ;;  %v5709_v51 = vld [vmem:[#allocation8 + $0x6c] ss:$16 sps:$4 sm:$0xff]   ;;  %7560 = vst [vmem:[#allocation28_spill] sm:$0xff] %v5712_v52 }
 0x219   :  { %v407_v58 = vpack.c.bf16 %v380_v54, %v377_v53  ;;  %7558 = vst [vmem:[#allocation26_spill] sm:$0xff] %v5707_v50  ;;  %7559 = vst [vmem:[#allocation27_spill] sm:$0xff] %v5709_v51  ;;  %v5717_v53 = vld [vmem:[#allocation8 + $0x84] ss:$16 sps:$4 sm:$0xff]   ;;  %v5719_v54 = vld [vmem:[#allocation8 + $0x80] ss:$16 sps:$4 sm:$0xff]  }
 0x21a   :  { %7561 = vst [vmem:[#allocation29_spill] sm:$0xff] %v5717_v53  ;;  %7562 = vst [vmem:[#allocation30_spill] sm:$0xff] %v5719_v54 }
 0x21b   :  { %636 = vmatmul.mubr.bf16.vlgmr.msra.gmra.mrb[8].mxu0 %v407_v58  ;;  %709 = vmatmul.mubr.bf16.vlgmr.msra.gmra.mrb[8].mxu1 %v407_v58  ;;  %v4449_v61 = vpop.f32.mrb[4].mxu1  ;;  %v5726_v58 = vld [vmem:[#allocation8 + $0x88] ss:$16 sps:$4 sm:$0xff]  }
 0x21c   :  { %1283 = vmatpush1.bf16.msra.mxu0 %v5567_v56  ;;  %v401_v62 = vadd.f32 %v4449_v61, %v4180_v47  ;;  %1324 = vmatpush1.bf16.msra.mxu1 %v5569_v57  ;;  %v392_v63 = vpop.f32.mrb[5].mxu1  ;;  %7564 = vst [vmem:[#allocation32_spill] sm:$0xff] %v5726_v58  ;;  %v5729_v61 = vld [vmem:[#allocation8 + $0xa4] ss:$16 sps:$4 sm:$0xff]  }
 0x21d   :  { %v393_v5 = vadd.f32 %v4180_v47, %v392_v63  ;;  %v4450_v6 = vpop.f32.mrb[6].mxu1  ;;  %1284 = vmatprep.subr.bf16.mxu0 %v5571_v59  ;;  %1325 = vmatprep.subr.bf16.mxu1 %v5573_v60  ;;  %7565 = vst [vmem:[#allocation33_spill] sm:$0xff] %v5729_v61  ;;  %v5733_v63 = vld [vmem:[#allocation8 + $0xac] ss:$16 sps:$4 sm:$0xff]  }
 0x21e   :  { %v404_v10 = vadd.f32 %v4450_v6, %v4180_v47  ;;  %v395_v11 = vpop.f32.mrb[7].mxu1  ;;  %645 = vmatprep.mubr.bf16.mxu0 %v7246_v17  ;;  %718 = vmatprep.mubr.bf16.mxu1 %v7246_v17  ;;  %7567 = vst [vmem:[#allocation35_spill] sm:$0xff] %v5733_v63  ;;  %v5741_v6 = vld [vmem:[#allocation8 + $0xc4] ss:$16 sps:$4 sm:$0xff]  }
 0x21f   :  { %v396_v12 = vadd.f32 %v4180_v47, %v395_v11  ;;  %v5697_v47 = vld [vmem:[#allocation8 + $0x4c] ss:$16 sps:$4 sm:$0xff]   ;;  %7569 = vst [vmem:[#allocation37_spill] sm:$0xff] %v5741_v6 }
 0x220   :  { %v410_v13 = vpack.c.bf16 %v404_v10, %v401_v62  ;;  %1285 = vmatpush1.bf16.msra.mxu0 %v5577_v0  ;;  %1326 = vmatpush1.bf16.msra.mxu1 %v5579_v1  ;;  %7555 = vst [vmem:[#allocation23_spill] sm:$0xff] %v5697_v47  ;;  %v5731_v62 = vld [vmem:[#allocation8 + $0xa0] ss:$16 sps:$4 sm:$0xff]   ;;  %v5745_v11 = vld [vmem:[#allocation8 + $0xcc] ss:$16 sps:$4 sm:$0xff]  }
 0x221   :  { %v409_v19 = vpack.c.bf16 %v396_v12, %v393_v5  ;;  %1286 = vmatprep.subr.bf16.mxu0 %v5583_v7  ;;  %1327 = vmatprep.subr.bf16.mxu1 %v5585_v9  ;;  %7566 = vst [vmem:[#allocation34_spill] sm:$0xff] %v5731_v62  ;;  %v5736_v5 = vld [vmem:[#allocation8 + $0xa8] ss:$16 sps:$4 sm:$0xff]   ;;  %v5743_v10 = vld [vmem:[#allocation8 + $0xc0] ss:$16 sps:$4 sm:$0xff]   ;;  %7571 = vst [vmem:[#allocation39_spill] sm:$0xff] %v5745_v11 }
 0x222   :  { %7568 = vst [vmem:[#allocation36_spill] sm:$0xff] %v5736_v5  ;;  %7570 = vst [vmem:[#allocation38_spill] sm:$0xff] %v5743_v10  ;;  %v5748_v12 = vld [vmem:[#allocation8 + $0xc8] ss:$16 sps:$4 sm:$0xff]  }
 0x223   :  { %646 = vmatmul.mubr.bf16.gmra.mrb[12].mxu0 %v408_v55  ;;  %719 = vmatmul.mubr.bf16.gmra.mrb[12].mxu1 %v408_v55  ;;  %v5721_v55 = vld [vmem:[#allocation8 + $0x8c] ss:$16 sps:$4 sm:$0xff]   ;;  %7572 = vst [vmem:[#allocation40_spill] sm:$0xff] %v5748_v12 }
 0x224   :  { %1287 = vmatpush1.bf16.msra.mxu0 %v5591_v14  ;;  %1328 = vmatpush1.bf16.msra.mxu1 %v5593_v18  ;;  %7563 = vst [vmem:[#allocation31_spill] sm:$0xff] %v5721_v55 }
 0x225   :  { %1288 = vmatprep.subr.bf16.mxu0 %v5597_v20  ;;  %1329 = vmatprep.subr.bf16.mxu1 %v5599_v21 }
 0x226   :  { %655 = vmatprep.mubr.bf16.mxu0 %v7246_v17  ;;  %728 = vmatprep.mubr.bf16.mxu1 %v7246_v17 }
 0x228   :  { %1289 = vmatpush1.bf16.msra.mxu0 %v5603_v22  ;;  %1330 = vmatpush1.bf16.msra.mxu1 %v5605_v23 }
 0x229   :  { %1290 = vmatprep.subr.bf16.mxu0 %v5609_v24  ;;  %1331 = vmatprep.subr.bf16.mxu1 %v5611_v25 }
 0x22b   :  { %656 = vmatmul.mubr.bf16.gmra.mrb[16].mxu0 %v409_v19  ;;  %729 = vmatmul.mubr.bf16.gmra.mrb[16].mxu1 %v409_v19  ;;  %v5755_v19 = vld [vmem:[#allocation8 + $0xe0] ss:$16 sps:$4 sm:$0xff]  }
 0x22c   :  { %1291 = vmatpush1.bf16.msra.mxu0 %v5617_v26  ;;  %1332 = vmatpush1.bf16.msra.mxu1 %v5619_v27  ;;  %7574 = vst [vmem:[#allocation42_spill] sm:$0xff] %v5755_v19 }
 0x22d   :  { %1292 = vmatprep.subr.bf16.mxu0 %v5623_v2  ;;  %1333 = vmatprep.subr.bf16.mxu1 %v5625_v28 }
 0x22e   :  { %665 = vmatprep.mubr.bf16.mxu0 %v7246_v17  ;;  %738 = vmatprep.mubr.bf16.mxu1 %v7246_v17 }
 0x230   :  { %1293 = vmatpush1.bf16.msra.mxu0 %v5629_v29  ;;  %1334 = vmatpush1.bf16.msra.mxu1 %v5631_v30 }
 0x231   :  { %1294 = vmatprep.subr.bf16.mxu0 %v5635_v31  ;;  %1335 = vmatprep.subr.bf16.mxu1 %v5637_v3 }
 0x233   :  { %666 = vmatmul.mubr.bf16.gmra.mrb[20].mxu0 %v410_v13  ;;  %739 = vmatmul.mubr.bf16.gmra.mrb[20].mxu1 %v410_v13  ;;  %v5753_v13 = vld [vmem:[#allocation8 + $0xe4] ss:$16 sps:$4 sm:$0xff]  }
 0x234   :  { %1295 = vmatpush1.bf16.msra.mxu0 %v5643_v32  ;;  %1336 = vmatpush1.bf16.msra.mxu1 %v5645_v33  ;;  %7573 = vst [vmem:[#allocation41_spill] sm:$0xff] %v5753_v13 }
 0x235   :  { %1296 = vmatprep.subr.bf16.mxu0 %v5649_v34  ;;  %1337 = vmatprep.subr.bf16.mxu1 %v5651_v35 }
 0x236   :  { %1314 = vmatprep.mubr.bf16.mxu0 %v7246_v17  ;;  %1355 = vmatprep.mubr.bf16.mxu1 %v7246_v17 }
 0x238   :  { %1297 = vmatpush1.bf16.msra.mxu0 %v5655_v36  ;;  %1338 = vmatpush1.bf16.msra.mxu1 %v5657_v4 }
 0x239   :  { %1553 = vmatprep.subr.bf16.mxu0 %v5669_v37  ;;  %1594 = vmatprep.subr.bf16.mxu1 %v5673_v39 }
 0x23b   :  { %1315 = vmatmul.mubr.bf16.vlgmr.msra.gmra.mrb[24].mxu0 %v7246_v17  ;;  %1356 = vmatmul.mubr.bf16.vlgmr.msra.gmra.mrb[24].mxu1 %v7246_v17 }
 0x23c   :  { %1585 = vmatprep.mubr.bf16.mxu0 %v7246_v17  ;;  %1626 = vmatprep.mubr.bf16.mxu1 %v7246_v17  ;;  %v5757_v17 = vld [vmem:[#allocation8 + $0xec] ss:$16 sps:$4 sm:$0xff]  }
 0x23d   :  { %1554 = vmatpush1.bf16.msra.mxu0 %v5671_v38  ;;  %1595 = vmatpush1.bf16.msra.mxu1 %v5676_v40  ;;  %7575 = vst [vmem:[#allocation43_spill] sm:$0xff] %v5757_v17 }
 0x23e   :  { %1555 = vmatprep.subr.bf16.mxu0 %v5681_v41  ;;  %1596 = vmatprep.subr.bf16.mxu1 %v5685_v43 }
 0x241   :  { %1556 = vmatpush1.bf16.msra.mxu0 %v5683_v8  ;;  %1597 = vmatpush1.bf16.msra.mxu1 %v5688_v44 }
 0x242   :  { %1557 = vmatprep.subr.bf16.mxu0 %v5693_v45  ;;  %1598 = vmatprep.subr.bf16.mxu1 %v5697_v47 }
 0x245   :  { %1558 = vmatpush1.bf16.msra.mxu0 %v5695_v46  ;;  %1599 = vmatpush1.bf16.msra.mxu1 %v5700_v48 }
 0x246   :  { %1559 = vmatprep.subr.bf16.mxu0 %v5705_v49  ;;  %1600 = vmatprep.subr.bf16.mxu1 %v5709_v51 }
 0x249   :  { %1560 = vmatpush1.bf16.msra.mxu0 %v5707_v50  ;;  %1601 = vmatpush1.bf16.msra.mxu1 %v5712_v52 }
 0x24a   :  { %1561 = vmatprep.subr.bf16.mxu0 %v5717_v53  ;;  %1602 = vmatprep.subr.bf16.mxu1 %v5721_v55 }
 0x24d   :  { %1562 = vmatpush1.bf16.msra.mxu0 %v5719_v54  ;;  %1603 = vmatpush1.bf16.msra.mxu1 %v5726_v58 }
 0x24e   :  { %1563 = vmatprep.subr.bf16.mxu0 %v5729_v61  ;;  %1604 = vmatprep.subr.bf16.mxu1 %v5733_v63  ;;  %v5853_v63 = vld [vmem:[#allocation7 + $0xec] ss:$16 sps:$4 sm:$0xff]  }
 0x24f   :  { %7607 = vst [vmem:[#allocation74_spill] sm:$0xff] %v5853_v63 }
 0x251   :  { %1564 = vmatpush1.bf16.msra.mxu0 %v5731_v62  ;;  %1605 = vmatpush1.bf16.msra.mxu1 %v5736_v5  ;;  %v5772_v5 = vld [vmem:[#allocation7 + $0x8] ss:$16 sps:$4 sm:$0xff]   ;;  %v5837_v62 = vld [vmem:[#allocation7 + $0xc4] ss:$16 sps:$4 sm:$0xff]  }
 0x252   :  { %1565 = vmatprep.subr.bf16.mxu0 %v5741_v6  ;;  %1606 = vmatprep.subr.bf16.mxu1 %v5745_v11  ;;  %v5767_v11 = vld [vmem:[#allocation7 + $0xc] ss:$16 sps:$4 sm:$0xff]   ;;  %v5770_v6 = vld [vmem:[#allocation7] ss:$16 sps:$4 sm:$0xff]   ;;  %7581 = vst [vmem:[#allocation48_spill] sm:$0xff] %v5772_v5  ;;  %7602 = vst [vmem:[#allocation69_spill] sm:$0xff] %v5837_v62 }
 0x253   :  { %7578 = vst [vmem:[#allocation46_spill] sm:$0xff] %v5767_v11  ;;  %7580 = vst [vmem:[#allocation47_spill] sm:$0xff] %v5770_v6 }
 0x255   :  { %1566 = vmatpush1.bf16.msra.mxu0 %v5743_v10  ;;  %1607 = vmatpush1.bf16.msra.mxu1 %v5748_v12  ;;  %v5765_v10 = vld [vmem:[#allocation7 + $0x4] ss:$16 sps:$4 sm:$0xff]   ;;  %v7579_v12 = vmov 0  }
 0x256   :  { %1567 = vmatprep.subr.bf16.mxu0 %v5753_v13  ;;  %1608 = vmatprep.subr.bf16.mxu1 %v5757_v17  ;;  %7577 = vst [vmem:[#allocation45_spill] sm:$0xff] %v5765_v10  ;;  %v5784_v17 = vld [vmem:[#allocation7 + $0x20] ss:$16 sps:$4 sm:$0xff]   ;;  %v5786_v13 = vld [vmem:[#allocation7 + $0x28] ss:$16 sps:$4 sm:$0xff]  }
 0x257   :  { %7584 = vst [vmem:[#allocation51_spill] sm:$0xff] %v5784_v17  ;;  %7585 = vst [vmem:[#allocation52_spill] sm:$0xff] %v5786_v13 }
 0x259   :  { %1568 = vmatpush1.bf16.msra.mxu0 %v5755_v19  ;;  %1609 = vmatpush1.bf16.msra.mxu1 %v5760_v42  ;;  %v5779_v42 = vld [vmem:[#allocation7 + $0x24] ss:$16 sps:$4 sm:$0xff]   ;;  %v5781_v19 = vld [vmem:[#allocation7 + $0x2c] ss:$16 sps:$4 sm:$0xff]  }
 0x25a   :  { %1795 = vmatprep.subr.bf16.mxu0 %v5765_v10  ;;  %1836 = vmatprep.subr.bf16.mxu1 %v5767_v11  ;;  %7582 = vst [vmem:[#allocation49_spill] sm:$0xff] %v5779_v42  ;;  %7583 = vst [vmem:[#allocation50_spill] sm:$0xff] %v5781_v19  ;;  %v5797_v11 = vld [vmem:[#allocation7 + $0x40] ss:$16 sps:$4 sm:$0xff]   ;;  %v5799_v10 = vld [vmem:[#allocation7 + $0x48] ss:$16 sps:$4 sm:$0xff]  }
 0x25b   :  { %7588 = vst [vmem:[#allocation55_spill] sm:$0xff] %v5797_v11  ;;  %7589 = vst [vmem:[#allocation56_spill] sm:$0xff] %v5799_v10 }
 0x25c   :  { %1586 = vmatmul.mubr.bf16.vlgmr.msra.gmra.mrb[28].mxu0 %v7579_v12  ;;  %1627 = vmatmul.mubr.bf16.vlgmr.msra.gmra.mrb[28].mxu1 %v7579_v12 }
 0x25d   :  { %1796 = vmatpush1.bf16.msra.mxu0 %v5770_v6  ;;  %1837 = vmatpush1.bf16.msra.mxu1 %v5772_v5  ;;  %v5793_v5 = vld [vmem:[#allocation7 + $0x44] ss:$16 sps:$4 sm:$0xff]   ;;  %v5795_v6 = vld [vmem:[#allocation7 + $0x4c] ss:$16 sps:$4 sm:$0xff]  }
 0x25e   :  { %1827 = vmatprep.mubr.bf16.mxu0 %v7579_v12  ;;  %1868 = vmatprep.mubr.bf16.mxu1 %v7579_v12  ;;  %7586 = vst [vmem:[#allocation53_spill] sm:$0xff] %v5793_v5  ;;  %7587 = vst [vmem:[#allocation54_spill] sm:$0xff] %v5795_v6 }
 0x25f   :  { %1797 = vmatprep.subr.bf16.mxu0 %v5779_v42  ;;  %1838 = vmatprep.subr.bf16.mxu1 %v5781_v19  ;;  %v5805_v19 = vld [vmem:[#allocation7 + $0x64] ss:$16 sps:$4 sm:$0xff]   ;;  %v5811_v42 = vld [vmem:[#allocation7 + $0x68] ss:$16 sps:$4 sm:$0xff]  }
 0x260   :  { %7590 = vst [vmem:[#allocation57_spill] sm:$0xff] %v5805_v19  ;;  %7593 = vst [vmem:[#allocation60_spill] sm:$0xff] %v5811_v42 }
 0x261   :  { %1798 = vmatpush1.bf16.msra.mxu0 %v5784_v17  ;;  %1839 = vmatpush1.bf16.msra.mxu1 %v5786_v13  ;;  %v5807_v17 = vld [vmem:[#allocation7 + $0x6c] ss:$16 sps:$4 sm:$0xff]   ;;  %v5809_v13 = vld [vmem:[#allocation7 + $0x60] ss:$16 sps:$4 sm:$0xff]  }
 0x262   :  { %1799 = vmatprep.subr.bf16.mxu0 %v5793_v5  ;;  %1840 = vmatprep.subr.bf16.mxu1 %v5795_v6  ;;  %7591 = vst [vmem:[#allocation58_spill] sm:$0xff] %v5807_v17  ;;  %7592 = vst [vmem:[#allocation59_spill] sm:$0xff] %v5809_v13  ;;  %v5817_v6 = vld [vmem:[#allocation7 + $0x84] ss:$16 sps:$4 sm:$0xff]   ;;  %v5823_v5 = vld [vmem:[#allocation7 + $0x88] ss:$16 sps:$4 sm:$0xff]  }
 0x263   :  { %7594 = vst [vmem:[#allocation61_spill] sm:$0xff] %v5817_v6  ;;  %7597 = vst [vmem:[#allocation64_spill] sm:$0xff] %v5823_v5 }
 0x265   :  { %1800 = vmatpush1.bf16.msra.mxu0 %v5797_v11  ;;  %1841 = vmatpush1.bf16.msra.mxu1 %v5799_v10  ;;  %v5819_v11 = vld [vmem:[#allocation7 + $0x8c] ss:$16 sps:$4 sm:$0xff]   ;;  %v5821_v10 = vld [vmem:[#allocation7 + $0x80] ss:$16 sps:$4 sm:$0xff]  }
 0x266   :  { %1801 = vmatprep.subr.bf16.mxu0 %v5805_v19  ;;  %1842 = vmatprep.subr.bf16.mxu1 %v5807_v17  ;;  %7595 = vst [vmem:[#allocation62_spill] sm:$0xff] %v5819_v11  ;;  %7596 = vst [vmem:[#allocation63_spill] sm:$0xff] %v5821_v10  ;;  %v5828_v19 = vld [vmem:[#allocation7 + $0xa4] ss:$16 sps:$4 sm:$0xff]   ;;  %v5830_v17 = vld [vmem:[#allocation7 + $0xac] ss:$16 sps:$4 sm:$0xff]  }
 0x267   :  { %7598 = vst [vmem:[#allocation65_spill] sm:$0xff] %v5828_v19  ;;  %7599 = vst [vmem:[#allocation66_spill] sm:$0xff] %v5830_v17 }
 0x269   :  { %1802 = vmatpush1.bf16.msra.mxu0 %v5809_v13  ;;  %1843 = vmatpush1.bf16.msra.mxu1 %v5811_v42  ;;  %v5832_v13 = vld [vmem:[#allocation7 + $0xa0] ss:$16 sps:$4 sm:$0xff]   ;;  %v5835_v42 = vld [vmem:[#allocation7 + $0xa8] ss:$16 sps:$4 sm:$0xff]  }
 0x26a   :  { %1803 = vmatprep.subr.bf16.mxu0 %v5817_v6  ;;  %1844 = vmatprep.subr.bf16.mxu1 %v5819_v11  ;;  %7600 = vst [vmem:[#allocation67_spill] sm:$0xff] %v5832_v13  ;;  %7601 = vst [vmem:[#allocation68_spill] sm:$0xff] %v5835_v42  ;;  %v5841_v6 = vld [vmem:[#allocation7 + $0xcc] ss:$16 sps:$4 sm:$0xff]   ;;  %v5848_v11 = vld [vmem:[#allocation7 + $0xc8] ss:$16 sps:$4 sm:$0xff]  }
 0x26b   :  { %7603 = vst [vmem:[#allocation70_spill] sm:$0xff] %v5841_v6  ;;  %7605 = vst [vmem:[#allocation72_spill] sm:$0xff] %v5848_v11 }
 0x26d   :  { %1804 = vmatpush1.bf16.msra.mxu0 %v5821_v10  ;;  %1845 = vmatpush1.bf16.msra.mxu1 %v5823_v5  ;;  %v5844_v10 = vld [vmem:[#allocation7 + $0xc0] ss:$16 sps:$4 sm:$0xff]   ;;  %v5850_v5 = vld [vmem:[#allocation7 + $0xe4] ss:$16 sps:$4 sm:$0xff]  }
 0x26e   :  { %1805 = vmatprep.subr.bf16.mxu0 %v5828_v19  ;;  %1846 = vmatprep.subr.bf16.mxu1 %v5830_v17  ;;  %7604 = vst [vmem:[#allocation71_spill] sm:$0xff] %v5844_v10  ;;  %7606 = vst [vmem:[#allocation73_spill] sm:$0xff] %v5850_v5  ;;  %v5856_v17 = vld [vmem:[#allocation7 + $0xe0] ss:$16 sps:$4 sm:$0xff]  }
 0x26f   :  { %7608 = vst [vmem:[#allocation75_spill] sm:$0xff] %v5856_v17 }
 0x271   :  { %1806 = vmatpush1.bf16.msra.mxu0 %v5832_v13  ;;  %1847 = vmatpush1.bf16.msra.mxu1 %v5835_v42  ;;  %v5860_v13 = vld [vmem:[#allocation7 + $0xe8] ss:$16 sps:$4 sm:$0xff]   ;;  %v762_v42 = vpop.permute.xlu1 %761 }
 0x272   :  { %1807 = vmatprep.subr.bf16.mxu0 %v5837_v62  ;;  %1848 = vmatprep.subr.bf16.mxu1 %v5841_v6  ;;  %7609 = vst [vmem:[#allocation76_spill] sm:$0xff] %v5860_v13  ;;  %v823_v6 = vlaneseq  ;;  %v752_v62 = vpop.permute.xlu0 %751 }
 0x275   :  { %1808 = vmatpush1.bf16.msra.mxu0 %v5844_v10  ;;  %1849 = vmatpush1.bf16.msra.mxu1 %v5848_v11  ;;  %v5867_v10 = vshrl.u32 %v823_v6, 7 }
 0x276   :  { %1809 = vmatprep.subr.bf16.mxu0 %v5850_v5  ;;  %1850 = vmatprep.subr.bf16.mxu1 %v5853_v63  ;;  %v821_v63 = vld [vmem:[%s7241_s7] sm:$0xf]  ;;  %v757_v6 = vpop.permute.xlu0 %756 }
 0x277   :  { %7610 = vst [vmem:[#allocation77_spill] sm:$0xff] %v5867_v10  ;;  %v7298_v11 = vsub.s32 0, %v5867_v10  ;;  %v7302_v5 = vsub.s32 2, %v5867_v10 }
 0x279   :  { %1810 = vmatpush1.bf16.msra.mxu0 %v5856_v17  ;;  %1851 = vmatpush1.bf16.msra.mxu1 %v5860_v13  ;;  %v7308_v17 = vsub.s32 1, %v5867_v10  ;;  %v7312_v13 = vsub.s32 3, %v5867_v10 }
 0x27a   :  { %1940 = vmatprep.subr.bf16.mxu0 %v5533_v15  ;;  %1981 = vmatprep.subr.bf16.mxu1 %v5535_v16  ;;  %v5878_v15 = vrot.slane %v821_v63, %v7298_v11  ;;  %v5882_v16 = vrot.slane %v821_v63, %v7302_v5 }
 0x27b   :  { %v5886_v58 = vrot.slane %v821_v63, %v7308_v17  ;;  %v5890_v54 = vrot.slane %v821_v63, %v7312_v13 }
 0x2ee   :  { %v637_v19 = vpop.f32.mrb[8].mxu0  ;;  %v710_v61 = vpop.f32.mrb[8].mxu1 }
 0x2ef   :  { %v789_v55 = vmul.f32 %v752_v62, %v637_v19  ;;  %v791_v53 = vmul.f32 %v752_v62, %v710_v61  ;;  %v639_v11 = vpop.f32.mrb[9].mxu0  ;;  %v712_v52 = vpop.f32.mrb[9].mxu1 }
 0x2f0   :  { %v790_v50 = vmul.f32 %v752_v62, %v639_v11  ;;  %v792_v51 = vmul.f32 %v752_v62, %v712_v52  ;;  %v641_v5 = vpop.f32.mrb[10].mxu0  ;;  %v714_v49 = vpop.f32.mrb[10].mxu1 }
 0x2f1   :  { %v843_v48 = vadd.f32 %v5878_v15, %v789_v55  ;;  %v845_v46 = vadd.f32 %v5882_v16, %v791_v53  ;;  %v793_v47 = vmul.f32 %v757_v6, %v641_v5  ;;  %v795_v45 = vmul.f32 %v757_v6, %v714_v49  ;;  %v643_v17 = vpop.f32.mrb[11].mxu0  ;;  %v716_v44 = vpop.f32.mrb[11].mxu1 }
 0x2f2   :  { %v844_v10 = vadd.f32 %v5886_v58, %v790_v50  ;;  %v846_v63 = vadd.f32 %v5890_v54, %v792_v51  ;;  %v794_v19 = vmul.f32 %v757_v6, %v643_v17  ;;  %v796_v61 = vmul.f32 %v757_v6, %v716_v44  ;;  %v767_v49 = vpop.permute.xlu1 %766 }
 0x2f3   :  { %v847_v13 = vadd.f32 %v5878_v15, %v793_v47  ;;  %v849_v52 = vadd.f32 %v5882_v16, %v795_v45 }
 0x2f4   :  { %v848_v62 = vadd.f32 %v5886_v58, %v794_v19  ;;  %v850_v55 = vadd.f32 %v5890_v54, %v796_v61  ;;  %v5900_v11 = vpack.c.bf16 %v844_v10, %v843_v48  ;;  %v5902_v53 = vpack.c.bf16 %v846_v63, %v845_v46 }
 0x2f6   :  { %v647_v5 = vpop.f32.mrb[12].mxu0  ;;  %v720_v8 = vpop.f32.mrb[12].mxu1  ;;  %v5904_v44 = vpack.c.bf16 %v848_v62, %v847_v13  ;;  %v5906_v47 = vpack.c.bf16 %v850_v55, %v849_v52 }
 0x2f7   :  { %v797_v50 = vmul.f32 %v762_v42, %v647_v5  ;;  %v799_v43 = vmul.f32 %v762_v42, %v720_v8  ;;  %v649_v51 = vpop.f32.mrb[13].mxu0  ;;  %v722_v17 = vpop.f32.mrb[13].mxu1 }
 0x2f8   :  { %7611 = vst [vmem:[#allocation78_spill] sm:$0xff] %v5904_v44  ;;  %7612 = vst [vmem:[#allocation79_spill] sm:$0xff] %v5906_v47  ;;  %v798_v45 = vmul.f32 %v762_v42, %v649_v51  ;;  %v800_v6 = vmul.f32 %v762_v42, %v722_v17  ;;  %v651_v19 = vpop.f32.mrb[14].mxu0  ;;  %v724_v41 = vpop.f32.mrb[14].mxu1 }
 0x2f9   :  { %v851_v48 = vadd.f32 %v5878_v15, %v797_v50  ;;  %v853_v46 = vadd.f32 %v5882_v16, %v799_v43  ;;  %v801_v10 = vmul.f32 %v767_v49, %v651_v19  ;;  %v803_v63 = vmul.f32 %v767_v49, %v724_v41  ;;  %v653_v61 = vpop.f32.mrb[15].mxu0  ;;  %v726_v40 = vpop.f32.mrb[15].mxu1 }
 0x2fa   :  { %v852_v8 = vadd.f32 %v5886_v58, %v798_v45  ;;  %v854_v5 = vadd.f32 %v5890_v54, %v800_v6  ;;  %v802_v13 = vmul.f32 %v767_v49, %v653_v61  ;;  %v804_v62 = vmul.f32 %v767_v49, %v726_v40  ;;  %v772_v51 = vpop.permute.xlu0 %771  ;;  %v777_v43 = vpop.permute.xlu1 %776 }
 0x2fb   :  { %v855_v52 = vadd.f32 %v5878_v15, %v801_v10  ;;  %v857_v42 = vadd.f32 %v5882_v16, %v803_v63 }
 0x2fc   :  { %v856_v55 = vadd.f32 %v5886_v58, %v802_v13  ;;  %v858_v50 = vadd.f32 %v5890_v54, %v804_v62  ;;  %v5916_v17 = vpack.c.bf16 %v852_v8, %v851_v48  ;;  %v5918_v41 = vpack.c.bf16 %v854_v5, %v853_v46 }
 0x2fe   :  { %7613 = vst [vmem:[#allocation80_spill] sm:$0xff] %v5916_v17  ;;  %7614 = vst [vmem:[#allocation81_spill] sm:$0xff] %v5918_v41  ;;  %v657_v19 = vpop.f32.mrb[16].mxu0  ;;  %v730_v45 = vpop.f32.mrb[16].mxu1  ;;  %v5920_v47 = vpack.c.bf16 %v856_v55, %v855_v52  ;;  %v5922_v6 = vpack.c.bf16 %v858_v50, %v857_v42 }
 0x2ff   :  { %v805_v40 = vmul.f32 %v772_v51, %v657_v19  ;;  %v807_v49 = vmul.f32 %v772_v51, %v730_v45  ;;  %v659_v10 = vpop.f32.mrb[17].mxu0  ;;  %v732_v63 = vpop.f32.mrb[17].mxu1 }
 0x300   :  { %7615 = vst [vmem:[#allocation82_spill] sm:$0xff] %v5920_v47  ;;  %7616 = vst [vmem:[#allocation83_spill] sm:$0xff] %v5922_v6  ;;  %v806_v61 = vmul.f32 %v772_v51, %v659_v10  ;;  %v808_v13 = vmul.f32 %v772_v51, %v732_v63  ;;  %v661_v44 = vpop.f32.mrb[18].mxu0  ;;  %v734_v62 = vpop.f32.mrb[18].mxu1 }
 0x301   :  { %v859_v38 = vadd.f32 %v5878_v15, %v805_v40  ;;  %v861_v48 = vadd.f32 %v5882_v16, %v807_v49  ;;  %v809_v46 = vmul.f32 %v777_v43, %v661_v44  ;;  %v811_v8 = vmul.f32 %v777_v43, %v734_v62  ;;  %v663_v5 = vpop.f32.mrb[19].mxu0  ;;  %v736_v41 = vpop.f32.mrb[19].mxu1 }
 0x302   :  { %v860_v52 = vadd.f32 %v5886_v58, %v806_v61  ;;  %v862_v42 = vadd.f32 %v5890_v54, %v808_v13  ;;  %v810_v55 = vmul.f32 %v777_v43, %v663_v5  ;;  %v812_v50 = vmul.f32 %v777_v43, %v736_v41  ;;  %v782_v10 = vpop.permute.xlu0 %781  ;;  %v787_v49 = vpop.permute.xlu1 %786 }
 0x303   :  { %v863_v19 = vadd.f32 %v5878_v15, %v809_v46  ;;  %v865_v51 = vadd.f32 %v5882_v16, %v811_v8 }
 0x304   :  { %v864_v45 = vadd.f32 %v5886_v58, %v810_v55  ;;  %v866_v40 = vadd.f32 %v5890_v54, %v812_v50  ;;  %v5932_v44 = vpack.c.bf16 %v860_v52, %v859_v38  ;;  %v5934_v63 = vpack.c.bf16 %v862_v42, %v861_v48 }
 0x306   :  { %7617 = vst [vmem:[#allocation84_spill] sm:$0xff] %v5932_v44  ;;  %7618 = vst [vmem:[#allocation85_spill] sm:$0xff] %v5934_v63  ;;  %v667_v62 = vpop.f32.mrb[20].mxu0  ;;  %v740_v61 = vpop.f32.mrb[20].mxu1  ;;  %v5936_v6 = vpack.c.bf16 %v864_v45, %v863_v19  ;;  %v5938_v13 = vpack.c.bf16 %v866_v40, %v865_v51  ;;  %v6281_v44 = vld [vmem:[#allocation8 + $0xa8] ss:$16 sps:$4 sm:$0xff]  }
 0x307   :  { %v813_v43 = vmul.f32 %v782_v10, %v667_v62  ;;  %v815_v41 = vmul.f32 %v782_v10, %v740_v61  ;;  %v669_v46 = vpop.f32.mrb[21].mxu0  ;;  %v742_v8 = vpop.f32.mrb[21].mxu1 }
 0x308   :  { %7619 = vst [vmem:[#allocation86_spill] sm:$0xff] %v5936_v6  ;;  %7620 = vst [vmem:[#allocation87_spill] sm:$0xff] %v5938_v13  ;;  %v814_v5 = vmul.f32 %v782_v10, %v669_v46  ;;  %v816_v55 = vmul.f32 %v782_v10, %v742_v8  ;;  %v671_v47 = vpop.f32.mrb[22].mxu0  ;;  %v744_v50 = vpop.f32.mrb[22].mxu1  ;;  %v6275_v13 = vld [vmem:[#allocation8 + $0xac] ss:$16 sps:$4 sm:$0xff]  }
 0x309   :  { %v867_v17 = vadd.f32 %v5878_v15, %v813_v43  ;;  %v869_v38 = vadd.f32 %v5882_v16, %v815_v41  ;;  %v817_v48 = vmul.f32 %v787_v49, %v671_v47  ;;  %v819_v52 = vmul.f32 %v787_v49, %v744_v50  ;;  %v673_v42 = vpop.f32.mrb[23].mxu0  ;;  %v746_v63 = vpop.f32.mrb[23].mxu1  ;;  %v6278_v6 = vld [vmem:[#allocation8 + $0xa0] ss:$16 sps:$4 sm:$0xff]  }
 0x30a   :  { %v868_v19 = vadd.f32 %v5886_v58, %v814_v5  ;;  %v870_v51 = vadd.f32 %v5890_v54, %v816_v55  ;;  %v818_v45 = vmul.f32 %v787_v49, %v673_v42  ;;  %v820_v40 = vmul.f32 %v787_v49, %v746_v63 }
 0x30b   :  { %v871_v62 = vadd.f32 %v5878_v15, %v817_v48  ;;  %v873_v10 = vadd.f32 %v5882_v16, %v819_v52  ;;  %v1118_v41 = vunpack.c.l.bf16 %v5900_v11  ;;  %v1120_v47 = vunpack.c.l.bf16 %v5902_v53 }
 0x30c   :  { %v872_v61 = vadd.f32 %v5886_v58, %v818_v45  ;;  %v874_v43 = vadd.f32 %v5890_v54, %v820_v40  ;;  %v5950_v46 = vpack.c.bf16 %v868_v19, %v867_v17  ;;  %v5952_v8 = vpack.c.bf16 %v870_v51, %v869_v38 }
 0x30d   :  { %v1119_v49 = vunpack.c.h.bf16 %v5900_v11  ;;  %v1121_v15 = vunpack.c.h.bf16 %v5902_v53 }
 0x30e   :  { %7621 = vst [vmem:[#allocation88_spill] sm:$0xff] %v5950_v46  ;;  %7622 = vst [vmem:[#allocation89_spill] sm:$0xff] %v5952_v8  ;;  %v1316_v5 = vpop.f32.mrb[24].mxu0  ;;  %v1357_v55 = vpop.f32.mrb[24].mxu1  ;;  %v5956_v63 = vpack.c.bf16 %v872_v61, %v871_v62  ;;  %v5958_v16 = vpack.c.bf16 %v874_v43, %v873_v10  ;;  %v6269_v8 = vld [vmem:[#allocation8 + $0x88] ss:$16 sps:$4 sm:$0xff]  }
 0x30f   :  { %v1364_v58 = vadd.f32 %v1316_v5, %v1118_v41  ;;  %v1366_v54 = vadd.f32 %v1357_v55, %v1120_v47  ;;  %v1318_v50 = vpop.f32.mrb[25].mxu0  ;;  %v1359_v48 = vpop.f32.mrb[25].mxu1  ;;  %v6272_v46 = vld [vmem:[#allocation8 + $0xa4] ss:$16 sps:$4 sm:$0xff]  }
 0x310   :  { %7623 = vst [vmem:[#allocation90_spill] sm:$0xff] %v5956_v63  ;;  %7624 = vst [vmem:[#allocation91_spill] sm:$0xff] %v5958_v16  ;;  %v1365_v52 = vadd.f32 %v1318_v50, %v1119_v49  ;;  %v1367_v42 = vadd.f32 %v1359_v48, %v1121_v15  ;;  %v1320_v17 = vpop.f32.mrb[26].mxu0  ;;  %v1361_v19 = vpop.f32.mrb[26].mxu1  ;;  %v6263_v16 = vld [vmem:[#allocation8 + $0x8c] ss:$16 sps:$4 sm:$0xff]  }
 0x311   :  { %v4269_v38 = vmul.f32 -1.442695, %v1364_v58  ;;  %v1321_v51 = vpop.f32.mrb[27].mxu0  ;;  %v1362_v45 = vpop.f32.mrb[27].mxu1  ;;  %v7650_v17 = vld [vmem:[#allocation40_spill] sm:$0xff]  ;;  %v7651_v19 = vld [vmem:[#allocation41_spill] sm:$0xff] }
 0x312   :  { %v4270_v40 = vmul.f32 -1.442695, %v1365_v52  ;;  %v4271_v11 = vmul.f32 -1.442695, %v1367_v42  ;;  %v7653_v51 = vld [vmem:[#allocation42_spill] sm:$0xff]  ;;  %v7654_v45 = vld [vmem:[#allocation44_spill] sm:$0xff] }
 0x313   :  { %4674 = vpow2.f32 %v4269_v38  ;;  %v7652_v38 = vld [vmem:[#allocation43_spill] sm:$0xff] }
 0x314   :  { %4676 = vpow2.f32 %v4270_v40  ;;  %v7655_v40 = vld [vmem:[#allocation45_spill] sm:$0xff] }
 0x315   :  { %4678 = vpow2.f32 %v4271_v11  ;;  %v7656_v11 = vld [vmem:[#allocation46_spill] sm:$0xff]  ;;  %v6266_v63 = vld [vmem:[#allocation8 + $0x80] ss:$16 sps:$4 sm:$0xff]  }
 0x316   :  { %4680 = vtanh.f32 %v1366_v54  ;;  %v7649_v54 = vld [vmem:[#allocation38_spill] sm:$0xff] }
 0x31d   :  { %v4675_v53 = vpop.eup %4674 }
 0x31e   :  { %v4677_v62 = vpop.eup %4676  ;;  %v1371_v61 = vadd.f32 1.0, %v4675_v53  ;;  %v7657_v53 = vld [vmem:[#allocation14_spill] sm:$0xff] }
 0x31f   :  { %v1377_v10 = vadd.f32 1.0, %v4677_v62  ;;  %v4679_v43 = vpop.eup %4678  ;;  %vm2244_vm6 = vcmp.eq.s32.totalorder %v7657_v53, 1  ;;  %vm2880_vm7 = vcmp.eq.s32.totalorder %v7657_v53, 3  ;;  %vm3516_vm8 = vcmp.eq.s32.totalorder %v7657_v53, 5 }
 0x320   :  { %4682 = vrcp.f32 %v1371_v61  ;;  %v4681_v41 = vpop.eup %4680  ;;  %v1384_v49 = vadd.f32 1.0, %v4679_v43  ;;  %v2245_v62 = vsel %vm2244_vm6, 1, %v7579_v12  ;;  %v2881_v61 = vsel %vm2880_vm7, 1, %v7579_v12  ;;  %v1115_v43 = vld [vmem:[#allocation10] sm:$0xf] }
 0x321   :  { %4684 = vrcp.f32 %v1377_v10  ;;  %2247 = vperm.xlu1 %4463, %v2245_v62   ;;  %v3517_v10 = vsel %vm3516_vm8, 1, %v7579_v12  ;;  %vm4152_vm9 = vcmp.eq.s32.totalorder %v7657_v53, 7 }
 0x322   :  { %4686 = vrcp.f32 %v1384_v49 }
 0x325   :  { %2883 = vperm.xlu1 %4463, %v2881_v61  }
 0x329   :  { %3519 = vperm.xlu1 %4463, %v3517_v10  }
 0x32a   :  { %v4683_v47 = vpop.eup %4682 }
 0x32b   :  { %v4685_v5 = vpop.eup %4684  ;;  %v1388_v55 = vmul.f32 %v4683_v47, %v4681_v41  ;;  %v4153_v41 = vsel %vm4152_vm9, 1, %v7579_v12  ;;  %v7658_v47 = vld [vmem:[#allocation77_spill] sm:$0xff] }
 0x32c   :  { %v1387_v15 = vmul.f32 0.0, %v4685_v5  ;;  %v4687_v50 = vpop.eup %4686  ;;  %v7659_v5 = vsub.s32 0, %v7658_v47 }
 0x32d   :  { %4155 = vperm.xlu1 %4463, %v4153_v41  }
 0x32e   :  { %v5960_v58 = vadd.f32 %v1388_v55, %v1387_v15  ;;  %v6041_v55 = vrot.slane %v1115_v43, %v7659_v5 }
 0x330   :  { %4688 = vtanh.f32 %v5960_v58 }
 0x33a   :  { %v4689_v48 = vpop.eup %4688 }
 0x33b   :  { %v1391_v52 = vmul.f32 %v4689_v48, %v4687_v50  ;;  %v7660_v50 = vsub.s32 1, %v7658_v47 }
 0x33d   :  { %v1392_v42 = vpack.c.bf16 %v1391_v52, %v1391_v52  ;;  %v6045_v48 = vrot.slane %v1115_v43, %v7660_v50 }
 0x33f   :  { %1828 = vmatmul.mubr.bf16.vlgmr.msra.gmra.mrb[32].mxu0 %v1392_v42  ;;  %1869 = vmatmul.mubr.bf16.vlgmr.msra.gmra.mrb[32].mxu1 %v1392_v42 }
 0x340   :  { %1941 = vmatpush1.bf16.msra.mxu0 %v5567_v56  ;;  %1982 = vmatpush1.bf16.msra.mxu1 %v5569_v57  ;;  %v7625_v56 = vld [vmem:[#allocation15_spill] sm:$0xff]  ;;  %v7626_v57 = vld [vmem:[#allocation16_spill] sm:$0xff] }
 0x341   :  { %1942 = vmatprep.subr.bf16.mxu0 %v5571_v59  ;;  %1983 = vmatprep.subr.bf16.mxu1 %v5573_v60  ;;  %v7627_v59 = vld [vmem:[#allocation17_spill] sm:$0xff]  ;;  %v7628_v60 = vld [vmem:[#allocation19_spill] sm:$0xff] }
 0x342   :  { %1972 = vmatprep.mubr.bf16.mxu0 %v7579_v12  ;;  %2013 = vmatprep.mubr.bf16.mxu1 %v7579_v12 }
 0x344   :  { %1943 = vmatpush1.bf16.msra.mxu0 %v5577_v0  ;;  %1984 = vmatpush1.bf16.msra.mxu1 %v5579_v1  ;;  %v7629_v0 = vld [vmem:[#allocation18_spill] sm:$0xff]  ;;  %v7630_v1 = vld [vmem:[#allocation20_spill] sm:$0xff] }
 0x345   :  { %1944 = vmatprep.subr.bf16.mxu0 %v5583_v7  ;;  %1985 = vmatprep.subr.bf16.mxu1 %v5585_v9  ;;  %v7631_v7 = vld [vmem:[#allocation21_spill] sm:$0xff]  ;;  %v7632_v9 = vld [vmem:[#allocation23_spill] sm:$0xff] }
 0x348   :  { %1945 = vmatpush1.bf16.msra.mxu0 %v5591_v14  ;;  %1986 = vmatpush1.bf16.msra.mxu1 %v5593_v18  ;;  %v7633_v14 = vld [vmem:[#allocation22_spill] sm:$0xff]  ;;  %v7634_v18 = vld [vmem:[#allocation24_spill] sm:$0xff] }
 0x349   :  { %1946 = vmatprep.subr.bf16.mxu0 %v5597_v20  ;;  %1987 = vmatprep.subr.bf16.mxu1 %v5599_v21  ;;  %v7635_v20 = vld [vmem:[#allocation25_spill] sm:$0xff]  ;;  %v7636_v21 = vld [vmem:[#allocation27_spill] sm:$0xff] }
 0x34c   :  { %1947 = vmatpush1.bf16.msra.mxu0 %v5603_v22  ;;  %1988 = vmatpush1.bf16.msra.mxu1 %v5605_v23  ;;  %v7637_v22 = vld [vmem:[#allocation26_spill] sm:$0xff]  ;;  %v7638_v23 = vld [vmem:[#allocation28_spill] sm:$0xff] }
 0x34d   :  { %1948 = vmatprep.subr.bf16.mxu0 %v5609_v24  ;;  %1989 = vmatprep.subr.bf16.mxu1 %v5611_v25  ;;  %v7639_v24 = vld [vmem:[#allocation29_spill] sm:$0xff]  ;;  %v7640_v25 = vld [vmem:[#allocation31_spill] sm:$0xff] }
 0x350   :  { %1949 = vmatpush1.bf16.msra.mxu0 %v5617_v26  ;;  %1990 = vmatpush1.bf16.msra.mxu1 %v5619_v27  ;;  %v7641_v26 = vld [vmem:[#allocation30_spill] sm:$0xff]  ;;  %v7642_v27 = vld [vmem:[#allocation32_spill] sm:$0xff] }
 0x351   :  { %1950 = vmatprep.subr.bf16.mxu0 %v5623_v2  ;;  %1991 = vmatprep.subr.bf16.mxu1 %v5625_v28  ;;  %v1587_v2 = vpop.f32.mrb[28].mxu0  ;;  %v7643_v28 = vld [vmem:[#allocation33_spill] sm:$0xff] }
 0x354   :  { %1951 = vmatpush1.bf16.msra.mxu0 %v5629_v29  ;;  %1992 = vmatpush1.bf16.msra.mxu1 %v5631_v30  ;;  %v7644_v29 = vld [vmem:[#allocation35_spill] sm:$0xff]  ;;  %v1589_v30 = vpop.f32.mrb[29].mxu0 }
 0x355   :  { %1952 = vmatprep.subr.bf16.mxu0 %v5635_v31  ;;  %1993 = vmatprep.subr.bf16.mxu1 %v5637_v3  ;;  %v1591_v31 = vpop.f32.mrb[30].mxu0  ;;  %v1628_v3 = vpop.f32.mrb[28].mxu1 }
 0x358   :  { %1953 = vmatpush1.bf16.msra.mxu0 %v5643_v32  ;;  %1994 = vmatpush1.bf16.msra.mxu1 %v5645_v33  ;;  %v1592_v32 = vpop.f32.mrb[31].mxu0  ;;  %v1630_v33 = vpop.f32.mrb[29].mxu1 }
 0x359   :  { %1954 = vmatprep.subr.bf16.mxu0 %v5649_v34  ;;  %1995 = vmatprep.subr.bf16.mxu1 %v5651_v35  ;;  %v7645_v34 = vld [vmem:[#allocation34_spill] sm:$0xff]  ;;  %v7646_v35 = vld [vmem:[#allocation36_spill] sm:$0xff] }
 0x35c   :  { %1955 = vmatpush1.bf16.msra.mxu0 %v5655_v36  ;;  %1996 = vmatpush1.bf16.msra.mxu1 %v5657_v4  ;;  %v1632_v36 = vpop.f32.mrb[30].mxu1  ;;  %v7647_v4 = vld [vmem:[#allocation37_spill] sm:$0xff] }
 0x35d   :  { %2052 = vmatprep.subr.bf16.mxu0 %v5669_v37  ;;  %2093 = vmatprep.subr.bf16.mxu1 %v5673_v39  ;;  %v7648_v37 = vld [vmem:[#allocation39_spill] sm:$0xff]  ;;  %v1633_v39 = vpop.f32.mrb[31].mxu1 }
 0x35e   :  { %v7666_v39 = vld [vmem:[#allocation79_spill] sm:$0xff] }
 0x35f   :  { %1973 = vmatmul.mubr.bf16.vlgmr.msra.gmra.mrb[36].mxu0 %v1392_v42  ;;  %2014 = vmatmul.mubr.bf16.vlgmr.msra.gmra.mrb[36].mxu1 %v1392_v42  ;;  %7730 = vst [vmem:[#allocation79_spill] sm:$0xff] %v6263_v16 }
 0x360   :  { %2053 = vmatpush1.bf16.msra.mxu0 %v7625_v56  ;;  %2094 = vmatpush1.bf16.msra.mxu1 %v7626_v57 }
 0x361   :  { %2054 = vmatprep.subr.bf16.mxu0 %v7627_v59  ;;  %2095 = vmatprep.subr.bf16.mxu1 %v7628_v60 }
 0x362   :  { %2084 = vmatprep.mubr.bf16.mxu0 %v7579_v12  ;;  %2125 = vmatprep.mubr.bf16.mxu1 %v7579_v12 }
 0x364   :  { %2055 = vmatpush1.bf16.msra.mxu0 %v7629_v0  ;;  %2096 = vmatpush1.bf16.msra.mxu1 %v7630_v1 }
 0x365   :  { %2056 = vmatprep.subr.bf16.mxu0 %v7631_v7  ;;  %2097 = vmatprep.subr.bf16.mxu1 %v7632_v9 }
 0x368   :  { %2057 = vmatpush1.bf16.msra.mxu0 %v7633_v14  ;;  %2098 = vmatpush1.bf16.msra.mxu1 %v7634_v18 }
 0x369   :  { %2058 = vmatprep.subr.bf16.mxu0 %v7635_v20  ;;  %2099 = vmatprep.subr.bf16.mxu1 %v7636_v21 }
 0x36c   :  { %2059 = vmatpush1.bf16.msra.mxu0 %v7637_v22  ;;  %2100 = vmatpush1.bf16.msra.mxu1 %v7638_v23  ;;  %v7661_v22 = vsub.s32 3, %v7658_v47 }
 0x36d   :  { %2060 = vmatprep.subr.bf16.mxu0 %v7639_v24  ;;  %2101 = vmatprep.subr.bf16.mxu1 %v7640_v25  ;;  %v7663_v25 = vsub.s32 2, %v7658_v47 }
 0x36e   :  { %v6051_v23 = vrot.slane %v1115_v43, %v7661_v22  ;;  %v7672_v22 = vld [vmem:[#allocation52_spill] sm:$0xff] }
 0x36f   :  { %7736 = vst [vmem:[#allocation52_spill] sm:$0xff] %v6281_v44 }
 0x370   :  { %2061 = vmatpush1.bf16.msra.mxu0 %v7641_v26  ;;  %2102 = vmatpush1.bf16.msra.mxu1 %v7642_v27  ;;  %7662 = vst [vmem:[#allocation15_spill] sm:$0xff] %v6051_v23  ;;  %v6056_v26 = vrot.slane %v1115_v43, %v7663_v25  ;;  %v7674_v25 = vld [vmem:[#allocation54_spill] sm:$0xff] }
 0x371   :  { %2062 = vmatprep.subr.bf16.mxu0 %v7643_v28  ;;  %2103 = vmatprep.subr.bf16.mxu1 %v7644_v29 }
 0x372   :  { %7664 = vst [vmem:[#allocation16_spill] sm:$0xff] %v6056_v26 }
 0x374   :  { %2063 = vmatpush1.bf16.msra.mxu0 %v7645_v34  ;;  %2104 = vmatpush1.bf16.msra.mxu1 %v7646_v35 }
 0x375   :  { %2064 = vmatprep.subr.bf16.mxu0 %v7647_v4  ;;  %2105 = vmatprep.subr.bf16.mxu1 %v7648_v37  ;;  %v7665_v4 = vld [vmem:[#allocation78_spill] sm:$0xff] }
 0x376   :  { %v1936_v37 = vunpack.c.l.bf16 %v7665_v4 }
 0x378   :  { %2065 = vmatpush1.bf16.msra.mxu0 %v7649_v54  ;;  %2106 = vmatpush1.bf16.msra.mxu1 %v7650_v17  ;;  %v1938_v54 = vunpack.c.l.bf16 %v7666_v39 }
 0x379   :  { %2066 = vmatprep.subr.bf16.mxu0 %v7651_v19  ;;  %2107 = vmatprep.subr.bf16.mxu1 %v7652_v38 }
 0x37c   :  { %2067 = vmatpush1.bf16.msra.mxu0 %v7653_v51  ;;  %2108 = vmatpush1.bf16.msra.mxu1 %v7654_v45  ;;  %v1937_v51 = vunpack.c.h.bf16 %v7665_v4  ;;  %v1939_v45 = vunpack.c.h.bf16 %v7666_v39  ;;  %v7679_v4 = vld [vmem:[#allocation59_spill] sm:$0xff]  ;;  %v7681_v39 = vld [vmem:[#allocation61_spill] sm:$0xff] }
 0x37d   :  { %2134 = vmatprep.subr.bf16.mxu0 %v7655_v40  ;;  %2175 = vmatprep.subr.bf16.mxu1 %v7656_v11 }
 0x412   :  { %v1829_v49 = vpop.f32.mrb[32].mxu0  ;;  %v1870_v15 = vpop.f32.mrb[32].mxu1 }
 0x413   :  { %v1830_v52 = vadd.f32 %v1829_v49, %v1587_v2  ;;  %v1871_v42 = vadd.f32 %v1870_v15, %v1628_v3  ;;  %v1831_v56 = vpop.f32.mrb[33].mxu0  ;;  %v1872_v57 = vpop.f32.mrb[33].mxu1 }
 0x414   :  { %v1832_v59 = vadd.f32 %v1831_v56, %v1589_v30  ;;  %v1873_v60 = vadd.f32 %v1872_v57, %v1630_v33  ;;  %v1833_v0 = vpop.f32.mrb[34].mxu0  ;;  %v1874_v1 = vpop.f32.mrb[34].mxu1 }
 0x415   :  { %v1898_v7 = vadd.f32 %v6041_v55, %v1830_v52  ;;  %v1834_v9 = vpop.f32.mrb[35].mxu0  ;;  %v1875_v14 = vpop.f32.mrb[35].mxu1  ;;  %v1900_v2 = vadd.f32 %v6056_v26, %v1871_v42 }
 0x416   :  { %v1899_v18 = vadd.f32 %v6045_v48, %v1832_v59  ;;  %v1901_v24 = vadd.f32 %v6051_v23, %v1873_v60  ;;  %v7667_v9 = vld [vmem:[#allocation47_spill] sm:$0xff]  ;;  %v7668_v14 = vld [vmem:[#allocation48_spill] sm:$0xff] }
 0x417   :  { %v4336_v20 = vmul.f32 -1.442695, %v1898_v7  ;;  %7731 = vst [vmem:[#allocation47_spill] sm:$0xff] %v6266_v63  ;;  %7732 = vst [vmem:[#allocation48_spill] sm:$0xff] %v6269_v8 }
 0x418   :  { %v4337_v21 = vmul.f32 -1.442695, %v1899_v18  ;;  %v4338_v27 = vmul.f32 -1.442695, %v1901_v24  ;;  %v7669_v18 = vld [vmem:[#allocation49_spill] sm:$0xff] }
 0x419   :  { %4690 = vpow2.f32 %v4336_v20  ;;  %v7670_v20 = vld [vmem:[#allocation50_spill] sm:$0xff]  ;;  %v7673_v24 = vld [vmem:[#allocation53_spill] sm:$0xff]  ;;  %7733 = vst [vmem:[#allocation49_spill] sm:$0xff] %v6272_v46 }
 0x41a   :  { %4692 = vpow2.f32 %v4337_v21  ;;  %v7671_v21 = vld [vmem:[#allocation51_spill] sm:$0xff]  ;;  %7734 = vst [vmem:[#allocation50_spill] sm:$0xff] %v6275_v13 }
 0x41b   :  { %4694 = vpow2.f32 %v4338_v27  ;;  %7735 = vst [vmem:[#allocation51_spill] sm:$0xff] %v6278_v6 }
 0x41c   :  { %4696 = vtanh.f32 %v1900_v2 }
 0x423   :  { %v4691_v28 = vpop.eup %4690 }
 0x424   :  { %v4693_v29 = vpop.eup %4692  ;;  %v1905_v30 = vadd.f32 1.0, %v4691_v28 }
 0x425   :  { %v1911_v31 = vadd.f32 1.0, %v4693_v29  ;;  %v4695_v3 = vpop.eup %4694  ;;  %v7675_v29 = vld [vmem:[#allocation55_spill] sm:$0xff] }
 0x426   :  { %4698 = vrcp.f32 %v1905_v30  ;;  %v4697_v32 = vpop.eup %4696  ;;  %v1918_v36 = vadd.f32 1.0, %v4695_v3  ;;  %v7676_v30 = vld [vmem:[#allocation56_spill] sm:$0xff] }
 0x427   :  { %4700 = vrcp.f32 %v1911_v31 }
 0x428   :  { %4702 = vrcp.f32 %v1918_v36 }
 0x430   :  { %v4699_v33 = vpop.eup %4698 }
 0x431   :  { %v4701_v34 = vpop.eup %4700  ;;  %v1922_v35 = vmul.f32 %v4699_v33, %v4697_v32  ;;  %v7677_v33 = vld [vmem:[#allocation57_spill] sm:$0xff] }
 0x432   :  { %v1921_v17 = vmul.f32 0.0, %v4701_v34  ;;  %v1974_v19 = vpop.f32.mrb[36].mxu0  ;;  %v2015_v38 = vpop.f32.mrb[36].mxu1  ;;  %v7678_v34 = vld [vmem:[#allocation58_spill] sm:$0xff] }
 0x433   :  { %v2022_v40 = vadd.f32 %v1974_v19, %v1936_v37  ;;  %v2024_v11 = vadd.f32 %v2015_v38, %v1938_v54  ;;  %v1976_v53 = vpop.f32.mrb[37].mxu0  ;;  %v2017_v62 = vpop.f32.mrb[37].mxu1  ;;  %v7680_v37 = vld [vmem:[#allocation60_spill] sm:$0xff]  ;;  %v7682_v54 = vld [vmem:[#allocation62_spill] sm:$0xff]  ;;  %v7685_v38 = vld [vmem:[#allocation65_spill] sm:$0xff] }
 0x434   :  { %v6063_v61 = vadd.f32 %v1922_v35, %v1921_v17  ;;  %v2023_v10 = vadd.f32 %v1976_v53, %v1937_v51  ;;  %v2025_v43 = vadd.f32 %v2017_v62, %v1939_v45  ;;  %v1978_v41 = vpop.f32.mrb[38].mxu0  ;;  %v2019_v47 = vpop.f32.mrb[38].mxu1  ;;  %v7683_v17 = vld [vmem:[#allocation63_spill] sm:$0xff]  ;;  %v7684_v19 = vld [vmem:[#allocation64_spill] sm:$0xff] }
 0x435   :  { %v4339_v5 = vmul.f32 -1.442695, %v2022_v40  ;;  %v1979_v49 = vpop.f32.mrb[39].mxu0  ;;  %v2020_v15 = vpop.f32.mrb[39].mxu1  ;;  %v7687_v51 = vld [vmem:[#allocation67_spill] sm:$0xff]  ;;  %v7688_v45 = vld [vmem:[#allocation68_spill] sm:$0xff] }
 0x436   :  { %4704 = vtanh.f32 %v6063_v61  ;;  %v4340_v50 = vmul.f32 -1.442695, %v2023_v10  ;;  %v4341_v52 = vmul.f32 -1.442695, %v2025_v43  ;;  %v4703_v42 = vpop.eup %4702  ;;  %v7689_v40 = vld [vmem:[#allocation69_spill] sm:$0xff]  ;;  %v7691_v10 = vld [vmem:[#allocation71_spill] sm:$0xff] }
 0x437   :  { %4706 = vpow2.f32 %v4339_v5  ;;  %v7692_v43 = vld [vmem:[#allocation72_spill] sm:$0xff]  ;;  %v7693_v41 = vld [vmem:[#allocation73_spill] sm:$0xff]  ;;  %v7694_v47 = vld [vmem:[#allocation74_spill] sm:$0xff] }
 0x438   :  { %4708 = vpow2.f32 %v4340_v50  ;;  %v7695_v49 = vld [vmem:[#allocation75_spill] sm:$0xff]  ;;  %v7696_v15 = vld [vmem:[#allocation76_spill] sm:$0xff] }
 0x439   :  { %4710 = vpow2.f32 %v4341_v52  ;;  %v6108_v52 = vld [vmem:[#allocation5 + $0x4] ss:$16 sps:$4 sm:$0xff]  }
 0x43a   :  { %4712 = vtanh.f32 %v2024_v11  ;;  %v7690_v11 = vld [vmem:[#allocation70_spill] sm:$0xff] }
 0x440   :  { %v4705_v56 = vpop.eup %4704 }
 0x441   :  { %v4707_v57 = vpop.eup %4706  ;;  %v6066_v59 = vmul.f32 %v4705_v56, %v4703_v42  ;;  %v6111_v42 = vld [vmem:[#allocation5 + $0xc] ss:$16 sps:$4 sm:$0xff]   ;;  %v6116_v56 = vld [vmem:[#allocation5] ss:$16 sps:$4 sm:$0xff]  }
 0x442   :  { %v4709_v60 = vpop.eup %4708  ;;  %v2029_v0 = vadd.f32 1.0, %v4707_v57  ;;  %v6119_v57 = vld [vmem:[#allocation5 + $0x8] ss:$16 sps:$4 sm:$0xff]  }
 0x443   :  { %v2035_v1 = vadd.f32 1.0, %v4709_v60  ;;  %v2051_v7 = vpack.c.bf16 %v6066_v59, %v6066_v59  ;;  %v4711_v27 = vpop.eup %4710  ;;  %v6122_v60 = vld [vmem:[#allocation5 + $0x24] ss:$16 sps:$4 sm:$0xff]  }
 0x444   :  { %4714 = vrcp.f32 %v2029_v0  ;;  %v4713_v2 = vpop.eup %4712  ;;  %v2042_v32 = vadd.f32 1.0, %v4711_v27  ;;  %v6125_v0 = vld [vmem:[#allocation5 + $0x2c] ss:$16 sps:$4 sm:$0xff]   ;;  %v6160_v27 = vld [vmem:[#allocation5 + $0x84] ss:$16 sps:$4 sm:$0xff]  }
 0x445   :  { %4716 = vrcp.f32 %v2035_v1  ;;  %2085 = vmatmul.mubr.bf16.vlgmr.msra.gmra.mrb[40].mxu0 %v2051_v7  ;;  %2126 = vmatmul.mubr.bf16.vlgmr.msra.gmra.mrb[40].mxu1 %v2051_v7  ;;  %v6130_v1 = vld [vmem:[#allocation5 + $0x20] ss:$16 sps:$4 sm:$0xff]   ;;  %v6133_v7 = vld [vmem:[#allocation5 + $0x28] ss:$16 sps:$4 sm:$0xff]   ;;  %7697 = vst [vmem:[#allocation17_spill] sm:$0xff] %v6160_v27 }
 0x446   :  { %2135 = vmatpush1.bf16.msra.mxu0 %v7667_v9  ;;  %2176 = vmatpush1.bf16.msra.mxu1 %v7668_v14  ;;  %4718 = vrcp.f32 %v2042_v32  ;;  %v6136_v9 = vld [vmem:[#allocation5 + $0x44] ss:$16 sps:$4 sm:$0xff]   ;;  %v6139_v14 = vld [vmem:[#allocation5 + $0x4c] ss:$16 sps:$4 sm:$0xff]   ;;  %v6181_v32 = vld [vmem:[#allocation5 + $0xa8] ss:$16 sps:$4 sm:$0xff]  }
 0x447   :  { %2136 = vmatprep.subr.bf16.mxu0 %v7669_v18  ;;  %2177 = vmatprep.subr.bf16.mxu1 %v7670_v20  ;;  %v6142_v18 = vld [vmem:[#allocation5 + $0x40] ss:$16 sps:$4 sm:$0xff]   ;;  %v6145_v20 = vld [vmem:[#allocation5 + $0x48] ss:$16 sps:$4 sm:$0xff]   ;;  %7704 = vst [vmem:[#allocation24_spill] sm:$0xff] %v6181_v32 }
 0x448   :  { %2166 = vmatprep.mubr.bf16.mxu0 %v7579_v12  ;;  %2207 = vmatprep.mubr.bf16.mxu1 %v7579_v12 }
 0x44a   :  { %2137 = vmatpush1.bf16.msra.mxu0 %v7671_v21  ;;  %2178 = vmatpush1.bf16.msra.mxu1 %v7672_v22  ;;  %v6148_v21 = vld [vmem:[#allocation5 + $0x64] ss:$16 sps:$4 sm:$0xff]   ;;  %v6151_v22 = vld [vmem:[#allocation5 + $0x6c] ss:$16 sps:$4 sm:$0xff]  }
 0x44b   :  { %2138 = vmatprep.subr.bf16.mxu0 %v7673_v24  ;;  %2179 = vmatprep.subr.bf16.mxu1 %v7674_v25  ;;  %v6154_v24 = vld [vmem:[#allocation5 + $0x60] ss:$16 sps:$4 sm:$0xff]   ;;  %v6157_v25 = vld [vmem:[#allocation5 + $0x68] ss:$16 sps:$4 sm:$0xff]  }
 0x44e   :  { %v4715_v28 = vpop.eup %4714  ;;  %2139 = vmatpush1.bf16.msra.mxu0 %v7675_v29  ;;  %2180 = vmatpush1.bf16.msra.mxu1 %v7676_v30  ;;  %v6169_v29 = vld [vmem:[#allocation5 + $0x88] ss:$16 sps:$4 sm:$0xff]   ;;  %v6172_v30 = vld [vmem:[#allocation5 + $0xa4] ss:$16 sps:$4 sm:$0xff]  }
 0x44f   :  { %v4717_v31 = vpop.eup %4716  ;;  %v2046_v3 = vmul.f32 %v4715_v28, %v4713_v2  ;;  %2140 = vmatprep.subr.bf16.mxu0 %v7677_v33  ;;  %2181 = vmatprep.subr.bf16.mxu1 %v7678_v34  ;;  %v6163_v2 = vld [vmem:[#allocation5 + $0x8c] ss:$16 sps:$4 sm:$0xff]   ;;  %v6166_v28 = vld [vmem:[#allocation5 + $0x80] ss:$16 sps:$4 sm:$0xff]   ;;  %7700 = vst [vmem:[#allocation20_spill] sm:$0xff] %v6169_v29  ;;  %7701 = vst [vmem:[#allocation21_spill] sm:$0xff] %v6172_v30 }
 0x450   :  { %v2045_v35 = vmul.f32 %v4717_v31, %v5960_v58  ;;  %v7686_v58 = vld [vmem:[#allocation66_spill] sm:$0xff]  ;;  %v4719_v53 = vpop.eup %4718  ;;  %7698 = vst [vmem:[#allocation19_spill] sm:$0xff] %v6163_v2  ;;  %7699 = vst [vmem:[#allocation18_spill] sm:$0xff] %v6166_v28  ;;  %v6175_v31 = vld [vmem:[#allocation5 + $0xac] ss:$16 sps:$4 sm:$0xff]  }
 0x451   :  { %7702 = vst [vmem:[#allocation23_spill] sm:$0xff] %v6175_v31  ;;  %v6184_v33 = vld [vmem:[#allocation5 + $0xc4] ss:$16 sps:$4 sm:$0xff]   ;;  %v6187_v34 = vld [vmem:[#allocation5 + $0xcc] ss:$16 sps:$4 sm:$0xff]  }
 0x452   :  { %v6085_v36 = vadd.f32 %v2046_v3, %v2045_v35  ;;  %2141 = vmatpush1.bf16.msra.mxu0 %v7679_v4  ;;  %2182 = vmatpush1.bf16.msra.mxu1 %v7680_v37  ;;  %v6178_v3 = vld [vmem:[#allocation5 + $0xa0] ss:$16 sps:$4 sm:$0xff]   ;;  %7705 = vst [vmem:[#allocation25_spill] sm:$0xff] %v6184_v33  ;;  %7706 = vst [vmem:[#allocation27_spill] sm:$0xff] %v6187_v34  ;;  %v6193_v4 = vld [vmem:[#allocation5 + $0xc8] ss:$16 sps:$4 sm:$0xff]  }
 0x453   :  { %2142 = vmatprep.subr.bf16.mxu0 %v7681_v39  ;;  %2183 = vmatprep.subr.bf16.mxu1 %v7682_v54  ;;  %7703 = vst [vmem:[#allocation22_spill] sm:$0xff] %v6178_v3  ;;  %v6190_v35 = vld [vmem:[#allocation5 + $0xc0] ss:$16 sps:$4 sm:$0xff]   ;;  %7708 = vst [vmem:[#allocation28_spill] sm:$0xff] %v6193_v4  ;;  %v6196_v37 = vld [vmem:[#allocation5 + $0xe4] ss:$16 sps:$4 sm:$0xff]  }
 0x454   :  { %4720 = vtanh.f32 %v6085_v36  ;;  %7707 = vst [vmem:[#allocation26_spill] sm:$0xff] %v6190_v35  ;;  %7709 = vst [vmem:[#allocation29_spill] sm:$0xff] %v6196_v37  ;;  %v6199_v39 = vld [vmem:[#allocation5 + $0xec] ss:$16 sps:$4 sm:$0xff]   ;;  %v6202_v54 = vld [vmem:[#allocation5 + $0xe0] ss:$16 sps:$4 sm:$0xff]  }
 0x455   :  { %7710 = vst [vmem:[#allocation31_spill] sm:$0xff] %v6199_v39  ;;  %7711 = vst [vmem:[#allocation30_spill] sm:$0xff] %v6202_v54 }
 0x456   :  { %2143 = vmatpush1.bf16.msra.mxu0 %v7683_v17  ;;  %2184 = vmatpush1.bf16.msra.mxu1 %v7684_v19  ;;  %v6205_v17 = vld [vmem:[#allocation5 + $0xe8] ss:$16 sps:$4 sm:$0xff]   ;;  %v6208_v19 = vld [vmem:[#allocation8 + $0x4] ss:$16 sps:$4 sm:$0xff]  }
 0x457   :  { %2144 = vmatprep.subr.bf16.mxu0 %v7685_v38  ;;  %2185 = vmatprep.subr.bf16.mxu1 %v7686_v58  ;;  %7712 = vst [vmem:[#allocation32_spill] sm:$0xff] %v6205_v17  ;;  %7713 = vst [vmem:[#allocation33_spill] sm:$0xff] %v6208_v19  ;;  %v6211_v38 = vld [vmem:[#allocation8 + $0xc] ss:$16 sps:$4 sm:$0xff]   ;;  %v6216_v58 = vld [vmem:[#allocation8] ss:$16 sps:$4 sm:$0xff]  }
 0x458   :  { %7714 = vst [vmem:[#allocation35_spill] sm:$0xff] %v6211_v38  ;;  %7715 = vst [vmem:[#allocation34_spill] sm:$0xff] %v6216_v58 }
 0x45a   :  { %2145 = vmatpush1.bf16.msra.mxu0 %v7687_v51  ;;  %2186 = vmatpush1.bf16.msra.mxu1 %v7688_v45  ;;  %v6219_v51 = vld [vmem:[#allocation8 + $0x8] ss:$16 sps:$4 sm:$0xff]   ;;  %v6222_v45 = vld [vmem:[#allocation8 + $0x24] ss:$16 sps:$4 sm:$0xff]  }
 0x45b   :  { %2146 = vmatprep.subr.bf16.mxu0 %v7689_v40  ;;  %2187 = vmatprep.subr.bf16.mxu1 %v7690_v11  ;;  %7716 = vst [vmem:[#allocation36_spill] sm:$0xff] %v6219_v51  ;;  %7717 = vst [vmem:[#allocation37_spill] sm:$0xff] %v6222_v45  ;;  %v6225_v40 = vld [vmem:[#allocation8 + $0x2c] ss:$16 sps:$4 sm:$0xff]   ;;  %v6230_v11 = vld [vmem:[#allocation8 + $0x20] ss:$16 sps:$4 sm:$0xff]  }
 0x45c   :  { %7718 = vst [vmem:[#allocation39_spill] sm:$0xff] %v6225_v40  ;;  %7719 = vst [vmem:[#allocation38_spill] sm:$0xff] %v6230_v11 }
 0x45e   :  { %v4721_v62 = vpop.eup %4720  ;;  %2147 = vmatpush1.bf16.msra.mxu0 %v7691_v10  ;;  %2188 = vmatpush1.bf16.msra.mxu1 %v7692_v43  ;;  %v6239_v10 = vld [vmem:[#allocation8 + $0x4c] ss:$16 sps:$4 sm:$0xff]   ;;  %v6242_v43 = vld [vmem:[#allocation8 + $0x40] ss:$16 sps:$4 sm:$0xff]  }
 0x45f   :  { %2148 = vmatprep.subr.bf16.mxu0 %v7693_v41  ;;  %2189 = vmatprep.subr.bf16.mxu1 %v7694_v47  ;;  %v2049_v5 = vmul.f32 %v4721_v62, %v4719_v53  ;;  %v6233_v53 = vld [vmem:[#allocation8 + $0x28] ss:$16 sps:$4 sm:$0xff]   ;;  %v6236_v62 = vld [vmem:[#allocation8 + $0x44] ss:$16 sps:$4 sm:$0xff]   ;;  %7722 = vst [vmem:[#allocation43_spill] sm:$0xff] %v6239_v10  ;;  %7723 = vst [vmem:[#allocation42_spill] sm:$0xff] %v6242_v43 }
 0x460   :  { %7720 = vst [vmem:[#allocation40_spill] sm:$0xff] %v6233_v53  ;;  %7721 = vst [vmem:[#allocation41_spill] sm:$0xff] %v6236_v62  ;;  %v6245_v41 = vld [vmem:[#allocation8 + $0x48] ss:$16 sps:$4 sm:$0xff]   ;;  %v6248_v47 = vld [vmem:[#allocation8 + $0x64] ss:$16 sps:$4 sm:$0xff]  }
 0x461   :  { %v6106_v50 = vpack.c.bf16 %v2049_v5, %v2049_v5  ;;  %7724 = vst [vmem:[#allocation44_spill] sm:$0xff] %v6245_v41  ;;  %7725 = vst [vmem:[#allocation45_spill] sm:$0xff] %v6248_v47  ;;  %v6251_v5 = vld [vmem:[#allocation8 + $0x6c] ss:$16 sps:$4 sm:$0xff]  }
 0x462   :  { %2149 = vmatpush1.bf16.msra.mxu0 %v7695_v49  ;;  %2190 = vmatpush1.bf16.msra.mxu1 %v7696_v15  ;;  %7726 = vst [vmem:[#allocation46_spill] sm:$0xff] %v6251_v5  ;;  %v6254_v49 = vld [vmem:[#allocation8 + $0x60] ss:$16 sps:$4 sm:$0xff]   ;;  %v6257_v15 = vld [vmem:[#allocation8 + $0x68] ss:$16 sps:$4 sm:$0xff]  }
 0x463   :  { %2258 = vmatprep.subr.bf16.mxu0 %v6108_v52  ;;  %2299 = vmatprep.subr.bf16.mxu1 %v6111_v42  ;;  %7727 = vst [vmem:[#allocation14_spill] sm:$0xff] %v6254_v49  ;;  %7728 = vst [vmem:[#allocation77_spill] sm:$0xff] %v6257_v15 }
 0x465   :  { %2167 = vmatmul.mubr.bf16.vlgmr.msra.gmra.mrb[44].mxu0 %v6106_v50  ;;  %2208 = vmatmul.mubr.bf16.vlgmr.msra.gmra.mrb[44].mxu1 %v6106_v50 }
 0x466   :  { %2259 = vmatpush1.bf16.msra.mxu0 %v6116_v56  ;;  %2300 = vmatpush1.bf16.msra.mxu1 %v6119_v57 }
 0x467   :  { %2260 = vmatprep.subr.bf16.mxu0 %v6122_v60  ;;  %2301 = vmatprep.subr.bf16.mxu1 %v6125_v0 }
 0x468   :  { %2290 = vmatprep.mubr.bf16.mxu0 %v7579_v12  ;;  %2331 = vmatprep.mubr.bf16.mxu1 %v7579_v12 }
 0x46a   :  { %2261 = vmatpush1.bf16.msra.mxu0 %v6130_v1  ;;  %2302 = vmatpush1.bf16.msra.mxu1 %v6133_v7 }
 0x46b   :  { %2262 = vmatprep.subr.bf16.mxu0 %v6136_v9  ;;  %2303 = vmatprep.subr.bf16.mxu1 %v6139_v14 }
 0x46e   :  { %2263 = vmatpush1.bf16.msra.mxu0 %v6142_v18  ;;  %2304 = vmatpush1.bf16.msra.mxu1 %v6145_v20 }
 0x46f   :  { %2264 = vmatprep.subr.bf16.mxu0 %v6148_v21  ;;  %2305 = vmatprep.subr.bf16.mxu1 %v6151_v22 }
 0x472   :  { %2265 = vmatpush1.bf16.msra.mxu0 %v6154_v24  ;;  %2306 = vmatpush1.bf16.msra.mxu1 %v6157_v25 }
 0x473   :  { %2266 = vmatprep.subr.bf16.mxu0 %v6160_v27  ;;  %2307 = vmatprep.subr.bf16.mxu1 %v6163_v2 }
 0x476   :  { %2267 = vmatpush1.bf16.msra.mxu0 %v6166_v28  ;;  %2308 = vmatpush1.bf16.msra.mxu1 %v6169_v29 }
 0x477   :  { %2268 = vmatprep.subr.bf16.mxu0 %v6172_v30  ;;  %2309 = vmatprep.subr.bf16.mxu1 %v6175_v31 }
 0x47a   :  { %2269 = vmatpush1.bf16.msra.mxu0 %v6178_v3  ;;  %2310 = vmatpush1.bf16.msra.mxu1 %v6181_v32 }
 0x47b   :  { %2270 = vmatprep.subr.bf16.mxu0 %v6184_v33  ;;  %2311 = vmatprep.subr.bf16.mxu1 %v6187_v34 }
 0x47e   :  { %2271 = vmatpush1.bf16.msra.mxu0 %v6190_v35  ;;  %2312 = vmatpush1.bf16.msra.mxu1 %v6193_v4 }
 0x47f   :  { %2272 = vmatprep.subr.bf16.mxu0 %v6196_v37  ;;  %2313 = vmatprep.subr.bf16.mxu1 %v6199_v39 }
 0x482   :  { %2273 = vmatpush1.bf16.msra.mxu0 %v6202_v54  ;;  %2314 = vmatpush1.bf16.msra.mxu1 %v6205_v17 }
 0x483   :  { %2370 = vmatprep.subr.bf16.mxu0 %v6208_v19  ;;  %2411 = vmatprep.subr.bf16.mxu1 %v6211_v38 }
 0x485   :  { %2291 = vmatmul.mubr.bf16.vlgmr.msra.gmra.mrb[48].mxu0 %v6106_v50  ;;  %2332 = vmatmul.mubr.bf16.vlgmr.msra.gmra.mrb[48].mxu1 %v6106_v50  ;;  %v6260_v50 = vld [vmem:[#allocation8 + $0x84] ss:$16 sps:$4 sm:$0xff]  }
 0x486   :  { %2371 = vmatpush1.bf16.msra.mxu0 %v6216_v58  ;;  %2412 = vmatpush1.bf16.msra.mxu1 %v6219_v51  ;;  %7729 = vst [vmem:[#allocation78_spill] sm:$0xff] %v6260_v50 }
 0x487   :  { %2372 = vmatprep.subr.bf16.mxu0 %v6222_v45  ;;  %2413 = vmatprep.subr.bf16.mxu1 %v6225_v40 }
 0x488   :  { %2402 = vmatprep.mubr.bf16.mxu0 %v7579_v12  ;;  %2443 = vmatprep.mubr.bf16.mxu1 %v7579_v12 }
 0x48a   :  { %2373 = vmatpush1.bf16.msra.mxu0 %v6230_v11  ;;  %2414 = vmatpush1.bf16.msra.mxu1 %v6233_v53 }
 0x48b   :  { %2374 = vmatprep.subr.bf16.mxu0 %v6236_v62  ;;  %2415 = vmatprep.subr.bf16.mxu1 %v6239_v10 }
 0x48e   :  { %2375 = vmatpush1.bf16.msra.mxu0 %v6242_v43  ;;  %2416 = vmatpush1.bf16.msra.mxu1 %v6245_v41 }
 0x48f   :  { %2376 = vmatprep.subr.bf16.mxu0 %v6248_v47  ;;  %2417 = vmatprep.subr.bf16.mxu1 %v6251_v5 }
 0x492   :  { %2377 = vmatpush1.bf16.msra.mxu0 %v6254_v49  ;;  %2418 = vmatpush1.bf16.msra.mxu1 %v6257_v15 }
 0x493   :  { %2378 = vmatprep.subr.bf16.mxu0 %v6260_v50  ;;  %2419 = vmatprep.subr.bf16.mxu1 %v6263_v16 }
 0x496   :  { %2379 = vmatpush1.bf16.msra.mxu0 %v6266_v63  ;;  %2420 = vmatpush1.bf16.msra.mxu1 %v6269_v8  ;;  %v6284_v63 = vld [vmem:[#allocation8 + $0xc4] ss:$16 sps:$4 sm:$0xff]   ;;  %v6287_v8 = vld [vmem:[#allocation8 + $0xcc] ss:$16 sps:$4 sm:$0xff]  }
 0x497   :  { %2380 = vmatprep.subr.bf16.mxu0 %v6272_v46  ;;  %2421 = vmatprep.subr.bf16.mxu1 %v6275_v13  ;;  %7737 = vst [vmem:[#allocation53_spill] sm:$0xff] %v6284_v63  ;;  %7738 = vst [vmem:[#allocation54_spill] sm:$0xff] %v6287_v8  ;;  %v6290_v46 = vld [vmem:[#allocation8 + $0xc0] ss:$16 sps:$4 sm:$0xff]   ;;  %v6293_v13 = vld [vmem:[#allocation8 + $0xc8] ss:$16 sps:$4 sm:$0xff]  }
 0x498   :  { %7739 = vst [vmem:[#allocation55_spill] sm:$0xff] %v6290_v46  ;;  %7740 = vst [vmem:[#allocation56_spill] sm:$0xff] %v6293_v13 }
 0x49a   :  { %2381 = vmatpush1.bf16.msra.mxu0 %v6278_v6  ;;  %2422 = vmatpush1.bf16.msra.mxu1 %v6281_v44  ;;  %v6296_v6 = vld [vmem:[#allocation8 + $0xe4] ss:$16 sps:$4 sm:$0xff]   ;;  %v6299_v44 = vld [vmem:[#allocation8 + $0xec] ss:$16 sps:$4 sm:$0xff]  }
 0x49b   :  { %2382 = vmatprep.subr.bf16.mxu0 %v6284_v63  ;;  %2423 = vmatprep.subr.bf16.mxu1 %v6287_v8  ;;  %7741 = vst [vmem:[#allocation57_spill] sm:$0xff] %v6296_v6  ;;  %7742 = vst [vmem:[#allocation58_spill] sm:$0xff] %v6299_v44  ;;  %v6302_v63 = vld [vmem:[#allocation8 + $0xe0] ss:$16 sps:$4 sm:$0xff]   ;;  %v6305_v8 = vld [vmem:[#allocation8 + $0xe8] ss:$16 sps:$4 sm:$0xff]  }
 0x49c   :  { %7743 = vst [vmem:[#allocation59_spill] sm:$0xff] %v6302_v63  ;;  %7744 = vst [vmem:[#allocation60_spill] sm:$0xff] %v6305_v8 }
 0x49e   :  { %2383 = vmatpush1.bf16.msra.mxu0 %v6290_v46  ;;  %2424 = vmatpush1.bf16.msra.mxu1 %v6293_v13  ;;  %v6308_v46 = vld [vmem:[#allocation7 + $0x4] ss:$16 sps:$4 sm:$0xff]   ;;  %v6311_v13 = vld [vmem:[#allocation7 + $0xc] ss:$16 sps:$4 sm:$0xff]  }
 0x49f   :  { %2384 = vmatprep.subr.bf16.mxu0 %v6296_v6  ;;  %2425 = vmatprep.subr.bf16.mxu1 %v6299_v44  ;;  %7745 = vst [vmem:[#allocation61_spill] sm:$0xff] %v6308_v46  ;;  %7746 = vst [vmem:[#allocation62_spill] sm:$0xff] %v6311_v13 }
 0x4a2   :  { %2385 = vmatpush1.bf16.msra.mxu0 %v6302_v63  ;;  %2426 = vmatpush1.bf16.msra.mxu1 %v6305_v8 }
 0x4a3   :  { %2452 = vmatprep.subr.bf16.mxu0 %v6308_v46  ;;  %2493 = vmatprep.subr.bf16.mxu1 %v6311_v13 }
 0x518   :  { %v2086_v6 = vpop.f32.mrb[40].mxu0  ;;  %v2127_v16 = vpop.f32.mrb[40].mxu1 }
 0x519   :  { %v2088_v50 = vpop.f32.mrb[41].mxu0  ;;  %v2129_v44 = vpop.f32.mrb[41].mxu1 }
 0x51a   :  { %v2090_v15 = vpop.f32.mrb[42].mxu0  ;;  %v2131_v49 = vpop.f32.mrb[42].mxu1 }
 0x51b   :  { %v2091_v5 = vpop.f32.mrb[43].mxu0  ;;  %v2132_v63 = vpop.f32.mrb[43].mxu1 }
 0x538   :  { %v2168_v47 = vpop.f32.mrb[44].mxu0  ;;  %v2209_v41 = vpop.f32.mrb[44].mxu1 }
 0x539   :  { %v2169_v43 = vadd.f32 %v2168_v47, %v2086_v6  ;;  %v2210_v8 = vadd.f32 %v2209_v41, %v2127_v16  ;;  %v2170_v10 = vpop.f32.mrb[45].mxu0  ;;  %v2211_v62 = vpop.f32.mrb[45].mxu1 }
 0x53a   :  { %v2171_v53 = vadd.f32 %v2170_v10, %v2088_v50  ;;  %v2212_v46 = vadd.f32 %v2211_v62, %v2129_v44  ;;  %v2172_v11 = vpop.f32.mrb[46].mxu0  ;;  %v2213_v40 = vpop.f32.mrb[46].mxu1  ;;  %v7747_v62 = vld [vmem:[#allocation80_spill] sm:$0xff] }
 0x53b   :  { %v2216_v13 = vadd.f32 %v2169_v43, %v6041_v55  ;;  %v2173_v45 = vpop.f32.mrb[47].mxu0  ;;  %v2214_v51 = vpop.f32.mrb[47].mxu1  ;;  %v2218_v16 = vadd.f32 %v2210_v8, %v6056_v26  ;;  %v2254_v43 = vunpack.c.l.bf16 %v7747_v62 }
 0x53c   :  { %v2217_v58 = vadd.f32 %v2171_v53, %v6045_v48  ;;  %v2219_v63 = vadd.f32 %v2212_v46, %v6051_v23  ;;  %v7748_v46 = vld [vmem:[#allocation81_spill] sm:$0xff] }
 0x53d   :  { %v4342_v15 = vmul.f32 -1.442695, %v2216_v13  ;;  %v2256_v47 = vunpack.c.l.bf16 %v7748_v46 }
 0x53e   :  { %v4343_v49 = vmul.f32 -1.442695, %v2217_v58  ;;  %v4344_v6 = vmul.f32 -1.442695, %v2219_v63 }
 0x53f   :  { %4722 = vpow2.f32 %v4342_v15  ;;  %v2255_v15 = vunpack.c.h.bf16 %v7747_v62 }
 0x540   :  { %4724 = vpow2.f32 %v4343_v49  ;;  %v2257_v49 = vunpack.c.h.bf16 %v7748_v46 }
 0x541   :  { %4726 = vpow2.f32 %v4344_v6 }
 0x542   :  { %4728 = vtanh.f32 %v2218_v16 }
 0x549   :  { %v4723_v41 = vpop.eup %4722 }
 0x54a   :  { %v4725_v10 = vpop.eup %4724  ;;  %v2223_v44 = vadd.f32 1.0, %v4723_v41 }
 0x54b   :  { %v2229_v40 = vadd.f32 1.0, %v4725_v10  ;;  %v4727_v51 = vpop.eup %4726 }
 0x54c   :  { %4730 = vrcp.f32 %v2223_v44  ;;  %v4729_v45 = vpop.eup %4728  ;;  %v2236_v53 = vadd.f32 1.0, %v4727_v51 }
 0x54d   :  { %4732 = vrcp.f32 %v2229_v40 }
 0x54e   :  { %4734 = vrcp.f32 %v2236_v53 }
 0x556   :  { %v4731_v11 = vpop.eup %4730 }
 0x557   :  { %v4733_v13 = vpop.eup %4732  ;;  %v2240_v58 = vmul.f32 %v4731_v11, %v4729_v45 }
 0x558   :  { %v2239_v8 = vmul.f32 %v4733_v13, %v6063_v61  ;;  %v2292_v5 = vpop.f32.mrb[48].mxu0  ;;  %v2333_v50 = vpop.f32.mrb[48].mxu1 }
 0x559   :  { %v2340_v63 = vadd.f32 %v2292_v5, %v2254_v43  ;;  %v2342_v6 = vadd.f32 %v2333_v50, %v2256_v47  ;;  %v2294_v16 = vpop.f32.mrb[49].mxu0  ;;  %v2335_v41 = vpop.f32.mrb[49].mxu1 }
 0x55a   :  { %v6323_v10 = vadd.f32 %v2240_v58, %v2239_v8  ;;  %v2341_v44 = vadd.f32 %v2294_v16, %v2255_v15  ;;  %v2343_v40 = vadd.f32 %v2335_v41, %v2257_v49  ;;  %v2296_v51 = vpop.f32.mrb[50].mxu0  ;;  %v2337_v45 = vpop.f32.mrb[50].mxu1  ;;  %v6329_v16 = vld [vmem:[#allocation7] ss:$16 sps:$4 sm:$0xff]   ;;  %v6332_v41 = vld [vmem:[#allocation7 + $0x8] ss:$16 sps:$4 sm:$0xff]  }
 0x55b   :  { %v4345_v11 = vmul.f32 -1.442695, %v2340_v63  ;;  %v2297_v26 = vpop.f32.mrb[51].mxu0  ;;  %v2338_v61 = vpop.f32.mrb[51].mxu1  ;;  %v6349_v51 = vld [vmem:[#allocation7 + $0x44] ss:$16 sps:$4 sm:$0xff]  }
 0x55c   :  { %4736 = vtanh.f32 %v6323_v10  ;;  %v4346_v13 = vmul.f32 -1.442695, %v2341_v44  ;;  %v4347_v62 = vmul.f32 -1.442695, %v2343_v40  ;;  %v4735_v43 = vpop.eup %4734  ;;  %v1930_v47 = vpop.permute.xlu0 %1929  ;;  %v6338_v44 = vld [vmem:[#allocation7 + $0x2c] ss:$16 sps:$4 sm:$0xff]  }
 0x55d   :  { %4738 = vpow2.f32 %v4345_v11  ;;  %vm1931_vm10 = vcmp.eq.s32.totalorder %v1930_v47, 1  ;;  %v2248_v8 = vpop.permute.xlu1 %2247  ;;  %v6346_v40 = vld [vmem:[#allocation7 + $0x28] ss:$16 sps:$4 sm:$0xff]   ;;  %v6352_v45 = vld [vmem:[#allocation7 + $0x4c] ss:$16 sps:$4 sm:$0xff]  }
 0x55e   :  { %4740 = vpow2.f32 %v4346_v13  ;;  %v1932_v15 = vsel %vm1931_vm10, %v6066_v59, 0.0  ;;  %vm2249_vm11 = vcmp.eq.s32.totalorder %v2248_v8, 1  ;;  %v6335_v59 = vld [vmem:[#allocation7 + $0x24] ss:$16 sps:$4 sm:$0xff]   ;;  %v6364_v8 = vld [vmem:[#allocation7 + $0x6c] ss:$16 sps:$4 sm:$0xff]  }
 0x55f   :  { %4742 = vpow2.f32 %v4347_v62  ;;  %v6355_v62 = vld [vmem:[#allocation7 + $0x40] ss:$16 sps:$4 sm:$0xff]  }
 0x560   :  { %4744 = vtanh.f32 %v2342_v6  ;;  %v6343_v6 = vld [vmem:[#allocation7 + $0x20] ss:$16 sps:$4 sm:$0xff]  }
 0x566   :  { %v4737_v46 = vpop.eup %4736 }
 0x567   :  { %v4739_v5 = vpop.eup %4738  ;;  %v2243_v58 = vmul.f32 %v4737_v46, %v4735_v43  ;;  %v6358_v43 = vld [vmem:[#allocation7 + $0x48] ss:$16 sps:$4 sm:$0xff]  }
 0x568   :  { %v4741_v50 = vpop.eup %4740  ;;  %v2347_v53 = vadd.f32 1.0, %v4739_v5 }
 0x569   :  { %v6327_v26 = vsel %vm2249_vm11, %v2243_v58, %v1932_v15  ;;  %v2353_v49 = vadd.f32 1.0, %v4741_v50  ;;  %v2369_v63 = vpack.c.bf16 %v2243_v58, %v2243_v58  ;;  %v4743_v11 = vpop.eup %4742  ;;  %v6361_v58 = vld [vmem:[#allocation7 + $0x64] ss:$16 sps:$4 sm:$0xff]  }
 0x56a   :  { %4746 = vrcp.f32 %v2347_v53  ;;  %v4745_v61 = vpop.eup %4744  ;;  %v2360_v5 = vadd.f32 1.0, %v4743_v11  ;;  %v6370_v53 = vld [vmem:[#allocation7 + $0x60] ss:$16 sps:$4 sm:$0xff]   ;;  %v6379_v11 = vld [vmem:[#allocation7 + $0x8c] ss:$16 sps:$4 sm:$0xff]  }
 0x56b   :  { %4748 = vrcp.f32 %v2353_v49  ;;  %2403 = vmatmul.mubr.bf16.vlgmr.msra.gmra.mrb[52].mxu0 %v2369_v63  ;;  %2444 = vmatmul.mubr.bf16.vlgmr.msra.gmra.mrb[52].mxu1 %v2369_v63  ;;  %v6373_v49 = vld [vmem:[#allocation7 + $0x68] ss:$16 sps:$4 sm:$0xff]   ;;  %v6376_v63 = vld [vmem:[#allocation7 + $0x84] ss:$16 sps:$4 sm:$0xff]   ;;  %7751 = vst [vmem:[#allocation65_spill] sm:$0xff] %v6379_v11 }
 0x56c   :  { %2453 = vmatpush1.bf16.msra.mxu0 %v6329_v16  ;;  %2494 = vmatpush1.bf16.msra.mxu1 %v6332_v41  ;;  %7749 = vst [vmem:[#allocation63_spill] sm:$0xff] %v6373_v49  ;;  %4750 = vrcp.f32 %v2360_v5  ;;  %7750 = vst [vmem:[#allocation64_spill] sm:$0xff] %v6376_v63  ;;  %v6398_v5 = vld [vmem:[#allocation7 + $0xa8] ss:$16 sps:$4 sm:$0xff]  }
 0x56d   :  { %2454 = vmatprep.subr.bf16.mxu0 %v6335_v59  ;;  %2495 = vmatprep.subr.bf16.mxu1 %v6338_v44  ;;  %7757 = vst [vmem:[#allocation71_spill] sm:$0xff] %v6398_v5 }
 0x56e   :  { %2484 = vmatprep.mubr.bf16.mxu0 %v7579_v12  ;;  %2525 = vmatprep.mubr.bf16.mxu1 %v7579_v12 }
 0x570   :  { %2455 = vmatpush1.bf16.msra.mxu0 %v6343_v6  ;;  %2496 = vmatpush1.bf16.msra.mxu1 %v6346_v40 }
 0x571   :  { %2456 = vmatprep.subr.bf16.mxu0 %v6349_v51  ;;  %2497 = vmatprep.subr.bf16.mxu1 %v6352_v45 }
 0x574   :  { %v4747_v13 = vpop.eup %4746  ;;  %2457 = vmatpush1.bf16.msra.mxu0 %v6355_v62  ;;  %2498 = vmatpush1.bf16.msra.mxu1 %v6358_v43 }
 0x575   :  { %v4749_v46 = vpop.eup %4748  ;;  %v2364_v47 = vmul.f32 %v4747_v13, %v4745_v61  ;;  %2458 = vmatprep.subr.bf16.mxu0 %v6361_v58  ;;  %2499 = vmatprep.subr.bf16.mxu1 %v6364_v8  ;;  %v6386_v61 = vld [vmem:[#allocation7 + $0x88] ss:$16 sps:$4 sm:$0xff]   ;;  %v6389_v13 = vld [vmem:[#allocation7 + $0xa4] ss:$16 sps:$4 sm:$0xff]  }
 0x576   :  { %v2363_v50 = vmul.f32 %v4749_v46, %v6085_v36  ;;  %v6383_v36 = vld [vmem:[#allocation7 + $0x80] ss:$16 sps:$4 sm:$0xff]   ;;  %7753 = vst [vmem:[#allocation67_spill] sm:$0xff] %v6386_v61  ;;  %7754 = vst [vmem:[#allocation68_spill] sm:$0xff] %v6389_v13  ;;  %v6392_v46 = vld [vmem:[#allocation7 + $0xac] ss:$16 sps:$4 sm:$0xff]  }
 0x577   :  { %7752 = vst [vmem:[#allocation66_spill] sm:$0xff] %v6383_v36  ;;  %7755 = vst [vmem:[#allocation69_spill] sm:$0xff] %v6392_v46 }
 0x578   :  { %v6368_v15 = vadd.f32 %v2364_v47, %v2363_v50  ;;  %2459 = vmatpush1.bf16.msra.mxu0 %v6370_v53  ;;  %2500 = vmatpush1.bf16.msra.mxu1 %v6373_v49  ;;  %v6395_v47 = vld [vmem:[#allocation7 + $0xa0] ss:$16 sps:$4 sm:$0xff]   ;;  %v6401_v50 = vld [vmem:[#allocation7 + $0xc4] ss:$16 sps:$4 sm:$0xff]   ;;  %v6422_v49 = vld [vmem:[#allocation7 + $0xe8] ss:$16 sps:$4 sm:$0xff]  }
 0x579   :  { %2460 = vmatprep.subr.bf16.mxu0 %v6376_v63  ;;  %2501 = vmatprep.subr.bf16.mxu1 %v6379_v11  ;;  %7756 = vst [vmem:[#allocation70_spill] sm:$0xff] %v6395_v47  ;;  %7758 = vst [vmem:[#allocation72_spill] sm:$0xff] %v6401_v50  ;;  %v6407_v11 = vld [vmem:[#allocation7 + $0xc0] ss:$16 sps:$4 sm:$0xff]  }
 0x57a   :  { %4752 = vtanh.f32 %v6368_v15  ;;  %v6419_v63 = vld [vmem:[#allocation7 + $0xe0] ss:$16 sps:$4 sm:$0xff]  }
 0x57c   :  { %2461 = vmatpush1.bf16.msra.mxu0 %v6383_v36  ;;  %2502 = vmatpush1.bf16.msra.mxu1 %v6386_v61  ;;  %v6404_v61 = vld [vmem:[#allocation7 + $0xcc] ss:$16 sps:$4 sm:$0xff]  }
 0x57d   :  { %2462 = vmatprep.subr.bf16.mxu0 %v6389_v13  ;;  %2503 = vmatprep.subr.bf16.mxu1 %v6392_v46  ;;  %7759 = vst [vmem:[#allocation73_spill] sm:$0xff] %v6404_v61  ;;  %v4751_v13 = vpop.eup %4750  ;;  %v6410_v46 = vld [vmem:[#allocation7 + $0xc8] ss:$16 sps:$4 sm:$0xff]  }
 0x580   :  { %2463 = vmatpush1.bf16.msra.mxu0 %v6395_v47  ;;  %2504 = vmatpush1.bf16.msra.mxu1 %v6398_v5  ;;  %v6413_v47 = vld [vmem:[#allocation7 + $0xe4] ss:$16 sps:$4 sm:$0xff]   ;;  %v6416_v5 = vld [vmem:[#allocation7 + $0xec] ss:$16 sps:$4 sm:$0xff]  }
 0x581   :  { %2464 = vmatprep.subr.bf16.mxu0 %v6401_v50  ;;  %2505 = vmatprep.subr.bf16.mxu1 %v6404_v61 }
 0x584   :  { %v4753_v36 = vpop.eup %4752  ;;  %2465 = vmatpush1.bf16.msra.mxu0 %v6407_v11  ;;  %2506 = vmatpush1.bf16.msra.mxu1 %v6410_v46 }
 0x585   :  { %2466 = vmatprep.subr.bf16.mxu0 %v6413_v47  ;;  %2507 = vmatprep.subr.bf16.mxu1 %v6416_v5  ;;  %v2367_v50 = vmul.f32 %v4753_v36, %v4751_v13  ;;  %v7760_v36 = vld [vmem:[#allocation34_spill] sm:$0xff]  ;;  %v7761_v13 = vld [vmem:[#allocation36_spill] sm:$0xff] }
 0x587   :  { %v2368_v61 = vpack.c.bf16 %v2367_v50, %v2367_v50  ;;  %v7762_v50 = vld [vmem:[#allocation37_spill] sm:$0xff] }
 0x588   :  { %2467 = vmatpush1.bf16.msra.mxu0 %v6419_v63  ;;  %2508 = vmatpush1.bf16.msra.mxu1 %v6422_v49 }
 0x589   :  { %2576 = vmatprep.subr.bf16.mxu0 %v6108_v52  ;;  %2617 = vmatprep.subr.bf16.mxu1 %v6111_v42 }
 0x58b   :  { %2485 = vmatmul.mubr.bf16.vlgmr.msra.gmra.mrb[56].mxu0 %v2368_v61  ;;  %2526 = vmatmul.mubr.bf16.vlgmr.msra.gmra.mrb[56].mxu1 %v2368_v61 }
 0x58c   :  { %2577 = vmatpush1.bf16.msra.mxu0 %v6116_v56  ;;  %2618 = vmatpush1.bf16.msra.mxu1 %v6119_v57 }
 0x58d   :  { %2578 = vmatprep.subr.bf16.mxu0 %v6122_v60  ;;  %2619 = vmatprep.subr.bf16.mxu1 %v6125_v0 }
 0x58e   :  { %2608 = vmatprep.mubr.bf16.mxu0 %v7579_v12  ;;  %2649 = vmatprep.mubr.bf16.mxu1 %v7579_v12 }
 0x590   :  { %2579 = vmatpush1.bf16.msra.mxu0 %v6130_v1  ;;  %2620 = vmatpush1.bf16.msra.mxu1 %v6133_v7 }
 0x591   :  { %2580 = vmatprep.subr.bf16.mxu0 %v6136_v9  ;;  %2621 = vmatprep.subr.bf16.mxu1 %v6139_v14 }
 0x594   :  { %2581 = vmatpush1.bf16.msra.mxu0 %v6142_v18  ;;  %2622 = vmatpush1.bf16.msra.mxu1 %v6145_v20 }
 0x595   :  { %2582 = vmatprep.subr.bf16.mxu0 %v6148_v21  ;;  %2623 = vmatprep.subr.bf16.mxu1 %v6151_v22 }
 0x598   :  { %2583 = vmatpush1.bf16.msra.mxu0 %v6154_v24  ;;  %2624 = vmatpush1.bf16.msra.mxu1 %v6157_v25 }
 0x599   :  { %2584 = vmatprep.subr.bf16.mxu0 %v6160_v27  ;;  %2625 = vmatprep.subr.bf16.mxu1 %v6163_v2 }
 0x59c   :  { %2585 = vmatpush1.bf16.msra.mxu0 %v6166_v28  ;;  %2626 = vmatpush1.bf16.msra.mxu1 %v6169_v29 }
 0x59d   :  { %2586 = vmatprep.subr.bf16.mxu0 %v6172_v30  ;;  %2627 = vmatprep.subr.bf16.mxu1 %v6175_v31 }
 0x5a0   :  { %2587 = vmatpush1.bf16.msra.mxu0 %v6178_v3  ;;  %2628 = vmatpush1.bf16.msra.mxu1 %v6181_v32 }
 0x5a1   :  { %2588 = vmatprep.subr.bf16.mxu0 %v6184_v33  ;;  %2629 = vmatprep.subr.bf16.mxu1 %v6187_v34 }
 0x5a4   :  { %2589 = vmatpush1.bf16.msra.mxu0 %v6190_v35  ;;  %2630 = vmatpush1.bf16.msra.mxu1 %v6193_v4  ;;  %v7763_v4 = vld [vmem:[#allocation39_spill] sm:$0xff] }
 0x5a5   :  { %2590 = vmatprep.subr.bf16.mxu0 %v6196_v37  ;;  %2631 = vmatprep.subr.bf16.mxu1 %v6199_v39  ;;  %v7773_v39 = vld [vmem:[#allocation77_spill] sm:$0xff]  ;;  %v7774_v37 = vld [vmem:[#allocation78_spill] sm:$0xff] }
 0x5a8   :  { %2591 = vmatpush1.bf16.msra.mxu0 %v6202_v54  ;;  %2632 = vmatpush1.bf16.msra.mxu1 %v6205_v17  ;;  %v7764_v54 = vld [vmem:[#allocation38_spill] sm:$0xff]  ;;  %v7765_v17 = vld [vmem:[#allocation40_spill] sm:$0xff] }
 0x5a9   :  { %2688 = vmatprep.subr.bf16.mxu0 %v6208_v19  ;;  %2729 = vmatprep.subr.bf16.mxu1 %v6211_v38  ;;  %v7766_v19 = vld [vmem:[#allocation41_spill] sm:$0xff]  ;;  %v7767_v38 = vld [vmem:[#allocation43_spill] sm:$0xff] }
 0x5ab   :  { %2609 = vmatmul.mubr.bf16.vlgmr.msra.gmra.mrb[60].mxu0 %v2368_v61  ;;  %2650 = vmatmul.mubr.bf16.vlgmr.msra.gmra.mrb[60].mxu1 %v2368_v61  ;;  %v7768_v61 = vld [vmem:[#allocation42_spill] sm:$0xff] }
 0x5ac   :  { %2689 = vmatpush1.bf16.msra.mxu0 %v7760_v36  ;;  %2730 = vmatpush1.bf16.msra.mxu1 %v7761_v13  ;;  %v7769_v36 = vld [vmem:[#allocation44_spill] sm:$0xff]  ;;  %v7770_v13 = vld [vmem:[#allocation45_spill] sm:$0xff] }
 0x5ad   :  { %2690 = vmatprep.subr.bf16.mxu0 %v7762_v50  ;;  %2731 = vmatprep.subr.bf16.mxu1 %v7763_v4  ;;  %v7771_v50 = vld [vmem:[#allocation46_spill] sm:$0xff] }
 0x5ae   :  { %2720 = vmatprep.mubr.bf16.mxu0 %v7579_v12  ;;  %2761 = vmatprep.mubr.bf16.mxu1 %v7579_v12  ;;  %v7772_v4 = vld [vmem:[#allocation14_spill] sm:$0xff] }
 0x5b0   :  { %2691 = vmatpush1.bf16.msra.mxu0 %v7764_v54  ;;  %2732 = vmatpush1.bf16.msra.mxu1 %v7765_v17  ;;  %v7775_v54 = vld [vmem:[#allocation79_spill] sm:$0xff] }
 0x5b1   :  { %2692 = vmatprep.subr.bf16.mxu0 %v7766_v19  ;;  %2733 = vmatprep.subr.bf16.mxu1 %v7767_v38  ;;  %v7776_v17 = vld [vmem:[#allocation47_spill] sm:$0xff]  ;;  %v7777_v19 = vld [vmem:[#allocation48_spill] sm:$0xff]  ;;  %v7778_v38 = vld [vmem:[#allocation49_spill] sm:$0xff] }
 0x5b4   :  { %2693 = vmatpush1.bf16.msra.mxu0 %v7768_v61  ;;  %2734 = vmatpush1.bf16.msra.mxu1 %v7769_v36  ;;  %v7779_v61 = vld [vmem:[#allocation50_spill] sm:$0xff]  ;;  %v7780_v36 = vld [vmem:[#allocation51_spill] sm:$0xff] }
 0x5b5   :  { %2694 = vmatprep.subr.bf16.mxu0 %v7770_v13  ;;  %2735 = vmatprep.subr.bf16.mxu1 %v7771_v50  ;;  %v7781_v13 = vld [vmem:[#allocation52_spill] sm:$0xff]  ;;  %v7782_v50 = vld [vmem:[#allocation53_spill] sm:$0xff] }
 0x5b8   :  { %2695 = vmatpush1.bf16.msra.mxu0 %v7772_v4  ;;  %2736 = vmatpush1.bf16.msra.mxu1 %v7773_v39  ;;  %v7783_v4 = vld [vmem:[#allocation54_spill] sm:$0xff]  ;;  %v7784_v39 = vld [vmem:[#allocation55_spill] sm:$0xff] }
 0x5b9   :  { %2696 = vmatprep.subr.bf16.mxu0 %v7774_v37  ;;  %2737 = vmatprep.subr.bf16.mxu1 %v7775_v54  ;;  %v7785_v37 = vld [vmem:[#allocation56_spill] sm:$0xff]  ;;  %v7786_v54 = vld [vmem:[#allocation57_spill] sm:$0xff] }
 0x5bc   :  { %2697 = vmatpush1.bf16.msra.mxu0 %v7776_v17  ;;  %2738 = vmatpush1.bf16.msra.mxu1 %v7777_v19  ;;  %v7787_v17 = vld [vmem:[#allocation58_spill] sm:$0xff]  ;;  %v7788_v19 = vld [vmem:[#allocation59_spill] sm:$0xff] }
 0x5bd   :  { %2698 = vmatprep.subr.bf16.mxu0 %v7778_v38  ;;  %2739 = vmatprep.subr.bf16.mxu1 %v7779_v61  ;;  %v7789_v38 = vld [vmem:[#allocation60_spill] sm:$0xff]  ;;  %v7790_v61 = vld [vmem:[#allocation61_spill] sm:$0xff] }
 0x5c0   :  { %2699 = vmatpush1.bf16.msra.mxu0 %v7780_v36  ;;  %2740 = vmatpush1.bf16.msra.mxu1 %v7781_v13  ;;  %v7791_v36 = vld [vmem:[#allocation62_spill] sm:$0xff] }
 0x5c1   :  { %2700 = vmatprep.subr.bf16.mxu0 %v7782_v50  ;;  %2741 = vmatprep.subr.bf16.mxu1 %v7783_v4 }
 0x5c4   :  { %2701 = vmatpush1.bf16.msra.mxu0 %v7784_v39  ;;  %2742 = vmatpush1.bf16.msra.mxu1 %v7785_v37 }
 0x5c5   :  { %2702 = vmatprep.subr.bf16.mxu0 %v7786_v54  ;;  %2743 = vmatprep.subr.bf16.mxu1 %v7787_v17 }
 0x5c8   :  { %2703 = vmatpush1.bf16.msra.mxu0 %v7788_v19  ;;  %2744 = vmatpush1.bf16.msra.mxu1 %v7789_v38 }
 0x5c9   :  { %2770 = vmatprep.subr.bf16.mxu0 %v7790_v61  ;;  %2811 = vmatprep.subr.bf16.mxu1 %v7791_v36 }
 0x63e   :  { %v2404_v13 = vpop.f32.mrb[52].mxu0  ;;  %v2445_v50 = vpop.f32.mrb[52].mxu1 }
 0x63f   :  { %v2406_v35 = vpop.f32.mrb[53].mxu0  ;;  %v2447_v4 = vpop.f32.mrb[53].mxu1 }
 0x640   :  { %v2408_v34 = vpop.f32.mrb[54].mxu0  ;;  %v2449_v39 = vpop.f32.mrb[54].mxu1 }
 0x641   :  { %v2409_v33 = vpop.f32.mrb[55].mxu0  ;;  %v2450_v37 = vpop.f32.mrb[55].mxu1 }
 0x642   :  { %v7792_v37 = vld [vmem:[#allocation16_spill] sm:$0xff] }
 0x65e   :  { %v2486_v32 = vpop.f32.mrb[56].mxu0  ;;  %v2527_v54 = vpop.f32.mrb[56].mxu1 }
 0x65f   :  { %v2487_v3 = vadd.f32 %v2486_v32, %v2404_v13  ;;  %v2528_v17 = vadd.f32 %v2527_v54, %v2445_v50  ;;  %v2488_v31 = vpop.f32.mrb[57].mxu0  ;;  %v2529_v19 = vpop.f32.mrb[57].mxu1 }
 0x660   :  { %v2489_v30 = vadd.f32 %v2488_v31, %v2406_v35  ;;  %v2530_v38 = vadd.f32 %v2529_v19, %v2447_v4  ;;  %v2490_v29 = vpop.f32.mrb[58].mxu0  ;;  %v2531_v61 = vpop.f32.mrb[58].mxu1  ;;  %v7793_v19 = vld [vmem:[#allocation82_spill] sm:$0xff] }
 0x661   :  { %v2534_v36 = vadd.f32 %v2487_v3, %v6041_v55  ;;  %v2491_v28 = vpop.f32.mrb[59].mxu0  ;;  %v2532_v2 = vpop.f32.mrb[59].mxu1  ;;  %v2536_v54 = vadd.f32 %v2528_v17, %v7792_v37 }
 0x662   :  { %v2535_v27 = vadd.f32 %v2489_v30, %v6045_v48  ;;  %v2537_v33 = vadd.f32 %v2530_v38, %v6051_v23  ;;  %v7794_v38 = vld [vmem:[#allocation83_spill] sm:$0xff] }
 0x663   :  { %v4348_v34 = vmul.f32 -1.442695, %v2534_v36  ;;  %v2572_v36 = vunpack.c.l.bf16 %v7793_v19  ;;  %v2574_v50 = vunpack.c.l.bf16 %v7794_v38 }
 0x664   :  { %v4349_v39 = vmul.f32 -1.442695, %v2535_v27  ;;  %v4350_v32 = vmul.f32 -1.442695, %v2537_v33  ;;  %v2575_v33 = vunpack.c.h.bf16 %v7794_v38 }
 0x665   :  { %4754 = vpow2.f32 %v4348_v34 }
 0x666   :  { %4756 = vpow2.f32 %v4349_v39  ;;  %v2573_v39 = vunpack.c.h.bf16 %v7793_v19 }
 0x667   :  { %4758 = vpow2.f32 %v4350_v32 }
 0x668   :  { %4760 = vtanh.f32 %v2536_v54 }
 0x66f   :  { %v4755_v13 = vpop.eup %4754 }
 0x670   :  { %v4757_v31 = vpop.eup %4756  ;;  %v2541_v35 = vadd.f32 1.0, %v4755_v13 }
 0x671   :  { %v2547_v29 = vadd.f32 1.0, %v4757_v31  ;;  %v4759_v2 = vpop.eup %4758 }
 0x672   :  { %4762 = vrcp.f32 %v2541_v35  ;;  %v4761_v28 = vpop.eup %4760  ;;  %v2554_v4 = vadd.f32 1.0, %v4759_v2 }
 0x673   :  { %4764 = vrcp.f32 %v2547_v29 }
 0x674   :  { %4766 = vrcp.f32 %v2554_v4 }
 0x67c   :  { %v4763_v30 = vpop.eup %4762 }
 0x67d   :  { %v4765_v3 = vpop.eup %4764  ;;  %v2558_v27 = vmul.f32 %v4763_v30, %v4761_v28 }
 0x67e   :  { %v2557_v17 = vmul.f32 %v4765_v3, %v6323_v10  ;;  %v2610_v61 = vpop.f32.mrb[60].mxu0  ;;  %v2651_v34 = vpop.f32.mrb[60].mxu1 }
 0x67f   :  { %v2658_v32 = vadd.f32 %v2610_v61, %v2572_v36  ;;  %v2660_v54 = vadd.f32 %v2651_v34, %v2574_v50  ;;  %v2612_v13 = vpop.f32.mrb[61].mxu0  ;;  %v2653_v31 = vpop.f32.mrb[61].mxu1 }
 0x680   :  { %v6504_v35 = vadd.f32 %v2558_v27, %v2557_v17  ;;  %v2659_v29 = vadd.f32 %v2612_v13, %v2573_v39  ;;  %v2661_v2 = vadd.f32 %v2653_v31, %v2575_v33  ;;  %v2614_v28 = vpop.f32.mrb[62].mxu0  ;;  %v2655_v30 = vpop.f32.mrb[62].mxu1 }
 0x681   :  { %v4351_v37 = vmul.f32 -1.442695, %v2658_v32  ;;  %v2615_v23 = vpop.f32.mrb[63].mxu0  ;;  %v2656_v10 = vpop.f32.mrb[63].mxu1  ;;  %v7796_v28 = vld [vmem:[#allocation64_spill] sm:$0xff]  ;;  %v7797_v30 = vld [vmem:[#allocation65_spill] sm:$0xff] }
 0x682   :  { %v4352_v3 = vmul.f32 -1.442695, %v2659_v29  ;;  %4768 = vtanh.f32 %v6504_v35  ;;  %v4353_v19 = vmul.f32 -1.442695, %v2661_v2  ;;  %v4767_v36 = vpop.eup %4766  ;;  %v2566_v61 = vpop.permute.xlu0 %2565  ;;  %v7795_v2 = vld [vmem:[#allocation63_spill] sm:$0xff]  ;;  %v7798_v10 = vld [vmem:[#allocation66_spill] sm:$0xff] }
 0x683   :  { %4770 = vpow2.f32 %v4351_v37  ;;  %vm2567_vm12 = vcmp.eq.s32.totalorder %v2566_v61, 1  ;;  %v7805_v61 = vld [vmem:[#allocation73_spill] sm:$0xff] }
 0x684   :  { %4772 = vpow2.f32 %v4352_v3  ;;  %v7799_v3 = vld [vmem:[#allocation67_spill] sm:$0xff] }
 0x685   :  { %4774 = vpow2.f32 %v4353_v19  ;;  %v7800_v19 = vld [vmem:[#allocation68_spill] sm:$0xff] }
 0x686   :  { %4776 = vtanh.f32 %v2660_v54 }
 0x68c   :  { %v4769_v38 = vpop.eup %4768 }
 0x68d   :  { %v4771_v50 = vpop.eup %4770  ;;  %v2561_v27 = vmul.f32 %v4769_v38, %v4767_v36  ;;  %v7802_v36 = vld [vmem:[#allocation70_spill] sm:$0xff]  ;;  %v7803_v38 = vld [vmem:[#allocation71_spill] sm:$0xff] }
 0x68e   :  { %v4773_v17 = vpop.eup %4772  ;;  %v2665_v34 = vadd.f32 1.0, %v4771_v50  ;;  %v7804_v50 = vld [vmem:[#allocation72_spill] sm:$0xff] }
 0x68f   :  { %v2671_v4 = vadd.f32 1.0, %v4773_v17  ;;  %v6508_v23 = vsel %vm2567_vm12, %v2561_v27, %v6327_v26  ;;  %v2687_v39 = vpack.c.bf16 %v2561_v27, %v2561_v27  ;;  %v4775_v26 = vpop.eup %4774 }
 0x690   :  { %4778 = vrcp.f32 %v2665_v34  ;;  %v4777_v37 = vpop.eup %4776  ;;  %v2678_v13 = vadd.f32 1.0, %v4775_v26  ;;  %v7823_v26 = vld [vmem:[#allocation35_spill] sm:$0xff] }
 0x691   :  { %4780 = vrcp.f32 %v2671_v4  ;;  %2721 = vmatmul.mubr.bf16.vlgmr.msra.gmra.mrb[64].mxu0 %v2687_v39  ;;  %2762 = vmatmul.mubr.bf16.vlgmr.msra.gmra.mrb[64].mxu1 %v2687_v39  ;;  %v7822_v39 = vld [vmem:[#allocation33_spill] sm:$0xff] }
 0x692   :  { %2771 = vmatpush1.bf16.msra.mxu0 %v6329_v16  ;;  %2812 = vmatpush1.bf16.msra.mxu1 %v6332_v41  ;;  %4782 = vrcp.f32 %v2678_v13  ;;  %v7828_v13 = vld [vmem:[#allocation38_spill] sm:$0xff] }
 0x693   :  { %2772 = vmatprep.subr.bf16.mxu0 %v6335_v59  ;;  %2813 = vmatprep.subr.bf16.mxu1 %v6338_v44 }
 0x694   :  { %2802 = vmatprep.mubr.bf16.mxu0 %v7579_v12  ;;  %2843 = vmatprep.mubr.bf16.mxu1 %v7579_v12 }
 0x696   :  { %2773 = vmatpush1.bf16.msra.mxu0 %v6343_v6  ;;  %2814 = vmatpush1.bf16.msra.mxu1 %v6346_v40 }
 0x697   :  { %2774 = vmatprep.subr.bf16.mxu0 %v6349_v51  ;;  %2815 = vmatprep.subr.bf16.mxu1 %v6352_v45 }
 0x69a   :  { %v4779_v33 = vpop.eup %4778  ;;  %2775 = vmatpush1.bf16.msra.mxu0 %v6355_v62  ;;  %2816 = vmatpush1.bf16.msra.mxu1 %v6358_v43 }
 0x69b   :  { %v4781_v32 = vpop.eup %4780  ;;  %v2682_v54 = vmul.f32 %v4779_v33, %v4777_v37  ;;  %2776 = vmatprep.subr.bf16.mxu0 %v6361_v58  ;;  %2817 = vmatprep.subr.bf16.mxu1 %v6364_v8  ;;  %v7824_v37 = vld [vmem:[#allocation34_spill] sm:$0xff]  ;;  %v7825_v33 = vld [vmem:[#allocation36_spill] sm:$0xff] }
 0x69c   :  { %v2681_v31 = vmul.f32 %v4781_v32, %v6368_v15  ;;  %v7801_v15 = vld [vmem:[#allocation69_spill] sm:$0xff]  ;;  %v4783_v27 = vpop.eup %4782 }
 0x69d   :  { %v7826_v32 = vld [vmem:[#allocation37_spill] sm:$0xff] }
 0x69e   :  { %v6525_v29 = vadd.f32 %v2682_v54, %v2681_v31  ;;  %2777 = vmatpush1.bf16.msra.mxu0 %v6370_v53  ;;  %2818 = vmatpush1.bf16.msra.mxu1 %v7795_v2  ;;  %v7827_v54 = vld [vmem:[#allocation39_spill] sm:$0xff]  ;;  %v7829_v31 = vld [vmem:[#allocation40_spill] sm:$0xff] }
 0x69f   :  { %2778 = vmatprep.subr.bf16.mxu0 %v7796_v28  ;;  %2819 = vmatprep.subr.bf16.mxu1 %v7797_v30 }
 0x6a0   :  { %4784 = vtanh.f32 %v6525_v29 }
 0x6a2   :  { %2779 = vmatpush1.bf16.msra.mxu0 %v7798_v10  ;;  %2820 = vmatpush1.bf16.msra.mxu1 %v7799_v3 }
 0x6a3   :  { %2780 = vmatprep.subr.bf16.mxu0 %v7800_v19  ;;  %2821 = vmatprep.subr.bf16.mxu1 %v7801_v15 }
 0x6a6   :  { %2781 = vmatpush1.bf16.msra.mxu0 %v7802_v36  ;;  %2822 = vmatpush1.bf16.msra.mxu1 %v7803_v38 }
 0x6a7   :  { %2782 = vmatprep.subr.bf16.mxu0 %v7804_v50  ;;  %2823 = vmatprep.subr.bf16.mxu1 %v7805_v61 }
 0x6aa   :  { %v4785_v17 = vpop.eup %4784  ;;  %2783 = vmatpush1.bf16.msra.mxu0 %v6407_v11  ;;  %2824 = vmatpush1.bf16.msra.mxu1 %v6410_v46 }
 0x6ab   :  { %2784 = vmatprep.subr.bf16.mxu0 %v6413_v47  ;;  %2825 = vmatprep.subr.bf16.mxu1 %v6416_v5  ;;  %v2685_v34 = vmul.f32 %v4785_v17, %v4783_v27  ;;  %v7830_v27 = vld [vmem:[#allocation41_spill] sm:$0xff]  ;;  %v7831_v17 = vld [vmem:[#allocation43_spill] sm:$0xff] }
 0x6ad   :  { %v2686_v4 = vpack.c.bf16 %v2685_v34, %v2685_v34  ;;  %v7832_v34 = vld [vmem:[#allocation42_spill] sm:$0xff] }
 0x6ae   :  { %2785 = vmatpush1.bf16.msra.mxu0 %v6419_v63  ;;  %2826 = vmatpush1.bf16.msra.mxu1 %v6422_v49 }
 0x6af   :  { %2894 = vmatprep.subr.bf16.mxu0 %v6108_v52  ;;  %2935 = vmatprep.subr.bf16.mxu1 %v6111_v42  ;;  %v7806_v52 = vld [vmem:[#allocation17_spill] sm:$0xff]  ;;  %v7807_v42 = vld [vmem:[#allocation19_spill] sm:$0xff] }
 0x6b1   :  { %2803 = vmatmul.mubr.bf16.vlgmr.msra.gmra.mrb[68].mxu0 %v2686_v4  ;;  %2844 = vmatmul.mubr.bf16.vlgmr.msra.gmra.mrb[68].mxu1 %v2686_v4 }
 0x6b2   :  { %2895 = vmatpush1.bf16.msra.mxu0 %v6116_v56  ;;  %2936 = vmatpush1.bf16.msra.mxu1 %v6119_v57  ;;  %v7808_v56 = vld [vmem:[#allocation18_spill] sm:$0xff]  ;;  %v7809_v57 = vld [vmem:[#allocation20_spill] sm:$0xff] }
 0x6b3   :  { %2896 = vmatprep.subr.bf16.mxu0 %v6122_v60  ;;  %2937 = vmatprep.subr.bf16.mxu1 %v6125_v0  ;;  %v7810_v60 = vld [vmem:[#allocation21_spill] sm:$0xff]  ;;  %v7811_v0 = vld [vmem:[#allocation23_spill] sm:$0xff] }
 0x6b4   :  { %2926 = vmatprep.mubr.bf16.mxu0 %v7579_v12  ;;  %2967 = vmatprep.mubr.bf16.mxu1 %v7579_v12 }
 0x6b6   :  { %2897 = vmatpush1.bf16.msra.mxu0 %v6130_v1  ;;  %2938 = vmatpush1.bf16.msra.mxu1 %v6133_v7  ;;  %v7812_v1 = vld [vmem:[#allocation22_spill] sm:$0xff]  ;;  %v7813_v7 = vld [vmem:[#allocation24_spill] sm:$0xff] }
 0x6b7   :  { %2898 = vmatprep.subr.bf16.mxu0 %v6136_v9  ;;  %2939 = vmatprep.subr.bf16.mxu1 %v6139_v14  ;;  %v7814_v9 = vld [vmem:[#allocation25_spill] sm:$0xff]  ;;  %v7815_v14 = vld [vmem:[#allocation27_spill] sm:$0xff] }
 0x6ba   :  { %2899 = vmatpush1.bf16.msra.mxu0 %v6142_v18  ;;  %2940 = vmatpush1.bf16.msra.mxu1 %v6145_v20  ;;  %v7816_v18 = vld [vmem:[#allocation26_spill] sm:$0xff]  ;;  %v7817_v20 = vld [vmem:[#allocation28_spill] sm:$0xff] }
 0x6bb   :  { %2900 = vmatprep.subr.bf16.mxu0 %v6148_v21  ;;  %2941 = vmatprep.subr.bf16.mxu1 %v6151_v22  ;;  %v7818_v21 = vld [vmem:[#allocation29_spill] sm:$0xff]  ;;  %v7819_v22 = vld [vmem:[#allocation31_spill] sm:$0xff] }
 0x6be   :  { %2901 = vmatpush1.bf16.msra.mxu0 %v6154_v24  ;;  %2942 = vmatpush1.bf16.msra.mxu1 %v6157_v25  ;;  %v7820_v24 = vld [vmem:[#allocation30_spill] sm:$0xff]  ;;  %v7821_v25 = vld [vmem:[#allocation32_spill] sm:$0xff] }
 0x6bf   :  { %2902 = vmatprep.subr.bf16.mxu0 %v7806_v52  ;;  %2943 = vmatprep.subr.bf16.mxu1 %v7807_v42  ;;  %v7834_v52 = vld [vmem:[#allocation45_spill] sm:$0xff]  ;;  %v7835_v42 = vld [vmem:[#allocation46_spill] sm:$0xff] }
 0x6c2   :  { %2903 = vmatpush1.bf16.msra.mxu0 %v7808_v56  ;;  %2944 = vmatpush1.bf16.msra.mxu1 %v7809_v57  ;;  %v7836_v56 = vld [vmem:[#allocation14_spill] sm:$0xff]  ;;  %v7837_v57 = vld [vmem:[#allocation77_spill] sm:$0xff] }
 0x6c3   :  { %2904 = vmatprep.subr.bf16.mxu0 %v7810_v60  ;;  %2945 = vmatprep.subr.bf16.mxu1 %v7811_v0  ;;  %v7838_v60 = vld [vmem:[#allocation78_spill] sm:$0xff]  ;;  %v7839_v0 = vld [vmem:[#allocation79_spill] sm:$0xff] }
 0x6c6   :  { %2905 = vmatpush1.bf16.msra.mxu0 %v7812_v1  ;;  %2946 = vmatpush1.bf16.msra.mxu1 %v7813_v7  ;;  %v7840_v1 = vld [vmem:[#allocation47_spill] sm:$0xff]  ;;  %v7841_v7 = vld [vmem:[#allocation48_spill] sm:$0xff] }
 0x6c7   :  { %2906 = vmatprep.subr.bf16.mxu0 %v7814_v9  ;;  %2947 = vmatprep.subr.bf16.mxu1 %v7815_v14  ;;  %v7842_v9 = vld [vmem:[#allocation49_spill] sm:$0xff]  ;;  %v7843_v14 = vld [vmem:[#allocation50_spill] sm:$0xff] }
 0x6ca   :  { %2907 = vmatpush1.bf16.msra.mxu0 %v7816_v18  ;;  %2948 = vmatpush1.bf16.msra.mxu1 %v7817_v20  ;;  %v7844_v18 = vld [vmem:[#allocation51_spill] sm:$0xff]  ;;  %v7845_v20 = vld [vmem:[#allocation52_spill] sm:$0xff] }
 0x6cb   :  { %2908 = vmatprep.subr.bf16.mxu0 %v7818_v21  ;;  %2949 = vmatprep.subr.bf16.mxu1 %v7819_v22  ;;  %v7846_v21 = vld [vmem:[#allocation53_spill] sm:$0xff]  ;;  %v7847_v22 = vld [vmem:[#allocation54_spill] sm:$0xff] }
 0x6ce   :  { %2909 = vmatpush1.bf16.msra.mxu0 %v7820_v24  ;;  %2950 = vmatpush1.bf16.msra.mxu1 %v7821_v25  ;;  %v7848_v24 = vld [vmem:[#allocation55_spill] sm:$0xff]  ;;  %v7849_v25 = vld [vmem:[#allocation56_spill] sm:$0xff] }
 0x6cf   :  { %3006 = vmatprep.subr.bf16.mxu0 %v7822_v39  ;;  %3047 = vmatprep.subr.bf16.mxu1 %v7823_v26  ;;  %v7850_v39 = vld [vmem:[#allocation57_spill] sm:$0xff]  ;;  %v7851_v26 = vld [vmem:[#allocation58_spill] sm:$0xff] }
 0x6d1   :  { %2927 = vmatmul.mubr.bf16.vlgmr.msra.gmra.mrb[72].mxu0 %v2686_v4  ;;  %2968 = vmatmul.mubr.bf16.vlgmr.msra.gmra.mrb[72].mxu1 %v2686_v4  ;;  %v7833_v4 = vld [vmem:[#allocation44_spill] sm:$0xff] }
 0x6d2   :  { %3007 = vmatpush1.bf16.msra.mxu0 %v7824_v37  ;;  %3048 = vmatpush1.bf16.msra.mxu1 %v7825_v33  ;;  %v7852_v37 = vld [vmem:[#allocation59_spill] sm:$0xff]  ;;  %v7853_v33 = vld [vmem:[#allocation60_spill] sm:$0xff] }
 0x6d3   :  { %3008 = vmatprep.subr.bf16.mxu0 %v7826_v32  ;;  %3049 = vmatprep.subr.bf16.mxu1 %v7827_v54  ;;  %v7854_v32 = vld [vmem:[#allocation61_spill] sm:$0xff]  ;;  %v7855_v54 = vld [vmem:[#allocation62_spill] sm:$0xff] }
 0x6d4   :  { %3038 = vmatprep.mubr.bf16.mxu0 %v7579_v12  ;;  %3079 = vmatprep.mubr.bf16.mxu1 %v7579_v12 }
 0x6d6   :  { %3009 = vmatpush1.bf16.msra.mxu0 %v7828_v13  ;;  %3050 = vmatpush1.bf16.msra.mxu1 %v7829_v31 }
 0x6d7   :  { %3010 = vmatprep.subr.bf16.mxu0 %v7830_v27  ;;  %3051 = vmatprep.subr.bf16.mxu1 %v7831_v17 }
 0x6da   :  { %3011 = vmatpush1.bf16.msra.mxu0 %v7832_v34  ;;  %3052 = vmatpush1.bf16.msra.mxu1 %v7833_v4 }
 0x6db   :  { %3012 = vmatprep.subr.bf16.mxu0 %v7834_v52  ;;  %3053 = vmatprep.subr.bf16.mxu1 %v7835_v42 }
 0x6de   :  { %3013 = vmatpush1.bf16.msra.mxu0 %v7836_v56  ;;  %3054 = vmatpush1.bf16.msra.mxu1 %v7837_v57 }
 0x6df   :  { %3014 = vmatprep.subr.bf16.mxu0 %v7838_v60  ;;  %3055 = vmatprep.subr.bf16.mxu1 %v7839_v0 }
 0x6e2   :  { %3015 = vmatpush1.bf16.msra.mxu0 %v7840_v1  ;;  %3056 = vmatpush1.bf16.msra.mxu1 %v7841_v7 }
 0x6e3   :  { %3016 = vmatprep.subr.bf16.mxu0 %v7842_v9  ;;  %3057 = vmatprep.subr.bf16.mxu1 %v7843_v14 }
 0x6e6   :  { %3017 = vmatpush1.bf16.msra.mxu0 %v7844_v18  ;;  %3058 = vmatpush1.bf16.msra.mxu1 %v7845_v20 }
 0x6e7   :  { %3018 = vmatprep.subr.bf16.mxu0 %v7846_v21  ;;  %3059 = vmatprep.subr.bf16.mxu1 %v7847_v22 }
 0x6ea   :  { %3019 = vmatpush1.bf16.msra.mxu0 %v7848_v24  ;;  %3060 = vmatpush1.bf16.msra.mxu1 %v7849_v25 }
 0x6eb   :  { %3020 = vmatprep.subr.bf16.mxu0 %v7850_v39  ;;  %3061 = vmatprep.subr.bf16.mxu1 %v7851_v26 }
 0x6ee   :  { %3021 = vmatpush1.bf16.msra.mxu0 %v7852_v37  ;;  %3062 = vmatpush1.bf16.msra.mxu1 %v7853_v33  ;;  %v7856_v37 = vld [vmem:[#allocation15_spill] sm:$0xff] }
 0x6ef   :  { %3088 = vmatprep.subr.bf16.mxu0 %v7854_v32  ;;  %3129 = vmatprep.subr.bf16.mxu1 %v7855_v54  ;;  %v7857_v54 = vld [vmem:[#allocation16_spill] sm:$0xff] }
 0x764   :  { %v2722_v13 = vpop.f32.mrb[64].mxu0  ;;  %v2763_v31 = vpop.f32.mrb[64].mxu1 }
 0x765   :  { %v2724_v27 = vpop.f32.mrb[65].mxu0  ;;  %v2765_v17 = vpop.f32.mrb[65].mxu1 }
 0x766   :  { %v2726_v34 = vpop.f32.mrb[66].mxu0  ;;  %v2767_v4 = vpop.f32.mrb[66].mxu1 }
 0x767   :  { %v2727_v52 = vpop.f32.mrb[67].mxu0  ;;  %v2768_v42 = vpop.f32.mrb[67].mxu1 }
 0x784   :  { %v2804_v56 = vpop.f32.mrb[68].mxu0  ;;  %v2845_v57 = vpop.f32.mrb[68].mxu1 }
 0x785   :  { %v2805_v60 = vadd.f32 %v2804_v56, %v2722_v13  ;;  %v2846_v0 = vadd.f32 %v2845_v57, %v2763_v31  ;;  %v2806_v1 = vpop.f32.mrb[69].mxu0  ;;  %v2847_v7 = vpop.f32.mrb[69].mxu1 }
 0x786   :  { %v2807_v9 = vadd.f32 %v2806_v1, %v2724_v27  ;;  %v2848_v14 = vadd.f32 %v2847_v7, %v2765_v17  ;;  %v2808_v18 = vpop.f32.mrb[70].mxu0  ;;  %v2849_v20 = vpop.f32.mrb[70].mxu1  ;;  %v7858_v1 = vld [vmem:[#allocation84_spill] sm:$0xff] }
 0x787   :  { %v2852_v21 = vadd.f32 %v2805_v60, %v6041_v55  ;;  %v2809_v22 = vpop.f32.mrb[71].mxu0  ;;  %v2850_v24 = vpop.f32.mrb[71].mxu1  ;;  %v2854_v13 = vadd.f32 %v2846_v0, %v7857_v54  ;;  %v2890_v7 = vunpack.c.l.bf16 %v7858_v1 }
 0x788   :  { %v2853_v25 = vadd.f32 %v2807_v9, %v6045_v48  ;;  %v2855_v33 = vadd.f32 %v2848_v14, %v7856_v37  ;;  %v7859_v9 = vld [vmem:[#allocation85_spill] sm:$0xff] }
 0x789   :  { %v4354_v39 = vmul.f32 -1.442695, %v2852_v21  ;;  %v2892_v14 = vunpack.c.l.bf16 %v7859_v9  ;;  %v2891_v21 = vunpack.c.h.bf16 %v7858_v1  ;;  %v2893_v22 = vunpack.c.h.bf16 %v7859_v9 }
 0x78a   :  { %v4355_v26 = vmul.f32 -1.442695, %v2853_v25  ;;  %v4356_v32 = vmul.f32 -1.442695, %v2855_v33 }
 0x78b   :  { %4786 = vpow2.f32 %v4354_v39 }
 0x78c   :  { %4788 = vpow2.f32 %v4355_v26 }
 0x78d   :  { %4790 = vpow2.f32 %v4356_v32 }
 0x78e   :  { %4792 = vtanh.f32 %v2854_v13 }
 0x795   :  { %v4787_v31 = vpop.eup %4786 }
 0x796   :  { %v4789_v27 = vpop.eup %4788  ;;  %v2859_v17 = vadd.f32 1.0, %v4787_v31 }
 0x797   :  { %v2865_v34 = vadd.f32 1.0, %v4789_v27  ;;  %v4791_v4 = vpop.eup %4790 }
 0x798   :  { %4794 = vrcp.f32 %v2859_v17  ;;  %v4793_v52 = vpop.eup %4792  ;;  %v2872_v60 = vadd.f32 1.0, %v4791_v4 }
 0x799   :  { %4796 = vrcp.f32 %v2865_v34 }
 0x79a   :  { %4798 = vrcp.f32 %v2872_v60 }
 0x7a2   :  { %v4795_v42 = vpop.eup %4794 }
 0x7a3   :  { %v4797_v56 = vpop.eup %4796  ;;  %v2876_v57 = vmul.f32 %v4795_v42, %v4793_v52 }
 0x7a4   :  { %v2875_v0 = vmul.f32 %v4797_v56, %v6504_v35  ;;  %v2928_v18 = vpop.f32.mrb[72].mxu0  ;;  %v2969_v20 = vpop.f32.mrb[72].mxu1 }
 0x7a5   :  { %v2976_v24 = vadd.f32 %v2928_v18, %v2890_v7  ;;  %v2978_v25 = vadd.f32 %v2969_v20, %v2892_v14  ;;  %v2930_v39 = vpop.f32.mrb[73].mxu0  ;;  %v2971_v26 = vpop.f32.mrb[73].mxu1 }
 0x7a6   :  { %v6625_v33 = vadd.f32 %v2876_v57, %v2875_v0  ;;  %v2977_v32 = vadd.f32 %v2930_v39, %v2891_v21  ;;  %v2979_v13 = vadd.f32 %v2971_v26, %v2893_v22  ;;  %v2932_v31 = vpop.f32.mrb[74].mxu0  ;;  %v2973_v27 = vpop.f32.mrb[74].mxu1  ;;  %v6736_v21 = vld [vmem:[#allocation5 + $0xac] ss:$16 sps:$4 sm:$0xff]   ;;  %v6739_v22 = vld [vmem:[#allocation5 + $0xa0] ss:$16 sps:$4 sm:$0xff]  }
 0x7a7   :  { %v4357_v17 = vmul.f32 -1.442695, %v2976_v24  ;;  %v2933_v34 = vpop.f32.mrb[75].mxu0  ;;  %v2974_v35 = vpop.f32.mrb[75].mxu1  ;;  %7865 = vst [vmem:[#allocation82_spill] sm:$0xff] %v6736_v21  ;;  %7866 = vst [vmem:[#allocation83_spill] sm:$0xff] %v6739_v22 }
 0x7a8   :  { %v4358_v4 = vmul.f32 -1.442695, %v2977_v32  ;;  %4800 = vtanh.f32 %v6625_v33  ;;  %v4359_v52 = vmul.f32 -1.442695, %v2979_v13  ;;  %v4799_v42 = vpop.eup %4798  ;;  %v2884_v7 = vpop.permute.xlu1 %2883  ;;  %v6742_v24 = vld [vmem:[#allocation5 + $0xa8] ss:$16 sps:$4 sm:$0xff]  }
 0x7a9   :  { %4802 = vpow2.f32 %v4357_v17  ;;  %vm2885_vm13 = vcmp.eq.s32.totalorder %v2884_v7, 1  ;;  %7867 = vst [vmem:[#allocation63_spill] sm:$0xff] %v6742_v24  ;;  %v6748_v39 = vld [vmem:[#allocation5 + $0xcc] ss:$16 sps:$4 sm:$0xff]   ;;  %v6751_v26 = vld [vmem:[#allocation5 + $0xc0] ss:$16 sps:$4 sm:$0xff]  }
 0x7aa   :  { %4804 = vpow2.f32 %v4358_v4  ;;  %7869 = vst [vmem:[#allocation65_spill] sm:$0xff] %v6748_v39  ;;  %7870 = vst [vmem:[#allocation66_spill] sm:$0xff] %v6751_v26  ;;  %v6754_v32 = vld [vmem:[#allocation5 + $0xc8] ss:$16 sps:$4 sm:$0xff]   ;;  %v6757_v13 = vld [vmem:[#allocation5 + $0xe4] ss:$16 sps:$4 sm:$0xff]  }
 0x7ab   :  { %4806 = vpow2.f32 %v4359_v52  ;;  %7871 = vst [vmem:[#allocation67_spill] sm:$0xff] %v6754_v32  ;;  %7872 = vst [vmem:[#allocation68_spill] sm:$0xff] %v6757_v13  ;;  %v6760_v31 = vld [vmem:[#allocation5 + $0xec] ss:$16 sps:$4 sm:$0xff]   ;;  %v6763_v27 = vld [vmem:[#allocation5 + $0xe0] ss:$16 sps:$4 sm:$0xff]  }
 0x7ac   :  { %4808 = vtanh.f32 %v2978_v25  ;;  %v6745_v25 = vld [vmem:[#allocation5 + $0xc4] ss:$16 sps:$4 sm:$0xff]   ;;  %7873 = vst [vmem:[#allocation69_spill] sm:$0xff] %v6760_v31  ;;  %7874 = vst [vmem:[#allocation70_spill] sm:$0xff] %v6763_v27  ;;  %v6766_v17 = vld [vmem:[#allocation5 + $0xe8] ss:$16 sps:$4 sm:$0xff]  }
 0x7ad   :  { %7868 = vst [vmem:[#allocation64_spill] sm:$0xff] %v6745_v25  ;;  %7875 = vst [vmem:[#allocation71_spill] sm:$0xff] %v6766_v17  ;;  %v6769_v34 = vld [vmem:[#allocation8 + $0x4] ss:$16 sps:$4 sm:$0xff]   ;;  %v6772_v35 = vld [vmem:[#allocation8 + $0xc] ss:$16 sps:$4 sm:$0xff]  }
 0x7ae   :  { %7876 = vst [vmem:[#allocation72_spill] sm:$0xff] %v6769_v34  ;;  %7877 = vst [vmem:[#allocation73_spill] sm:$0xff] %v6772_v35  ;;  %v6777_v4 = vld [vmem:[#allocation8] ss:$16 sps:$4 sm:$0xff]   ;;  %v6780_v52 = vld [vmem:[#allocation8 + $0x8] ss:$16 sps:$4 sm:$0xff]  }
 0x7af   :  { %7878 = vst [vmem:[#allocation17_spill] sm:$0xff] %v6777_v4  ;;  %7879 = vst [vmem:[#allocation19_spill] sm:$0xff] %v6780_v52  ;;  %v6794_v7 = vld [vmem:[#allocation8 + $0x28] ss:$16 sps:$4 sm:$0xff]  }
 0x7b0   :  { %7883 = vst [vmem:[#allocation23_spill] sm:$0xff] %v6794_v7 }
 0x7b2   :  { %v4801_v56 = vpop.eup %4800 }
 0x7b3   :  { %v4803_v1 = vpop.eup %4802  ;;  %v2879_v57 = vmul.f32 %v4801_v56, %v4799_v42  ;;  %v6783_v42 = vld [vmem:[#allocation8 + $0x24] ss:$16 sps:$4 sm:$0xff]   ;;  %v6786_v56 = vld [vmem:[#allocation8 + $0x2c] ss:$16 sps:$4 sm:$0xff]  }
 0x7b4   :  { %v4805_v9 = vpop.eup %4804  ;;  %v2983_v14 = vadd.f32 1.0, %v4803_v1  ;;  %7880 = vst [vmem:[#allocation18_spill] sm:$0xff] %v6783_v42  ;;  %7881 = vst [vmem:[#allocation20_spill] sm:$0xff] %v6786_v56  ;;  %v6791_v1 = vld [vmem:[#allocation8 + $0x20] ss:$16 sps:$4 sm:$0xff]  }
 0x7b5   :  { %v2989_v60 = vadd.f32 1.0, %v4805_v9  ;;  %v6629_v0 = vsel %vm2885_vm13, %v2879_v57, %v6508_v23  ;;  %v3005_v18 = vpack.c.bf16 %v2879_v57, %v2879_v57  ;;  %v4807_v23 = vpop.eup %4806  ;;  %7882 = vst [vmem:[#allocation21_spill] sm:$0xff] %v6791_v1  ;;  %v6797_v57 = vld [vmem:[#allocation8 + $0x44] ss:$16 sps:$4 sm:$0xff]   ;;  %v6800_v9 = vld [vmem:[#allocation8 + $0x4c] ss:$16 sps:$4 sm:$0xff]  }
 0x7b6   :  { %4810 = vrcp.f32 %v2983_v14  ;;  %7884 = vst [vmem:[#allocation22_spill] sm:$0xff] %v6797_v57  ;;  %7885 = vst [vmem:[#allocation24_spill] sm:$0xff] %v6800_v9  ;;  %v6803_v14 = vld [vmem:[#allocation8 + $0x40] ss:$16 sps:$4 sm:$0xff]  }
 0x7b7   :  { %4812 = vrcp.f32 %v2989_v60  ;;  %3039 = vmatmul.mubr.bf16.vlgmr.msra.gmra.mrb[76].mxu0 %v3005_v18  ;;  %3080 = vmatmul.mubr.bf16.vlgmr.msra.gmra.mrb[76].mxu1 %v3005_v18  ;;  %7886 = vst [vmem:[#allocation25_spill] sm:$0xff] %v6803_v14  ;;  %v6806_v60 = vld [vmem:[#allocation8 + $0x48] ss:$16 sps:$4 sm:$0xff]   ;;  %v6809_v18 = vld [vmem:[#allocation8 + $0x64] ss:$16 sps:$4 sm:$0xff]  }
 0x7b8   :  { %3089 = vmatpush1.bf16.msra.mxu0 %v6329_v16  ;;  %3130 = vmatpush1.bf16.msra.mxu1 %v6332_v41  ;;  %v4809_v16 = vpop.eup %4808  ;;  %7887 = vst [vmem:[#allocation27_spill] sm:$0xff] %v6806_v60  ;;  %7888 = vst [vmem:[#allocation26_spill] sm:$0xff] %v6809_v18 }
 0x7b9   :  { %3090 = vmatprep.subr.bf16.mxu0 %v6335_v59  ;;  %3131 = vmatprep.subr.bf16.mxu1 %v6338_v44  ;;  %v2996_v44 = vadd.f32 1.0, %v4807_v23  ;;  %v6812_v23 = vld [vmem:[#allocation8 + $0x6c] ss:$16 sps:$4 sm:$0xff]  }
 0x7ba   :  { %3120 = vmatprep.mubr.bf16.mxu0 %v7579_v12  ;;  %3161 = vmatprep.mubr.bf16.mxu1 %v7579_v12  ;;  %7889 = vst [vmem:[#allocation28_spill] sm:$0xff] %v6812_v23 }
 0x7bb   :  { %4814 = vrcp.f32 %v2996_v44  ;;  %v6827_v44 = vld [vmem:[#allocation8 + $0x80] ss:$16 sps:$4 sm:$0xff]  }
 0x7bc   :  { %3091 = vmatpush1.bf16.msra.mxu0 %v6343_v6  ;;  %3132 = vmatpush1.bf16.msra.mxu1 %v6346_v40  ;;  %7894 = vst [vmem:[#allocation33_spill] sm:$0xff] %v6827_v44 }
 0x7bd   :  { %3092 = vmatprep.subr.bf16.mxu0 %v6349_v51  ;;  %3133 = vmatprep.subr.bf16.mxu1 %v6352_v45 }
 0x7c0   :  { %v4811_v20 = vpop.eup %4810  ;;  %3093 = vmatpush1.bf16.msra.mxu0 %v6355_v62  ;;  %3134 = vmatpush1.bf16.msra.mxu1 %v6358_v43 }
 0x7c1   :  { %v4813_v41 = vpop.eup %4812  ;;  %v3000_v59 = vmul.f32 %v4811_v20, %v4809_v16  ;;  %3094 = vmatprep.subr.bf16.mxu0 %v6361_v58  ;;  %3135 = vmatprep.subr.bf16.mxu1 %v6364_v8  ;;  %v6669_v58 = vld [vmem:[#allocation5 + $0x4] ss:$16 sps:$4 sm:$0xff]   ;;  %v6672_v8 = vld [vmem:[#allocation5 + $0xc] ss:$16 sps:$4 sm:$0xff]   ;;  %v6815_v16 = vld [vmem:[#allocation8 + $0x60] ss:$16 sps:$4 sm:$0xff]  }
 0x7c2   :  { %v2999_v6 = vmul.f32 %v4813_v41, %v6525_v29  ;;  %v6700_v29 = vld [vmem:[#allocation5 + $0x4c] ss:$16 sps:$4 sm:$0xff]   ;;  %7890 = vst [vmem:[#allocation29_spill] sm:$0xff] %v6815_v16  ;;  %v6818_v20 = vld [vmem:[#allocation8 + $0x68] ss:$16 sps:$4 sm:$0xff]  }
 0x7c3   :  { %7891 = vst [vmem:[#allocation31_spill] sm:$0xff] %v6818_v20  ;;  %v6821_v41 = vld [vmem:[#allocation8 + $0x84] ss:$16 sps:$4 sm:$0xff]  }
 0x7c4   :  { %v6646_v40 = vadd.f32 %v3000_v59, %v2999_v6  ;;  %3095 = vmatpush1.bf16.msra.mxu0 %v6370_v53  ;;  %3136 = vmatpush1.bf16.msra.mxu1 %v7795_v2  ;;  %v6677_v53 = vld [vmem:[#allocation5] ss:$16 sps:$4 sm:$0xff]   ;;  %7892 = vst [vmem:[#allocation30_spill] sm:$0xff] %v6821_v41  ;;  %v6824_v59 = vld [vmem:[#allocation8 + $0x8c] ss:$16 sps:$4 sm:$0xff]  }
 0x7c5   :  { %3096 = vmatprep.subr.bf16.mxu0 %v7796_v28  ;;  %3137 = vmatprep.subr.bf16.mxu1 %v7797_v30  ;;  %v4815_v51 = vpop.eup %4814  ;;  %v6703_v2 = vld [vmem:[#allocation5 + $0x40] ss:$16 sps:$4 sm:$0xff]   ;;  %v6706_v28 = vld [vmem:[#allocation5 + $0x48] ss:$16 sps:$4 sm:$0xff]   ;;  %v6709_v30 = vld [vmem:[#allocation5 + $0x64] ss:$16 sps:$4 sm:$0xff]  }
 0x7c6   :  { %4816 = vtanh.f32 %v6646_v40  ;;  %7893 = vst [vmem:[#allocation32_spill] sm:$0xff] %v6824_v59  ;;  %v6830_v6 = vld [vmem:[#allocation8 + $0x88] ss:$16 sps:$4 sm:$0xff]  }
 0x7c7   :  { %7895 = vst [vmem:[#allocation35_spill] sm:$0xff] %v6830_v6 }
 0x7c8   :  { %3097 = vmatpush1.bf16.msra.mxu0 %v7798_v10  ;;  %3138 = vmatpush1.bf16.msra.mxu1 %v7799_v3  ;;  %v6712_v10 = vld [vmem:[#allocation5 + $0x6c] ss:$16 sps:$4 sm:$0xff]   ;;  %v6715_v3 = vld [vmem:[#allocation5 + $0x60] ss:$16 sps:$4 sm:$0xff]  }
 0x7c9   :  { %3098 = vmatprep.subr.bf16.mxu0 %v7800_v19  ;;  %3139 = vmatprep.subr.bf16.mxu1 %v7801_v15  ;;  %v6718_v19 = vld [vmem:[#allocation5 + $0x68] ss:$16 sps:$4 sm:$0xff]   ;;  %v6721_v15 = vld [vmem:[#allocation5 + $0x84] ss:$16 sps:$4 sm:$0xff]  }
 0x7ca   :  { %7860 = vst [vmem:[#allocation74_spill] sm:$0xff] %v6721_v15 }
 0x7cc   :  { %3099 = vmatpush1.bf16.msra.mxu0 %v7802_v36  ;;  %3140 = vmatpush1.bf16.msra.mxu1 %v7803_v38  ;;  %v6724_v36 = vld [vmem:[#allocation5 + $0x8c] ss:$16 sps:$4 sm:$0xff]   ;;  %v6727_v38 = vld [vmem:[#allocation5 + $0x80] ss:$16 sps:$4 sm:$0xff]  }
 0x7cd   :  { %3100 = vmatprep.subr.bf16.mxu0 %v7804_v50  ;;  %3141 = vmatprep.subr.bf16.mxu1 %v7805_v61  ;;  %7861 = vst [vmem:[#allocation75_spill] sm:$0xff] %v6724_v36  ;;  %7862 = vst [vmem:[#allocation76_spill] sm:$0xff] %v6727_v38  ;;  %v6730_v50 = vld [vmem:[#allocation5 + $0x88] ss:$16 sps:$4 sm:$0xff]   ;;  %v6733_v61 = vld [vmem:[#allocation5 + $0xa4] ss:$16 sps:$4 sm:$0xff]  }
 0x7ce   :  { %7863 = vst [vmem:[#allocation80_spill] sm:$0xff] %v6730_v50  ;;  %7864 = vst [vmem:[#allocation81_spill] sm:$0xff] %v6733_v61 }
 0x7d0   :  { %v4817_v45 = vpop.eup %4816  ;;  %3101 = vmatpush1.bf16.msra.mxu0 %v6407_v11  ;;  %3142 = vmatpush1.bf16.msra.mxu1 %v6410_v46  ;;  %v6680_v11 = vld [vmem:[#allocation5 + $0x8] ss:$16 sps:$4 sm:$0xff]   ;;  %v6691_v46 = vld [vmem:[#allocation5 + $0x20] ss:$16 sps:$4 sm:$0xff]  }
 0x7d1   :  { %3102 = vmatprep.subr.bf16.mxu0 %v6413_v47  ;;  %3143 = vmatprep.subr.bf16.mxu1 %v6416_v5  ;;  %v3003_v62 = vmul.f32 %v4817_v45, %v4815_v51  ;;  %v6694_v47 = vld [vmem:[#allocation5 + $0x28] ss:$16 sps:$4 sm:$0xff]   ;;  %v6697_v5 = vld [vmem:[#allocation5 + $0x44] ss:$16 sps:$4 sm:$0xff]   ;;  %v6836_v45 = vld [vmem:[#allocation8 + $0xac] ss:$16 sps:$4 sm:$0xff]  }
 0x7d2   :  { %v6833_v51 = vld [vmem:[#allocation8 + $0xa4] ss:$16 sps:$4 sm:$0xff]   ;;  %7897 = vst [vmem:[#allocation36_spill] sm:$0xff] %v6836_v45 }
 0x7d3   :  { %v6665_v43 = vpack.c.bf16 %v3003_v62, %v3003_v62  ;;  %7896 = vst [vmem:[#allocation34_spill] sm:$0xff] %v6833_v51  ;;  %v6839_v62 = vld [vmem:[#allocation8 + $0xa0] ss:$16 sps:$4 sm:$0xff]  }
 0x7d4   :  { %3103 = vmatpush1.bf16.msra.mxu0 %v6419_v63  ;;  %3144 = vmatpush1.bf16.msra.mxu1 %v6422_v49  ;;  %v6683_v49 = vld [vmem:[#allocation5 + $0x24] ss:$16 sps:$4 sm:$0xff]   ;;  %v6686_v63 = vld [vmem:[#allocation5 + $0x2c] ss:$16 sps:$4 sm:$0xff]   ;;  %7898 = vst [vmem:[#allocation37_spill] sm:$0xff] %v6839_v62 }
 0x7d5   :  { %3212 = vmatprep.subr.bf16.mxu0 %v6669_v58  ;;  %3253 = vmatprep.subr.bf16.mxu1 %v6672_v8 }
 0x7d7   :  { %3121 = vmatmul.mubr.bf16.vlgmr.msra.gmra.mrb[80].mxu0 %v6665_v43  ;;  %3162 = vmatmul.mubr.bf16.vlgmr.msra.gmra.mrb[80].mxu1 %v6665_v43 }
 0x7d8   :  { %3213 = vmatpush1.bf16.msra.mxu0 %v6677_v53  ;;  %3254 = vmatpush1.bf16.msra.mxu1 %v6680_v11 }
 0x7d9   :  { %3214 = vmatprep.subr.bf16.mxu0 %v6683_v49  ;;  %3255 = vmatprep.subr.bf16.mxu1 %v6686_v63 }
 0x7da   :  { %3244 = vmatprep.mubr.bf16.mxu0 %v7579_v12  ;;  %3285 = vmatprep.mubr.bf16.mxu1 %v7579_v12 }
 0x7dc   :  { %3215 = vmatpush1.bf16.msra.mxu0 %v6691_v46  ;;  %3256 = vmatpush1.bf16.msra.mxu1 %v6694_v47 }
 0x7dd   :  { %3216 = vmatprep.subr.bf16.mxu0 %v6697_v5  ;;  %3257 = vmatprep.subr.bf16.mxu1 %v6700_v29 }
 0x7e0   :  { %3217 = vmatpush1.bf16.msra.mxu0 %v6703_v2  ;;  %3258 = vmatpush1.bf16.msra.mxu1 %v6706_v28 }
 0x7e1   :  { %3218 = vmatprep.subr.bf16.mxu0 %v6709_v30  ;;  %3259 = vmatprep.subr.bf16.mxu1 %v6712_v10 }
 0x7e4   :  { %3219 = vmatpush1.bf16.msra.mxu0 %v6715_v3  ;;  %3260 = vmatpush1.bf16.msra.mxu1 %v6718_v19 }
 0x7e5   :  { %3220 = vmatprep.subr.bf16.mxu0 %v6721_v15  ;;  %3261 = vmatprep.subr.bf16.mxu1 %v6724_v36 }
 0x7e8   :  { %3221 = vmatpush1.bf16.msra.mxu0 %v6727_v38  ;;  %3262 = vmatpush1.bf16.msra.mxu1 %v6730_v50 }
 0x7e9   :  { %3222 = vmatprep.subr.bf16.mxu0 %v6733_v61  ;;  %3263 = vmatprep.subr.bf16.mxu1 %v6736_v21 }
 0x7ec   :  { %3223 = vmatpush1.bf16.msra.mxu0 %v6739_v22  ;;  %3264 = vmatpush1.bf16.msra.mxu1 %v6742_v24 }
 0x7ed   :  { %3224 = vmatprep.subr.bf16.mxu0 %v6745_v25  ;;  %3265 = vmatprep.subr.bf16.mxu1 %v6748_v39 }
 0x7f0   :  { %3225 = vmatpush1.bf16.msra.mxu0 %v6751_v26  ;;  %3266 = vmatpush1.bf16.msra.mxu1 %v6754_v32 }
 0x7f1   :  { %3226 = vmatprep.subr.bf16.mxu0 %v6757_v13  ;;  %3267 = vmatprep.subr.bf16.mxu1 %v6760_v31 }
 0x7f4   :  { %3227 = vmatpush1.bf16.msra.mxu0 %v6763_v27  ;;  %3268 = vmatpush1.bf16.msra.mxu1 %v6766_v17 }
 0x7f5   :  { %3324 = vmatprep.subr.bf16.mxu0 %v6769_v34  ;;  %3365 = vmatprep.subr.bf16.mxu1 %v6772_v35 }
 0x7f7   :  { %3245 = vmatmul.mubr.bf16.vlgmr.msra.gmra.mrb[84].mxu0 %v6665_v43  ;;  %3286 = vmatmul.mubr.bf16.vlgmr.msra.gmra.mrb[84].mxu1 %v6665_v43  ;;  %v6842_v43 = vld [vmem:[#allocation8 + $0xa8] ss:$16 sps:$4 sm:$0xff]  }
 0x7f8   :  { %3325 = vmatpush1.bf16.msra.mxu0 %v6777_v4  ;;  %3366 = vmatpush1.bf16.msra.mxu1 %v6780_v52  ;;  %7899 = vst [vmem:[#allocation39_spill] sm:$0xff] %v6842_v43 }
 0x7f9   :  { %3326 = vmatprep.subr.bf16.mxu0 %v6783_v42  ;;  %3367 = vmatprep.subr.bf16.mxu1 %v6786_v56 }
 0x7fa   :  { %3356 = vmatprep.mubr.bf16.mxu0 %v7579_v12  ;;  %3397 = vmatprep.mubr.bf16.mxu1 %v7579_v12 }
 0x7fc   :  { %3327 = vmatpush1.bf16.msra.mxu0 %v6791_v1  ;;  %3368 = vmatpush1.bf16.msra.mxu1 %v6794_v7 }
 0x7fd   :  { %3328 = vmatprep.subr.bf16.mxu0 %v6797_v57  ;;  %3369 = vmatprep.subr.bf16.mxu1 %v6800_v9 }
 0x800   :  { %3329 = vmatpush1.bf16.msra.mxu0 %v6803_v14  ;;  %3370 = vmatpush1.bf16.msra.mxu1 %v6806_v60 }
 0x801   :  { %3330 = vmatprep.subr.bf16.mxu0 %v6809_v18  ;;  %3371 = vmatprep.subr.bf16.mxu1 %v6812_v23 }
 0x804   :  { %3331 = vmatpush1.bf16.msra.mxu0 %v6815_v16  ;;  %3372 = vmatpush1.bf16.msra.mxu1 %v6818_v20 }
 0x805   :  { %3332 = vmatprep.subr.bf16.mxu0 %v6821_v41  ;;  %3373 = vmatprep.subr.bf16.mxu1 %v6824_v59 }
 0x808   :  { %3333 = vmatpush1.bf16.msra.mxu0 %v6827_v44  ;;  %3374 = vmatpush1.bf16.msra.mxu1 %v6830_v6  ;;  %v6845_v44 = vld [vmem:[#allocation8 + $0xc4] ss:$16 sps:$4 sm:$0xff]   ;;  %v6848_v6 = vld [vmem:[#allocation8 + $0xcc] ss:$16 sps:$4 sm:$0xff]  }
 0x809   :  { %3334 = vmatprep.subr.bf16.mxu0 %v6833_v51  ;;  %3375 = vmatprep.subr.bf16.mxu1 %v6836_v45  ;;  %7900 = vst [vmem:[#allocation38_spill] sm:$0xff] %v6845_v44  ;;  %7901 = vst [vmem:[#allocation40_spill] sm:$0xff] %v6848_v6  ;;  %v6851_v51 = vld [vmem:[#allocation8 + $0xc0] ss:$16 sps:$4 sm:$0xff]   ;;  %v6854_v45 = vld [vmem:[#allocation8 + $0xc8] ss:$16 sps:$4 sm:$0xff]  }
 0x80a   :  { %7902 = vst [vmem:[#allocation41_spill] sm:$0xff] %v6851_v51  ;;  %7903 = vst [vmem:[#allocation43_spill] sm:$0xff] %v6854_v45 }
 0x80c   :  { %3335 = vmatpush1.bf16.msra.mxu0 %v6839_v62  ;;  %3376 = vmatpush1.bf16.msra.mxu1 %v6842_v43  ;;  %v6857_v62 = vld [vmem:[#allocation8 + $0xe4] ss:$16 sps:$4 sm:$0xff]   ;;  %v6860_v43 = vld [vmem:[#allocation8 + $0xec] ss:$16 sps:$4 sm:$0xff]  }
 0x80d   :  { %3336 = vmatprep.subr.bf16.mxu0 %v6845_v44  ;;  %3377 = vmatprep.subr.bf16.mxu1 %v6848_v6  ;;  %7904 = vst [vmem:[#allocation42_spill] sm:$0xff] %v6857_v62  ;;  %7905 = vst [vmem:[#allocation44_spill] sm:$0xff] %v6860_v43  ;;  %v6863_v44 = vld [vmem:[#allocation8 + $0xe0] ss:$16 sps:$4 sm:$0xff]   ;;  %v6866_v6 = vld [vmem:[#allocation8 + $0xe8] ss:$16 sps:$4 sm:$0xff]  }
 0x80e   :  { %7906 = vst [vmem:[#allocation45_spill] sm:$0xff] %v6863_v44  ;;  %7907 = vst [vmem:[#allocation46_spill] sm:$0xff] %v6866_v6 }
 0x810   :  { %3337 = vmatpush1.bf16.msra.mxu0 %v6851_v51  ;;  %3378 = vmatpush1.bf16.msra.mxu1 %v6854_v45  ;;  %v6869_v51 = vld [vmem:[#allocation7 + $0x4] ss:$16 sps:$4 sm:$0xff]   ;;  %v6872_v45 = vld [vmem:[#allocation7 + $0xc] ss:$16 sps:$4 sm:$0xff]  }
 0x811   :  { %3338 = vmatprep.subr.bf16.mxu0 %v6857_v62  ;;  %3379 = vmatprep.subr.bf16.mxu1 %v6860_v43  ;;  %7908 = vst [vmem:[#allocation14_spill] sm:$0xff] %v6869_v51  ;;  %7909 = vst [vmem:[#allocation77_spill] sm:$0xff] %v6872_v45 }
 0x814   :  { %3339 = vmatpush1.bf16.msra.mxu0 %v6863_v44  ;;  %3380 = vmatpush1.bf16.msra.mxu1 %v6866_v6 }
 0x815   :  { %3406 = vmatprep.subr.bf16.mxu0 %v6869_v51  ;;  %3447 = vmatprep.subr.bf16.mxu1 %v6872_v45 }
 0x88a   :  { %v3040_v62 = vpop.f32.mrb[76].mxu0  ;;  %v3081_v59 = vpop.f32.mrb[76].mxu1 }
 0x88b   :  { %v3042_v41 = vpop.f32.mrb[77].mxu0  ;;  %v3083_v43 = vpop.f32.mrb[77].mxu1 }
 0x88c   :  { %v3044_v20 = vpop.f32.mrb[78].mxu0  ;;  %v3085_v16 = vpop.f32.mrb[78].mxu1 }
 0x88d   :  { %v3045_v23 = vpop.f32.mrb[79].mxu0  ;;  %v3086_v44 = vpop.f32.mrb[79].mxu1 }
 0x8aa   :  { %v3122_v18 = vpop.f32.mrb[80].mxu0  ;;  %v3163_v60 = vpop.f32.mrb[80].mxu1 }
 0x8ab   :  { %v3123_v14 = vadd.f32 %v3122_v18, %v3040_v62  ;;  %v3164_v6 = vadd.f32 %v3163_v60, %v3081_v59  ;;  %v3124_v9 = vpop.f32.mrb[81].mxu0  ;;  %v3165_v57 = vpop.f32.mrb[81].mxu1 }
 0x8ac   :  { %v3125_v7 = vadd.f32 %v3124_v9, %v3042_v41  ;;  %v3166_v51 = vadd.f32 %v3165_v57, %v3083_v43  ;;  %v3126_v1 = vpop.f32.mrb[82].mxu0  ;;  %v3167_v56 = vpop.f32.mrb[82].mxu1  ;;  %v7910_v41 = vld [vmem:[#allocation86_spill] sm:$0xff] }
 0x8ad   :  { %v3170_v45 = vadd.f32 %v3123_v14, %v6041_v55  ;;  %v3127_v42 = vpop.f32.mrb[83].mxu0  ;;  %v3168_v52 = vpop.f32.mrb[83].mxu1  ;;  %v3172_v60 = vadd.f32 %v3164_v6, %v7857_v54  ;;  %v3208_v44 = vunpack.c.l.bf16 %v7910_v41 }
 0x8ae   :  { %v3171_v4 = vadd.f32 %v3125_v7, %v6045_v48  ;;  %v3173_v23 = vadd.f32 %v3166_v51, %v7856_v37  ;;  %v7911_v51 = vld [vmem:[#allocation87_spill] sm:$0xff] }
 0x8af   :  { %v4360_v20 = vmul.f32 -1.442695, %v3170_v45  ;;  %v3210_v45 = vunpack.c.l.bf16 %v7911_v51 }
 0x8b0   :  { %v4361_v16 = vmul.f32 -1.442695, %v3171_v4  ;;  %v4362_v18 = vmul.f32 -1.442695, %v3173_v23 }
 0x8b1   :  { %4818 = vpow2.f32 %v4360_v20  ;;  %v3209_v20 = vunpack.c.h.bf16 %v7910_v41 }
 0x8b2   :  { %4820 = vpow2.f32 %v4361_v16  ;;  %v3211_v16 = vunpack.c.h.bf16 %v7911_v51 }
 0x8b3   :  { %4822 = vpow2.f32 %v4362_v18 }
 0x8b4   :  { %4824 = vtanh.f32 %v3172_v60 }
 0x8bb   :  { %v4819_v59 = vpop.eup %4818 }
 0x8bc   :  { %v4821_v9 = vpop.eup %4820  ;;  %v3177_v57 = vadd.f32 1.0, %v4819_v59 }
 0x8bd   :  { %v3183_v56 = vadd.f32 1.0, %v4821_v9  ;;  %v4823_v52 = vpop.eup %4822 }
 0x8be   :  { %4826 = vrcp.f32 %v3177_v57  ;;  %v4825_v42 = vpop.eup %4824  ;;  %v3190_v14 = vadd.f32 1.0, %v4823_v52 }
 0x8bf   :  { %4828 = vrcp.f32 %v3183_v56 }
 0x8c0   :  { %4830 = vrcp.f32 %v3190_v14 }
 0x8c8   :  { %v4827_v1 = vpop.eup %4826 }
 0x8c9   :  { %v4829_v7 = vpop.eup %4828  ;;  %v3194_v4 = vmul.f32 %v4827_v1, %v4825_v42 }
 0x8ca   :  { %v3193_v6 = vmul.f32 %v4829_v7, %v6625_v33  ;;  %v3246_v62 = vpop.f32.mrb[84].mxu0  ;;  %v3287_v43 = vpop.f32.mrb[84].mxu1 }
 0x8cb   :  { %v3294_v23 = vadd.f32 %v3246_v62, %v3208_v44  ;;  %v3296_v18 = vadd.f32 %v3287_v43, %v3210_v45  ;;  %v3248_v60 = vpop.f32.mrb[85].mxu0  ;;  %v3289_v59 = vpop.f32.mrb[85].mxu1 }
 0x8cc   :  { %v6884_v9 = vadd.f32 %v3194_v4, %v3193_v6  ;;  %v3295_v57 = vadd.f32 %v3248_v60, %v3209_v20  ;;  %v3297_v56 = vadd.f32 %v3289_v59, %v3211_v16  ;;  %v3250_v52 = vpop.f32.mrb[86].mxu0  ;;  %v3291_v42 = vpop.f32.mrb[86].mxu1  ;;  %v6890_v16 = vld [vmem:[#allocation7] ss:$16 sps:$4 sm:$0xff]   ;;  %v6896_v60 = vld [vmem:[#allocation7 + $0x24] ss:$16 sps:$4 sm:$0xff]  }
 0x8cd   :  { %v4363_v1 = vmul.f32 -1.442695, %v3294_v23  ;;  %v3251_v54 = vpop.f32.mrb[87].mxu0  ;;  %v3292_v33 = vpop.f32.mrb[87].mxu1  ;;  %v6893_v23 = vld [vmem:[#allocation7 + $0x8] ss:$16 sps:$4 sm:$0xff]  }
 0x8ce   :  { %v4364_v7 = vmul.f32 -1.442695, %v3295_v57  ;;  %4832 = vtanh.f32 %v6884_v9  ;;  %v4365_v41 = vmul.f32 -1.442695, %v3297_v56  ;;  %v4831_v44 = vpop.eup %4830  ;;  %v3202_v62 = vpop.permute.xlu0 %3201  ;;  %v6907_v59 = vld [vmem:[#allocation7 + $0x28] ss:$16 sps:$4 sm:$0xff]  }
 0x8cf   :  { %4834 = vpow2.f32 %v4363_v1  ;;  %vm3203_vm14 = vcmp.eq.s32.totalorder %v3202_v62, 1  ;;  %v6910_v57 = vld [vmem:[#allocation7 + $0x44] ss:$16 sps:$4 sm:$0xff]   ;;  %v6913_v56 = vld [vmem:[#allocation7 + $0x4c] ss:$16 sps:$4 sm:$0xff]  }
 0x8d0   :  { %4836 = vpow2.f32 %v4364_v7  ;;  %v6916_v33 = vld [vmem:[#allocation7 + $0x40] ss:$16 sps:$4 sm:$0xff]   ;;  %v6919_v7 = vld [vmem:[#allocation7 + $0x48] ss:$16 sps:$4 sm:$0xff]   ;;  %v6925_v62 = vld [vmem:[#allocation7 + $0x6c] ss:$16 sps:$4 sm:$0xff]  }
 0x8d1   :  { %4838 = vpow2.f32 %v4365_v41 }
 0x8d2   :  { %4840 = vtanh.f32 %v3296_v18  ;;  %v6899_v18 = vld [vmem:[#allocation7 + $0x2c] ss:$16 sps:$4 sm:$0xff]  }
 0x8d8   :  { %v4833_v51 = vpop.eup %4832 }
 0x8d9   :  { %v4835_v45 = vpop.eup %4834  ;;  %v3197_v4 = vmul.f32 %v4833_v51, %v4831_v44 }
 0x8da   :  { %v4837_v6 = vpop.eup %4836  ;;  %v3301_v43 = vadd.f32 1.0, %v4835_v45  ;;  %v6922_v45 = vld [vmem:[#allocation7 + $0x64] ss:$16 sps:$4 sm:$0xff]  }
 0x8db   :  { %v3307_v14 = vadd.f32 1.0, %v4837_v6  ;;  %v6888_v54 = vsel %vm3203_vm14, %v3197_v4, %v6629_v0  ;;  %v3323_v20 = vpack.c.bf16 %v3197_v4, %v3197_v4  ;;  %v6904_v0 = vld [vmem:[#allocation7 + $0x20] ss:$16 sps:$4 sm:$0xff]   ;;  %v4839_v52 = vpop.eup %4838 }
 0x8dc   :  { %4842 = vrcp.f32 %v3301_v43  ;;  %v4841_v42 = vpop.eup %4840  ;;  %v3314_v51 = vadd.f32 1.0, %v4839_v52  ;;  %v6931_v43 = vld [vmem:[#allocation7 + $0x60] ss:$16 sps:$4 sm:$0xff]   ;;  %v6940_v52 = vld [vmem:[#allocation7 + $0x8c] ss:$16 sps:$4 sm:$0xff]  }
 0x8dd   :  { %4844 = vrcp.f32 %v3307_v14  ;;  %3357 = vmatmul.mubr.bf16.vlgmr.msra.gmra.mrb[88].mxu0 %v3323_v20  ;;  %3398 = vmatmul.mubr.bf16.vlgmr.msra.gmra.mrb[88].mxu1 %v3323_v20  ;;  %v6934_v14 = vld [vmem:[#allocation7 + $0x68] ss:$16 sps:$4 sm:$0xff]   ;;  %v6937_v20 = vld [vmem:[#allocation7 + $0x84] ss:$16 sps:$4 sm:$0xff]   ;;  %7914 = vst [vmem:[#allocation47_spill] sm:$0xff] %v6940_v52 }
 0x8de   :  { %3407 = vmatpush1.bf16.msra.mxu0 %v6890_v16  ;;  %3448 = vmatpush1.bf16.msra.mxu1 %v6893_v23  ;;  %7912 = vst [vmem:[#allocation78_spill] sm:$0xff] %v6934_v14  ;;  %4846 = vrcp.f32 %v3314_v51  ;;  %7913 = vst [vmem:[#allocation79_spill] sm:$0xff] %v6937_v20  ;;  %v6959_v51 = vld [vmem:[#allocation7 + $0xa8] ss:$16 sps:$4 sm:$0xff]  }
 0x8df   :  { %3408 = vmatprep.subr.bf16.mxu0 %v6896_v60  ;;  %3449 = vmatprep.subr.bf16.mxu1 %v6899_v18  ;;  %7920 = vst [vmem:[#allocation53_spill] sm:$0xff] %v6959_v51 }
 0x8e0   :  { %3438 = vmatprep.mubr.bf16.mxu0 %v7579_v12  ;;  %3479 = vmatprep.mubr.bf16.mxu1 %v7579_v12 }
 0x8e2   :  { %3409 = vmatpush1.bf16.msra.mxu0 %v6904_v0  ;;  %3450 = vmatpush1.bf16.msra.mxu1 %v6907_v59 }
 0x8e3   :  { %3410 = vmatprep.subr.bf16.mxu0 %v6910_v57  ;;  %3451 = vmatprep.subr.bf16.mxu1 %v6913_v56 }
 0x8e6   :  { %v4843_v1 = vpop.eup %4842  ;;  %3411 = vmatpush1.bf16.msra.mxu0 %v6916_v33  ;;  %3452 = vmatpush1.bf16.msra.mxu1 %v6919_v7 }
 0x8e7   :  { %v4845_v41 = vpop.eup %4844  ;;  %v3318_v44 = vmul.f32 %v4843_v1, %v4841_v42  ;;  %3412 = vmatprep.subr.bf16.mxu0 %v6922_v45  ;;  %3453 = vmatprep.subr.bf16.mxu1 %v6925_v62  ;;  %v6947_v42 = vld [vmem:[#allocation7 + $0x88] ss:$16 sps:$4 sm:$0xff]   ;;  %v6950_v1 = vld [vmem:[#allocation7 + $0xa4] ss:$16 sps:$4 sm:$0xff]  }
 0x8e8   :  { %v3317_v4 = vmul.f32 %v4845_v41, %v6646_v40  ;;  %v6944_v40 = vld [vmem:[#allocation7 + $0x80] ss:$16 sps:$4 sm:$0xff]   ;;  %7916 = vst [vmem:[#allocation49_spill] sm:$0xff] %v6947_v42  ;;  %7917 = vst [vmem:[#allocation50_spill] sm:$0xff] %v6950_v1  ;;  %v6953_v41 = vld [vmem:[#allocation7 + $0xac] ss:$16 sps:$4 sm:$0xff]  }
 0x8e9   :  { %7915 = vst [vmem:[#allocation48_spill] sm:$0xff] %v6944_v40  ;;  %7918 = vst [vmem:[#allocation51_spill] sm:$0xff] %v6953_v41 }
 0x8ea   :  { %v6929_v6 = vadd.f32 %v3318_v44, %v3317_v4  ;;  %3413 = vmatpush1.bf16.msra.mxu0 %v6931_v43  ;;  %3454 = vmatpush1.bf16.msra.mxu1 %v6934_v14  ;;  %v6956_v44 = vld [vmem:[#allocation7 + $0xa0] ss:$16 sps:$4 sm:$0xff]   ;;  %v6962_v4 = vld [vmem:[#allocation7 + $0xc4] ss:$16 sps:$4 sm:$0xff]   ;;  %v6983_v14 = vld [vmem:[#allocation7 + $0xe8] ss:$16 sps:$4 sm:$0xff]  }
 0x8eb   :  { %3414 = vmatprep.subr.bf16.mxu0 %v6937_v20  ;;  %3455 = vmatprep.subr.bf16.mxu1 %v6940_v52  ;;  %7919 = vst [vmem:[#allocation52_spill] sm:$0xff] %v6956_v44  ;;  %7921 = vst [vmem:[#allocation54_spill] sm:$0xff] %v6962_v4  ;;  %v6968_v52 = vld [vmem:[#allocation7 + $0xc0] ss:$16 sps:$4 sm:$0xff]  }
 0x8ec   :  { %4848 = vtanh.f32 %v6929_v6  ;;  %v6980_v20 = vld [vmem:[#allocation7 + $0xe0] ss:$16 sps:$4 sm:$0xff]  }
 0x8ee   :  { %3415 = vmatpush1.bf16.msra.mxu0 %v6944_v40  ;;  %3456 = vmatpush1.bf16.msra.mxu1 %v6947_v42  ;;  %v6965_v42 = vld [vmem:[#allocation7 + $0xcc] ss:$16 sps:$4 sm:$0xff]  }
 0x8ef   :  { %3416 = vmatprep.subr.bf16.mxu0 %v6950_v1  ;;  %3457 = vmatprep.subr.bf16.mxu1 %v6953_v41  ;;  %7922 = vst [vmem:[#allocation55_spill] sm:$0xff] %v6965_v42  ;;  %v4847_v1 = vpop.eup %4846  ;;  %v6971_v41 = vld [vmem:[#allocation7 + $0xc8] ss:$16 sps:$4 sm:$0xff]  }
 0x8f2   :  { %3417 = vmatpush1.bf16.msra.mxu0 %v6956_v44  ;;  %3458 = vmatpush1.bf16.msra.mxu1 %v6959_v51  ;;  %v6974_v44 = vld [vmem:[#allocation7 + $0xe4] ss:$16 sps:$4 sm:$0xff]   ;;  %v6977_v51 = vld [vmem:[#allocation7 + $0xec] ss:$16 sps:$4 sm:$0xff]  }
 0x8f3   :  { %3418 = vmatprep.subr.bf16.mxu0 %v6962_v4  ;;  %3459 = vmatprep.subr.bf16.mxu1 %v6965_v42 }
 0x8f6   :  { %v4849_v40 = vpop.eup %4848  ;;  %3419 = vmatpush1.bf16.msra.mxu0 %v6968_v52  ;;  %3460 = vmatpush1.bf16.msra.mxu1 %v6971_v41 }
 0x8f7   :  { %3420 = vmatprep.subr.bf16.mxu0 %v6974_v44  ;;  %3461 = vmatprep.subr.bf16.mxu1 %v6977_v51  ;;  %v3321_v4 = vmul.f32 %v4849_v40, %v4847_v1  ;;  %v7923_v40 = vld [vmem:[#allocation17_spill] sm:$0xff]  ;;  %v7924_v1 = vld [vmem:[#allocation19_spill] sm:$0xff] }
 0x8f9   :  { %v3322_v42 = vpack.c.bf16 %v3321_v4, %v3321_v4  ;;  %v7925_v4 = vld [vmem:[#allocation18_spill] sm:$0xff] }
 0x8fa   :  { %3421 = vmatpush1.bf16.msra.mxu0 %v6980_v20  ;;  %3462 = vmatpush1.bf16.msra.mxu1 %v6983_v14 }
 0x8fb   :  { %3530 = vmatprep.subr.bf16.mxu0 %v6669_v58  ;;  %3571 = vmatprep.subr.bf16.mxu1 %v6672_v8 }
 0x8fd   :  { %3439 = vmatmul.mubr.bf16.vlgmr.msra.gmra.mrb[92].mxu0 %v3322_v42  ;;  %3480 = vmatmul.mubr.bf16.vlgmr.msra.gmra.mrb[92].mxu1 %v3322_v42 }
 0x8fe   :  { %3531 = vmatpush1.bf16.msra.mxu0 %v6677_v53  ;;  %3572 = vmatpush1.bf16.msra.mxu1 %v6680_v11 }
 0x8ff   :  { %3532 = vmatprep.subr.bf16.mxu0 %v6683_v49  ;;  %3573 = vmatprep.subr.bf16.mxu1 %v6686_v63 }
 0x900   :  { %3562 = vmatprep.mubr.bf16.mxu0 %v7579_v12  ;;  %3603 = vmatprep.mubr.bf16.mxu1 %v7579_v12 }
 0x902   :  { %3533 = vmatpush1.bf16.msra.mxu0 %v6691_v46  ;;  %3574 = vmatpush1.bf16.msra.mxu1 %v6694_v47 }
 0x903   :  { %3534 = vmatprep.subr.bf16.mxu0 %v6697_v5  ;;  %3575 = vmatprep.subr.bf16.mxu1 %v6700_v29 }
 0x906   :  { %3535 = vmatpush1.bf16.msra.mxu0 %v6703_v2  ;;  %3576 = vmatpush1.bf16.msra.mxu1 %v6706_v28 }
 0x907   :  { %3536 = vmatprep.subr.bf16.mxu0 %v6709_v30  ;;  %3577 = vmatprep.subr.bf16.mxu1 %v6712_v10 }
 0x90a   :  { %3537 = vmatpush1.bf16.msra.mxu0 %v6715_v3  ;;  %3578 = vmatpush1.bf16.msra.mxu1 %v6718_v19 }
 0x90b   :  { %3538 = vmatprep.subr.bf16.mxu0 %v6721_v15  ;;  %3579 = vmatprep.subr.bf16.mxu1 %v6724_v36 }
 0x90e   :  { %3539 = vmatpush1.bf16.msra.mxu0 %v6727_v38  ;;  %3580 = vmatpush1.bf16.msra.mxu1 %v6730_v50 }
 0x90f   :  { %3540 = vmatprep.subr.bf16.mxu0 %v6733_v61  ;;  %3581 = vmatprep.subr.bf16.mxu1 %v6736_v21 }
 0x912   :  { %3541 = vmatpush1.bf16.msra.mxu0 %v6739_v22  ;;  %3582 = vmatpush1.bf16.msra.mxu1 %v6742_v24 }
 0x913   :  { %3542 = vmatprep.subr.bf16.mxu0 %v6745_v25  ;;  %3583 = vmatprep.subr.bf16.mxu1 %v6748_v39 }
 0x916   :  { %3543 = vmatpush1.bf16.msra.mxu0 %v6751_v26  ;;  %3584 = vmatpush1.bf16.msra.mxu1 %v6754_v32  ;;  %v7926_v32 = vld [vmem:[#allocation20_spill] sm:$0xff] }
 0x917   :  { %3544 = vmatprep.subr.bf16.mxu0 %v6757_v13  ;;  %3585 = vmatprep.subr.bf16.mxu1 %v6760_v31  ;;  %v7936_v31 = vld [vmem:[#allocation31_spill] sm:$0xff]  ;;  %v7937_v13 = vld [vmem:[#allocation30_spill] sm:$0xff] }
 0x91a   :  { %3545 = vmatpush1.bf16.msra.mxu0 %v6763_v27  ;;  %3586 = vmatpush1.bf16.msra.mxu1 %v6766_v17  ;;  %v7927_v27 = vld [vmem:[#allocation21_spill] sm:$0xff]  ;;  %v7928_v17 = vld [vmem:[#allocation23_spill] sm:$0xff] }
 0x91b   :  { %3642 = vmatprep.subr.bf16.mxu0 %v6769_v34  ;;  %3683 = vmatprep.subr.bf16.mxu1 %v6772_v35  ;;  %v7929_v34 = vld [vmem:[#allocation22_spill] sm:$0xff]  ;;  %v7930_v35 = vld [vmem:[#allocation24_spill] sm:$0xff] }
 0x91d   :  { %3563 = vmatmul.mubr.bf16.vlgmr.msra.gmra.mrb[96].mxu0 %v3322_v42  ;;  %3604 = vmatmul.mubr.bf16.vlgmr.msra.gmra.mrb[96].mxu1 %v3322_v42  ;;  %v7931_v42 = vld [vmem:[#allocation25_spill] sm:$0xff] }
 0x91e   :  { %3643 = vmatpush1.bf16.msra.mxu0 %v7923_v40  ;;  %3684 = vmatpush1.bf16.msra.mxu1 %v7924_v1  ;;  %v7932_v40 = vld [vmem:[#allocation27_spill] sm:$0xff]  ;;  %v7933_v1 = vld [vmem:[#allocation26_spill] sm:$0xff] }
 0x91f   :  { %3644 = vmatprep.subr.bf16.mxu0 %v7925_v4  ;;  %3685 = vmatprep.subr.bf16.mxu1 %v7926_v32  ;;  %v7934_v4 = vld [vmem:[#allocation28_spill] sm:$0xff]  ;;  %v7935_v32 = vld [vmem:[#allocation29_spill] sm:$0xff] }
 0x920   :  { %3674 = vmatprep.mubr.bf16.mxu0 %v7579_v12  ;;  %3715 = vmatprep.mubr.bf16.mxu1 %v7579_v12 }
 0x922   :  { %3645 = vmatpush1.bf16.msra.mxu0 %v7927_v27  ;;  %3686 = vmatpush1.bf16.msra.mxu1 %v7928_v17  ;;  %v7938_v27 = vld [vmem:[#allocation32_spill] sm:$0xff]  ;;  %v7939_v17 = vld [vmem:[#allocation33_spill] sm:$0xff] }
 0x923   :  { %3646 = vmatprep.subr.bf16.mxu0 %v7929_v34  ;;  %3687 = vmatprep.subr.bf16.mxu1 %v7930_v35  ;;  %v7940_v34 = vld [vmem:[#allocation35_spill] sm:$0xff]  ;;  %v7941_v35 = vld [vmem:[#allocation34_spill] sm:$0xff] }
 0x926   :  { %3647 = vmatpush1.bf16.msra.mxu0 %v7931_v42  ;;  %3688 = vmatpush1.bf16.msra.mxu1 %v7932_v40  ;;  %v7942_v42 = vld [vmem:[#allocation36_spill] sm:$0xff]  ;;  %v7943_v40 = vld [vmem:[#allocation37_spill] sm:$0xff] }
 0x927   :  { %3648 = vmatprep.subr.bf16.mxu0 %v7933_v1  ;;  %3689 = vmatprep.subr.bf16.mxu1 %v7934_v4  ;;  %v7944_v1 = vld [vmem:[#allocation39_spill] sm:$0xff]  ;;  %v7945_v4 = vld [vmem:[#allocation38_spill] sm:$0xff] }
 0x92a   :  { %3649 = vmatpush1.bf16.msra.mxu0 %v7935_v32  ;;  %3690 = vmatpush1.bf16.msra.mxu1 %v7936_v31  ;;  %v7946_v32 = vld [vmem:[#allocation40_spill] sm:$0xff]  ;;  %v7947_v31 = vld [vmem:[#allocation41_spill] sm:$0xff] }
 0x92b   :  { %3650 = vmatprep.subr.bf16.mxu0 %v7937_v13  ;;  %3691 = vmatprep.subr.bf16.mxu1 %v7938_v27  ;;  %v7948_v13 = vld [vmem:[#allocation43_spill] sm:$0xff]  ;;  %v7949_v27 = vld [vmem:[#allocation42_spill] sm:$0xff] }
 0x92e   :  { %3651 = vmatpush1.bf16.msra.mxu0 %v7939_v17  ;;  %3692 = vmatpush1.bf16.msra.mxu1 %v7940_v34  ;;  %v7950_v17 = vld [vmem:[#allocation44_spill] sm:$0xff]  ;;  %v7951_v34 = vld [vmem:[#allocation45_spill] sm:$0xff] }
 0x92f   :  { %3652 = vmatprep.subr.bf16.mxu0 %v7941_v35  ;;  %3693 = vmatprep.subr.bf16.mxu1 %v7942_v42  ;;  %v7952_v35 = vld [vmem:[#allocation46_spill] sm:$0xff] }
 0x930   :  { %v7953_v42 = vld [vmem:[#allocation14_spill] sm:$0xff] }
 0x932   :  { %3653 = vmatpush1.bf16.msra.mxu0 %v7943_v40  ;;  %3694 = vmatpush1.bf16.msra.mxu1 %v7944_v1  ;;  %v7954_v40 = vld [vmem:[#allocation77_spill] sm:$0xff] }
 0x933   :  { %3654 = vmatprep.subr.bf16.mxu0 %v7945_v4  ;;  %3695 = vmatprep.subr.bf16.mxu1 %v7946_v32 }
 0x936   :  { %3655 = vmatpush1.bf16.msra.mxu0 %v7947_v31  ;;  %3696 = vmatpush1.bf16.msra.mxu1 %v7948_v13 }
 0x937   :  { %3656 = vmatprep.subr.bf16.mxu0 %v7949_v27  ;;  %3697 = vmatprep.subr.bf16.mxu1 %v7950_v17 }
 0x93a   :  { %3657 = vmatpush1.bf16.msra.mxu0 %v7951_v34  ;;  %3698 = vmatpush1.bf16.msra.mxu1 %v7952_v35 }
 0x93b   :  { %3724 = vmatprep.subr.bf16.mxu0 %v7953_v42  ;;  %3765 = vmatprep.subr.bf16.mxu1 %v7954_v40 }
 0x9b0   :  { %v3358_v1 = vpop.f32.mrb[88].mxu0  ;;  %v3399_v4 = vpop.f32.mrb[88].mxu1 }
 0x9b1   :  { %v3360_v26 = vpop.f32.mrb[89].mxu0  ;;  %v3401_v32 = vpop.f32.mrb[89].mxu1 }
 0x9b2   :  { %v3362_v39 = vpop.f32.mrb[90].mxu0  ;;  %v3403_v31 = vpop.f32.mrb[90].mxu1 }
 0x9b3   :  { %v3363_v25 = vpop.f32.mrb[91].mxu0  ;;  %v3404_v13 = vpop.f32.mrb[91].mxu1 }
 0x9b4   :  { %v7955_v13 = vld [vmem:[#allocation16_spill] sm:$0xff] }
 0x9d0   :  { %v3440_v24 = vpop.f32.mrb[92].mxu0  ;;  %v3481_v27 = vpop.f32.mrb[92].mxu1 }
 0x9d1   :  { %v3441_v22 = vadd.f32 %v3440_v24, %v3358_v1  ;;  %v3482_v17 = vadd.f32 %v3481_v27, %v3399_v4  ;;  %v3442_v21 = vpop.f32.mrb[93].mxu0  ;;  %v3483_v34 = vpop.f32.mrb[93].mxu1 }
 0x9d2   :  { %v3443_v61 = vadd.f32 %v3442_v21, %v3360_v26  ;;  %v3484_v35 = vadd.f32 %v3483_v34, %v3401_v32  ;;  %v3444_v50 = vpop.f32.mrb[94].mxu0  ;;  %v3485_v42 = vpop.f32.mrb[94].mxu1  ;;  %v7956_v34 = vld [vmem:[#allocation88_spill] sm:$0xff] }
 0x9d3   :  { %v3488_v40 = vadd.f32 %v3441_v22, %v6041_v55  ;;  %v3445_v38 = vpop.f32.mrb[95].mxu0  ;;  %v3486_v36 = vpop.f32.mrb[95].mxu1  ;;  %v3490_v27 = vadd.f32 %v3482_v17, %v7955_v13 }
 0x9d4   :  { %v3489_v15 = vadd.f32 %v3443_v61, %v6045_v48  ;;  %v3491_v25 = vadd.f32 %v3484_v35, %v7856_v37  ;;  %v7957_v35 = vld [vmem:[#allocation89_spill] sm:$0xff] }
 0x9d5   :  { %v4366_v39 = vmul.f32 -1.442695, %v3488_v40  ;;  %v3526_v40 = vunpack.c.l.bf16 %v7956_v34  ;;  %v3528_v4 = vunpack.c.l.bf16 %v7957_v35 }
 0x9d6   :  { %v4367_v31 = vmul.f32 -1.442695, %v3489_v15  ;;  %v4368_v24 = vmul.f32 -1.442695, %v3491_v25  ;;  %v3529_v25 = vunpack.c.h.bf16 %v7957_v35 }
 0x9d7   :  { %4850 = vpow2.f32 %v4366_v39 }
 0x9d8   :  { %4852 = vpow2.f32 %v4367_v31  ;;  %v3527_v31 = vunpack.c.h.bf16 %v7956_v34 }
 0x9d9   :  { %4854 = vpow2.f32 %v4368_v24 }
 0x9da   :  { %4856 = vtanh.f32 %v3490_v27 }
 0x9e1   :  { %v4851_v1 = vpop.eup %4850 }
 0x9e2   :  { %v4853_v21 = vpop.eup %4852  ;;  %v3495_v26 = vadd.f32 1.0, %v4851_v1 }
 0x9e3   :  { %v3501_v50 = vadd.f32 1.0, %v4853_v21  ;;  %v4855_v36 = vpop.eup %4854 }
 0x9e4   :  { %4858 = vrcp.f32 %v3495_v26  ;;  %v4857_v38 = vpop.eup %4856  ;;  %v3508_v32 = vadd.f32 1.0, %v4855_v36 }
 0x9e5   :  { %4860 = vrcp.f32 %v3501_v50 }
 0x9e6   :  { %4862 = vrcp.f32 %v3508_v32 }
 0x9ee   :  { %v4859_v61 = vpop.eup %4858 }
 0x9ef   :  { %v4861_v22 = vpop.eup %4860  ;;  %v3512_v15 = vmul.f32 %v4859_v61, %v4857_v38 }
 0x9f0   :  { %v3511_v17 = vmul.f32 %v4861_v22, %v6884_v9  ;;  %v3564_v42 = vpop.f32.mrb[96].mxu0  ;;  %v3605_v39 = vpop.f32.mrb[96].mxu1 }
 0x9f1   :  { %v3612_v24 = vadd.f32 %v3564_v42, %v3526_v40  ;;  %v3614_v27 = vadd.f32 %v3605_v39, %v3528_v4  ;;  %v3566_v1 = vpop.f32.mrb[97].mxu0  ;;  %v3607_v21 = vpop.f32.mrb[97].mxu1 }
 0x9f2   :  { %v7065_v26 = vadd.f32 %v3512_v15, %v3511_v17  ;;  %v3613_v50 = vadd.f32 %v3566_v1, %v3527_v31  ;;  %v3615_v36 = vadd.f32 %v3607_v21, %v3529_v25  ;;  %v3568_v38 = vpop.f32.mrb[98].mxu0  ;;  %v3609_v61 = vpop.f32.mrb[98].mxu1 }
 0x9f3   :  { %v4369_v13 = vmul.f32 -1.442695, %v3612_v24  ;;  %v3569_v37 = vpop.f32.mrb[99].mxu0  ;;  %v3610_v9 = vpop.f32.mrb[99].mxu1  ;;  %v7959_v38 = vld [vmem:[#allocation79_spill] sm:$0xff] }
 0x9f4   :  { %v4370_v22 = vmul.f32 -1.442695, %v3613_v50  ;;  %4864 = vtanh.f32 %v7065_v26  ;;  %v4371_v34 = vmul.f32 -1.442695, %v3615_v36  ;;  %v4863_v40 = vpop.eup %4862  ;;  %v3520_v42 = vpop.permute.xlu1 %3519  ;;  %v7958_v36 = vld [vmem:[#allocation78_spill] sm:$0xff]  ;;  %v7960_v61 = vld [vmem:[#allocation47_spill] sm:$0xff] }
 0x9f5   :  { %4866 = vpow2.f32 %v4369_v13  ;;  %vm3521_vm15 = vcmp.eq.s32.totalorder %v3520_v42, 1  ;;  %v7961_v9 = vld [vmem:[#allocation48_spill] sm:$0xff]  ;;  %v7968_v42 = vld [vmem:[#allocation55_spill] sm:$0xff] }
 0x9f6   :  { %4868 = vpow2.f32 %v4370_v22  ;;  %v7962_v22 = vld [vmem:[#allocation49_spill] sm:$0xff] }
 0x9f7   :  { %4870 = vpow2.f32 %v4371_v34  ;;  %v7963_v34 = vld [vmem:[#allocation50_spill] sm:$0xff] }
 0x9f8   :  { %4872 = vtanh.f32 %v3614_v27 }
 0x9fe   :  { %v4865_v35 = vpop.eup %4864 }
 0x9ff   :  { %v4867_v4 = vpop.eup %4866  ;;  %v3515_v15 = vmul.f32 %v4865_v35, %v4863_v40  ;;  %v7965_v40 = vld [vmem:[#allocation52_spill] sm:$0xff]  ;;  %v7966_v35 = vld [vmem:[#allocation53_spill] sm:$0xff] }
 0xa00   :  { %v4869_v17 = vpop.eup %4868  ;;  %v3619_v39 = vadd.f32 1.0, %v4867_v4  ;;  %v7967_v4 = vld [vmem:[#allocation54_spill] sm:$0xff] }
 0xa01   :  { %v3625_v32 = vadd.f32 1.0, %v4869_v17  ;;  %v7069_v37 = vsel %vm3521_vm15, %v3515_v15, %v6888_v54  ;;  %v3641_v31 = vpack.c.bf16 %v3515_v15, %v3515_v15  ;;  %v4871_v54 = vpop.eup %4870 }
 0xa02   :  { %4874 = vrcp.f32 %v3619_v39  ;;  %v4873_v13 = vpop.eup %4872  ;;  %v3632_v1 = vadd.f32 1.0, %v4871_v54  ;;  %v7986_v54 = vld [vmem:[#allocation73_spill] sm:$0xff] }
 0xa03   :  { %4876 = vrcp.f32 %v3625_v32  ;;  %3675 = vmatmul.mubr.bf16.vlgmr.msra.gmra.mrb[100].mxu0 %v3641_v31  ;;  %3716 = vmatmul.mubr.bf16.vlgmr.msra.gmra.mrb[100].mxu1 %v3641_v31  ;;  %v7985_v31 = vld [vmem:[#allocation72_spill] sm:$0xff] }
 0xa04   :  { %3725 = vmatpush1.bf16.msra.mxu0 %v6890_v16  ;;  %3766 = vmatpush1.bf16.msra.mxu1 %v6893_v23  ;;  %4878 = vrcp.f32 %v3632_v1  ;;  %v7991_v1 = vld [vmem:[#allocation21_spill] sm:$0xff] }
 0xa05   :  { %3726 = vmatprep.subr.bf16.mxu0 %v6896_v60  ;;  %3767 = vmatprep.subr.bf16.mxu1 %v6899_v18 }
 0xa06   :  { %3756 = vmatprep.mubr.bf16.mxu0 %v7579_v12  ;;  %3797 = vmatprep.mubr.bf16.mxu1 %v7579_v12 }
 0xa08   :  { %3727 = vmatpush1.bf16.msra.mxu0 %v6904_v0  ;;  %3768 = vmatpush1.bf16.msra.mxu1 %v6907_v59 }
 0xa09   :  { %3728 = vmatprep.subr.bf16.mxu0 %v6910_v57  ;;  %3769 = vmatprep.subr.bf16.mxu1 %v6913_v56 }
 0xa0c   :  { %v4875_v25 = vpop.eup %4874  ;;  %3729 = vmatpush1.bf16.msra.mxu0 %v6916_v33  ;;  %3770 = vmatpush1.bf16.msra.mxu1 %v6919_v7 }
 0xa0d   :  { %v4877_v24 = vpop.eup %4876  ;;  %v3636_v27 = vmul.f32 %v4875_v25, %v4873_v13  ;;  %3730 = vmatprep.subr.bf16.mxu0 %v6922_v45  ;;  %3771 = vmatprep.subr.bf16.mxu1 %v6925_v62  ;;  %v7987_v13 = vld [vmem:[#allocation17_spill] sm:$0xff]  ;;  %v7988_v25 = vld [vmem:[#allocation19_spill] sm:$0xff] }
 0xa0e   :  { %v3635_v21 = vmul.f32 %v4877_v24, %v6929_v6  ;;  %v7964_v6 = vld [vmem:[#allocation51_spill] sm:$0xff]  ;;  %v4879_v15 = vpop.eup %4878  ;;  %v7989_v24 = vld [vmem:[#allocation18_spill] sm:$0xff] }
 0xa10   :  { %v7086_v50 = vadd.f32 %v3636_v27, %v3635_v21  ;;  %3731 = vmatpush1.bf16.msra.mxu0 %v6931_v43  ;;  %3772 = vmatpush1.bf16.msra.mxu1 %v7958_v36  ;;  %v7990_v27 = vld [vmem:[#allocation20_spill] sm:$0xff]  ;;  %v7992_v21 = vld [vmem:[#allocation23_spill] sm:$0xff] }
 0xa11   :  { %3732 = vmatprep.subr.bf16.mxu0 %v7959_v38  ;;  %3773 = vmatprep.subr.bf16.mxu1 %v7960_v61 }
 0xa12   :  { %4880 = vtanh.f32 %v7086_v50 }
 0xa14   :  { %3733 = vmatpush1.bf16.msra.mxu0 %v7961_v9  ;;  %3774 = vmatpush1.bf16.msra.mxu1 %v7962_v22 }
 0xa15   :  { %3734 = vmatprep.subr.bf16.mxu0 %v7963_v34  ;;  %3775 = vmatprep.subr.bf16.mxu1 %v7964_v6 }
 0xa18   :  { %3735 = vmatpush1.bf16.msra.mxu0 %v7965_v40  ;;  %3776 = vmatpush1.bf16.msra.mxu1 %v7966_v35 }
 0xa19   :  { %3736 = vmatprep.subr.bf16.mxu0 %v7967_v4  ;;  %3777 = vmatprep.subr.bf16.mxu1 %v7968_v42 }
 0xa1c   :  { %v4881_v17 = vpop.eup %4880  ;;  %3737 = vmatpush1.bf16.msra.mxu0 %v6968_v52  ;;  %3778 = vmatpush1.bf16.msra.mxu1 %v6971_v41 }
 0xa1d   :  { %3738 = vmatprep.subr.bf16.mxu0 %v6974_v44  ;;  %3779 = vmatprep.subr.bf16.mxu1 %v6977_v51  ;;  %v3639_v39 = vmul.f32 %v4881_v17, %v4879_v15  ;;  %v7993_v15 = vld [vmem:[#allocation22_spill] sm:$0xff]  ;;  %v7994_v17 = vld [vmem:[#allocation24_spill] sm:$0xff] }
 0xa1f   :  { %v3640_v32 = vpack.c.bf16 %v3639_v39, %v3639_v39  ;;  %v7995_v39 = vld [vmem:[#allocation25_spill] sm:$0xff] }
 0xa20   :  { %3739 = vmatpush1.bf16.msra.mxu0 %v6980_v20  ;;  %3780 = vmatpush1.bf16.msra.mxu1 %v6983_v14 }
 0xa21   :  { %3848 = vmatprep.subr.bf16.mxu0 %v6669_v58  ;;  %3889 = vmatprep.subr.bf16.mxu1 %v6672_v8  ;;  %v7969_v58 = vld [vmem:[#allocation74_spill] sm:$0xff]  ;;  %v7970_v8 = vld [vmem:[#allocation75_spill] sm:$0xff] }
 0xa23   :  { %3757 = vmatmul.mubr.bf16.vlgmr.msra.gmra.mrb[104].mxu0 %v3640_v32  ;;  %3798 = vmatmul.mubr.bf16.vlgmr.msra.gmra.mrb[104].mxu1 %v3640_v32 }
 0xa24   :  { %3849 = vmatpush1.bf16.msra.mxu0 %v6677_v53  ;;  %3890 = vmatpush1.bf16.msra.mxu1 %v6680_v11  ;;  %v7971_v53 = vld [vmem:[#allocation76_spill] sm:$0xff] }
 0xa25   :  { %3850 = vmatprep.subr.bf16.mxu0 %v6683_v49  ;;  %3891 = vmatprep.subr.bf16.mxu1 %v6686_v63  ;;  %v7972_v11 = vld [vmem:[#allocation80_spill] sm:$0xff]  ;;  %v7973_v49 = vld [vmem:[#allocation81_spill] sm:$0xff]  ;;  %v7974_v63 = vld [vmem:[#allocation82_spill] sm:$0xff] }
 0xa26   :  { %3880 = vmatprep.mubr.bf16.mxu0 %v7579_v12  ;;  %3921 = vmatprep.mubr.bf16.mxu1 %v7579_v12 }
 0xa28   :  { %3851 = vmatpush1.bf16.msra.mxu0 %v6691_v46  ;;  %3892 = vmatpush1.bf16.msra.mxu1 %v6694_v47  ;;  %v7975_v46 = vld [vmem:[#allocation83_spill] sm:$0xff] }
 0xa29   :  { %3852 = vmatprep.subr.bf16.mxu0 %v6697_v5  ;;  %3893 = vmatprep.subr.bf16.mxu1 %v6700_v29  ;;  %v7976_v47 = vld [vmem:[#allocation63_spill] sm:$0xff]  ;;  %v7977_v5 = vld [vmem:[#allocation64_spill] sm:$0xff]  ;;  %v7978_v29 = vld [vmem:[#allocation65_spill] sm:$0xff] }
 0xa2c   :  { %3853 = vmatpush1.bf16.msra.mxu0 %v6703_v2  ;;  %3894 = vmatpush1.bf16.msra.mxu1 %v6706_v28  ;;  %v7979_v2 = vld [vmem:[#allocation66_spill] sm:$0xff]  ;;  %v7980_v28 = vld [vmem:[#allocation67_spill] sm:$0xff] }
 0xa2d   :  { %3854 = vmatprep.subr.bf16.mxu0 %v6709_v30  ;;  %3895 = vmatprep.subr.bf16.mxu1 %v6712_v10  ;;  %v7981_v30 = vld [vmem:[#allocation68_spill] sm:$0xff]  ;;  %v7982_v10 = vld [vmem:[#allocation69_spill] sm:$0xff] }
 0xa30   :  { %3855 = vmatpush1.bf16.msra.mxu0 %v6715_v3  ;;  %3896 = vmatpush1.bf16.msra.mxu1 %v6718_v19  ;;  %v7983_v3 = vld [vmem:[#allocation70_spill] sm:$0xff]  ;;  %v7984_v19 = vld [vmem:[#allocation71_spill] sm:$0xff] }
 0xa31   :  { %3856 = vmatprep.subr.bf16.mxu0 %v7969_v58  ;;  %3897 = vmatprep.subr.bf16.mxu1 %v7970_v8  ;;  %v7997_v58 = vld [vmem:[#allocation26_spill] sm:$0xff]  ;;  %v7998_v8 = vld [vmem:[#allocation28_spill] sm:$0xff] }
 0xa34   :  { %3857 = vmatpush1.bf16.msra.mxu0 %v7971_v53  ;;  %3898 = vmatpush1.bf16.msra.mxu1 %v7972_v11  ;;  %v7999_v53 = vld [vmem:[#allocation29_spill] sm:$0xff]  ;;  %v8000_v11 = vld [vmem:[#allocation31_spill] sm:$0xff] }
 0xa35   :  { %3858 = vmatprep.subr.bf16.mxu0 %v7973_v49  ;;  %3899 = vmatprep.subr.bf16.mxu1 %v7974_v63  ;;  %v8001_v49 = vld [vmem:[#allocation30_spill] sm:$0xff]  ;;  %v8002_v63 = vld [vmem:[#allocation32_spill] sm:$0xff] }
 0xa38   :  { %3859 = vmatpush1.bf16.msra.mxu0 %v7975_v46  ;;  %3900 = vmatpush1.bf16.msra.mxu1 %v7976_v47  ;;  %v8003_v46 = vld [vmem:[#allocation33_spill] sm:$0xff]  ;;  %v8004_v47 = vld [vmem:[#allocation35_spill] sm:$0xff] }
 0xa39   :  { %3860 = vmatprep.subr.bf16.mxu0 %v7977_v5  ;;  %3901 = vmatprep.subr.bf16.mxu1 %v7978_v29  ;;  %v8005_v5 = vld [vmem:[#allocation34_spill] sm:$0xff]  ;;  %v8006_v29 = vld [vmem:[#allocation36_spill] sm:$0xff] }
 0xa3c   :  { %3861 = vmatpush1.bf16.msra.mxu0 %v7979_v2  ;;  %3902 = vmatpush1.bf16.msra.mxu1 %v7980_v28  ;;  %v8007_v2 = vld [vmem:[#allocation37_spill] sm:$0xff]  ;;  %v8008_v28 = vld [vmem:[#allocation39_spill] sm:$0xff] }
 0xa3d   :  { %3862 = vmatprep.subr.bf16.mxu0 %v7981_v30  ;;  %3903 = vmatprep.subr.bf16.mxu1 %v7982_v10  ;;  %v8009_v30 = vld [vmem:[#allocation38_spill] sm:$0xff]  ;;  %v8010_v10 = vld [vmem:[#allocation40_spill] sm:$0xff] }
 0xa40   :  { %3863 = vmatpush1.bf16.msra.mxu0 %v7983_v3  ;;  %3904 = vmatpush1.bf16.msra.mxu1 %v7984_v19  ;;  %v8011_v3 = vld [vmem:[#allocation41_spill] sm:$0xff]  ;;  %v8012_v19 = vld [vmem:[#allocation43_spill] sm:$0xff] }
 0xa41   :  { %3960 = vmatprep.subr.bf16.mxu0 %v7985_v31  ;;  %4001 = vmatprep.subr.bf16.mxu1 %v7986_v54  ;;  %v8013_v31 = vld [vmem:[#allocation42_spill] sm:$0xff]  ;;  %v8014_v54 = vld [vmem:[#allocation44_spill] sm:$0xff] }
 0xa43   :  { %3881 = vmatmul.mubr.bf16.vlgmr.msra.gmra.mrb[108].mxu0 %v3640_v32  ;;  %3922 = vmatmul.mubr.bf16.vlgmr.msra.gmra.mrb[108].mxu1 %v3640_v32  ;;  %v7996_v32 = vld [vmem:[#allocation27_spill] sm:$0xff] }
 0xa44   :  { %3961 = vmatpush1.bf16.msra.mxu0 %v7987_v13  ;;  %4002 = vmatpush1.bf16.msra.mxu1 %v7988_v25  ;;  %v8015_v13 = vld [vmem:[#allocation45_spill] sm:$0xff]  ;;  %v8016_v25 = vld [vmem:[#allocation46_spill] sm:$0xff] }
 0xa45   :  { %3962 = vmatprep.subr.bf16.mxu0 %v7989_v24  ;;  %4003 = vmatprep.subr.bf16.mxu1 %v7990_v27  ;;  %v8017_v24 = vld [vmem:[#allocation14_spill] sm:$0xff]  ;;  %v8018_v27 = vld [vmem:[#allocation77_spill] sm:$0xff] }
 0xa46   :  { %3992 = vmatprep.mubr.bf16.mxu0 %v7579_v12  ;;  %4033 = vmatprep.mubr.bf16.mxu1 %v7579_v12 }
 0xa48   :  { %3963 = vmatpush1.bf16.msra.mxu0 %v7991_v1  ;;  %4004 = vmatpush1.bf16.msra.mxu1 %v7992_v21 }
 0xa49   :  { %3964 = vmatprep.subr.bf16.mxu0 %v7993_v15  ;;  %4005 = vmatprep.subr.bf16.mxu1 %v7994_v17 }
 0xa4c   :  { %3965 = vmatpush1.bf16.msra.mxu0 %v7995_v39  ;;  %4006 = vmatpush1.bf16.msra.mxu1 %v7996_v32 }
 0xa4d   :  { %3966 = vmatprep.subr.bf16.mxu0 %v7997_v58  ;;  %4007 = vmatprep.subr.bf16.mxu1 %v7998_v8 }
 0xa50   :  { %3967 = vmatpush1.bf16.msra.mxu0 %v7999_v53  ;;  %4008 = vmatpush1.bf16.msra.mxu1 %v8000_v11 }
 0xa51   :  { %3968 = vmatprep.subr.bf16.mxu0 %v8001_v49  ;;  %4009 = vmatprep.subr.bf16.mxu1 %v8002_v63 }
 0xa54   :  { %3969 = vmatpush1.bf16.msra.mxu0 %v8003_v46  ;;  %4010 = vmatpush1.bf16.msra.mxu1 %v8004_v47 }
 0xa55   :  { %3970 = vmatprep.subr.bf16.mxu0 %v8005_v5  ;;  %4011 = vmatprep.subr.bf16.mxu1 %v8006_v29 }
 0xa58   :  { %3971 = vmatpush1.bf16.msra.mxu0 %v8007_v2  ;;  %4012 = vmatpush1.bf16.msra.mxu1 %v8008_v28 }
 0xa59   :  { %3972 = vmatprep.subr.bf16.mxu0 %v8009_v30  ;;  %4013 = vmatprep.subr.bf16.mxu1 %v8010_v10 }
 0xa5c   :  { %3973 = vmatpush1.bf16.msra.mxu0 %v8011_v3  ;;  %4014 = vmatpush1.bf16.msra.mxu1 %v8012_v19 }
 0xa5d   :  { %3974 = vmatprep.subr.bf16.mxu0 %v8013_v31  ;;  %4015 = vmatprep.subr.bf16.mxu1 %v8014_v54 }
 0xa60   :  { %3975 = vmatpush1.bf16.msra.mxu0 %v8015_v13  ;;  %4016 = vmatpush1.bf16.msra.mxu1 %v8016_v25  ;;  %v8019_v13 = vld [vmem:[#allocation15_spill] sm:$0xff] }
 0xa61   :  { %4042 = vmatprep.subr.bf16.mxu0 %v8017_v24  ;;  %4083 = vmatprep.subr.bf16.mxu1 %v8018_v27  ;;  %v8020_v27 = vld [vmem:[#allocation16_spill] sm:$0xff] }
 0xad6   :  { %v3676_v1 = vpop.f32.mrb[100].mxu0  ;;  %v3717_v21 = vpop.f32.mrb[100].mxu1 }
 0xad7   :  { %v3678_v15 = vpop.f32.mrb[101].mxu0  ;;  %v3719_v17 = vpop.f32.mrb[101].mxu1 }
 0xad8   :  { %v3680_v39 = vpop.f32.mrb[102].mxu0  ;;  %v3721_v32 = vpop.f32.mrb[102].mxu1 }
 0xad9   :  { %v3681_v58 = vpop.f32.mrb[103].mxu0  ;;  %v3722_v8 = vpop.f32.mrb[103].mxu1 }
 0xaf6   :  { %v3758_v53 = vpop.f32.mrb[104].mxu0  ;;  %v3799_v11 = vpop.f32.mrb[104].mxu1 }
 0xaf7   :  { %v3759_v49 = vadd.f32 %v3758_v53, %v3676_v1  ;;  %v3800_v63 = vadd.f32 %v3799_v11, %v3717_v21  ;;  %v3760_v46 = vpop.f32.mrb[105].mxu0  ;;  %v3801_v47 = vpop.f32.mrb[105].mxu1 }
 0xaf8   :  { %v3761_v5 = vadd.f32 %v3760_v46, %v3678_v15  ;;  %v3802_v29 = vadd.f32 %v3801_v47, %v3719_v17  ;;  %v3762_v2 = vpop.f32.mrb[106].mxu0  ;;  %v3803_v28 = vpop.f32.mrb[106].mxu1  ;;  %v8021_v46 = vld [vmem:[#allocation90_spill] sm:$0xff] }
 0xaf9   :  { %v3806_v30 = vadd.f32 %v3759_v49, %v6041_v55  ;;  %v3763_v10 = vpop.f32.mrb[107].mxu0  ;;  %v3804_v3 = vpop.f32.mrb[107].mxu1  ;;  %v3808_v1 = vadd.f32 %v3800_v63, %v8020_v27  ;;  %v3844_v47 = vunpack.c.l.bf16 %v8021_v46 }
 0xafa   :  { %v3807_v19 = vadd.f32 %v3761_v5, %v6045_v48  ;;  %v3809_v25 = vadd.f32 %v3802_v29, %v8019_v13  ;;  %v8022_v5 = vld [vmem:[#allocation91_spill] sm:$0xff] }
 0xafb   :  { %v4372_v31 = vmul.f32 -1.442695, %v3806_v30  ;;  %v3846_v29 = vunpack.c.l.bf16 %v8022_v5  ;;  %v3845_v30 = vunpack.c.h.bf16 %v8021_v46  ;;  %v3847_v10 = vunpack.c.h.bf16 %v8022_v5 }
 0xafc   :  { %v4373_v54 = vmul.f32 -1.442695, %v3807_v19  ;;  %v4374_v24 = vmul.f32 -1.442695, %v3809_v25 }
 0xafd   :  { %4882 = vpow2.f32 %v4372_v31 }
 0xafe   :  { %4884 = vpow2.f32 %v4373_v54 }
 0xaff   :  { %4886 = vpow2.f32 %v4374_v24 }
 0xb00   :  { %4888 = vtanh.f32 %v3808_v1 }
 0xb07   :  { %v4883_v21 = vpop.eup %4882 }
 0xb08   :  { %v4885_v15 = vpop.eup %4884  ;;  %v3813_v17 = vadd.f32 1.0, %v4883_v21 }
 0xb09   :  { %v3819_v39 = vadd.f32 1.0, %v4885_v15  ;;  %v4887_v32 = vpop.eup %4886 }
 0xb0a   :  { %4890 = vrcp.f32 %v3813_v17  ;;  %v4889_v58 = vpop.eup %4888  ;;  %v3826_v49 = vadd.f32 1.0, %v4887_v32 }
 0xb0b   :  { %4892 = vrcp.f32 %v3819_v39 }
 0xb0c   :  { %4894 = vrcp.f32 %v3826_v49 }
 0xb14   :  { %v4891_v8 = vpop.eup %4890 }
 0xb15   :  { %v4893_v53 = vpop.eup %4892  ;;  %v3830_v11 = vmul.f32 %v4891_v8, %v4889_v58 }
 0xb16   :  { %v3829_v63 = vmul.f32 %v4893_v53, %v7065_v26  ;;  %v3882_v2 = vpop.f32.mrb[108].mxu0  ;;  %v3923_v28 = vpop.f32.mrb[108].mxu1 }
 0xb17   :  { %v3930_v3 = vadd.f32 %v3882_v2, %v3844_v47  ;;  %v3932_v19 = vadd.f32 %v3923_v28, %v3846_v29  ;;  %v3884_v31 = vpop.f32.mrb[109].mxu0  ;;  %v3925_v54 = vpop.f32.mrb[109].mxu1 }
 0xb18   :  { %v7186_v25 = vadd.f32 %v3830_v11, %v3829_v63  ;;  %v3931_v24 = vadd.f32 %v3884_v31, %v3845_v30  ;;  %v3933_v1 = vadd.f32 %v3925_v54, %v3847_v10  ;;  %v3886_v21 = vpop.f32.mrb[110].mxu0  ;;  %v3927_v15 = vpop.f32.mrb[110].mxu1 }
 0xb19   :  { %v4375_v17 = vmul.f32 -1.442695, %v3930_v3  ;;  %v3887_v39 = vpop.f32.mrb[111].mxu0  ;;  %v3928_v26 = vpop.f32.mrb[111].mxu1 }
 0xb1a   :  { %v4376_v32 = vmul.f32 -1.442695, %v3931_v24  ;;  %4896 = vtanh.f32 %v7186_v25  ;;  %v4377_v58 = vmul.f32 -1.442695, %v3933_v1  ;;  %v4895_v8 = vpop.eup %4894  ;;  %v3838_v53 = vpop.permute.xlu0 %3837 }
 0xb1b   :  { %4898 = vpow2.f32 %v4375_v17  ;;  %vm3839_vm0 = vcmp.eq.s32.totalorder %v3838_v53, 1 }
 0xb1c   :  { %4900 = vpow2.f32 %v4376_v32 }
 0xb1d   :  { %4902 = vpow2.f32 %v4377_v58  ;;  %v4156_v58 = vpop.permute.xlu1 %4155 }
 0xb1e   :  { %4904 = vtanh.f32 %v3932_v19  ;;  %vm4157_vm1 = vcmp.eq.s32.totalorder %v4156_v58, 1 }
 0xb24   :  { %v4897_v46 = vpop.eup %4896 }
 0xb25   :  { %v4899_v47 = vpop.eup %4898  ;;  %v3833_v11 = vmul.f32 %v4897_v46, %v4895_v8 }
 0xb26   :  { %v4901_v5 = vpop.eup %4900  ;;  %v3937_v29 = vadd.f32 1.0, %v4899_v47 }
 0xb27   :  { %v3943_v49 = vadd.f32 1.0, %v4901_v5  ;;  %v7190_v63 = vsel %vm3839_vm0, %v3833_v11, %v7069_v37  ;;  %v3959_v2 = vpack.c.bf16 %v3833_v11, %v3833_v11  ;;  %v4903_v37 = vpop.eup %4902 }
 0xb28   :  { %4906 = vrcp.f32 %v3937_v29 }
 0xb29   :  { %4908 = vrcp.f32 %v3943_v49  ;;  %3993 = vmatmul.mubr.bf16.vlgmr.msra.gmra.mrb[112].mxu0 %v3959_v2  ;;  %4034 = vmatmul.mubr.bf16.vlgmr.msra.gmra.mrb[112].mxu1 %v3959_v2 }
 0xb2a   :  { %4043 = vmatpush1.bf16.msra.mxu0 %v6890_v16  ;;  %4084 = vmatpush1.bf16.msra.mxu1 %v6893_v23  ;;  %v4905_v16 = vpop.eup %4904 }
 0xb2b   :  { %4044 = vmatprep.subr.bf16.mxu0 %v6896_v60  ;;  %4085 = vmatprep.subr.bf16.mxu1 %v6899_v18  ;;  %v3950_v18 = vadd.f32 1.0, %v4903_v37 }
 0xb2c   :  { %4074 = vmatprep.mubr.bf16.mxu0 %v7579_v12  ;;  %4115 = vmatprep.mubr.bf16.mxu1 %v7579_v12 }
 0xb2d   :  { %4910 = vrcp.f32 %v3950_v18 }
 0xb2e   :  { %4045 = vmatpush1.bf16.msra.mxu0 %v6904_v0  ;;  %4086 = vmatpush1.bf16.msra.mxu1 %v6907_v59 }
 0xb2f   :  { %4046 = vmatprep.subr.bf16.mxu0 %v6910_v57  ;;  %4087 = vmatprep.subr.bf16.mxu1 %v6913_v56 }
 0xb32   :  { %v4907_v28 = vpop.eup %4906  ;;  %4047 = vmatpush1.bf16.msra.mxu0 %v6916_v33  ;;  %4088 = vmatpush1.bf16.msra.mxu1 %v6919_v7 }
 0xb33   :  { %v4909_v23 = vpop.eup %4908  ;;  %v3954_v60 = vmul.f32 %v4907_v28, %v4905_v16  ;;  %4048 = vmatprep.subr.bf16.mxu0 %v6922_v45  ;;  %4089 = vmatprep.subr.bf16.mxu1 %v6925_v62 }
 0xb34   :  { %v3953_v12 = vmul.f32 %v4909_v23, %v7086_v50 }
 0xb36   :  { %v3955_v0 = vadd.f32 %v3954_v60, %v3953_v12  ;;  %4049 = vmatpush1.bf16.msra.mxu0 %v6931_v43  ;;  %4090 = vmatpush1.bf16.msra.mxu1 %v7958_v36 }
 0xb37   :  { %4050 = vmatprep.subr.bf16.mxu0 %v7959_v38  ;;  %4091 = vmatprep.subr.bf16.mxu1 %v7960_v61  ;;  %v4911_v59 = vpop.eup %4910 }
 0xb38   :  { %4912 = vtanh.f32 %v3955_v0 }
 0xb3a   :  { %4051 = vmatpush1.bf16.msra.mxu0 %v7961_v9  ;;  %4092 = vmatpush1.bf16.msra.mxu1 %v7962_v22 }
 0xb3b   :  { %4052 = vmatprep.subr.bf16.mxu0 %v7963_v34  ;;  %4093 = vmatprep.subr.bf16.mxu1 %v7964_v6 }
 0xb3e   :  { %4053 = vmatpush1.bf16.msra.mxu0 %v7965_v40  ;;  %4094 = vmatpush1.bf16.msra.mxu1 %v7966_v35 }
 0xb3f   :  { %4054 = vmatprep.subr.bf16.mxu0 %v7967_v4  ;;  %4095 = vmatprep.subr.bf16.mxu1 %v7968_v42 }
 0xb42   :  { %v4913_v57 = vpop.eup %4912  ;;  %4055 = vmatpush1.bf16.msra.mxu0 %v6968_v52  ;;  %4096 = vmatpush1.bf16.msra.mxu1 %v6971_v41 }
 0xb43   :  { %4056 = vmatprep.subr.bf16.mxu0 %v6974_v44  ;;  %4097 = vmatprep.subr.bf16.mxu1 %v6977_v51  ;;  %v3957_v56 = vmul.f32 %v4913_v57, %v4911_v59 }
 0xb45   :  { %v3958_v33 = vpack.c.bf16 %v3957_v56, %v3957_v56 }
 0xb46   :  { %4057 = vmatpush1.bf16.msra.mxu0 %v6980_v20  ;;  %4098 = vmatpush1.bf16.msra.mxu1 %v6983_v14 }
 0xb49   :  { %4075 = vmatmul.mubr.bf16.vlgmr.msra.gmra.mrb[116].mxu0 %v3958_v33  ;;  %4116 = vmatmul.mubr.bf16.vlgmr.msra.gmra.mrb[116].mxu1 %v3958_v33 }
 0xbfc   :  { %v3994_v7 = vpop.f32.mrb[112].mxu0  ;;  %v4035_v45 = vpop.f32.mrb[112].mxu1 }
 0xbfd   :  { %v3996_v62 = vpop.f32.mrb[113].mxu0  ;;  %v4037_v43 = vpop.f32.mrb[113].mxu1 }
 0xbfe   :  { %v3998_v50 = vpop.f32.mrb[114].mxu0  ;;  %v4039_v52 = vpop.f32.mrb[114].mxu1 }
 0xbff   :  { %v3999_v36 = vpop.f32.mrb[115].mxu0  ;;  %v4040_v41 = vpop.f32.mrb[115].mxu1 }
 0xc1c   :  { %v4076_v38 = vpop.f32.mrb[116].mxu0  ;;  %v4117_v44 = vpop.f32.mrb[116].mxu1 }
 0xc1d   :  { %v4077_v61 = vadd.f32 %v4076_v38, %v3994_v7  ;;  %v4118_v51 = vadd.f32 %v4117_v44, %v4035_v45  ;;  %v4078_v9 = vpop.f32.mrb[117].mxu0  ;;  %v4119_v22 = vpop.f32.mrb[117].mxu1 }
 0xc1e   :  { %v4079_v34 = vadd.f32 %v4078_v9, %v3996_v62  ;;  %v4120_v20 = vadd.f32 %v4119_v22, %v4037_v43  ;;  %v4080_v6 = vpop.f32.mrb[118].mxu0  ;;  %v4121_v14 = vpop.f32.mrb[118].mxu1 }
 0xc1f   :  { %v4124_v40 = vadd.f32 %v4077_v61, %v6041_v55  ;;  %v4081_v35 = vpop.f32.mrb[119].mxu0  ;;  %v4122_v4 = vpop.f32.mrb[119].mxu1  ;;  %v4126_v31 = vadd.f32 %v4118_v51, %v8020_v27 }
 0xc20   :  { %v4125_v42 = vadd.f32 %v4079_v34, %v6045_v48  ;;  %v4127_v3 = vadd.f32 %v4120_v20, %v8019_v13 }
 0xc21   :  { %v4378_v30 = vmul.f32 -1.442695, %v4124_v40 }
 0xc22   :  { %v4379_v10 = vmul.f32 -1.442695, %v4125_v42  ;;  %v4380_v19 = vmul.f32 -1.442695, %v4127_v3 }
 0xc23   :  { %4914 = vpow2.f32 %v4378_v30 }
 0xc24   :  { %4916 = vpow2.f32 %v4379_v10 }
 0xc25   :  { %4918 = vpow2.f32 %v4380_v19 }
 0xc26   :  { %4920 = vtanh.f32 %v4126_v31 }
 0xc2d   :  { %v4915_v54 = vpop.eup %4914 }
 0xc2e   :  { %v4917_v24 = vpop.eup %4916  ;;  %v4131_v1 = vadd.f32 1.0, %v4915_v54 }
 0xc2f   :  { %v4137_v21 = vadd.f32 1.0, %v4917_v24  ;;  %v4919_v55 = vpop.eup %4918 }
 0xc30   :  { %4922 = vrcp.f32 %v4131_v1  ;;  %v4921_v15 = vpop.eup %4920  ;;  %v4144_v26 = vadd.f32 1.0, %v4919_v55 }
 0xc31   :  { %4924 = vrcp.f32 %v4137_v21 }
 0xc32   :  { %4926 = vrcp.f32 %v4144_v26 }
 0xc3a   :  { %v4923_v48 = vpop.eup %4922 }
 0xc3b   :  { %v4925_v17 = vpop.eup %4924  ;;  %v4148_v39 = vmul.f32 %v4923_v48, %v4921_v15 }
 0xc3c   :  { %v4147_v32 = vmul.f32 %v4925_v17, %v7186_v25  ;;  %v4927_v27 = vpop.eup %4926 }
 0xc3e   :  { %v4149_v13 = vadd.f32 %v4148_v39, %v4147_v32 }
 0xc40   :  { %4928 = vtanh.f32 %v4149_v13 }
 0xc4a   :  { %v4929_v8 = vpop.eup %4928 }
 0xc4b   :  { %v4151_v53 = vmul.f32 %v4929_v8, %v4927_v27 }
 0xc4d   :  { %v4158_v46 = vsel %vm4157_vm1, %v4151_v53, %v7190_v63 }
 0xc4e   :  { %v4159_v47 = vpack.c.bf16 %v4158_v46, %v4158_v46 }
 0xc50   :  { %4160 = vst [vmem:[%s7245_s11] sm:$0xf] %v4159_v47 }
 0xc51   :  { %4165 = vsyncpa [#allocation4], 1 }
 0xc52   :  { %4166 = vsyncpa [#allocation6], 1 }
 0xc53   :  { %4167 = vsyncpa [#allocation9], 1 }

// kernel: trajectory_lstm_forward.3
= control target key start
LH: loop header
LB: loop body
LE: loop exit
PB: predicated region body
PF: predicated region fallthrough
CT: control target
= control target key end

     0   :  { %s6545_s0 = inlined_call_operand.vmem [shape: bf16[8,128], index: 0, kind: input, shape index: {}]   ;;  %s6546_s1 = inlined_call_operand.vmem [shape: bf16[2,8], index: 1, kind: input, shape index: {}]   ;;  %s6547_s2 = inlined_call_operand.vmem [shape: f32[2,8], index: 2, kind: input, shape index: {}]   ;;  %s6548_s3 = inlined_call_operand.vmem [shape: bf16[128,128], index: 3, kind: input, shape index: {}]   ;;  %s6549_s4 = inlined_call_operand.vmem [shape: f32[1,128], index: 4, kind: input, shape index: {}]   ;;  %s6550_s5 = inlined_call_operand.vmem [shape: bf16[128,256], index: 5, kind: input, shape index: {}]   ;;  %s6551_s6 = inlined_call_operand.vmem [shape: f32[1,256], index: 6, kind: input, shape index: {}]   ;;  %s6552_s7 = inlined_call_operand.vmem [shape: bf16[128,128], index: 7, kind: input, shape index: {}]   ;;  %s6553_s8 = inlined_call_operand.vmem [shape: f32[1,128], index: 8, kind: input, shape index: {}]   ;;  %s6554_s9 = inlined_call_operand.vmem [shape: bf16[128,128], index: 9, kind: input, shape index: {}]   ;;  %s6555_s10 = inlined_call_operand.vmem [shape: f32[1,128], index: 10, kind: input, shape index: {}]   ;;  %s6556_s11 = inlined_call_operand.vmem [shape: bf16[128,6], index: 11, kind: input, shape index: {}]   ;;  %s6557_s12 = inlined_call_operand.vmem [shape: f32[1,6], index: 12, kind: input, shape index: {}]   ;;  %s6558_s13 = inlined_call_operand.vmem [shape: bf16[6,128,128], index: 13, kind: input, shape index: {}]   ;;  %s6559_s14 = inlined_call_operand.vmem [shape: f32[6,1,128], index: 14, kind: input, shape index: {}]   ;;  %s6560_s15 = inlined_call_operand.vmem [shape: bf16[6,128,128], index: 15, kind: input, shape index: {}]   ;;  %s6561_s16 = inlined_call_operand.vmem [shape: f32[6,1,128], index: 16, kind: input, shape index: {}]   ;;  %s6562_s17 = inlined_call_operand.vmem [shape: bf16[6,128,64], index: 17, kind: input, shape index: {}]   ;;  %s6563_s18 = inlined_call_operand.vmem [shape: f32[6,1,64], index: 18, kind: input, shape index: {}]   ;;  %s6564_s19 = inlined_call_operand.hbm [shape: f32[2,6], index: 19, kind: output, shape index: {0}]   ;;  %s6565_s20 = inlined_call_operand.vmem [shape: f32[6,2,64], index: 20, kind: output, shape index: {1}]  }
   0x1   :  { %6567 = sst [smem:[#allocation5_spill]] %s6545_s0 }
   0x2   :  { %6568 = sst [smem:[#allocation6_spill]] %s6546_s1 }
   0x3   :  { %6569 = sst [smem:[#allocation7_spill]] %s6547_s2 }
   0x4   :  { %6570 = sst [smem:[#allocation8_spill]] %s6548_s3 }
   0x5   :  { %6571 = sst [smem:[#allocation9_spill]] %s6549_s4 }
   0x6   :  { %s6572_s23 = sld [smem:[#allocation5_spill]]  ;;  %vm221_vm0 = vcmask 1043456   ;;  %v5311_v1 = vmov 0.0   ;;  %vm5312_vm1 = vmmov 0   ;;  %s6573_s25 = sld [smem:[#allocation6_spill]]  ;;  %vm217_vm2 = vcmask 64512  }
   0x7   :  { %4470 = vmatprep.subr.bf16.mxu1 %v5311_v1  ;;  %4472 = vmatprep.mubr.msk.bf16.mxu1 %vm5312_vm1, %v5311_v1  ;;  %v5051_v4 = vld [vmem:[%s6550_s5 + $0x4] ss:$8 sps:$4 sm:$0xff]   ;;  %v5053_v5 = vld [vmem:[%s6550_s5] ss:$8 sps:$4 sm:$0xff]   ;;  %v5313_v6 = vmov 0   ;;  %s6574_s24 = sld [smem:[#allocation8_spill]] }
   0x8   :  { %207 = vmatprep.mubr.bf16.mxu0 %v5313_v6  ;;  %v5054_v7 = vld [vmem:[%s6550_s5 + $0x14] ss:$8 sps:$4 sm:$0xff]   ;;  %175 = vmatprep.subr.bf16.mxu0 %v5051_v4  ;;  %v5056_v8 = vld [vmem:[%s6550_s5 + $0x10] ss:$8 sps:$4 sm:$0xff]   ;;  %v5057_v9 = vld [vmem:[%s6550_s5 + $0x24] ss:$8 sps:$4 sm:$0xff]  }
   0x9   :  { %176 = vmatpush1.bf16.msra.mxu0 %v5053_v5  ;;  %v5059_v11 = vld [vmem:[%s6550_s5 + $0x20] ss:$8 sps:$4 sm:$0xff]   ;;  %v5060_v13 = vld [vmem:[%s6550_s5 + $0x34] ss:$8 sps:$4 sm:$0xff]   ;;  %v5062_v14 = vld [vmem:[%s6550_s5 + $0x30] ss:$8 sps:$4 sm:$0xff]  }
   0xa   :  { %177 = vmatprep.subr.bf16.mxu0 %v5054_v7  ;;  %v5064_v16 = vld [vmem:[%s6550_s5 + $0x44] ss:$8 sps:$4 sm:$0xff]   ;;  %v5066_v17 = vld [vmem:[%s6550_s5 + $0x40] ss:$8 sps:$4 sm:$0xff]   ;;  %v5068_v19 = vld [vmem:[%s6550_s5 + $0x54] ss:$8 sps:$4 sm:$0xff]  }
   0xb   :  { %v5070_v20 = vld [vmem:[%s6550_s5 + $0x50] ss:$8 sps:$4 sm:$0xff]   ;;  %v5072_v22 = vld [vmem:[%s6550_s5 + $0x64] ss:$8 sps:$4 sm:$0xff]   ;;  %v5074_v23 = vld [vmem:[%s6550_s5 + $0x60] ss:$8 sps:$4 sm:$0xff]  }
   0xc   :  { %v5430_v0 = vld [vmem:[%s6572_s23] sm:$0xf]  ;;  %v5076_v25 = vld [vmem:[%s6550_s5 + $0x74] ss:$8 sps:$4 sm:$0xff]   ;;  %v5078_v26 = vld [vmem:[%s6550_s5 + $0x70] ss:$8 sps:$4 sm:$0xff]  }
   0xd   :  { %v223_v2 = vsel %vm221_vm0, %v5430_v0, 0  ;;  %v216_v3 = vld [vmem:[%s6573_s25] sm:$0x1]  ;;  %178 = vmatpush1.bf16.msra.mxu0 %v5056_v8  ;;  %v5067_v12 = vld [vmem:[%s6574_s24 + $0x8] sm:$0xff]   ;;  %v5071_v15 = vld [vmem:[%s6574_s24 + $0x10] sm:$0xff]  }
   0xe   :  { %4471 = vmatpush3.bf16.msra.mxu1 %v223_v2  ;;  %v5063_v10 = vld [vmem:[%s6574_s24] sm:$0xff]   ;;  %179 = vmatprep.subr.bf16.mxu0 %v5057_v9  ;;  %v5075_v18 = vld [vmem:[%s6574_s24 + $0x18] sm:$0xff]   ;;  %v5080_v24 = vld [vmem:[%s6574_s24 + $0x28] sm:$0xff]  }
   0xf   :  { %4476 = vmatprep.subr.bf16.mxu1 %v5311_v1  ;;  %v5079_v21 = vld [vmem:[%s6574_s24 + $0x20] sm:$0xff]   ;;  %v5081_v27 = vld [vmem:[%s6574_s24 + $0x30] sm:$0xff]   ;;  %v5082_v28 = vld [vmem:[%s6574_s24 + $0x38] sm:$0xff]  }
  0x11   :  { %4473 = vmatmul.mubr.msk.bf16.vlgmr.msra.gmra.mrb[0].mxu1 %vm217_vm2, %v216_v3  ;;  %180 = vmatpush1.bf16.msra.mxu0 %v5059_v11 }
  0x12   :  { %4492 = vmatprep.mubr.msk.bf16.mxu1 %vm5312_vm1, %v5311_v1  ;;  %4477 = vmatpush3.bf16.msra.mxu1 %v5063_v10 }
  0x13   :  { %4478 = vmatprep.subr.bf16.mxu1 %v5311_v1  ;;  %181 = vmatprep.subr.bf16.mxu0 %v5060_v13 }
  0x15   :  { %182 = vmatpush1.bf16.msra.mxu0 %v5062_v14 }
  0x16   :  { %4479 = vmatpush3.bf16.msra.mxu1 %v5067_v12  ;;  %183 = vmatprep.subr.bf16.mxu0 %v5064_v16 }
  0x17   :  { %4480 = vmatprep.subr.bf16.mxu1 %v5311_v1 }
  0x19   :  { %184 = vmatpush1.bf16.msra.mxu0 %v5066_v17 }
  0x1a   :  { %4481 = vmatpush3.bf16.msra.mxu1 %v5071_v15  ;;  %185 = vmatprep.subr.bf16.mxu0 %v5068_v19 }
  0x1b   :  { %4482 = vmatprep.subr.bf16.mxu1 %v5311_v1 }
  0x1d   :  { %186 = vmatpush1.bf16.msra.mxu0 %v5070_v20 }
  0x1e   :  { %4483 = vmatpush3.bf16.msra.mxu1 %v5075_v18  ;;  %187 = vmatprep.subr.bf16.mxu0 %v5072_v22 }
  0x1f   :  { %4484 = vmatprep.subr.bf16.mxu1 %v5311_v1 }
  0x21   :  { %188 = vmatpush1.bf16.msra.mxu0 %v5074_v23 }
  0x22   :  { %4485 = vmatpush3.bf16.msra.mxu1 %v5079_v21  ;;  %189 = vmatprep.subr.bf16.mxu0 %v5076_v25 }
  0x23   :  { %4486 = vmatprep.subr.bf16.mxu1 %v5311_v1 }
  0x25   :  { %190 = vmatpush1.bf16.msra.mxu0 %v5078_v26 }
  0x26   :  { %4487 = vmatpush3.bf16.msra.mxu1 %v5080_v24  ;;  %4496 = vmatprep.subr.bf16.mxu0 %v5311_v1 }
  0x27   :  { %4488 = vmatprep.subr.bf16.mxu1 %v5311_v1 }
  0x28   :  { %208 = vmatmul.mubr.bf16.vlgmr.msra.gmra.mrb[0].mxu0 %v5430_v0 }
  0x29   :  { %4498 = vmatprep.mubr.msk.bf16.mxu0 %vm5312_vm1, %v5311_v1 }
  0x2a   :  { %4489 = vmatpush3.bf16.msra.mxu1 %v5081_v27 }
  0x2b   :  { %4490 = vmatprep.subr.bf16.mxu1 %v5311_v1 }
  0x2e   :  { %4491 = vmatpush3.bf16.msra.mxu1 %v5082_v28 }
  0x2f   :  { %4502 = vmatprep.subr.bf16.mxu1 %v5311_v1 }
  0x30   :  { %26 = vsyncpa [#allocation3], 0  ;;  %v85_v34 = vlaneseq  ;;  %v83_v37 = vld [vmem:[%s6551_s6] sm:$0x3]  ;;  %vm398_vm3 = vcmask 130048   ;;  %s5314_s24 = smov 112  }
  0x31   :  { %s6575_s21 = sld [smem:[#allocation9_spill]]  ;;  %s6576_s23 = sld [smem:[#allocation7_spill]]  ;;  %vm447_vm5 = vcmask 58368   ;;  %v5084_v27 = vld [vmem:[%s6552_s7 + $0x8] sm:$0xff]   ;;  %vm1932_vm6 = vcmask 41984   ;;  %vm3967_vm7 = vcmask 517120  }
  0x32   :  { %v86_v35 = vshrl.u32 %v85_v34, 7  ;;  %s5315_s2 = smov 96   ;;  %s5316_s28 = smov 80  }
  0x33   :  { %s5317_s29 = smov 64   ;;  %s5318_s6 = smov 48  }
  0x34   :  { %v87_v36 = vsub.s32 0, %v86_v35  ;;  %v91_v38 = vsub.s32 1, %v86_v35  ;;  %s5319_s1 = smov 32  }
  0x36   :  { %v88_v39 = vrot.slane %v83_v37, %v87_v36  ;;  %v92_v40 = vrot.slane %v83_v37, %v91_v38 }
  0x37   :  { %v4009_v51 = vld [vmem:[%s6575_s21] ss:$0 sm:$0xff] }
  0x38   :  { %v5564_v61 = vld [vmem:[%s6576_s23] sm:$0x3] }
  0x39   :  { %vm394_vm4 = vcmp.gt.f32.partialorder %v5564_v61, 0.0 }
  0xe4   :  { %v259_v29 = vpop.f32.mrb[0].mxu1 }
  0xe5   :  { %v265_v30 = vpack.c.bf16 %v259_v29, %v259_v29  ;;  %v4474_v31 = vpop.f32.mrb[1].mxu1 }
  0xe6   :  { %v262_v32 = vpop.f32.mrb[2].mxu1 }
  0xe7   :  { %v4475_v33 = vpop.f32.mrb[3].mxu1  ;;  %4493 = vmatmul.mubr.bf16.vlgmr.msra.gmra.mrb[4].mxu1 %v265_v30 }
  0xe8   :  { %4504 = vmatprep.mubr.msk.bf16.mxu1 %vm5312_vm1, %v5311_v1  ;;  %v5083_v33 = vld [vmem:[%s6552_s7] sm:$0xff]  }
  0xfb   :  { %v209_v41 = vpop.f32.mrb[0].mxu0 }
  0xfc   :  { %v210_v42 = vadd.f32 %v209_v41, %v88_v39  ;;  %v211_v43 = vpop.f32.mrb[1].mxu0 }
  0xfd   :  { %v212_v44 = vadd.f32 %v211_v43, %v92_v40  ;;  %v213_v45 = vpop.f32.mrb[2].mxu0 }
  0xfe   :  { %v5533_v46 = vpack.c.bf16 %v210_v42, %v210_v42  ;;  %v214_v47 = vpop.f32.mrb[3].mxu0 }
  0xff   :  { %v5535_v48 = vpack.c.bf16 %v212_v44, %v212_v44 }
 0x100   :  { %511 = vrot.lane.b32.xlu0 %v5533_v46, %s5314_s24  ;;  %v403_v49 = vsel %vm398_vm3, %v5533_v46, 0 }
 0x101   :  { %4497 = vmatpush3.bf16.xpose.msra.mxu0 %v403_v49  ;;  %v464_v50 = vsel %vm221_vm0, %v5535_v48, 0 }
 0x102   :  { %4503 = vmatpush3.bf16.msra.mxu1 %v464_v50  ;;  %4508 = vmatprep.subr.bf16.mxu0 %v5311_v1 }
 0x103   :  { %4514 = vmatprep.subr.bf16.mxu1 %v5311_v1 }
 0x172   :  { %v512_v53 = vpop.permute.xlu0 %511 }
 0x173   :  { %v517_v59 = vsel %vm398_vm3, %v512_v53, 0 }
 0x1ba   :  { %v371_v52 = vpop.f32.mrb[4].mxu1 }
 0x1bb   :  { %v372_v54 = vadd.f32 %v4009_v51, %v371_v52  ;;  %v4494_v55 = vpop.f32.mrb[5].mxu1 }
 0x1bc   :  { %v374_v56 = vpop.f32.mrb[6].mxu1 }
 0x1bd   :  { %v5548_v57 = vpack.c.bf16 %v372_v54, %v372_v54  ;;  %v4495_v58 = vpop.f32.mrb[7].mxu1 }
 0x1bf   :  { %508 = vrot.lane.b32.xlu0 %v5548_v57, %s5314_s24  ;;  %4499 = vmatmul.mubr.msk.bf16.vlgmr.msra.gmra.mrb[4].mxu0 %vm398_vm3, %v5548_v57 }
 0x1c0   :  { %4509 = vmatpush3.bf16.xpose.msra.mxu0 %v517_v59  ;;  %4510 = vmatprep.mubr.msk.bf16.mxu0 %vm5312_vm1, %v5311_v1 }
 0x1c1   :  { %4520 = vmatprep.subr.bf16.mxu0 %v5311_v1 }
 0x231   :  { %v509_v60 = vpop.permute.xlu0 %508 }
 0x232   :  { %4511 = vmatmul.mubr.msk.bf16.vlgmr.msra.gmra.mrb[8].mxu0 %vm398_vm3, %v509_v60 }
 0x233   :  { %4522 = vmatprep.mubr.msk.bf16.mxu0 %vm5312_vm1, %v5311_v1  ;;  %4521 = vmatpush3.bf16.msra.mxu0 %v5084_v27 }
 0x234   :  { %4532 = vmatprep.subr.bf16.mxu0 %v5311_v1 }
 0x292   :  { %v439_v62 = vpop.f32.mrb[4].mxu0 }
 0x293   :  { %v445_v63 = vmul.f32 0.25, %v439_v62  ;;  %v4500_v0 = vpop.f32.mrb[5].mxu0 }
 0x294   :  { %v442_v2 = vpop.f32.mrb[6].mxu0 }
 0x295   :  { %v4501_v3 = vpop.f32.mrb[7].mxu0  ;;  %v446_v4 = vsel %vm394_vm4, %v445_v63, -1e+30 }
 0x296   :  { %v448_v5 = vsel %vm447_vm5, %v446_v4, -inf }
 0x297   :  { %449 = vmax.xlane.f32.xlu1 %v448_v5 }
 0x305   :  { %v553_v6 = vpop.f32.mrb[8].mxu0 }
 0x306   :  { %v559_v7 = vmul.f32 0.25, %v553_v6  ;;  %v4512_v8 = vpop.f32.mrb[9].mxu0 }
 0x307   :  { %v556_v9 = vpop.f32.mrb[10].mxu0 }
 0x308   :  { %v4513_v10 = vpop.f32.mrb[11].mxu0  ;;  %v560_v11 = vsel %vm394_vm4, %v559_v7, -1e+30 }
 0x309   :  { %v561_v12 = vsel %vm447_vm5, %v560_v11, -inf }
 0x30a   :  { %562 = vmax.xlane.f32.xlu1 %v561_v12  ;;  %v5085_v12 = vld [vmem:[%s6552_s7 + $0x10] sm:$0xff]  }
 0x324   :  { %v450_v13 = vpop.xlane.xlu1 %449 }
 0x325   :  { %v451_v14 = vsub.f32 %v446_v4, %v450_v13 }
 0x327   :  { %v452_v15 = vmul.f32 1.442695, %v451_v14 }
 0x329   :  { %5251 = vpow2.f32 %v452_v15 }
 0x333   :  { %v5252_v16 = vpop.eup %5251 }
 0x334   :  { %v454_v17 = vsel %vm447_vm5, %v5252_v16, 0.0 }
 0x335   :  { %455 = vadd.xlane.f32.xlu0 %v454_v17 }
 0x34b   :  { %785 = vrot.lane.b32.xlu0 %v5535_v48, %s5315_s2 }
 0x397   :  { %v563_v18 = vpop.xlane.xlu1 %562 }
 0x398   :  { %v564_v19 = vsub.f32 %v560_v11, %v563_v18 }
 0x39a   :  { %v565_v20 = vmul.f32 1.442695, %v564_v19 }
 0x39c   :  { %5253 = vpow2.f32 %v565_v20 }
 0x3a6   :  { %v5254_v21 = vpop.eup %5253 }
 0x3a7   :  { %v567_v22 = vsel %vm447_vm5, %v5254_v21, 0.0 }
 0x3a8   :  { %568 = vadd.xlane.f32.xlu1 %v567_v22 }
 0x3b9   :  { %574 = vrot.lane.b32.xlu1 %v5535_v48, %s5314_s24 }
 0x3bd   :  { %723 = vrot.lane.b32.xlu1 %v5533_v46, %s5315_s2 }
 0x3c1   :  { %721 = vrot.lane.b32.xlu1 %v5548_v57, %s5315_s2  ;;  %s5320_s2 = smov 16  }
 0x3c2   :  { %v456_v23 = vpop.xlane.xlu0 %455 }
 0x3c3   :  { %5255 = vrcp.f32 %v456_v23 }
 0x3c6   :  { %v786_v35 = vpop.permute.xlu0 %785 }
 0x3c7   :  { %v791_v40 = vsel %vm221_vm0, %v786_v35, 0 }
 0x3cd   :  { %v5256_v24 = vpop.eup %5255 }
 0x3ce   :  { %v458_v25 = vmul.f32 %v5256_v24, %v5252_v16 }
 0x3d0   :  { %v459_v26 = vpack.c.bf16 %v458_v25, %v458_v25 }
 0x3d2   :  { %4505 = vmatmul.mubr.msk.bf16.vlgmr.msra.gmra.mrb[8].mxu1 %vm217_vm2, %v459_v26 }
 0x3d3   :  { %4516 = vmatprep.mubr.msk.bf16.mxu1 %vm5312_vm1, %v5311_v1 }
 0x435   :  { %v569_v28 = vpop.xlane.xlu1 %568 }
 0x436   :  { %5257 = vrcp.f32 %v569_v28 }
 0x439   :  { %v575_v29 = vpop.permute.xlu1 %574 }
 0x43a   :  { %v580_v30 = vsel %vm221_vm0, %v575_v29, 0 }
 0x43b   :  { %4515 = vmatpush3.bf16.msra.mxu1 %v580_v30 }
 0x43c   :  { %4526 = vmatprep.subr.bf16.mxu1 %v5311_v1 }
 0x43d   :  { %v724_v42 = vpop.permute.xlu1 %723 }
 0x43e   :  { %v729_v49 = vsel %vm398_vm3, %v724_v42, 0 }
 0x440   :  { %v5258_v31 = vpop.eup %5257 }
 0x441   :  { %v571_v32 = vmul.f32 %v5258_v31, %v5254_v21  ;;  %v722_v51 = vpop.permute.xlu1 %721 }
 0x443   :  { %v572_v34 = vpack.c.bf16 %v571_v32, %v571_v32 }
 0x445   :  { %4517 = vmatmul.mubr.msk.bf16.vlgmr.msra.gmra.mrb[12].mxu1 %vm217_vm2, %v572_v34 }
 0x446   :  { %4527 = vmatpush3.bf16.msra.mxu1 %v5083_v33  ;;  %4528 = vmatprep.mubr.msk.bf16.mxu1 %vm5312_vm1, %v5311_v1 }
 0x447   :  { %4538 = vmatprep.subr.bf16.mxu1 %v5311_v1 }
 0x4a5   :  { %v500_v36 = vpop.f32.mrb[8].mxu1 }
 0x4a6   :  { %v506_v37 = vpack.c.bf16 %v500_v36, %v500_v36  ;;  %v4506_v38 = vpop.f32.mrb[9].mxu1 }
 0x4a7   :  { %v503_v39 = vpop.f32.mrb[10].mxu1 }
 0x4a8   :  { %v4507_v41 = vpop.f32.mrb[11].mxu1  ;;  %4529 = vmatmul.mubr.msk.bf16.vlgmr.msra.gmra.mrb[16].mxu1 %vm398_vm3, %v506_v37  ;;  %v5086_v39 = vld [vmem:[%s6552_s7 + $0x18] sm:$0xff]  }
 0x4a9   :  { %4539 = vmatpush3.bf16.msra.mxu1 %v791_v40  ;;  %4540 = vmatprep.mubr.msk.bf16.mxu1 %vm5312_vm1, %v5311_v1 }
 0x4aa   :  { %4550 = vmatprep.subr.bf16.mxu1 %v5311_v1 }
 0x518   :  { %v616_v43 = vpop.f32.mrb[12].mxu1 }
 0x519   :  { %v622_v44 = vpack.c.bf16 %v616_v43, %v616_v43  ;;  %v4518_v45 = vpop.f32.mrb[13].mxu1 }
 0x51a   :  { %v619_v47 = vpop.f32.mrb[14].mxu1 }
 0x51b   :  { %v4519_v50 = vpop.f32.mrb[15].mxu1  ;;  %4523 = vmatmul.mubr.msk.bf16.vlgmr.msra.gmra.mrb[12].mxu0 %vm398_vm3, %v622_v44 }
 0x51c   :  { %4533 = vmatpush3.bf16.xpose.msra.mxu0 %v729_v49  ;;  %4534 = vmatprep.mubr.msk.bf16.mxu0 %vm5312_vm1, %v5311_v1 }
 0x51d   :  { %4544 = vmatprep.subr.bf16.mxu0 %v5311_v1 }
 0x523   :  { %4535 = vmatmul.mubr.msk.bf16.vlgmr.msra.gmra.mrb[16].mxu0 %vm398_vm3, %v722_v51 }
 0x524   :  { %4546 = vmatprep.mubr.msk.bf16.mxu0 %vm5312_vm1, %v5311_v1  ;;  %4545 = vmatpush3.bf16.msra.mxu0 %v5085_v12  ;;  %v5087_v12 = vld [vmem:[%s6552_s7 + $0x20] sm:$0xff]  }
 0x525   :  { %4556 = vmatprep.subr.bf16.mxu0 %v5311_v1 }
 0x57b   :  { %v715_v52 = vpop.f32.mrb[16].mxu1 }
 0x57c   :  { %v4530_v53 = vpop.f32.mrb[17].mxu1 }
 0x57d   :  { %v718_v54 = vpop.f32.mrb[18].mxu1 }
 0x57e   :  { %v4531_v55 = vpop.f32.mrb[19].mxu1 }
 0x5ee   :  { %v666_v56 = vpop.f32.mrb[12].mxu0 }
 0x5ef   :  { %v5609_v58 = vadd.f32 %v715_v52, %v666_v56  ;;  %v4524_v59 = vpop.f32.mrb[13].mxu0 }
 0x5f0   :  { %v669_v60 = vpop.f32.mrb[14].mxu0 }
 0x5f1   :  { %v4525_v62 = vpop.f32.mrb[15].mxu0 }
 0x5f6   :  { %v765_v63 = vpop.f32.mrb[16].mxu0 }
 0x5f7   :  { %v771_v0 = vmul.f32 0.25, %v765_v63  ;;  %v4536_v2 = vpop.f32.mrb[17].mxu0 }
 0x5f8   :  { %v768_v3 = vpop.f32.mrb[18].mxu0 }
 0x5f9   :  { %v4537_v4 = vpop.f32.mrb[19].mxu0  ;;  %v772_v5 = vsel %vm394_vm4, %v771_v0, -1e+30 }
 0x5fa   :  { %v773_v6 = vsel %vm447_vm5, %v772_v5, -inf }
 0x5fb   :  { %774 = vmax.xlane.f32.xlu1 %v773_v6 }
 0x60c   :  { %948 = vrot.lane.b32.xlu1 %v5535_v48, %s5316_s28 }
 0x688   :  { %v775_v7 = vpop.xlane.xlu1 %774 }
 0x689   :  { %v776_v8 = vsub.f32 %v772_v5, %v775_v7 }
 0x68b   :  { %v777_v9 = vmul.f32 1.442695, %v776_v8 }
 0x68c   :  { %v949_v20 = vpop.permute.xlu1 %948 }
 0x68d   :  { %5259 = vpow2.f32 %v777_v9  ;;  %v954_v25 = vsel %vm221_vm0, %v949_v20, 0 }
 0x697   :  { %v5260_v10 = vpop.eup %5259 }
 0x698   :  { %v779_v11 = vsel %vm447_vm5, %v5260_v10, 0.0 }
 0x699   :  { %780 = vadd.xlane.f32.xlu0 %v779_v11 }
 0x6af   :  { %886 = vrot.lane.b32.xlu0 %v5533_v46, %s5316_s28 }
 0x6b3   :  { %884 = vrot.lane.b32.xlu0 %v5548_v57, %s5316_s28 }
 0x726   :  { %v781_v13 = vpop.xlane.xlu0 %780 }
 0x727   :  { %5261 = vrcp.f32 %v781_v13 }
 0x72a   :  { %v887_v16 = vpop.permute.xlu0 %886 }
 0x72b   :  { %v892_v18 = vsel %vm398_vm3, %v887_v16, 0 }
 0x72e   :  { %v885_v19 = vpop.permute.xlu0 %884 }
 0x731   :  { %v5262_v14 = vpop.eup %5261 }
 0x732   :  { %v783_v15 = vmul.f32 %v5262_v14, %v5260_v10 }
 0x734   :  { %v784_v17 = vpack.c.bf16 %v783_v15, %v783_v15 }
 0x736   :  { %4541 = vmatmul.mubr.msk.bf16.vlgmr.msra.gmra.mrb[20].mxu1 %vm217_vm2, %v784_v17 }
 0x737   :  { %4551 = vmatpush3.bf16.xpose.msra.mxu1 %v892_v18  ;;  %4552 = vmatprep.mubr.msk.bf16.mxu1 %vm5312_vm1, %v5311_v1 }
 0x738   :  { %4562 = vmatprep.subr.bf16.mxu1 %v5311_v1 }
 0x73e   :  { %4553 = vmatmul.mubr.msk.bf16.vlgmr.msra.gmra.mrb[24].mxu1 %vm398_vm3, %v885_v19 }
 0x73f   :  { %4564 = vmatprep.mubr.msk.bf16.mxu1 %vm5312_vm1, %v5311_v1  ;;  %4563 = vmatpush3.bf16.msra.mxu1 %v5086_v39 }
 0x740   :  { %4574 = vmatprep.subr.bf16.mxu1 %v5311_v1 }
 0x809   :  { %v827_v21 = vpop.f32.mrb[20].mxu1 }
 0x80a   :  { %v833_v22 = vpack.c.bf16 %v827_v21, %v827_v21  ;;  %v4542_v23 = vpop.f32.mrb[21].mxu1 }
 0x80b   :  { %v830_v24 = vpop.f32.mrb[22].mxu1 }
 0x80c   :  { %v4543_v26 = vpop.f32.mrb[23].mxu1  ;;  %4547 = vmatmul.mubr.msk.bf16.vlgmr.msra.gmra.mrb[20].mxu0 %vm398_vm3, %v833_v22 }
 0x80d   :  { %4557 = vmatpush3.bf16.msra.mxu0 %v954_v25  ;;  %4558 = vmatprep.mubr.msk.bf16.mxu0 %vm5312_vm1, %v5311_v1 }
 0x80e   :  { %4568 = vmatprep.subr.bf16.mxu0 %v5311_v1 }
 0x811   :  { %v928_v27 = vpop.f32.mrb[24].mxu1 }
 0x812   :  { %v934_v28 = vmul.f32 0.25, %v928_v27  ;;  %v4554_v29 = vpop.f32.mrb[25].mxu1 }
 0x813   :  { %v931_v30 = vpop.f32.mrb[26].mxu1 }
 0x814   :  { %v4555_v31 = vpop.f32.mrb[27].mxu1  ;;  %v935_v32 = vsel %vm394_vm4, %v934_v28, -1e+30 }
 0x815   :  { %v936_v33 = vsel %vm447_vm5, %v935_v32, -inf }
 0x816   :  { %937 = vmax.xlane.f32.xlu0 %v936_v33 }
 0x82c   :  { %1111 = vrot.lane.b32.xlu0 %v5535_v48, %s5317_s29 }
 0x8a3   :  { %v938_v34 = vpop.xlane.xlu0 %937 }
 0x8a4   :  { %v939_v35 = vsub.f32 %v935_v32, %v938_v34 }
 0x8a6   :  { %v940_v36 = vmul.f32 1.442695, %v939_v35 }
 0x8a7   :  { %v1112_v54 = vpop.permute.xlu0 %1111 }
 0x8a8   :  { %5263 = vpow2.f32 %v940_v36  ;;  %v1117_v60 = vsel %vm221_vm0, %v1112_v54, 0 }
 0x8b2   :  { %v5264_v37 = vpop.eup %5263 }
 0x8b3   :  { %v942_v38 = vsel %vm447_vm5, %v5264_v37, 0.0 }
 0x8b4   :  { %943 = vadd.xlane.f32.xlu1 %v942_v38 }
 0x8c5   :  { %1049 = vrot.lane.b32.xlu1 %v5533_v46, %s5317_s29 }
 0x8c9   :  { %1047 = vrot.lane.b32.xlu1 %v5548_v57, %s5317_s29 }
 0x8df   :  { %v877_v40 = vpop.f32.mrb[20].mxu0 }
 0x8e0   :  { %v883_v41 = vadd.f32 %v877_v40, %v5609_v58  ;;  %v4548_v42 = vpop.f32.mrb[21].mxu0 }
 0x8e1   :  { %v880_v43 = vpop.f32.mrb[22].mxu0 }
 0x8e2   :  { %v4549_v44 = vpop.f32.mrb[23].mxu0 }
 0x8e3   :  { %v5088_v44 = vld [vmem:[%s6552_s7 + $0x28] sm:$0xff]  }
 0x941   :  { %v944_v45 = vpop.xlane.xlu1 %943 }
 0x942   :  { %5265 = vrcp.f32 %v944_v45 }
 0x945   :  { %v1050_v50 = vpop.permute.xlu1 %1049 }
 0x946   :  { %v1055_v52 = vsel %vm398_vm3, %v1050_v50, 0 }
 0x949   :  { %v1048_v53 = vpop.permute.xlu1 %1047 }
 0x94c   :  { %v5266_v47 = vpop.eup %5265 }
 0x94d   :  { %v946_v49 = vmul.f32 %v5266_v47, %v5264_v37 }
 0x94f   :  { %v947_v51 = vpack.c.bf16 %v946_v49, %v946_v49 }
 0x951   :  { %4559 = vmatmul.mubr.msk.bf16.vlgmr.msra.gmra.mrb[24].mxu0 %vm217_vm2, %v947_v51 }
 0x952   :  { %4569 = vmatpush3.bf16.xpose.msra.mxu0 %v1055_v52  ;;  %4570 = vmatprep.mubr.msk.bf16.mxu0 %vm5312_vm1, %v5311_v1 }
 0x953   :  { %4580 = vmatprep.subr.bf16.mxu0 %v5311_v1 }
 0x959   :  { %4571 = vmatmul.mubr.msk.bf16.vlgmr.msra.gmra.mrb[28].mxu0 %vm398_vm3, %v1048_v53 }
 0x95a   :  { %4582 = vmatprep.mubr.msk.bf16.mxu0 %vm5312_vm1, %v5311_v1  ;;  %4581 = vmatpush3.bf16.msra.mxu0 %v5087_v12 }
 0x95b   :  { %4592 = vmatprep.subr.bf16.mxu0 %v5311_v1 }
 0xa24   :  { %v990_v55 = vpop.f32.mrb[24].mxu0 }
 0xa25   :  { %v996_v56 = vpack.c.bf16 %v990_v55, %v990_v55  ;;  %v4560_v58 = vpop.f32.mrb[25].mxu0 }
 0xa26   :  { %v993_v59 = vpop.f32.mrb[26].mxu0 }
 0xa27   :  { %v4561_v62 = vpop.f32.mrb[27].mxu0  ;;  %4565 = vmatmul.mubr.msk.bf16.vlgmr.msra.gmra.mrb[28].mxu1 %vm398_vm3, %v996_v56 }
 0xa28   :  { %4575 = vmatpush3.bf16.msra.mxu1 %v1117_v60  ;;  %4576 = vmatprep.mubr.msk.bf16.mxu1 %vm5312_vm1, %v5311_v1 }
 0xa29   :  { %4586 = vmatprep.subr.bf16.mxu1 %v5311_v1 }
 0xa2c   :  { %v1091_v63 = vpop.f32.mrb[28].mxu0 }
 0xa2d   :  { %v1097_v0 = vmul.f32 0.25, %v1091_v63  ;;  %v4572_v2 = vpop.f32.mrb[29].mxu0 }
 0xa2e   :  { %v1094_v3 = vpop.f32.mrb[30].mxu0 }
 0xa2f   :  { %v4573_v4 = vpop.f32.mrb[31].mxu0  ;;  %v1098_v5 = vsel %vm394_vm4, %v1097_v0, -1e+30 }
 0xa30   :  { %v1099_v6 = vsel %vm447_vm5, %v1098_v5, -inf }
 0xa31   :  { %1100 = vmax.xlane.f32.xlu1 %v1099_v6 }
 0xa42   :  { %1274 = vrot.lane.b32.xlu1 %v5535_v48, %s5318_s6 }
 0xabe   :  { %v1101_v7 = vpop.xlane.xlu1 %1100 }
 0xabf   :  { %v1102_v8 = vsub.f32 %v1098_v5, %v1101_v7 }
 0xac1   :  { %v1103_v9 = vmul.f32 1.442695, %v1102_v8 }
 0xac2   :  { %v1275_v25 = vpop.permute.xlu1 %1274 }
 0xac3   :  { %5267 = vpow2.f32 %v1103_v9  ;;  %v1280_v30 = vsel %vm221_vm0, %v1275_v25, 0 }
 0xacd   :  { %v5268_v10 = vpop.eup %5267 }
 0xace   :  { %v1105_v11 = vsel %vm447_vm5, %v5268_v10, 0.0 }
 0xacf   :  { %1106 = vadd.xlane.f32.xlu0 %v1105_v11 }
 0xae5   :  { %1212 = vrot.lane.b32.xlu0 %v5533_v46, %s5318_s6 }
 0xae9   :  { %1210 = vrot.lane.b32.xlu0 %v5548_v57, %s5318_s6 }
 0xafa   :  { %v1040_v13 = vpop.f32.mrb[28].mxu1 }
 0xafb   :  { %v1046_v14 = vadd.f32 %v1040_v13, %v883_v41  ;;  %v4566_v15 = vpop.f32.mrb[29].mxu1 }
 0xafc   :  { %v1043_v16 = vpop.f32.mrb[30].mxu1 }
 0xafd   :  { %v4567_v17 = vpop.f32.mrb[31].mxu1 }
 0xb5c   :  { %v1107_v18 = vpop.xlane.xlu0 %1106 }
 0xb5d   :  { %5269 = vrcp.f32 %v1107_v18 }
 0xb60   :  { %v1213_v21 = vpop.permute.xlu0 %1212 }
 0xb61   :  { %v1218_v23 = vsel %vm398_vm3, %v1213_v21, 0 }
 0xb64   :  { %v1211_v24 = vpop.permute.xlu0 %1210 }
 0xb67   :  { %v5270_v19 = vpop.eup %5269 }
 0xb68   :  { %v1109_v20 = vmul.f32 %v5270_v19, %v5268_v10 }
 0xb6a   :  { %v1110_v22 = vpack.c.bf16 %v1109_v20, %v1109_v20 }
 0xb6c   :  { %4577 = vmatmul.mubr.msk.bf16.vlgmr.msra.gmra.mrb[32].mxu1 %vm217_vm2, %v1110_v22 }
 0xb6d   :  { %4587 = vmatpush3.bf16.xpose.msra.mxu1 %v1218_v23  ;;  %4588 = vmatprep.mubr.msk.bf16.mxu1 %vm5312_vm1, %v5311_v1 }
 0xb6e   :  { %4598 = vmatprep.subr.bf16.mxu1 %v5311_v1 }
 0xb74   :  { %4589 = vmatmul.mubr.msk.bf16.vlgmr.msra.gmra.mrb[36].mxu1 %vm398_vm3, %v1211_v24 }
 0xb75   :  { %4600 = vmatprep.mubr.msk.bf16.mxu1 %vm5312_vm1, %v5311_v1  ;;  %4599 = vmatpush3.bf16.msra.mxu1 %v5088_v44 }
 0xb76   :  { %4610 = vmatprep.subr.bf16.mxu1 %v5311_v1 }
 0xc3f   :  { %v1153_v26 = vpop.f32.mrb[32].mxu1 }
 0xc40   :  { %v1159_v27 = vpack.c.bf16 %v1153_v26, %v1153_v26  ;;  %v4578_v28 = vpop.f32.mrb[33].mxu1 }
 0xc41   :  { %v1156_v29 = vpop.f32.mrb[34].mxu1 }
 0xc42   :  { %v4579_v31 = vpop.f32.mrb[35].mxu1  ;;  %4583 = vmatmul.mubr.msk.bf16.vlgmr.msra.gmra.mrb[32].mxu0 %vm398_vm3, %v1159_v27 }
 0xc43   :  { %4593 = vmatpush3.bf16.msra.mxu0 %v1280_v30  ;;  %4594 = vmatprep.mubr.msk.bf16.mxu0 %vm5312_vm1, %v5311_v1 }
 0xc44   :  { %4604 = vmatprep.subr.bf16.mxu0 %v5311_v1 }
 0xc47   :  { %v1254_v32 = vpop.f32.mrb[36].mxu1 }
 0xc48   :  { %v1260_v33 = vmul.f32 0.25, %v1254_v32  ;;  %v4590_v34 = vpop.f32.mrb[37].mxu1 }
 0xc49   :  { %v1257_v35 = vpop.f32.mrb[38].mxu1 }
 0xc4a   :  { %v4591_v36 = vpop.f32.mrb[39].mxu1  ;;  %v1261_v37 = vsel %vm394_vm4, %v1260_v33, -1e+30 }
 0xc4b   :  { %v1262_v38 = vsel %vm447_vm5, %v1261_v37, -inf }
 0xc4c   :  { %1263 = vmax.xlane.f32.xlu0 %v1262_v38 }
 0xc62   :  { %1437 = vrot.lane.b32.xlu0 %v5535_v48, %s5319_s1 }
 0xcd9   :  { %v1264_v39 = vpop.xlane.xlu0 %1263 }
 0xcda   :  { %v1265_v40 = vsub.f32 %v1261_v37, %v1264_v39 }
 0xcdc   :  { %v1266_v41 = vmul.f32 1.442695, %v1265_v40 }
 0xcdd   :  { %v1438_v60 = vpop.permute.xlu0 %1437 }
 0xcde   :  { %5271 = vpow2.f32 %v1266_v41  ;;  %v1443_v3 = vsel %vm221_vm0, %v1438_v60, 0  ;;  %v5093_v60 = vld [vmem:[%s6554_s9 + $0x10] sm:$0xff]  }
 0xce8   :  { %v5272_v42 = vpop.eup %5271 }
 0xce9   :  { %v1268_v43 = vsel %vm447_vm5, %v5272_v42, 0.0 }
 0xcea   :  { %1269 = vadd.xlane.f32.xlu1 %v1268_v43 }
 0xcfb   :  { %1375 = vrot.lane.b32.xlu1 %v5533_v46, %s5319_s1 }
 0xcff   :  { %1373 = vrot.lane.b32.xlu1 %v5548_v57, %s5319_s1 }
 0xd15   :  { %v1203_v45 = vpop.f32.mrb[32].mxu0 }
 0xd16   :  { %v1209_v47 = vadd.f32 %v1203_v45, %v1046_v14  ;;  %v4584_v49 = vpop.f32.mrb[33].mxu0  ;;  %v5090_v45 = vld [vmem:[%s6552_s7 + $0x38] sm:$0xff]  }
 0xd17   :  { %v1206_v50 = vpop.f32.mrb[34].mxu0 }
 0xd18   :  { %v4585_v51 = vpop.f32.mrb[35].mxu0 }
 0xd77   :  { %v1270_v52 = vpop.xlane.xlu1 %1269 }
 0xd78   :  { %5273 = vrcp.f32 %v1270_v52 }
 0xd7b   :  { %v1376_v55 = vpop.permute.xlu1 %1375 }
 0xd7c   :  { %v1381_v58 = vsel %vm398_vm3, %v1376_v55, 0 }
 0xd7f   :  { %v1374_v59 = vpop.permute.xlu1 %1373 }
 0xd82   :  { %v5274_v53 = vpop.eup %5273 }
 0xd83   :  { %v1272_v54 = vmul.f32 %v5274_v53, %v5272_v42 }
 0xd85   :  { %v1273_v56 = vpack.c.bf16 %v1272_v54, %v1272_v54 }
 0xd87   :  { %4595 = vmatmul.mubr.msk.bf16.vlgmr.msra.gmra.mrb[36].mxu0 %vm217_vm2, %v1273_v56 }
 0xd88   :  { %4605 = vmatpush3.bf16.xpose.msra.mxu0 %v1381_v58  ;;  %4606 = vmatprep.mubr.msk.bf16.mxu0 %vm5312_vm1, %v5311_v1  ;;  %v5091_v58 = vld [vmem:[%s6554_s9] sm:$0xff]  }
 0xd89   :  { %4616 = vmatprep.subr.bf16.mxu0 %v5311_v1 }
 0xd8f   :  { %4607 = vmatmul.mubr.msk.bf16.vlgmr.msra.gmra.mrb[40].mxu0 %vm398_vm3, %v1374_v59  ;;  %v5092_v59 = vld [vmem:[%s6554_s9 + $0x8] sm:$0xff]  }
 0xd90   :  { %4618 = vmatprep.mubr.msk.bf16.mxu0 %vm5312_vm1, %v5311_v1 }
 0xe5a   :  { %v1316_v62 = vpop.f32.mrb[36].mxu0 }
 0xe5b   :  { %v1322_v63 = vpack.c.bf16 %v1316_v62, %v1316_v62  ;;  %v4596_v0 = vpop.f32.mrb[37].mxu0  ;;  %v5094_v62 = vld [vmem:[%s6554_s9 + $0x18] sm:$0xff]  }
 0xe5c   :  { %v1319_v2 = vpop.f32.mrb[38].mxu0  ;;  %v5096_v0 = vld [vmem:[%s6554_s9 + $0x28] sm:$0xff]  }
 0xe5d   :  { %v4597_v4 = vpop.f32.mrb[39].mxu0  ;;  %4601 = vmatmul.mubr.msk.bf16.vlgmr.msra.gmra.mrb[40].mxu1 %vm398_vm3, %v1322_v63  ;;  %v5095_v63 = vld [vmem:[%s6554_s9 + $0x20] sm:$0xff]   ;;  %v5097_v2 = vld [vmem:[%s6554_s9 + $0x30] sm:$0xff]  }
 0xe5e   :  { %4611 = vmatpush3.bf16.msra.mxu1 %v1443_v3  ;;  %4612 = vmatprep.mubr.msk.bf16.mxu1 %vm5312_vm1, %v5311_v1 }
 0xe5f   :  { %4622 = vmatprep.subr.bf16.mxu1 %v5311_v1 }
 0xe62   :  { %v1417_v5 = vpop.f32.mrb[40].mxu0 }
 0xe63   :  { %v1423_v6 = vmul.f32 0.25, %v1417_v5  ;;  %v4608_v7 = vpop.f32.mrb[41].mxu0 }
 0xe64   :  { %v1420_v8 = vpop.f32.mrb[42].mxu0 }
 0xe65   :  { %v4609_v9 = vpop.f32.mrb[43].mxu0  ;;  %v1424_v10 = vsel %vm394_vm4, %v1423_v6, -1e+30  ;;  %v5098_v8 = vld [vmem:[%s6554_s9 + $0x38] sm:$0xff]  }
 0xe66   :  { %v1425_v11 = vsel %vm447_vm5, %v1424_v10, -inf  ;;  %v5123_v9 = vld [vmem:[%s6556_s11] sm:$0xff]  }
 0xe67   :  { %1426 = vmax.xlane.f32.xlu1 %v1425_v11  ;;  %v5125_v11 = vld [vmem:[%s6556_s11 + $0x10] sm:$0xff]  }
 0xef4   :  { %v1427_v12 = vpop.xlane.xlu1 %1426 }
 0xef5   :  { %v1428_v13 = vsub.f32 %v1424_v10, %v1427_v12  ;;  %v5124_v10 = vld [vmem:[%s6556_s11 + $0x8] sm:$0xff]   ;;  %v5126_v12 = vld [vmem:[%s6556_s11 + $0x18] sm:$0xff]  }
 0xef7   :  { %v1429_v14 = vmul.f32 1.442695, %v1428_v13  ;;  %v5127_v13 = vld [vmem:[%s6556_s11 + $0x20] sm:$0xff]  }
 0xef9   :  { %5275 = vpow2.f32 %v1429_v14  ;;  %v5128_v14 = vld [vmem:[%s6556_s11 + $0x28] sm:$0xff]  }
 0xf03   :  { %v5276_v15 = vpop.eup %5275 }
 0xf04   :  { %v1431_v16 = vsel %vm447_vm5, %v5276_v15, 0.0 }
 0xf05   :  { %1432 = vadd.xlane.f32.xlu0 %v1431_v16 }
 0xf1b   :  { %1538 = vrot.lane.b32.xlu0 %v5533_v46, %s5320_s2 }
 0xf1f   :  { %1536 = vrot.lane.b32.xlu0 %v5548_v57, %s5320_s2  ;;  %v5089_v57 = vld [vmem:[%s6552_s7 + $0x30] sm:$0xff]  }
 0xf20   :  { %4617 = vmatpush3.bf16.msra.mxu0 %v5089_v57  ;;  %v5104_v57 = vld [vmem:[%s6558_s13 + $0x28] sm:$0xff]  }
 0xf21   :  { %4628 = vmatprep.subr.bf16.mxu0 %v5311_v1 }
 0xf30   :  { %v1366_v17 = vpop.f32.mrb[40].mxu1 }
 0xf31   :  { %v1372_v18 = vadd.f32 %v1366_v17, %v1209_v47  ;;  %v4602_v19 = vpop.f32.mrb[41].mxu1  ;;  %v4050_v17 = vld [vmem:[%s6553_s8] ss:$0 sm:$0xff] }
 0xf32   :  { %v1369_v20 = vpop.f32.mrb[42].mxu1 }
 0xf33   :  { %v4603_v21 = vpop.f32.mrb[43].mxu1 }
 0xf92   :  { %v1433_v22 = vpop.xlane.xlu0 %1432 }
 0xf93   :  { %5277 = vrcp.f32 %v1433_v22 }
 0xf96   :  { %v1539_v25 = vpop.permute.xlu0 %1538 }
 0xf97   :  { %v1544_v27 = vsel %vm398_vm3, %v1539_v25, 0  ;;  %v5100_v25 = vld [vmem:[%s6558_s13 + $0x8] sm:$0xff]  }
 0xf9a   :  { %v1537_v46 = vpop.permute.xlu0 %1536 }
 0xf9d   :  { %v5278_v23 = vpop.eup %5277 }
 0xf9e   :  { %v1435_v24 = vmul.f32 %v5278_v23, %v5276_v15  ;;  %v5129_v15 = vld [vmem:[%s6556_s11 + $0x30] sm:$0xff]   ;;  %v5099_v23 = vld [vmem:[%s6558_s13] sm:$0xff]  }
 0xfa0   :  { %v1436_v26 = vpack.c.bf16 %v1435_v24, %v1435_v24 }
 0xfa2   :  { %4613 = vmatmul.mubr.msk.bf16.vlgmr.msra.gmra.mrb[44].mxu1 %vm217_vm2, %v1436_v26  ;;  %v5101_v26 = vld [vmem:[%s6558_s13 + $0x10] sm:$0xff]  }
 0xfa3   :  { %4623 = vmatpush3.bf16.xpose.msra.mxu1 %v1544_v27  ;;  %4624 = vmatprep.mubr.msk.bf16.mxu1 %vm5312_vm1, %v5311_v1  ;;  %v5102_v27 = vld [vmem:[%s6558_s13 + $0x18] sm:$0xff]  }
 0xfa4   :  { %4634 = vmatprep.subr.bf16.mxu1 %v5311_v1 }
 0xfaa   :  { %4625 = vmatmul.mubr.msk.bf16.vlgmr.msra.gmra.mrb[48].mxu1 %vm398_vm3, %v1537_v46  ;;  %v5103_v46 = vld [vmem:[%s6558_s13 + $0x20] sm:$0xff]  }
 0xfab   :  { %4636 = vmatprep.mubr.msk.bf16.mxu1 %vm5312_vm1, %v5311_v1  ;;  %4635 = vmatpush3.bf16.msra.mxu1 %v5090_v45  ;;  %v5130_v45 = vld [vmem:[%s6556_s11 + $0x38] sm:$0xff]  }
 0xfac   :  { %4660 = vmatprep.subr.bf16.mxu1 %v5311_v1 }
0x1075   :  { %v1479_v28 = vpop.f32.mrb[44].mxu1 }
0x1076   :  { %v1485_v29 = vpack.c.bf16 %v1479_v28, %v1479_v28  ;;  %v4614_v30 = vpop.f32.mrb[45].mxu1  ;;  %v5105_v28 = vld [vmem:[%s6558_s13 + $0x30] sm:$0xff]  }
0x1077   :  { %v1482_v31 = vpop.f32.mrb[46].mxu1  ;;  %v5107_v30 = vld [vmem:[%s6558_s13 + $0x80] sm:$0xff]  }
0x1078   :  { %v4615_v32 = vpop.f32.mrb[47].mxu1  ;;  %4619 = vmatmul.mubr.msk.bf16.vlgmr.msra.gmra.mrb[44].mxu0 %vm398_vm3, %v1485_v29  ;;  %v5106_v29 = vld [vmem:[%s6558_s13 + $0x38] sm:$0xff]   ;;  %v5108_v31 = vld [vmem:[%s6558_s13 + $0x88] sm:$0xff]  }
0x1079   :  { %4630 = vmatprep.mubr.msk.bf16.mxu0 %vm5312_vm1, %v5311_v1  ;;  %v5109_v32 = vld [vmem:[%s6558_s13 + $0x90] sm:$0xff]  }
0x107d   :  { %v1580_v33 = vpop.f32.mrb[48].mxu1 }
0x107e   :  { %v1586_v34 = vmul.f32 0.25, %v1580_v33  ;;  %v4626_v35 = vpop.f32.mrb[49].mxu1  ;;  %v5110_v33 = vld [vmem:[%s6558_s13 + $0x98] sm:$0xff]  }
0x107f   :  { %v1583_v36 = vpop.f32.mrb[50].mxu1  ;;  %v5112_v35 = vld [vmem:[%s6558_s13 + $0xa8] sm:$0xff]  }
0x1080   :  { %v4627_v37 = vpop.f32.mrb[51].mxu1  ;;  %v1587_v38 = vsel %vm394_vm4, %v1586_v34, -1e+30  ;;  %v5111_v34 = vld [vmem:[%s6558_s13 + $0xa0] sm:$0xff]   ;;  %v5113_v36 = vld [vmem:[%s6558_s13 + $0xb0] sm:$0xff]  }
0x1081   :  { %v1588_v39 = vsel %vm447_vm5, %v1587_v38, -inf  ;;  %v5114_v37 = vld [vmem:[%s6558_s13 + $0xb8] sm:$0xff]  }
0x1082   :  { %1589 = vmax.xlane.f32.xlu0 %v1588_v39  ;;  %v5116_v39 = vld [vmem:[%s6558_s13 + $0x108] sm:$0xff]  }
0x110f   :  { %v1590_v40 = vpop.xlane.xlu0 %1589 }
0x1110   :  { %v1591_v41 = vsub.f32 %v1587_v38, %v1590_v40  ;;  %v5115_v38 = vld [vmem:[%s6558_s13 + $0x100] sm:$0xff]   ;;  %v5117_v40 = vld [vmem:[%s6558_s13 + $0x110] sm:$0xff]  }
0x1112   :  { %v1592_v42 = vmul.f32 1.442695, %v1591_v41  ;;  %v5118_v41 = vld [vmem:[%s6558_s13 + $0x118] sm:$0xff]  }
0x1114   :  { %5279 = vpow2.f32 %v1592_v42  ;;  %v5119_v42 = vld [vmem:[%s6558_s13 + $0x120] sm:$0xff]  }
0x111e   :  { %v5280_v43 = vpop.eup %5279 }
0x111f   :  { %v1594_v44 = vsel %vm447_vm5, %v5280_v43, 0.0 }
0x1120   :  { %1595 = vadd.xlane.f32.xlu1 %v1594_v44  ;;  %v5121_v44 = vld [vmem:[%s6558_s13 + $0x130] sm:$0xff]  }
0x1131   :  { %1600 = vrot.lane.b32.xlu1 %v5535_v48, %s5320_s2 }
0x114b   :  { %v1529_v61 = vpop.f32.mrb[44].mxu0 }
0x114c   :  { %v5741_v47 = vadd.f32 %v1529_v61, %v1372_v18  ;;  %v4620_v49 = vpop.f32.mrb[45].mxu0  ;;  %v5122_v61 = vld [vmem:[%s6558_s13 + $0x138] sm:$0xff]  }
0x114d   :  { %v1532_v50 = vpop.f32.mrb[46].mxu0  ;;  %v5134_v49 = vld [vmem:[%s6560_s15 + $0x8] sm:$0xff]  }
0x114e   :  { %v4621_v51 = vpop.f32.mrb[47].mxu0  ;;  %v5136_v50 = vld [vmem:[%s6560_s15 + $0x10] sm:$0xff]  }
0x114f   :  { %v5138_v51 = vld [vmem:[%s6560_s15 + $0x18] sm:$0xff]  }
0x11ad   :  { %v1596_v52 = vpop.xlane.xlu1 %1595 }
0x11ae   :  { %5281 = vrcp.f32 %v1596_v52  ;;  %v5140_v52 = vld [vmem:[%s6560_s15 + $0x20] sm:$0xff]  }
0x11b1   :  { %v1601_v53 = vpop.permute.xlu1 %1600 }
0x11b2   :  { %v1606_v54 = vsel %vm221_vm0, %v1601_v53, 0  ;;  %v5142_v53 = vld [vmem:[%s6560_s15 + $0x28] sm:$0xff]  }
0x11b3   :  { %4629 = vmatpush3.bf16.msra.mxu0 %v1606_v54  ;;  %v5144_v54 = vld [vmem:[%s6560_s15 + $0x30] sm:$0xff]  }
0x11b4   :  { %4640 = vmatprep.subr.bf16.mxu0 %v5311_v1 }
0x11b8   :  { %v5282_v48 = vpop.eup %5281 }
0x11b9   :  { %v1598_v55 = vmul.f32 %v5282_v48, %v5280_v43  ;;  %v5120_v43 = vld [vmem:[%s6558_s13 + $0x128] sm:$0xff]   ;;  %v5146_v48 = vld [vmem:[%s6560_s15 + $0x38] sm:$0xff]  }
0x11bb   :  { %v1599_v56 = vpack.c.bf16 %v1598_v55, %v1598_v55  ;;  %v4051_v55 = vld [vmem:[%s6555_s10] ss:$0 sm:$0xff] }
0x11bd   :  { %4631 = vmatmul.mubr.msk.bf16.vlgmr.msra.gmra.mrb[48].mxu0 %vm217_vm2, %v1599_v56 }
0x11be   :  { %4656 = vmatprep.mubr.msk.bf16.mxu0 %vm5312_vm1, %v5311_v1  ;;  %4641 = vmatpush3.bf16.msra.mxu0 %v5091_v58 }
0x11bf   :  { %4642 = vmatprep.subr.bf16.mxu0 %v5311_v1 }
0x11c2   :  { %4643 = vmatpush3.bf16.msra.mxu0 %v5092_v59 }
0x11c3   :  { %4644 = vmatprep.subr.bf16.mxu0 %v5311_v1 }
0x11c6   :  { %4645 = vmatpush3.bf16.msra.mxu0 %v5093_v60 }
0x11c7   :  { %4646 = vmatprep.subr.bf16.mxu0 %v5311_v1 }
0x11ca   :  { %4647 = vmatpush3.bf16.msra.mxu0 %v5094_v62 }
0x11cb   :  { %4648 = vmatprep.subr.bf16.mxu0 %v5311_v1 }
0x11ce   :  { %4649 = vmatpush3.bf16.msra.mxu0 %v5095_v63 }
0x11cf   :  { %4650 = vmatprep.subr.bf16.mxu0 %v5311_v1 }
0x11d2   :  { %4651 = vmatpush3.bf16.msra.mxu0 %v5096_v0  ;;  %v5131_v0 = vld [vmem:[%s6558_s13 + $0x40] sm:$0xff]  }
0x11d3   :  { %4652 = vmatprep.subr.bf16.mxu0 %v5311_v1 }
0x11d6   :  { %4653 = vmatpush3.bf16.msra.mxu0 %v5097_v2 }
0x11d7   :  { %4654 = vmatprep.subr.bf16.mxu0 %v5311_v1 }
0x11da   :  { %4655 = vmatpush3.bf16.msra.mxu0 %v5098_v8  ;;  %v5143_v8 = vld [vmem:[%s6558_s13 + $0x70] sm:$0xff]  }
0x11db   :  { %4680 = vmatprep.subr.bf16.mxu0 %v5311_v1 }
0x1290   :  { %v1642_v3 = vpop.f32.mrb[48].mxu0 }
0x1291   :  { %v1648_v4 = vpack.c.bf16 %v1642_v3, %v1642_v3  ;;  %v4632_v5 = vpop.f32.mrb[49].mxu0  ;;  %v5133_v3 = vld [vmem:[%s6558_s13 + $0x48] sm:$0xff]  }
0x1292   :  { %v1645_v6 = vpop.f32.mrb[50].mxu0  ;;  %v5137_v5 = vld [vmem:[%s6558_s13 + $0x58] sm:$0xff]  }
0x1293   :  { %v4633_v7 = vpop.f32.mrb[51].mxu0  ;;  %4637 = vmatmul.mubr.msk.bf16.vlgmr.msra.gmra.mrb[52].mxu1 %vm398_vm3, %v1648_v4  ;;  %v5135_v4 = vld [vmem:[%s6558_s13 + $0x50] sm:$0xff]   ;;  %v5139_v6 = vld [vmem:[%s6558_s13 + $0x60] sm:$0xff]  }
0x1294   :  { %4676 = vmatprep.mubr.msk.bf16.mxu1 %vm5312_vm1, %v5311_v1  ;;  %4661 = vmatpush3.bf16.msra.mxu1 %v5123_v9  ;;  %v5141_v7 = vld [vmem:[%s6558_s13 + $0x68] sm:$0xff]   ;;  %v4069_v9 = vld [vmem:[%s6559_s14] ss:$0 sm:$0xff] }
0x1295   :  { %4662 = vmatprep.subr.bf16.mxu1 %v5311_v1 }
0x1298   :  { %4663 = vmatpush3.bf16.msra.mxu1 %v5124_v10 }
0x1299   :  { %4664 = vmatprep.subr.bf16.mxu1 %v5311_v1 }
0x129c   :  { %4665 = vmatpush3.bf16.msra.mxu1 %v5125_v11  ;;  %v5145_v11 = vld [vmem:[%s6558_s13 + $0x78] sm:$0xff]  }
0x129d   :  { %4666 = vmatprep.subr.bf16.mxu1 %v5311_v1 }
0x12a0   :  { %4667 = vmatpush3.bf16.msra.mxu1 %v5126_v12 }
0x12a1   :  { %4668 = vmatprep.subr.bf16.mxu1 %v5311_v1 }
0x12a4   :  { %4669 = vmatpush3.bf16.msra.mxu1 %v5127_v13 }
0x12a5   :  { %4670 = vmatprep.subr.bf16.mxu1 %v5311_v1 }
0x12a8   :  { %4671 = vmatpush3.bf16.msra.mxu1 %v5128_v14 }
0x12a9   :  { %4672 = vmatprep.subr.bf16.mxu1 %v5311_v1 }
0x12ac   :  { %4673 = vmatpush3.bf16.msra.mxu1 %v5129_v15 }
0x12ad   :  { %4674 = vmatprep.subr.bf16.mxu1 %v5311_v1 }
0x12b0   :  { %4675 = vmatpush3.bf16.msra.mxu1 %v5130_v45  ;;  %v5167_v45 = vld [vmem:[%s6558_s13 + $0x150] sm:$0xff]  }
0x12b1   :  { %4700 = vmatprep.subr.bf16.mxu1 %v5311_v1 }
0x1366   :  { %v1692_v16 = vpop.f32.mrb[52].mxu1 }
0x1367   :  { %v1698_v18 = vadd.f32 %v1692_v16, %v5741_v47  ;;  %v4638_v19 = vpop.f32.mrb[53].mxu1  ;;  %v5132_v47 = vld [vmem:[%s6560_s15] sm:$0xff]  }
0x1368   :  { %v1695_v20 = vpop.f32.mrb[54].mxu1 }
0x1369   :  { %v1706_v21 = vadd.f32 %v4050_v17, %v1698_v18  ;;  %v4639_v22 = vpop.f32.mrb[55].mxu1  ;;  %v5147_v17 = vld [vmem:[%s6558_s13 + $0xc0] sm:$0xff]   ;;  %v5149_v20 = vld [vmem:[%s6558_s13 + $0xc8] sm:$0xff]  }
0x136a   :  { %v5148_v18 = vld [vmem:[%s6560_s15 + $0x80] sm:$0xff]   ;;  %v5151_v22 = vld [vmem:[%s6558_s13 + $0xd0] sm:$0xff]  }
0x136b   :  { %v5818_v24 = vpack.c.bf16 %v1706_v21, %v1706_v21  ;;  %v5150_v21 = vld [vmem:[%s6560_s15 + $0x88] sm:$0xff]  }
0x136d   :  { %4657 = vmatmul.mubr.bf16.vlgmr.msra.gmra.mrb[52].mxu0 %v5818_v24 }
0x136e   :  { %4681 = vmatpush3.bf16.msra.mxu0 %v5099_v23  ;;  %4696 = vmatprep.mubr.msk.bf16.mxu0 %vm5312_vm1, %v5311_v1  ;;  %v5152_v23 = vld [vmem:[%s6560_s15 + $0x90] sm:$0xff]  }
0x136f   :  { %4682 = vmatprep.subr.bf16.mxu0 %v5311_v1 }
0x1372   :  { %4683 = vmatpush3.bf16.msra.mxu0 %v5100_v25  ;;  %v5153_v25 = vld [vmem:[%s6558_s13 + $0xd8] sm:$0xff]  }
0x1373   :  { %4684 = vmatprep.subr.bf16.mxu0 %v5311_v1 }
0x1376   :  { %4685 = vmatpush3.bf16.msra.mxu0 %v5101_v26  ;;  %v5154_v26 = vld [vmem:[%s6560_s15 + $0x98] sm:$0xff]  }
0x1377   :  { %4686 = vmatprep.subr.bf16.mxu0 %v5311_v1 }
0x137a   :  { %4687 = vmatpush3.bf16.msra.mxu0 %v5102_v27  ;;  %v5155_v27 = vld [vmem:[%s6558_s13 + $0xe0] sm:$0xff]  }
0x137b   :  { %4688 = vmatprep.subr.bf16.mxu0 %v5311_v1 }
0x137e   :  { %4689 = vmatpush3.bf16.msra.mxu0 %v5103_v46  ;;  %v5156_v46 = vld [vmem:[%s6560_s15 + $0xa0] sm:$0xff]  }
0x137f   :  { %4690 = vmatprep.subr.bf16.mxu0 %v5311_v1 }
0x1382   :  { %4691 = vmatpush3.bf16.msra.mxu0 %v5104_v57  ;;  %v5157_v57 = vld [vmem:[%s6558_s13 + $0xe8] sm:$0xff]  }
0x1383   :  { %4692 = vmatprep.subr.bf16.mxu0 %v5311_v1 }
0x1386   :  { %4693 = vmatpush3.bf16.msra.mxu0 %v5105_v28  ;;  %v5158_v28 = vld [vmem:[%s6560_s15 + $0xa8] sm:$0xff]  }
0x1387   :  { %4694 = vmatprep.subr.bf16.mxu0 %v5311_v1 }
0x138a   :  { %4695 = vmatpush3.bf16.msra.mxu0 %v5106_v29  ;;  %v5159_v29 = vld [vmem:[%s6558_s13 + $0xf0] sm:$0xff]  }
0x138b   :  { %4720 = vmatprep.subr.bf16.mxu0 %v5311_v1 }
0x138d   :  { %4697 = vmatmul.mubr.bf16.vlgmr.msra.gmra.mrb[56].mxu0 %v5818_v24 }
0x138e   :  { %4721 = vmatpush3.bf16.msra.mxu0 %v5107_v30  ;;  %4736 = vmatprep.mubr.msk.bf16.mxu0 %vm5312_vm1, %v5311_v1  ;;  %v5160_v30 = vld [vmem:[%s6560_s15 + $0xb0] sm:$0xff]  }
0x138f   :  { %4722 = vmatprep.subr.bf16.mxu0 %v5311_v1 }
0x1392   :  { %4723 = vmatpush3.bf16.msra.mxu0 %v5108_v31  ;;  %v4071_v31 = vld [vmem:[%s6559_s14 + $0x2] ss:$0 sm:$0xff] }
0x1393   :  { %4724 = vmatprep.subr.bf16.mxu0 %v5311_v1 }
0x1396   :  { %4725 = vmatpush3.bf16.msra.mxu0 %v5109_v32 }
0x1397   :  { %4726 = vmatprep.subr.bf16.mxu0 %v5311_v1 }
0x139a   :  { %4727 = vmatpush3.bf16.msra.mxu0 %v5110_v33  ;;  %v5161_v33 = vld [vmem:[%s6558_s13 + $0xf8] sm:$0xff]  }
0x139b   :  { %4728 = vmatprep.subr.bf16.mxu0 %v5311_v1 }
0x139e   :  { %4729 = vmatpush3.bf16.msra.mxu0 %v5111_v34  ;;  %v5162_v34 = vld [vmem:[%s6560_s15 + $0xb8] sm:$0xff]  }
0x139f   :  { %4730 = vmatprep.subr.bf16.mxu0 %v5311_v1 }
0x13a2   :  { %4731 = vmatpush3.bf16.msra.mxu0 %v5112_v35 }
0x13a3   :  { %4732 = vmatprep.subr.bf16.mxu0 %v5311_v1 }
0x13a6   :  { %4733 = vmatpush3.bf16.msra.mxu0 %v5113_v36 }
0x13a7   :  { %4734 = vmatprep.subr.bf16.mxu0 %v5311_v1 }
0x13aa   :  { %4735 = vmatpush3.bf16.msra.mxu0 %v5114_v37 }
0x13ab   :  { %4760 = vmatprep.subr.bf16.mxu0 %v5311_v1 }
0x13ad   :  { %4737 = vmatmul.mubr.bf16.vlgmr.msra.gmra.mrb[60].mxu0 %v5818_v24 }
0x13ae   :  { %4761 = vmatpush3.bf16.msra.mxu0 %v5115_v38  ;;  %4776 = vmatprep.mubr.msk.bf16.mxu0 %vm5312_vm1, %v5311_v1 }
0x13af   :  { %4762 = vmatprep.subr.bf16.mxu0 %v5311_v1 }
0x13b2   :  { %4763 = vmatpush3.bf16.msra.mxu0 %v5116_v39 }
0x13b3   :  { %4764 = vmatprep.subr.bf16.mxu0 %v5311_v1 }
0x13b6   :  { %4765 = vmatpush3.bf16.msra.mxu0 %v5117_v40  ;;  %v5163_v40 = vld [vmem:[%s6558_s13 + $0x140] sm:$0xff]  }
0x13b7   :  { %4766 = vmatprep.subr.bf16.mxu0 %v5311_v1 }
0x13ba   :  { %4767 = vmatpush3.bf16.msra.mxu0 %v5118_v41  ;;  %v5164_v41 = vld [vmem:[%s6560_s15 + $0x100] sm:$0xff]  }
0x13bb   :  { %4768 = vmatprep.subr.bf16.mxu0 %v5311_v1 }
0x13be   :  { %4769 = vmatpush3.bf16.msra.mxu0 %v5119_v42 }
0x13bf   :  { %4770 = vmatprep.subr.bf16.mxu0 %v5311_v1 }
0x13c2   :  { %4771 = vmatpush3.bf16.msra.mxu0 %v5120_v43  ;;  %v5165_v43 = vld [vmem:[%s6558_s13 + $0x148] sm:$0xff]  }
0x13c3   :  { %4772 = vmatprep.subr.bf16.mxu0 %v5311_v1 }
0x13c6   :  { %4773 = vmatpush3.bf16.msra.mxu0 %v5121_v44  ;;  %v5166_v44 = vld [vmem:[%s6560_s15 + $0x108] sm:$0xff]  }
0x13c7   :  { %4774 = vmatprep.subr.bf16.mxu0 %v5311_v1 }
0x13ca   :  { %4775 = vmatpush3.bf16.msra.mxu0 %v5122_v61  ;;  %v5168_v61 = vld [vmem:[%s6560_s15 + $0x110] sm:$0xff]  }
0x13cb   :  { %4800 = vmatprep.subr.bf16.mxu0 %v5311_v1 }
0x13cd   :  { %4777 = vmatmul.mubr.bf16.vlgmr.msra.gmra.mrb[64].mxu0 %v5818_v24 }
0x13ce   :  { %4801 = vmatpush3.bf16.msra.mxu0 %v5132_v47  ;;  %4816 = vmatprep.mubr.msk.bf16.mxu0 %vm5312_vm1, %v5311_v1  ;;  %v5169_v47 = vld [vmem:[%s6558_s13 + $0x158] sm:$0xff]  }
0x13cf   :  { %4802 = vmatprep.subr.bf16.mxu0 %v5311_v1 }
0x13d2   :  { %4803 = vmatpush3.bf16.msra.mxu0 %v5134_v49  ;;  %v5170_v49 = vld [vmem:[%s6560_s15 + $0x118] sm:$0xff]  }
0x13d3   :  { %4804 = vmatprep.subr.bf16.mxu0 %v5311_v1 }
0x13d6   :  { %4805 = vmatpush3.bf16.msra.mxu0 %v5136_v50  ;;  %v5171_v50 = vld [vmem:[%s6558_s13 + $0x160] sm:$0xff]  }
0x13d7   :  { %4806 = vmatprep.subr.bf16.mxu0 %v5311_v1 }
0x13da   :  { %4807 = vmatpush3.bf16.msra.mxu0 %v5138_v51  ;;  %v5172_v51 = vld [vmem:[%s6560_s15 + $0x120] sm:$0xff]  }
0x13db   :  { %4808 = vmatprep.subr.bf16.mxu0 %v5311_v1 }
0x13de   :  { %4809 = vmatpush3.bf16.msra.mxu0 %v5140_v52  ;;  %v5173_v52 = vld [vmem:[%s6558_s13 + $0x168] sm:$0xff]  }
0x13df   :  { %4810 = vmatprep.subr.bf16.mxu0 %v5311_v1 }
0x13e2   :  { %4811 = vmatpush3.bf16.msra.mxu0 %v5142_v53  ;;  %v5174_v53 = vld [vmem:[%s6560_s15 + $0x128] sm:$0xff]  }
0x13e3   :  { %4812 = vmatprep.subr.bf16.mxu0 %v5311_v1 }
0x13e6   :  { %4813 = vmatpush3.bf16.msra.mxu0 %v5144_v54  ;;  %v5175_v54 = vld [vmem:[%s6558_s13 + $0x170] sm:$0xff]  }
0x13e7   :  { %4814 = vmatprep.subr.bf16.mxu0 %v5311_v1 }
0x13ea   :  { %4815 = vmatpush3.bf16.msra.mxu0 %v5146_v48  ;;  %v5176_v48 = vld [vmem:[%s6560_s15 + $0x130] sm:$0xff]  }
0x13eb   :  { %4840 = vmatprep.subr.bf16.mxu0 %v5311_v1 }
0x1440   :  { %v1813_v56 = vpop.f32.mrb[52].mxu0 }
0x1441   :  { %v1814_v58 = vadd.f32 %v4051_v55, %v1813_v56  ;;  %v4658_v59 = vpop.f32.mrb[53].mxu0  ;;  %v4073_v55 = vld [vmem:[%s6559_s14 + $0x4] ss:$0 sm:$0xff] }
0x1442   :  { %v1816_v60 = vpop.f32.mrb[54].mxu0  ;;  %v5178_v59 = vld [vmem:[%s6560_s15 + $0x138] sm:$0xff]  }
0x1443   :  { %v1819_v62 = vmax.f32 %v1814_v58, 0.0  ;;  %v4659_v63 = vpop.f32.mrb[55].mxu0  ;;  %v5177_v58 = vld [vmem:[%s6558_s13 + $0x178] sm:$0xff]  }
0x1445   :  { %v1820_v2 = vpack.c.bf16 %v1819_v62, %v1819_v62 }
0x1447   :  { %4677 = vmatmul.mubr.bf16.vlgmr.msra.gmra.mrb[56].mxu1 %v1820_v2 }
0x1448   :  { %4701 = vmatpush3.bf16.msra.mxu1 %v5131_v0  ;;  %4716 = vmatprep.mubr.msk.bf16.mxu1 %vm5312_vm1, %v5311_v1 }
0x1449   :  { %4702 = vmatprep.subr.bf16.mxu1 %v5311_v1 }
0x144c   :  { %4703 = vmatpush3.bf16.msra.mxu1 %v5133_v3  ;;  %v5179_v3 = vld [vmem:[%s6560_s15 + $0x40] sm:$0xff]  }
0x144d   :  { %4704 = vmatprep.subr.bf16.mxu1 %v5311_v1 }
0x1450   :  { %4705 = vmatpush3.bf16.msra.mxu1 %v5135_v4  ;;  %v5180_v4 = vld [vmem:[%s6562_s17] sm:$0xff]  }
0x1451   :  { %4706 = vmatprep.subr.bf16.mxu1 %v5311_v1 }
0x1454   :  { %4707 = vmatpush3.bf16.msra.mxu1 %v5137_v5 }
0x1455   :  { %4708 = vmatprep.subr.bf16.mxu1 %v5311_v1 }
0x1458   :  { %4709 = vmatpush3.bf16.msra.mxu1 %v5139_v6  ;;  %v5181_v6 = vld [vmem:[%s6560_s15 + $0x48] sm:$0xff]  }
0x1459   :  { %4710 = vmatprep.subr.bf16.mxu1 %v5311_v1 }
0x145c   :  { %4711 = vmatpush3.bf16.msra.mxu1 %v5141_v7  ;;  %v5182_v7 = vld [vmem:[%s6562_s17 + $0x8] sm:$0xff]  }
0x145d   :  { %4712 = vmatprep.subr.bf16.mxu1 %v5311_v1 }
0x1460   :  { %v2165_v10 = vpop.f32.mrb[56].mxu0  ;;  %4713 = vmatpush3.bf16.msra.mxu1 %v5143_v8  ;;  %v5184_v8 = vld [vmem:[%s6562_s17 + $0x10] sm:$0xff]  }
0x1461   :  { %v2166_v12 = vadd.f32 %v4069_v9, %v2165_v10  ;;  %v4698_v13 = vpop.f32.mrb[57].mxu0  ;;  %4714 = vmatprep.subr.bf16.mxu1 %v5311_v1  ;;  %v5185_v9 = vld [vmem:[%s6560_s15 + $0x58] sm:$0xff]  }
0x1462   :  { %v2168_v14 = vpop.f32.mrb[58].mxu0  ;;  %v5186_v10 = vld [vmem:[%s6562_s17 + $0x18] sm:$0xff]   ;;  %v5189_v13 = vld [vmem:[%s6560_s15 + $0x68] sm:$0xff]  }
0x1463   :  { %v2611_v15 = vmax.f32 %v2166_v12, 0.0  ;;  %v4699_v16 = vpop.f32.mrb[59].mxu0  ;;  %v5188_v12 = vld [vmem:[%s6562_s17 + $0x20] sm:$0xff]   ;;  %v5190_v14 = vld [vmem:[%s6562_s17 + $0x28] sm:$0xff]  }
0x1464   :  { %4715 = vmatpush3.bf16.msra.mxu1 %v5145_v11  ;;  %v5187_v11 = vld [vmem:[%s6560_s15 + $0x60] sm:$0xff]   ;;  %v5192_v16 = vld [vmem:[%s6562_s17 + $0x30] sm:$0xff]  }
0x1465   :  { %v2617_v19 = vpack.c.bf16 %v2611_v15, %v2611_v15  ;;  %4740 = vmatprep.subr.bf16.mxu1 %v5311_v1  ;;  %v5191_v15 = vld [vmem:[%s6560_s15 + $0x70] sm:$0xff]  }
0x1467   :  { %4717 = vmatmul.mubr.bf16.vlgmr.msra.gmra.mrb[60].mxu1 %v5818_v24  ;;  %4817 = vmatmul.mubr.bf16.vlgmr.msra.gmra.mrb[68].mxu0 %v2617_v19  ;;  %v4060_v19 = vld [vmem:[%s6557_s12] ss:$0 sm:$0xff] }
0x1468   :  { %4741 = vmatpush3.bf16.msra.mxu1 %v5147_v17  ;;  %4841 = vmatpush3.bf16.msra.mxu0 %v5148_v18  ;;  %v5193_v17 = vld [vmem:[%s6560_s15 + $0x78] sm:$0xff]  }
0x1469   :  { %4742 = vmatprep.subr.bf16.mxu1 %v5311_v1  ;;  %4842 = vmatprep.subr.bf16.mxu0 %v5311_v1  ;;  %v5194_v18 = vld [vmem:[%s6562_s17 + $0x38] sm:$0xff]  }
0x146a   :  { %4756 = vmatprep.mubr.msk.bf16.mxu1 %vm5312_vm1, %v5311_v1  ;;  %4856 = vmatprep.mubr.msk.bf16.mxu0 %vm5312_vm1, %v5311_v1 }
0x146c   :  { %4743 = vmatpush3.bf16.msra.mxu1 %v5149_v20  ;;  %4843 = vmatpush3.bf16.msra.mxu0 %v5150_v21 }
0x146d   :  { %4744 = vmatprep.subr.bf16.mxu1 %v5311_v1  ;;  %4844 = vmatprep.subr.bf16.mxu0 %v5311_v1 }
0x1470   :  { %4745 = vmatpush3.bf16.msra.mxu1 %v5151_v22  ;;  %4845 = vmatpush3.bf16.msra.mxu0 %v5152_v23 }
0x1471   :  { %4746 = vmatprep.subr.bf16.mxu1 %v5311_v1  ;;  %4846 = vmatprep.subr.bf16.mxu0 %v5311_v1 }
0x1474   :  { %4747 = vmatpush3.bf16.msra.mxu1 %v5153_v25  ;;  %4847 = vmatpush3.bf16.msra.mxu0 %v5154_v26 }
0x1475   :  { %4748 = vmatprep.subr.bf16.mxu1 %v5311_v1  ;;  %4848 = vmatprep.subr.bf16.mxu0 %v5311_v1 }
0x1478   :  { %4749 = vmatpush3.bf16.msra.mxu1 %v5155_v27  ;;  %4849 = vmatpush3.bf16.msra.mxu0 %v5156_v46  ;;  %v4070_v27 = vld [vmem:[%s6559_s14 + $0x1] ss:$0 sm:$0xff]  ;;  %v4123_v46 = vld [vmem:[%s6561_s16] ss:$0 sm:$0xff] }
0x1479   :  { %4750 = vmatprep.subr.bf16.mxu1 %v5311_v1  ;;  %4850 = vmatprep.subr.bf16.mxu0 %v5311_v1 }
0x147c   :  { %4751 = vmatpush3.bf16.msra.mxu1 %v5157_v57  ;;  %4851 = vmatpush3.bf16.msra.mxu0 %v5158_v28 }
0x147d   :  { %4752 = vmatprep.subr.bf16.mxu1 %v5311_v1  ;;  %4852 = vmatprep.subr.bf16.mxu0 %v5311_v1 }
0x1480   :  { %v2341_v32 = vpop.f32.mrb[60].mxu0  ;;  %4753 = vmatpush3.bf16.msra.mxu1 %v5159_v29  ;;  %4853 = vmatpush3.bf16.msra.mxu0 %v5160_v30 }
0x1481   :  { %v2342_v35 = vadd.f32 %v4071_v31, %v2341_v32  ;;  %v4738_v36 = vpop.f32.mrb[61].mxu0  ;;  %4754 = vmatprep.subr.bf16.mxu1 %v5311_v1  ;;  %4854 = vmatprep.subr.bf16.mxu0 %v5311_v1 }
0x1482   :  { %v2344_v37 = vpop.f32.mrb[62].mxu0 }
0x1483   :  { %v2613_v38 = vmax.f32 %v2342_v35, 0.0  ;;  %v4739_v39 = vpop.f32.mrb[63].mxu0 }
0x1484   :  { %4755 = vmatpush3.bf16.msra.mxu1 %v5161_v33  ;;  %4855 = vmatpush3.bf16.msra.mxu0 %v5162_v34  ;;  %v5195_v39 = vld [vmem:[%s6560_s15 + $0xc0] sm:$0xff]  }
0x1485   :  { %v2619_v42 = vpack.c.bf16 %v2613_v38, %v2613_v38  ;;  %4780 = vmatprep.subr.bf16.mxu1 %v5311_v1  ;;  %4880 = vmatprep.subr.bf16.mxu0 %v5311_v1 }
0x1487   :  { %4757 = vmatmul.mubr.bf16.vlgmr.msra.gmra.mrb[64].mxu1 %v5818_v24  ;;  %4857 = vmatmul.mubr.bf16.vlgmr.msra.gmra.mrb[72].mxu0 %v2619_v42 }
0x1488   :  { %4781 = vmatpush3.bf16.msra.mxu1 %v5163_v40  ;;  %4881 = vmatpush3.bf16.msra.mxu0 %v5164_v41  ;;  %v5196_v40 = vld [vmem:[%s6562_s17 + $0x80] sm:$0xff]  }
0x1489   :  { %4782 = vmatprep.subr.bf16.mxu1 %v5311_v1  ;;  %4882 = vmatprep.subr.bf16.mxu0 %v5311_v1 }
0x148a   :  { %4796 = vmatprep.mubr.msk.bf16.mxu1 %vm5312_vm1, %v5311_v1  ;;  %4896 = vmatprep.mubr.msk.bf16.mxu0 %vm5312_vm1, %v5311_v1 }
0x148c   :  { %4783 = vmatpush3.bf16.msra.mxu1 %v5165_v43  ;;  %4883 = vmatpush3.bf16.msra.mxu0 %v5166_v44  ;;  %v5197_v43 = vld [vmem:[%s6560_s15 + $0xc8] sm:$0xff]  }
0x148d   :  { %4784 = vmatprep.subr.bf16.mxu1 %v5311_v1  ;;  %4884 = vmatprep.subr.bf16.mxu0 %v5311_v1  ;;  %v5198_v44 = vld [vmem:[%s6562_s17 + $0x88] sm:$0xff]  }
0x1490   :  { %4785 = vmatpush3.bf16.msra.mxu1 %v5167_v45  ;;  %4885 = vmatpush3.bf16.msra.mxu0 %v5168_v61  ;;  %v5199_v45 = vld [vmem:[%s6560_s15 + $0xd0] sm:$0xff]  }
0x1491   :  { %4786 = vmatprep.subr.bf16.mxu1 %v5311_v1  ;;  %4886 = vmatprep.subr.bf16.mxu0 %v5311_v1  ;;  %v5200_v61 = vld [vmem:[%s6562_s17 + $0x90] sm:$0xff]  }
0x1494   :  { %4787 = vmatpush3.bf16.msra.mxu1 %v5169_v47  ;;  %4887 = vmatpush3.bf16.msra.mxu0 %v5170_v49  ;;  %v5201_v47 = vld [vmem:[%s6560_s15 + $0xd8] sm:$0xff]  }
0x1495   :  { %4788 = vmatprep.subr.bf16.mxu1 %v5311_v1  ;;  %4888 = vmatprep.subr.bf16.mxu0 %v5311_v1  ;;  %v5202_v49 = vld [vmem:[%s6562_s17 + $0x98] sm:$0xff]  }
0x1498   :  { %4789 = vmatpush3.bf16.msra.mxu1 %v5171_v50  ;;  %4889 = vmatpush3.bf16.msra.mxu0 %v5172_v51  ;;  %v5203_v50 = vld [vmem:[%s6560_s15 + $0xe0] sm:$0xff]  }
0x1499   :  { %4790 = vmatprep.subr.bf16.mxu1 %v5311_v1  ;;  %4890 = vmatprep.subr.bf16.mxu0 %v5311_v1  ;;  %v5204_v51 = vld [vmem:[%s6562_s17 + $0xa0] sm:$0xff]  }
0x149c   :  { %4791 = vmatpush3.bf16.msra.mxu1 %v5173_v52  ;;  %4891 = vmatpush3.bf16.msra.mxu0 %v5174_v53  ;;  %v5205_v52 = vld [vmem:[%s6560_s15 + $0xe8] sm:$0xff]  }
0x149d   :  { %4792 = vmatprep.subr.bf16.mxu1 %v5311_v1  ;;  %4892 = vmatprep.subr.bf16.mxu0 %v5311_v1  ;;  %v5206_v53 = vld [vmem:[%s6562_s17 + $0xa8] sm:$0xff]  }
0x14a0   :  { %v2517_v56 = vpop.f32.mrb[64].mxu0  ;;  %4793 = vmatpush3.bf16.msra.mxu1 %v5175_v54  ;;  %4893 = vmatpush3.bf16.msra.mxu0 %v5176_v48  ;;  %v5207_v54 = vld [vmem:[%s6560_s15 + $0xf0] sm:$0xff]  }
0x14a1   :  { %v2518_v60 = vadd.f32 %v4073_v55, %v2517_v56  ;;  %v4778_v62 = vpop.f32.mrb[65].mxu0  ;;  %4794 = vmatprep.subr.bf16.mxu1 %v5311_v1  ;;  %4894 = vmatprep.subr.bf16.mxu0 %v5311_v1  ;;  %v5208_v48 = vld [vmem:[%s6562_s17 + $0xb0] sm:$0xff]   ;;  %v4072_v55 = vld [vmem:[%s6559_s14 + $0x3] ss:$0 sm:$0xff]  ;;  %v4125_v56 = vld [vmem:[%s6561_s16 + $0x2] ss:$0 sm:$0xff] }
0x14a2   :  { %v2520_v63 = vpop.f32.mrb[66].mxu0  ;;  %v5210_v62 = vld [vmem:[%s6562_s17 + $0xb8] sm:$0xff]  }
0x14a3   :  { %v2615_v0 = vmax.f32 %v2518_v60, 0.0  ;;  %v4779_v2 = vpop.f32.mrb[67].mxu0  ;;  %v5209_v60 = vld [vmem:[%s6560_s15 + $0xf8] sm:$0xff]  }
0x14a4   :  { %4795 = vmatpush3.bf16.msra.mxu1 %v5177_v58  ;;  %4895 = vmatpush3.bf16.msra.mxu0 %v5178_v59 }
0x14a5   :  { %v2621_v5 = vpack.c.bf16 %v2615_v0, %v2615_v0  ;;  %4820 = vmatprep.subr.bf16.mxu1 %v5311_v1  ;;  %4920 = vmatprep.subr.bf16.mxu0 %v5311_v1 }
0x14a7   :  { %4797 = vmatmul.mubr.bf16.vlgmr.msra.gmra.mrb[68].mxu1 %v5818_v24  ;;  %4897 = vmatmul.mubr.bf16.vlgmr.msra.gmra.mrb[76].mxu0 %v2621_v5  ;;  %v5183_v24 = vld [vmem:[%s6560_s15 + $0x50] sm:$0xff]  }
0x14a8   :  { %4821 = vmatpush3.bf16.msra.mxu1 %v5179_v3  ;;  %4921 = vmatpush3.bf16.msra.mxu0 %v5180_v4 }
0x14a9   :  { %4822 = vmatprep.subr.bf16.mxu1 %v5311_v1  ;;  %4922 = vmatprep.subr.bf16.mxu0 %v5311_v1 }
0x14aa   :  { %4836 = vmatprep.mubr.msk.bf16.mxu1 %vm5312_vm1, %v5311_v1  ;;  %4936 = vmatprep.mubr.msk.bf16.mxu0 %vm5312_vm1, %v5311_v1 }
0x14ac   :  { %4823 = vmatpush3.bf16.msra.mxu1 %v5181_v6  ;;  %4923 = vmatpush3.bf16.msra.mxu0 %v5182_v7 }
0x14ad   :  { %4824 = vmatprep.subr.bf16.mxu1 %v5311_v1  ;;  %4924 = vmatprep.subr.bf16.mxu0 %v5311_v1 }
0x14b0   :  { %4825 = vmatpush3.bf16.msra.mxu1 %v5183_v24  ;;  %4925 = vmatpush3.bf16.msra.mxu0 %v5184_v8 }
0x14b1   :  { %4826 = vmatprep.subr.bf16.mxu1 %v5311_v1  ;;  %4926 = vmatprep.subr.bf16.mxu0 %v5311_v1 }
0x14b4   :  { %4827 = vmatpush3.bf16.msra.mxu1 %v5185_v9  ;;  %4927 = vmatpush3.bf16.msra.mxu0 %v5186_v10  ;;  %v5211_v9 = vld [vmem:[%s6560_s15 + $0x140] sm:$0xff]  }
0x14b5   :  { %4828 = vmatprep.subr.bf16.mxu1 %v5311_v1  ;;  %4928 = vmatprep.subr.bf16.mxu0 %v5311_v1  ;;  %v5212_v10 = vld [vmem:[%s6562_s17 + $0x100] sm:$0xff]  }
0x14b8   :  { %4829 = vmatpush3.bf16.msra.mxu1 %v5187_v11  ;;  %4929 = vmatpush3.bf16.msra.mxu0 %v5188_v12 }
0x14b9   :  { %4830 = vmatprep.subr.bf16.mxu1 %v5311_v1  ;;  %4930 = vmatprep.subr.bf16.mxu0 %v5311_v1 }
0x14bc   :  { %4831 = vmatpush3.bf16.msra.mxu1 %v5189_v13  ;;  %4931 = vmatpush3.bf16.msra.mxu0 %v5190_v14  ;;  %v5213_v13 = vld [vmem:[%s6560_s15 + $0x148] sm:$0xff]  }
0x14bd   :  { %4832 = vmatprep.subr.bf16.mxu1 %v5311_v1  ;;  %4932 = vmatprep.subr.bf16.mxu0 %v5311_v1  ;;  %v5214_v14 = vld [vmem:[%s6562_s17 + $0x108] sm:$0xff]  }
0x14c0   :  { %4833 = vmatpush3.bf16.msra.mxu1 %v5191_v15  ;;  %4933 = vmatpush3.bf16.msra.mxu0 %v5192_v16  ;;  %v5215_v15 = vld [vmem:[%s6560_s15 + $0x150] sm:$0xff]  }
0x14c1   :  { %4834 = vmatprep.subr.bf16.mxu1 %v5311_v1  ;;  %4934 = vmatprep.subr.bf16.mxu0 %v5311_v1  ;;  %v5216_v16 = vld [vmem:[%s6562_s17 + $0x110] sm:$0xff]  }
0x14c4   :  { %4835 = vmatpush3.bf16.msra.mxu1 %v5193_v17  ;;  %4935 = vmatpush3.bf16.msra.mxu0 %v5194_v18  ;;  %v5217_v17 = vld [vmem:[%s6560_s15 + $0x158] sm:$0xff]  }
0x14c5   :  { %4860 = vmatprep.subr.bf16.mxu1 %v5311_v1  ;;  %4960 = vmatprep.subr.bf16.mxu0 %v5311_v1  ;;  %v5218_v18 = vld [vmem:[%s6562_s17 + $0x118] sm:$0xff]  }
0x151a   :  { %v1926_v20 = vpop.f32.mrb[56].mxu1 }
0x151b   :  { %v6217_v21 = vadd.f32 %v4060_v19, %v1926_v20  ;;  %v4678_v22 = vpop.f32.mrb[57].mxu1  ;;  %v5219_v19 = vld [vmem:[%s6560_s15 + $0x160] sm:$0xff]  }
0x151c   :  { %v1929_v23 = vpop.f32.mrb[58].mxu1  ;;  %v5220_v20 = vld [vmem:[%s6562_s17 + $0x120] sm:$0xff]   ;;  %v5221_v22 = vld [vmem:[%s6560_s15 + $0x168] sm:$0xff]  }
0x151d   :  { %v4679_v25 = vpop.f32.mrb[59].mxu1  ;;  %v1933_v26 = vsel %vm1932_vm6, %v6217_v21, -inf  ;;  %v5222_v23 = vld [vmem:[%s6562_s17 + $0x128] sm:$0xff]  }
0x151e   :  { %1934 = vmax.xlane.f32.xlu1 %v1933_v26  ;;  %v5223_v25 = vld [vmem:[%s6560_s15 + $0x170] sm:$0xff]  }
0x151f   :  { %v5224_v26 = vld [vmem:[%s6562_s17 + $0x130] sm:$0xff]  }
0x153a   :  { %v2253_v57 = vpop.f32.mrb[60].mxu1  ;;  %v2843_v28 = vpop.f32.mrb[68].mxu0 }
0x153b   :  { %v2254_v29 = vadd.f32 %v4070_v27, %v2253_v57  ;;  %v2844_v30 = vadd.f32 %v4123_v46, %v2843_v28  ;;  %v4718_v31 = vpop.f32.mrb[61].mxu1  ;;  %v4818_v32 = vpop.f32.mrb[69].mxu0  ;;  %v4074_v27 = vld [vmem:[%s6559_s14 + $0x5] ss:$0 sm:$0xff]  ;;  %v4127_v46 = vld [vmem:[%s6561_s16 + $0x4] ss:$0 sm:$0xff] }
0x153c   :  { %v2256_v33 = vpop.f32.mrb[62].mxu1  ;;  %v2846_v34 = vpop.f32.mrb[70].mxu0 }
0x153d   :  { %v2612_v35 = vmax.f32 %v2254_v29, 0.0  ;;  %v3289_v36 = vmax.f32 %v2844_v30, 0.0  ;;  %v4719_v37 = vpop.f32.mrb[63].mxu1  ;;  %v4819_v38 = vpop.f32.mrb[71].mxu0  ;;  %v5225_v29 = vld [vmem:[%s6560_s15 + $0x178] sm:$0xff]  }
0x153e   :  { %v5226_v30 = vld [vmem:[%s6562_s17 + $0x138] sm:$0xff]  }
0x153f   :  { %v2618_v41 = vpack.c.bf16 %v2612_v35, %v2612_v35  ;;  %v3295_v42 = vpack.c.bf16 %v3289_v36, %v3289_v36 }
0x1541   :  { %4837 = vmatmul.mubr.bf16.vlgmr.msra.gmra.mrb[72].mxu1 %v2618_v41  ;;  %4937 = vmatmul.mubr.bf16.vlgmr.msra.gmra.mrb[80].mxu0 %v3295_v42  ;;  %v5227_v41 = vld [vmem:[%s6562_s17 + $0x40] sm:$0xff]  }
0x1542   :  { %4861 = vmatpush3.bf16.msra.mxu1 %v5195_v39  ;;  %4961 = vmatpush3.bf16.msra.mxu0 %v5196_v40 }
0x1543   :  { %4862 = vmatprep.subr.bf16.mxu1 %v5311_v1  ;;  %4962 = vmatprep.subr.bf16.mxu0 %v5311_v1 }
0x1544   :  { %4876 = vmatprep.mubr.msk.bf16.mxu1 %vm5312_vm1, %v5311_v1  ;;  %4976 = vmatprep.mubr.msk.bf16.mxu0 %vm5312_vm1, %v5311_v1 }
0x1546   :  { %4863 = vmatpush3.bf16.msra.mxu1 %v5197_v43  ;;  %4963 = vmatpush3.bf16.msra.mxu0 %v5198_v44  ;;  %v5228_v44 = vld [vmem:[%s6562_s17 + $0x48] sm:$0xff]  }
0x1547   :  { %4864 = vmatprep.subr.bf16.mxu1 %v5311_v1  ;;  %4964 = vmatprep.subr.bf16.mxu0 %v5311_v1 }
0x154a   :  { %4865 = vmatpush3.bf16.msra.mxu1 %v5199_v45  ;;  %4965 = vmatpush3.bf16.msra.mxu0 %v5200_v61  ;;  %v5229_v45 = vld [vmem:[%s6562_s17 + $0x50] sm:$0xff]   ;;  %v5230_v61 = vld [vmem:[%s6562_s17 + $0x58] sm:$0xff]  }
0x154b   :  { %4866 = vmatprep.subr.bf16.mxu1 %v5311_v1  ;;  %4966 = vmatprep.subr.bf16.mxu0 %v5311_v1 }
0x154e   :  { %4867 = vmatpush3.bf16.msra.mxu1 %v5201_v47  ;;  %4967 = vmatpush3.bf16.msra.mxu0 %v5202_v49  ;;  %v5231_v47 = vld [vmem:[%s6562_s17 + $0x60] sm:$0xff]   ;;  %v5232_v49 = vld [vmem:[%s6562_s17 + $0x68] sm:$0xff]  }
0x154f   :  { %4868 = vmatprep.subr.bf16.mxu1 %v5311_v1  ;;  %4968 = vmatprep.subr.bf16.mxu0 %v5311_v1 }
0x1552   :  { %4869 = vmatpush3.bf16.msra.mxu1 %v5203_v50  ;;  %4969 = vmatpush3.bf16.msra.mxu0 %v5204_v51  ;;  %v5233_v50 = vld [vmem:[%s6562_s17 + $0x70] sm:$0xff]   ;;  %v5234_v51 = vld [vmem:[%s6562_s17 + $0x78] sm:$0xff]  }
0x1553   :  { %4870 = vmatprep.subr.bf16.mxu1 %v5311_v1  ;;  %4970 = vmatprep.subr.bf16.mxu0 %v5311_v1 }
0x1556   :  { %4871 = vmatpush3.bf16.msra.mxu1 %v5205_v52  ;;  %4971 = vmatpush3.bf16.msra.mxu0 %v5206_v53 }
0x1557   :  { %4872 = vmatprep.subr.bf16.mxu1 %v5311_v1  ;;  %4972 = vmatprep.subr.bf16.mxu0 %v5311_v1 }
0x155a   :  { %v2429_v58 = vpop.f32.mrb[64].mxu1  ;;  %v3019_v59 = vpop.f32.mrb[72].mxu0  ;;  %4873 = vmatpush3.bf16.msra.mxu1 %v5207_v54  ;;  %4973 = vmatpush3.bf16.msra.mxu0 %v5208_v48 }
0x155b   :  { %v2430_v63 = vadd.f32 %v4072_v55, %v2429_v58  ;;  %v3020_v0 = vadd.f32 %v4125_v56, %v3019_v59  ;;  %v4758_v2 = vpop.f32.mrb[65].mxu1  ;;  %v4858_v3 = vpop.f32.mrb[73].mxu0  ;;  %4874 = vmatprep.subr.bf16.mxu1 %v5311_v1  ;;  %4974 = vmatprep.subr.bf16.mxu0 %v5311_v1  ;;  %v4124_v56 = vld [vmem:[%s6561_s16 + $0x1] ss:$0 sm:$0xff]  ;;  %v4177_v58 = vld [vmem:[%s6563_s18] ss:$0 sm:$0xff] }
0x155c   :  { %v2432_v4 = vpop.f32.mrb[66].mxu1  ;;  %v3022_v5 = vpop.f32.mrb[74].mxu0 }
0x155d   :  { %v2614_v6 = vmax.f32 %v2430_v63, 0.0  ;;  %v3291_v7 = vmax.f32 %v3020_v0, 0.0  ;;  %v4759_v24 = vpop.f32.mrb[67].mxu1  ;;  %v4859_v8 = vpop.f32.mrb[75].mxu0 }
0x155e   :  { %4875 = vmatpush3.bf16.msra.mxu1 %v5209_v60  ;;  %4975 = vmatpush3.bf16.msra.mxu0 %v5210_v62  ;;  %v5236_v8 = vld [vmem:[%s6562_s17 + $0xc8] sm:$0xff]  }
0x155f   :  { %v2620_v11 = vpack.c.bf16 %v2614_v6, %v2614_v6  ;;  %v3297_v12 = vpack.c.bf16 %v3291_v7, %v3291_v7  ;;  %4900 = vmatprep.subr.bf16.mxu1 %v5311_v1  ;;  %5000 = vmatprep.subr.bf16.mxu0 %v5311_v1  ;;  %v5235_v7 = vld [vmem:[%s6562_s17 + $0xc0] sm:$0xff]  }
0x1561   :  { %4877 = vmatmul.mubr.bf16.vlgmr.msra.gmra.mrb[76].mxu1 %v2620_v11  ;;  %4977 = vmatmul.mubr.bf16.vlgmr.msra.gmra.mrb[84].mxu0 %v3297_v12  ;;  %v5239_v11 = vld [vmem:[%s6562_s17 + $0xe0] sm:$0xff]   ;;  %v5240_v12 = vld [vmem:[%s6562_s17 + $0xe8] sm:$0xff]  }
0x1562   :  { %4901 = vmatpush3.bf16.msra.mxu1 %v5211_v9  ;;  %5001 = vmatpush3.bf16.msra.mxu0 %v5212_v10  ;;  %v5237_v9 = vld [vmem:[%s6562_s17 + $0xd0] sm:$0xff]   ;;  %v5238_v10 = vld [vmem:[%s6562_s17 + $0xd8] sm:$0xff]  }
0x1563   :  { %4902 = vmatprep.subr.bf16.mxu1 %v5311_v1  ;;  %5002 = vmatprep.subr.bf16.mxu0 %v5311_v1 }
0x1564   :  { %4916 = vmatprep.mubr.msk.bf16.mxu1 %vm5312_vm1, %v5311_v1  ;;  %5016 = vmatprep.mubr.msk.bf16.mxu0 %vm5312_vm1, %v5311_v1 }
0x1566   :  { %4903 = vmatpush3.bf16.msra.mxu1 %v5213_v13  ;;  %5003 = vmatpush3.bf16.msra.mxu0 %v5214_v14  ;;  %v5241_v13 = vld [vmem:[%s6562_s17 + $0xf0] sm:$0xff]   ;;  %v4126_v14 = vld [vmem:[%s6561_s16 + $0x3] ss:$0 sm:$0xff] }
0x1567   :  { %4904 = vmatprep.subr.bf16.mxu1 %v5311_v1  ;;  %5004 = vmatprep.subr.bf16.mxu0 %v5311_v1 }
0x156a   :  { %4905 = vmatpush3.bf16.msra.mxu1 %v5215_v15  ;;  %5005 = vmatpush3.bf16.msra.mxu0 %v5216_v16  ;;  %v4179_v15 = vld [vmem:[%s6563_s18 + $0x2] ss:$0 sm:$0xff] }
0x156b   :  { %4906 = vmatprep.subr.bf16.mxu1 %v5311_v1  ;;  %5006 = vmatprep.subr.bf16.mxu0 %v5311_v1 }
0x156e   :  { %4907 = vmatpush3.bf16.msra.mxu1 %v5217_v17  ;;  %5007 = vmatpush3.bf16.msra.mxu0 %v5218_v18  ;;  %v5242_v18 = vld [vmem:[%s6562_s17 + $0xf8] sm:$0xff]  }
0x156f   :  { %4908 = vmatprep.subr.bf16.mxu1 %v5311_v1  ;;  %5008 = vmatprep.subr.bf16.mxu0 %v5311_v1 }
0x1572   :  { %4909 = vmatpush3.bf16.msra.mxu1 %v5219_v19  ;;  %5009 = vmatpush3.bf16.msra.mxu0 %v5220_v20 }
0x1573   :  { %4910 = vmatprep.subr.bf16.mxu1 %v5311_v1  ;;  %5010 = vmatprep.subr.bf16.mxu0 %v5311_v1 }
0x1576   :  { %4911 = vmatpush3.bf16.msra.mxu1 %v5221_v22  ;;  %5011 = vmatpush3.bf16.msra.mxu0 %v5222_v23 }
0x1577   :  { %4912 = vmatprep.subr.bf16.mxu1 %v5311_v1  ;;  %5012 = vmatprep.subr.bf16.mxu0 %v5311_v1 }
0x157a   :  { %v2605_v57 = vpop.f32.mrb[68].mxu1  ;;  %v3195_v28 = vpop.f32.mrb[76].mxu0  ;;  %4913 = vmatpush3.bf16.msra.mxu1 %v5223_v25  ;;  %5013 = vmatpush3.bf16.msra.mxu0 %v5224_v26 }
0x157b   :  { %v2606_v31 = vadd.f32 %v4074_v27, %v2605_v57  ;;  %v3196_v32 = vadd.f32 %v4127_v46, %v3195_v28  ;;  %v4798_v33 = vpop.f32.mrb[69].mxu1  ;;  %v4898_v34 = vpop.f32.mrb[77].mxu0  ;;  %4914 = vmatprep.subr.bf16.mxu1 %v5311_v1  ;;  %5014 = vmatprep.subr.bf16.mxu0 %v5311_v1  ;;  %v5243_v28 = vld [vmem:[%s6562_s17 + $0x140] sm:$0xff]  }
0x157c   :  { %v2608_v35 = vpop.f32.mrb[70].mxu1  ;;  %v3198_v36 = vpop.f32.mrb[78].mxu0  ;;  %v5247_v33 = vld [vmem:[%s6562_s17 + $0x160] sm:$0xff]  }
0x157d   :  { %v2616_v37 = vmax.f32 %v2606_v31, 0.0  ;;  %v3293_v38 = vmax.f32 %v3196_v32, 0.0  ;;  %v4799_v39 = vpop.f32.mrb[71].mxu1  ;;  %v4899_v40 = vpop.f32.mrb[79].mxu0  ;;  %v5245_v31 = vld [vmem:[%s6562_s17 + $0x150] sm:$0xff]   ;;  %v5246_v32 = vld [vmem:[%s6562_s17 + $0x158] sm:$0xff]  }
0x157e   :  { %4915 = vmatpush3.bf16.msra.mxu1 %v5225_v29  ;;  %5015 = vmatpush3.bf16.msra.mxu0 %v5226_v30  ;;  %v5244_v30 = vld [vmem:[%s6562_s17 + $0x148] sm:$0xff]   ;;  %v5249_v36 = vld [vmem:[%s6562_s17 + $0x170] sm:$0xff]  }
0x157f   :  { %v2622_v42 = vpack.c.bf16 %v2616_v37, %v2616_v37  ;;  %v3299_v43 = vpack.c.bf16 %v3293_v38, %v3293_v38  ;;  %4940 = vmatprep.subr.bf16.mxu1 %v5311_v1  ;;  %v5248_v35 = vld [vmem:[%s6562_s17 + $0x168] sm:$0xff]   ;;  %v4128_v37 = vld [vmem:[%s6561_s16 + $0x5] ss:$0 sm:$0xff]  ;;  %v4181_v38 = vld [vmem:[%s6563_s18 + $0x4] ss:$0 sm:$0xff] }
0x1581   :  { %4917 = vmatmul.mubr.bf16.vlgmr.msra.gmra.mrb[80].mxu1 %v2622_v42  ;;  %5017 = vmatmul.mubr.bf16.vlgmr.msra.gmra.mrb[88].mxu0 %v3299_v43  ;;  %v5250_v42 = vld [vmem:[%s6562_s17 + $0x178] sm:$0xff]   ;;  %s5321_s17 = smov [#allocation2]  }
0x1582   :  { %4941 = vmatpush3.bf16.msra.mxu1 %v5227_v41  ;;  %4956 = vmatprep.mubr.msk.bf16.mxu1 %vm5312_vm1, %v5311_v1  ;;  %s3980_s13 = sshll.u32 %s5321_s17, 4  ;;  %s3981_s13 = int_to_ptr.vmem [resolvable:$true] %s3980_s13 }
0x1583   :  { %4942 = vmatprep.subr.bf16.mxu1 %v5311_v1  ;;  %s5287_s28 = scalar_lea.vmem %s3981_s13, 32  ;;  %p5292_p1 = scmp.lt.s32.totalorder %s3981_s13, %s3981_s13 }
0x1584   :  { %p5288_p0 = scmp.ne.s32.totalorder %s3981_s13, %s5287_s28  ;;  %p5293_p2 = scmp.lt.s32.totalorder %s5287_s28, %s5287_s28 }
0x1586   :  { %4943 = vmatpush3.bf16.msra.mxu1 %v5228_v44  ;;  %p5294_p3 = por %p5293_p2, %p5292_p1 }
0x1587   :  { %4944 = vmatprep.subr.bf16.mxu1 %v5311_v1 }
0x1588   :  { %p5295_p4 = pnand %p5294_p3, %p5288_p0 }
0x158a   :  { %4945 = vmatpush3.bf16.msra.mxu1 %v5229_v45 }
0x158b   :  { %4946 = vmatprep.subr.bf16.mxu1 %v5311_v1 }
0x158e   :  { %4947 = vmatpush3.bf16.msra.mxu1 %v5230_v61 }
0x158f   :  { %4948 = vmatprep.subr.bf16.mxu1 %v5311_v1 }
0x1592   :  { %4949 = vmatpush3.bf16.msra.mxu1 %v5231_v47 }
0x1593   :  { %4950 = vmatprep.subr.bf16.mxu1 %v5311_v1 }
0x1596   :  { %4951 = vmatpush3.bf16.msra.mxu1 %v5232_v49 }
0x1597   :  { %4952 = vmatprep.subr.bf16.mxu1 %v5311_v1 }
0x159a   :  { %4953 = vmatpush3.bf16.msra.mxu1 %v5233_v50 }
0x159b   :  { %4954 = vmatprep.subr.bf16.mxu1 %v5311_v1 }
0x159e   :  { %4955 = vmatpush3.bf16.msra.mxu1 %v5234_v51 }
0x159f   :  { %4980 = vmatprep.subr.bf16.mxu1 %v5311_v1 }
0x15ab   :  { %v1935_v52 = vpop.xlane.xlu1 %1934 }
0x15ac   :  { %v1936_v53 = vsub.f32 %v6217_v21, %v1935_v52 }
0x15ae   :  { %v1937_v54 = vmul.f32 1.442695, %v1936_v53 }
0x15b0   :  { %5283 = vpow2.f32 %v1937_v54 }
0x15ba   :  { %v6409_v48 = vpop.eup %5283 }
0x15bb   :  { %v1939_v55 = vsel %vm1932_vm6, %v6409_v48, 0.0 }
0x15bc   :  { %1940 = vadd.xlane.f32.xlu0 %v1939_v55 }
0x1614   :  { %v2931_v59 = vpop.f32.mrb[72].mxu1  ;;  %v3521_v60 = vpop.f32.mrb[80].mxu0 }
0x1615   :  { %v2932_v21 = vadd.f32 %v4124_v56, %v2931_v59  ;;  %v3522_v62 = vadd.f32 %v4177_v58, %v3521_v60  ;;  %v4838_v63 = vpop.f32.mrb[73].mxu1  ;;  %v4938_v0 = vpop.f32.mrb[81].mxu0 }
0x1616   :  { %v2934_v2 = vpop.f32.mrb[74].mxu1  ;;  %v3524_v3 = vpop.f32.mrb[82].mxu0 }
0x1617   :  { %v3290_v4 = vmax.f32 %v2932_v21, 0.0  ;;  %3968 = vst.msk [vmem:[%s6565_s20] sm:$0x3] %vm3967_vm7, %v3522_v62  ;;  %v4839_v5 = vpop.f32.mrb[75].mxu1  ;;  %v4939_v6 = vpop.f32.mrb[83].mxu0 }
0x1619   :  { %v3296_v24 = vpack.c.bf16 %v3290_v4, %v3290_v4 }
0x161b   :  { %4957 = vmatmul.mubr.bf16.vlgmr.msra.gmra.mrb[84].mxu1 %v3296_v24 }
0x161c   :  { %4981 = vmatpush3.bf16.msra.mxu1 %v5235_v7  ;;  %4996 = vmatprep.mubr.msk.bf16.mxu1 %vm5312_vm1, %v5311_v1 }
0x161d   :  { %4982 = vmatprep.subr.bf16.mxu1 %v5311_v1 }
0x1620   :  { %4983 = vmatpush3.bf16.msra.mxu1 %v5236_v8 }
0x1621   :  { %4984 = vmatprep.subr.bf16.mxu1 %v5311_v1 }
0x1624   :  { %4985 = vmatpush3.bf16.msra.mxu1 %v5237_v9 }
0x1625   :  { %4986 = vmatprep.subr.bf16.mxu1 %v5311_v1 }
0x1628   :  { %4987 = vmatpush3.bf16.msra.mxu1 %v5238_v10 }
0x1629   :  { %4988 = vmatprep.subr.bf16.mxu1 %v5311_v1 }
0x162c   :  { %4989 = vmatpush3.bf16.msra.mxu1 %v5239_v11 }
0x162d   :  { %4990 = vmatprep.subr.bf16.mxu1 %v5311_v1 }
0x1630   :  { %4991 = vmatpush3.bf16.msra.mxu1 %v5240_v12 }
0x1631   :  { %4992 = vmatprep.subr.bf16.mxu1 %v5311_v1 }
0x1634   :  { %v3107_v16 = vpop.f32.mrb[76].mxu1  ;;  %v3697_v17 = vpop.f32.mrb[84].mxu0  ;;  %4993 = vmatpush3.bf16.msra.mxu1 %v5241_v13 }
0x1635   :  { %v3108_v19 = vadd.f32 %v4126_v14, %v3107_v16  ;;  %v3698_v20 = vadd.f32 %v4179_v15, %v3697_v17  ;;  %v4878_v22 = vpop.f32.mrb[77].mxu1  ;;  %v4978_v23 = vpop.f32.mrb[85].mxu0  ;;  %4994 = vmatprep.subr.bf16.mxu1 %v5311_v1 }
0x1636   :  { %v3110_v25 = vpop.f32.mrb[78].mxu1  ;;  %v3700_v26 = vpop.f32.mrb[86].mxu0 }
0x1637   :  { %v3292_v27 = vmax.f32 %v3108_v19, 0.0  ;;  %3970 = vst.msk [vmem:[%s6565_s20 + $0x4] sm:$0x3] %vm3967_vm7, %v3698_v20  ;;  %v4879_v46 = vpop.f32.mrb[79].mxu1  ;;  %v4979_v57 = vpop.f32.mrb[87].mxu0 }
0x1638   :  { %4995 = vmatpush3.bf16.msra.mxu1 %v5242_v18 }
0x1639   :  { %v3298_v29 = vpack.c.bf16 %v3292_v27, %v3292_v27  ;;  %5020 = vmatprep.subr.bf16.mxu1 %v5311_v1 }
0x163b   :  { %4997 = vmatmul.mubr.bf16.vlgmr.msra.gmra.mrb[88].mxu1 %v3298_v29 }
0x163c   :  { %5021 = vmatpush3.bf16.msra.mxu1 %v5243_v28  ;;  %5036 = vmatprep.mubr.msk.bf16.mxu1 %vm5312_vm1, %v5311_v1 }
0x163d   :  { %5022 = vmatprep.subr.bf16.mxu1 %v5311_v1 }
0x1640   :  { %5023 = vmatpush3.bf16.msra.mxu1 %v5244_v30 }
0x1641   :  { %5024 = vmatprep.subr.bf16.mxu1 %v5311_v1 }
0x1644   :  { %5025 = vmatpush3.bf16.msra.mxu1 %v5245_v31 }
0x1645   :  { %5026 = vmatprep.subr.bf16.mxu1 %v5311_v1 }
0x1648   :  { %5027 = vmatpush3.bf16.msra.mxu1 %v5246_v32 }
0x1649   :  { %v1941_v34 = vpop.xlane.xlu0 %1940  ;;  %5028 = vmatprep.subr.bf16.mxu1 %v5311_v1 }
0x164a   :  { %5285 = vrcp.f32 %v1941_v34 }
0x164c   :  { %5029 = vmatpush3.bf16.msra.mxu1 %v5247_v33 }
0x164d   :  { %5030 = vmatprep.subr.bf16.mxu1 %v5311_v1 }
0x1650   :  { %5031 = vmatpush3.bf16.msra.mxu1 %v5248_v35 }
0x1651   :  { %5032 = vmatprep.subr.bf16.mxu1 %v5311_v1 }
0x1654   :  { %v5286_v39 = vpop.eup %5285  ;;  %v3283_v40 = vpop.f32.mrb[80].mxu1  ;;  %5033 = vmatpush3.bf16.msra.mxu1 %v5249_v36 }
0x1655   :  { %v3873_v41 = vpop.f32.mrb[88].mxu0  ;;  %v3284_v43 = vadd.f32 %v4128_v37, %v3283_v40  ;;  %v4918_v45 = vpop.f32.mrb[81].mxu1  ;;  %5034 = vmatprep.subr.bf16.mxu1 %v5311_v1  ;;  %v1943_v47 = vmul.f32 %v5286_v39, %v6409_v48 }
0x1656   :  { %v3874_v44 = vadd.f32 %v4181_v38, %v3873_v41  ;;  %v5018_v61 = vpop.f32.mrb[89].mxu0  ;;  %v3286_v49 = vpop.f32.mrb[82].mxu1 }
0x1657   :  { %v3876_v50 = vpop.f32.mrb[90].mxu0  ;;  %v3294_v51 = vmax.f32 %v3284_v43, 0.0  ;;  %v4919_v52 = vpop.f32.mrb[83].mxu1  ;;  %1944 = vst.msk [vmem:[#allocation2] sm:$0x3] %vm1932_vm6, %v1943_v47 }
0x1658   :  { %3972 = vst.msk [vmem:[%s6565_s20 + $0x8] sm:$0x3] %vm3967_vm7, %v3874_v44  ;;  %v5019_v53 = vpop.f32.mrb[91].mxu0  ;;  %5035 = vmatpush3.bf16.msra.mxu1 %v5250_v42 }
0x1659   :  { %v3300_v54 = vpack.c.bf16 %v3294_v51, %v3294_v51 }
0x165b   :  { %5037 = vmatmul.mubr.bf16.vlgmr.msra.gmra.mrb[92].mxu1 %v3300_v54 }
0x165c   :  { %5298 = shalt.err (!%p5295_p4)
}
0x165d   :  { %s5299_s9 = scalar_lea.hbm %s6564_s19, 32 }
0x165e   :  { %p5300_p5 = scmp.ne.s32.totalorder %s6564_s19, %s5299_s9  ;;  %p5303_p6 = scmp.lt.u32.totalorder %s5299_s9, %s6564_s19 }
0x1660   :  { %p5305_p7 = pnand %p5303_p6, %p5300_p5 }
0x1662   :  { %5308 = shalt.err (!%p5305_p7)
}
0x1663   :  { %3983 = dma.vmem_to_hbm [thread:$0]  %s3981_s13, 32, %s6564_s19, [#allocation3]   ;;  %v4178_v1 = vld [vmem:[%s6563_s18 + $0x1] ss:$0 sm:$0xff]  ;;  %v4180_v60 = vld [vmem:[%s6563_s18 + $0x3] ss:$0 sm:$0xff] }
0x1664   :  { %v4182_v3 = vld [vmem:[%s6563_s18 + $0x5] ss:$0 sm:$0xff] }
0x16ee   :  { %v3609_v48 = vpop.f32.mrb[84].mxu1 }
0x16ef   :  { %v3610_v55 = vadd.f32 %v4178_v1, %v3609_v48  ;;  %v4958_v56 = vpop.f32.mrb[85].mxu1 }
0x16f0   :  { %v3612_v58 = vpop.f32.mrb[86].mxu1 }
0x16f1   :  { %3969 = vst.msk [vmem:[%s6565_s20 + $0x2] sm:$0x3] %vm3967_vm7, %v3610_v55  ;;  %v4959_v59 = vpop.f32.mrb[87].mxu1 }
0x170e   :  { %v3785_v21 = vpop.f32.mrb[88].mxu1 }
0x170f   :  { %v3786_v62 = vadd.f32 %v4180_v60, %v3785_v21  ;;  %v4998_v63 = vpop.f32.mrb[89].mxu1 }
0x1710   :  { %v3788_v0 = vpop.f32.mrb[90].mxu1 }
0x1711   :  { %3971 = vst.msk [vmem:[%s6565_s20 + $0x6] sm:$0x3] %vm3967_vm7, %v3786_v62  ;;  %v4999_v2 = vpop.f32.mrb[91].mxu1 }
0x172e   :  { %v3961_v4 = vpop.f32.mrb[92].mxu1 }
0x172f   :  { %v3962_v5 = vadd.f32 %v4182_v3, %v3961_v4  ;;  %v5038_v6 = vpop.f32.mrb[93].mxu1 }
0x1730   :  { %v3964_v7 = vpop.f32.mrb[94].mxu1 }
0x1731   :  { %3973 = vst.msk [vmem:[%s6565_s20 + $0xa] sm:$0x3] %vm3967_vm7, %v3962_v5  ;;  %v5039_v24 = vpop.f32.mrb[95].mxu1 }
0x1732   :  { %5309 = dma.done.wait [#allocation3], 32  }
0x1733   :  { %5310 = vsyncadd [#allocation3], 4294967264 }
0x1734   :  { %3991 = vsyncpa [#allocation3], 1 }

</bundles_post_ra>
